<compile_context>
chip_gen: v5e
topology: v5e:2x2
jax: 0.10.0
libtpu: 0.0.40
codegen_flags: <defaults>
</compile_context>

<pallas_src>
import functools

import jax
import jax.numpy as jnp
from jax.experimental import pallas as pl
from jax.experimental.pallas import tpu as pltpu

EPS = 1e-5


def _round_up(a, b):
    return (a + b - 1) // b * b


# ----------------------------------------------------------------------------
# Pallas kernel
# ----------------------------------------------------------------------------
def _mstc_kernel(x_ref, A_ref, c_ref, Wt_ref, e_ref, pool_ref, sToT_ref,
                 WT_ref, cT_ref, Asel_ref, Bexp_ref, out_ref,
                 *, Vp, dilations, bc):
    f32 = jnp.float32
    nd = len(dilations)
    nb = nd + 2

    xs = x_ref[...]                                  # (Rp, Cin)
    Rp = xs.shape[0]

    def dot(a, b):
        return jnp.dot(a, b, preferred_element_type=f32)

    # ---- all per-branch 1x1 convs (+ folded BN1) as one matmul; ReLU for branches 0..nd
    Ylin = dot(xs, A_ref[...]) + c_ref[...]          # (Rp, Cout)
    Yr = jnp.maximum(Ylin, 0.0)

    def shift_rows(y, s, fill):
        # z[r] = y[r - s]; rows shifted in from outside the sequence get `fill`.
        # s is a multiple of Vp (and Vp % 8 == 0) -> aligned whole-vreg moves, no MXU.
        pad = jnp.full((abs(s), y.shape[1]), fill, dtype=y.dtype)
        if s > 0:
            return jnp.concatenate([pad, y[:Rp - s, :]], axis=0)
        return jnp.concatenate([y[(-s):, :], pad], axis=0)

    # ---- temporal-conv branches: every tap of every dilation in ONE matmul -----------
    taps = []
    for bi, d in enumerate(dilations):
        y = Yr[:, bi * bc:(bi + 1) * bc]
        s = d * Vp
        taps += [shift_rows(y, s, 0.0), y, shift_rows(y, -s, 0.0)]
    taps = jnp.concatenate(taps, axis=1)             # (Rp, 3*nd*bc)
    tconv = dot(taps, Wt_ref[...]) + e_ref[...]      # (Rp, nd*bc)   block-diag weight

    # ---- MaxPool(3,1) branch + BN ------------------------------------------------------
    y = Yr[:, nd * bc:(nd + 1) * bc]
    prev = shift_rows(y, Vp, -jnp.inf)
    nxt = shift_rows(y, -Vp, -jnp.inf)
    pool = (jnp.maximum(jnp.maximum(prev, y), nxt) * pool_ref[0:1, :]
            + pool_ref[1:2, :])                      # (Rp, bc)

    # ---- plain 1x1 branch (no ReLU) ----------------------------------------------------
    last = Ylin[:, (nb - 1) * bc:]                   # (Rp, bc)

    out_all = jnp.concatenate([tconv, pool, last], axis=1)   # (Rp, Cout)

    # ---- local + add_coeff[v] * global (global = rows with v == V) ---------------------
    out_g = dot(Asel_ref[...], out_all)              # (T, Cout)
    comb = out_all + dot(Bexp_ref[...], out_g)       # (Rp, Cout)

    # ---- transform: BN -> ReLU -> 1x1 conv, folded with the final BN -------------------
    z = jnp.maximum(comb * sToT_ref[0:1, :] + sToT_ref[1:2, :], 0.0)
    out_ref[...] = (dot(z, WT_ref[...]) + cT_ref[...]).astype(out_ref.dtype)


# ----------------------------------------------------------------------------
# Wrapper (layout transform + pallas_call)
# ----------------------------------------------------------------------------
def multiscale_temporalconv(x_nchw, folded, T, V, Cout, dilations):
    N, Cin, _, _ = x_nchw.shape
    nb = len(dilations) + 2
    bc = Cout // nb
    Vp = _round_up(V + 1, 8)
    Rp = T * Vp

    # NCHW -> rows = (t, v) t-major, with the V-mean as virtual joint v == V, padded to Vp
    x3 = jnp.transpose(x_nchw, (0, 2, 3, 1)).astype(jnp.float32)     # (N, T, V, Cin)
    xg = jnp.mean(x3, axis=2, keepdims=True)                         # (N, T, 1, Cin)
    zpad = jnp.zeros((N, T, Vp - V - 1, Cin), jnp.float32)
    xs = jnp.concatenate([x3, xg, zpad], axis=2).reshape(N, Rp, Cin)

    kern = functools.partial(_mstc_kernel, Vp=Vp, dilations=tuple(dilations), bc=bc)
    names = ('A', 'c', 'Wt', 'e', 'pool', 'sToT', 'WT', 'cT', 'Asel', 'Bexp')
    params = [folded[k] for k in names]

    def full_spec(a):
        r = a.ndim
        return pl.BlockSpec(a.shape, lambda n: (0,) * r)

    out = pl.pallas_call(
        kern,
        out_shape=jax.ShapeDtypeStruct((N, Rp, Cout), jnp.float32),
        grid=(N,),
        in_specs=[pl.BlockSpec((pl.Squeezed(), Rp, Cin), lambda n: (n, 0, 0))]
                 + [full_spec(a) for a in params],
        out_specs=pl.BlockSpec((pl.Squeezed(), Rp, Cout), lambda n: (n, 0, 0)),
        compiler_params=pltpu.CompilerParams(dimension_semantics=("parallel",)),
    )(xs, *params)

    out = out.reshape(N, T, Vp, Cout)[:, :, :V, :]
    return jnp.transpose(out, (0, 3, 1, 2))


# ----------------------------------------------------------------------------
# Deterministic parameter construction + folding
# ----------------------------------------------------------------------------
def make_raw_params(key, Cin, Cout, dilations, V):
    nd = len(dilations)
    nb = nd + 2
    assert Cout % nb == 0
    bc = Cout // nb
    keys = iter(jax.random.split(key, 128))

    def nrm(shape, scale=0.5):
        return scale * jax.random.normal(next(keys), shape, jnp.float32)

    def bnp(ch):
        g = 1.0 + 0.1 * jax.random.normal(next(keys), (ch,), jnp.float32)
        b = 0.1 * jax.random.normal(next(keys), (ch,), jnp.float32)
        m = 0.1 * jax.random.normal(next(keys), (ch,), jnp.float32)
        v = 0.5 + jax.random.uniform(next(keys), (ch,), jnp.float32)
        return (g, b, m, v)

    p = {}
    for i in range(nb):
        p[f'w1_{i}'] = nrm((bc, Cin))
        p[f'b1_{i}'] = nrm((bc,), 0.1)
        p[f'bn1_{i}'] = bnp(bc)
    for i in range(nd):
        p[f'wt_{i}'] = nrm((bc, bc, 3))
        p[f'bt_{i}'] = nrm((bc,), 0.1)
        p[f'bn2_{i}'] = bnp(bc)
    p['bn_pool'] = bnp(bc)
    p['add_coeff'] = 0.5 * jax.random.normal(next(keys), (25,), jnp.float32)  # num_joints=25
    p['bn_t'] = bnp(Cout)
    p['w_t'] = nrm((Cout, Cout), 0.3)
    p['b_t'] = nrm((Cout,), 0.1)
    p['bn_f'] = bnp(Cout)
    return p


def fold_params(p, T, V, Vp, Cin, Cout, dilations):
    nd = len(dilations)
    nb = nd + 2
    bc = Cout // nb
    Rp = T * Vp

    def bn_so(bn):
        g, b, m, v = bn
        s = g / jnp.sqrt(v + EPS)
        return s, b - m * s

    # fused 1x1 convs (+ BN1) across branches -> (Cin, Cout), (1, Cout)
    A_cols, c_cols = [], []
    for i in range(nb):
        s1, o1 = bn_so(p[f'bn1_{i}'])
        A_cols.append((p[f'w1_{i}'] * s1[:, None]).T)
        c_cols.append(p[f'b1_{i}'] * s1 + o1)
    A = jnp.concatenate(A_cols, axis=1)
    c = jnp.concatenate(c_cols)[None, :]

    # block-diagonal fused temporal-conv (+ BN2) weight; taps ordered [t-d, t, t+d]
    Wt = jnp.zeros((3 * nd * bc, nd * bc), jnp.float32)
    e_cols = []
    for i in range(nd):
        s2, o2 = bn_so(p[f'bn2_{i}'])
        w = p[f'wt_{i}'] * s2[:, None, None]                      # (bc_out, bc_in, 3)
        blk = jnp.transpose(w, (2, 1, 0)).reshape(3 * bc, bc)     # rows = (tap, cin)
        Wt = Wt.at[i * 3 * bc:(i + 1) * 3 * bc, i * bc:(i + 1) * bc].set(blk)
        e_cols.append(p[f'bt_{i}'] * s2 + o2)
    e = jnp.concatenate(e_cols)[None, :]

    sp, op = bn_so(p['bn_pool'])
    sT, oT = bn_so(p['bn_t'])
    sF, oF = bn_so(p['bn_f'])
    WT = (p['w_t'] * sF[:, None]).T                               # (Cout, Cout)
    cT = (p['b_t'] * sF + oF)[None, :]

    # precomputed global-feature select (rows v == V) and add_coeff-scaled broadcast
    rows = jnp.arange(Rp)
    t_idx, v_idx = rows // Vp, rows % Vp
    oh = jax.nn.one_hot(t_idx, T, dtype=jnp.float32)              # (Rp, T)
    Asel = oh.T * (v_idx == V).astype(jnp.float32)[None, :]       # (T, Rp)
    coeff = jnp.where(v_idx < V,
                      jnp.take(p['add_coeff'], jnp.minimum(v_idx, V - 1)), 0.0)
    Bexp = oh * coeff[:, None]                                    # (Rp, T)

    return dict(A=A, c=c, Wt=Wt, e=e, pool=jnp.stack([sp, op]),
                sToT=jnp.stack([sT, oT]), WT=WT, cT=cT, Asel=Asel, Bexp=Bexp)


# ----------------------------------------------------------------------------
# Pure-JAX reference (mirrors the PyTorch NCHW forward, eval-mode BN)
# ----------------------------------------------------------------------------
def reference_forward(x, p, dilations):
    N, Cin, T, V = x.shape
    nd = len(dilations)

    def bn(y, bnp):
        g, b, m, v = bnp
        return (y - m[None, :, None, None]) / jnp.sqrt(v + EPS)[None, :, None, None] \
            * g[None, :, None, None] + b[None, :, None, None]

    def conv1x1(y, w, b):
        return jnp.einsum('ncts,oc->nots', y, w) + b[None, :, None, None]

    def tconv(y, w, b, d):
        Tt = y.shape[2]
        yp = jnp.pad(y, ((0, 0), (0, 0), (d, d), (0, 0)))
        out = jnp.zeros((y.shape[0], w.shape[0], Tt, y.shape[3]), jnp.float32)
        for k in range(3):
            out = out + jnp.einsum('ncts,oc->nots', yp[:, :, k * d:k * d + Tt, :], w[:, :, k])
        return out + b[None, :, None, None]

    xm = x.mean(-1, keepdims=True)
    xp = jnp.concatenate([x, xm], axis=-1)

    branch_outs = []
    for i, d in enumerate(dilations):
        y = jax.nn.relu(bn(conv1x1(xp, p[f'w1_{i}'], p[f'b1_{i}']), p[f'bn1_{i}']))
        y = bn(tconv(y, p[f'wt_{i}'], p[f'bt_{i}'], d), p[f'bn2_{i}'])
        branch_outs.append(y)
    i = nd
    y = jax.nn.relu(bn(conv1x1(xp, p[f'w1_{i}'], p[f'b1_{i}']), p[f'bn1_{i}']))
    Tt = y.shape[2]
    ypad = jnp.pad(y, ((0, 0), (0, 0), (1, 1), (0, 0)), constant_values=-jnp.inf)
    y = jnp.maximum(jnp.maximum(ypad[:, :, 0:Tt], ypad[:, :, 1:Tt + 1]), ypad[:, :, 2:Tt + 2])
    branch_outs.append(bn(y, p['bn_pool']))
    i = nd + 1
    branch_outs.append(bn(conv1x1(xp, p[f'w1_{i}'], p[f'b1_{i}']), p[f'bn1_{i}']))

    out = jnp.concatenate(branch_outs, axis=1)
    local_feat = out[..., :V]
    global_feat = out[..., V]
    out = local_feat + jnp.einsum('nct,v->nctv', global_feat, p['add_coeff'][:V])
    out = conv1x1(jax.nn.relu(bn(out, p['bn_t'])), p['w_t'], p['b_t'])
    out = bn(out, p['bn_f'])
    return out


# ----------------------------------------------------------------------------
if __name__ == "__main__":
    key = jax.random.PRNGKey(0)
    kx, kp = jax.random.split(key)

    N, Cin, Cout, T, V = 2, 8, 12, 16, 25     # Cout multiple of 6 branches; V <= 25 joints
    dilations = (1, 2, 3, 4)
    Vp = _round_up(V + 1, 8)

    x = jax.random.normal(kx, (N, Cin, T, V), jnp.float32)
    raw = make_raw_params(kp, Cin, Cout, dilations, V)
    folded = fold_params(raw, T, V, Vp, Cin, Cout, dilations)

    out = multiscale_temporalconv(x, folded, T, V, Cout, dilations)
    out = jax.block_until_ready(out)

    ref = reference_forward(x, raw, dilations)
    err = float(jnp.max(jnp.abs(out - ref)))
    scale = float(jnp.max(jnp.abs(ref)))
    assert err <= 2e-2 * max(1.0, scale), f"mismatch: max|diff|={err}, ref scale={scale}"
    print("KERNEL_OK")
</pallas_src>

<mosaic_0001>
module attributes {stable_mosaic.version = 11 : i64} {
  func.func @_mstc_kernel(%arg0: i32, %arg1: memref<1x512x8xf32, #tpu.memory_space<vmem>>, %arg2: memref<8x12xf32, #tpu.memory_space<vmem>>, %arg3: memref<1x12xf32, #tpu.memory_space<vmem>>, %arg4: memref<24x8xf32, #tpu.memory_space<vmem>>, %arg5: memref<1x8xf32, #tpu.memory_space<vmem>>, %arg6: memref<2x2xf32, #tpu.memory_space<vmem>>, %arg7: memref<2x12xf32, #tpu.memory_space<vmem>>, %arg8: memref<12x12xf32, #tpu.memory_space<vmem>>, %arg9: memref<1x12xf32, #tpu.memory_space<vmem>>, %arg10: memref<16x512xf32, #tpu.memory_space<vmem>>, %arg11: memref<512x16xf32, #tpu.memory_space<vmem>>, %arg12: memref<1x512x12xf32, #tpu.memory_space<vmem>>) attributes {dimension_semantics = [#tpu.dimension_semantics<parallel>], iteration_bounds = array<i64: 2>, scalar_prefetch = 0 : i64, scratch_operands = 0 : i64, tpu.core_type = #tpu.core_type<tc>, window_params = [{transform_indices = @transform_0, window_bounds = array<i64: 1, 512, 8>}, {pipeline_mode = #tpu.pipeline_mode<synchronous>, transform_indices = @transform_1, window_bounds = array<i64: 8, 12>}, {pipeline_mode = #tpu.pipeline_mode<synchronous>, transform_indices = @transform_2, window_bounds = array<i64: 1, 12>}, {pipeline_mode = #tpu.pipeline_mode<synchronous>, transform_indices = @transform_3, window_bounds = array<i64: 24, 8>}, {pipeline_mode = #tpu.pipeline_mode<synchronous>, transform_indices = @transform_4, window_bounds = array<i64: 1, 8>}, {pipeline_mode = #tpu.pipeline_mode<synchronous>, transform_indices = @transform_5, window_bounds = array<i64: 2, 2>}, {pipeline_mode = #tpu.pipeline_mode<synchronous>, transform_indices = @transform_6, window_bounds = array<i64: 2, 12>}, {pipeline_mode = #tpu.pipeline_mode<synchronous>, transform_indices = @transform_7, window_bounds = array<i64: 12, 12>}, {pipeline_mode = #tpu.pipeline_mode<synchronous>, transform_indices = @transform_8, window_bounds = array<i64: 1, 12>}, {pipeline_mode = #tpu.pipeline_mode<synchronous>, transform_indices = @transform_9, window_bounds = array<i64: 16, 512>}, {pipeline_mode = #tpu.pipeline_mode<synchronous>, transform_indices = @transform_10, window_bounds = array<i64: 512, 16>}, {transform_indices = @transform_11, window_bounds = array<i64: 1, 512, 12>}]} {
    %c0 = arith.constant 0 : index
    %c0_0 = arith.constant 0 : index
    %c0_1 = arith.constant 0 : index
    %0 = vector.load %arg1[%c0, %c0_0, %c0_1] : memref<1x512x8xf32, #tpu.memory_space<vmem>>, vector<1x512x8xf32>
    %1 = vector.shape_cast %0 : vector<1x512x8xf32> to vector<512x8xf32>
    %c0_2 = arith.constant 0 : index
    %c0_3 = arith.constant 0 : index
    %2 = vector.load %arg2[%c0_2, %c0_3] : memref<8x12xf32, #tpu.memory_space<vmem>>, vector<8x12xf32>
    %cst = arith.constant dense<0.000000e+00> : vector<512x12xf32>
    %3 = tpu.matmul %1, %2, %cst {dimension_numbers = #tpu.dot_dimension_numbers<[1], [0], [0], [1], [0, 0, 1, 1], [], []>} : vector<512x8xf32>, vector<8x12xf32>, vector<512x12xf32> -> vector<512x12xf32>
    %c0_4 = arith.constant 0 : index
    %c0_5 = arith.constant 0 : index
    %4 = vector.load %arg3[%c0_4, %c0_5] : memref<1x12xf32, #tpu.memory_space<vmem>>, vector<1x12xf32>
    %5 = vector.broadcast %4 : vector<1x12xf32> to vector<512x12xf32>
    %6 = arith.addf %3, %5 : vector<512x12xf32>
    %cst_6 = arith.constant 0.000000e+00 : f32
    %7 = vector.broadcast %cst_6 : f32 to vector<512x12xf32>
    %8 = arith.maximumf %6, %7 : vector<512x12xf32>
    %9 = vector.extract_strided_slice %8 {offsets = [0, 0], sizes = [512, 2], strides = [1, 1]} : vector<512x12xf32> to vector<512x2xf32>
    %cst_7 = arith.constant 0.000000e+00 : f32
    %10 = vector.broadcast %cst_7 : f32 to vector<32x2xf32>
    %11 = vector.extract_strided_slice %9 {offsets = [0, 0], sizes = [480, 2], strides = [1, 1]} : vector<512x2xf32> to vector<480x2xf32>
    %12 = tpu.concatenate %10, %11 in 0 : vector<32x2xf32>, vector<480x2xf32> -> vector<512x2xf32>
    %cst_8 = arith.constant 0.000000e+00 : f32
    %13 = vector.broadcast %cst_8 : f32 to vector<32x2xf32>
    %14 = vector.extract_strided_slice %9 {offsets = [32, 0], sizes = [480, 2], strides = [1, 1]} : vector<512x2xf32> to vector<480x2xf32>
    %15 = tpu.concatenate %14, %13 in 0 : vector<480x2xf32>, vector<32x2xf32> -> vector<512x2xf32>
    %16 = vector.extract_strided_slice %8 {offsets = [0, 2], sizes = [512, 2], strides = [1, 1]} : vector<512x12xf32> to vector<512x2xf32>
    %cst_9 = arith.constant 0.000000e+00 : f32
    %17 = vector.broadcast %cst_9 : f32 to vector<64x2xf32>
    %18 = vector.extract_strided_slice %16 {offsets = [0, 0], sizes = [448, 2], strides = [1, 1]} : vector<512x2xf32> to vector<448x2xf32>
    %19 = tpu.concatenate %17, %18 in 0 : vector<64x2xf32>, vector<448x2xf32> -> vector<512x2xf32>
    %cst_10 = arith.constant 0.000000e+00 : f32
    %20 = vector.broadcast %cst_10 : f32 to vector<64x2xf32>
    %21 = vector.extract_strided_slice %16 {offsets = [64, 0], sizes = [448, 2], strides = [1, 1]} : vector<512x2xf32> to vector<448x2xf32>
    %22 = tpu.concatenate %21, %20 in 0 : vector<448x2xf32>, vector<64x2xf32> -> vector<512x2xf32>
    %23 = vector.extract_strided_slice %8 {offsets = [0, 4], sizes = [512, 2], strides = [1, 1]} : vector<512x12xf32> to vector<512x2xf32>
    %cst_11 = arith.constant 0.000000e+00 : f32
    %24 = vector.broadcast %cst_11 : f32 to vector<96x2xf32>
    %25 = vector.extract_strided_slice %23 {offsets = [0, 0], sizes = [416, 2], strides = [1, 1]} : vector<512x2xf32> to vector<416x2xf32>
    %26 = tpu.concatenate %24, %25 in 0 : vector<96x2xf32>, vector<416x2xf32> -> vector<512x2xf32>
    %cst_12 = arith.constant 0.000000e+00 : f32
    %27 = vector.broadcast %cst_12 : f32 to vector<96x2xf32>
    %28 = vector.extract_strided_slice %23 {offsets = [96, 0], sizes = [416, 2], strides = [1, 1]} : vector<512x2xf32> to vector<416x2xf32>
    %29 = tpu.concatenate %28, %27 in 0 : vector<416x2xf32>, vector<96x2xf32> -> vector<512x2xf32>
    %30 = vector.extract_strided_slice %8 {offsets = [0, 6], sizes = [512, 2], strides = [1, 1]} : vector<512x12xf32> to vector<512x2xf32>
    %cst_13 = arith.constant 0.000000e+00 : f32
    %31 = vector.broadcast %cst_13 : f32 to vector<128x2xf32>
    %32 = vector.extract_strided_slice %30 {offsets = [0, 0], sizes = [384, 2], strides = [1, 1]} : vector<512x2xf32> to vector<384x2xf32>
    %33 = tpu.concatenate %31, %32 in 0 : vector<128x2xf32>, vector<384x2xf32> -> vector<512x2xf32>
    %cst_14 = arith.constant 0.000000e+00 : f32
    %34 = vector.broadcast %cst_14 : f32 to vector<128x2xf32>
    %35 = vector.extract_strided_slice %30 {offsets = [128, 0], sizes = [384, 2], strides = [1, 1]} : vector<512x2xf32> to vector<384x2xf32>
    %36 = tpu.concatenate %35, %34 in 0 : vector<384x2xf32>, vector<128x2xf32> -> vector<512x2xf32>
    %37 = tpu.concatenate %12, %9, %15, %19, %16, %22, %26, %23, %29, %33, %30, %36 in 1 : vector<512x2xf32>, vector<512x2xf32>, vector<512x2xf32>, vector<512x2xf32>, vector<512x2xf32>, vector<512x2xf32>, vector<512x2xf32>, vector<512x2xf32>, vector<512x2xf32>, vector<512x2xf32>, vector<512x2xf32>, vector<512x2xf32> -> vector<512x24xf32>
    %c0_15 = arith.constant 0 : index
    %c0_16 = arith.constant 0 : index
    %38 = vector.load %arg4[%c0_15, %c0_16] : memref<24x8xf32, #tpu.memory_space<vmem>>, vector<24x8xf32>
    %cst_17 = arith.constant dense<0.000000e+00> : vector<512x8xf32>
    %39 = tpu.matmul %37, %38, %cst_17 {dimension_numbers = #tpu.dot_dimension_numbers<[1], [0], [0], [1], [0, 0, 1, 1], [], []>} : vector<512x24xf32>, vector<24x8xf32>, vector<512x8xf32> -> vector<512x8xf32>
    %c0_18 = arith.constant 0 : index
    %c0_19 = arith.constant 0 : index
    %40 = vector.load %arg5[%c0_18, %c0_19] : memref<1x8xf32, #tpu.memory_space<vmem>>, vector<1x8xf32>
    %41 = vector.broadcast %40 : vector<1x8xf32> to vector<512x8xf32>
    %42 = arith.addf %39, %41 : vector<512x8xf32>
    %43 = vector.extract_strided_slice %8 {offsets = [0, 8], sizes = [512, 2], strides = [1, 1]} : vector<512x12xf32> to vector<512x2xf32>
    %cst_20 = arith.constant 0xFF800000 : f32
    %44 = vector.broadcast %cst_20 : f32 to vector<32x2xf32>
    %45 = vector.extract_strided_slice %43 {offsets = [0, 0], sizes = [480, 2], strides = [1, 1]} : vector<512x2xf32> to vector<480x2xf32>
    %46 = tpu.concatenate %44, %45 in 0 : vector<32x2xf32>, vector<480x2xf32> -> vector<512x2xf32>
    %cst_21 = arith.constant 0xFF800000 : f32
    %47 = vector.broadcast %cst_21 : f32 to vector<32x2xf32>
    %48 = vector.extract_strided_slice %43 {offsets = [32, 0], sizes = [480, 2], strides = [1, 1]} : vector<512x2xf32> to vector<480x2xf32>
    %49 = tpu.concatenate %48, %47 in 0 : vector<480x2xf32>, vector<32x2xf32> -> vector<512x2xf32>
    %50 = arith.maximumf %46, %43 : vector<512x2xf32>
    %51 = arith.maximumf %50, %49 : vector<512x2xf32>
    %c0_22 = arith.constant 0 : index
    %c0_23 = arith.constant 0 : index
    %52 = vector.load %arg6[%c0_22, %c0_23] : memref<2x2xf32, #tpu.memory_space<vmem>>, vector<1x2xf32>
    %53 = vector.broadcast %52 : vector<1x2xf32> to vector<512x2xf32>
    %54 = arith.mulf %51, %53 : vector<512x2xf32>
    %c1 = arith.constant 1 : index
    %c0_24 = arith.constant 0 : index
    %55 = vector.load %arg6[%c1, %c0_24] : memref<2x2xf32, #tpu.memory_space<vmem>>, vector<1x2xf32>
    %56 = vector.broadcast %55 : vector<1x2xf32> to vector<512x2xf32>
    %57 = arith.addf %54, %56 : vector<512x2xf32>
    %58 = vector.extract_strided_slice %6 {offsets = [0, 10], sizes = [512, 2], strides = [1, 1]} : vector<512x12xf32> to vector<512x2xf32>
    %59 = tpu.concatenate %42, %57, %58 in 1 : vector<512x8xf32>, vector<512x2xf32>, vector<512x2xf32> -> vector<512x12xf32>
    %c0_25 = arith.constant 0 : index
    %c0_26 = arith.constant 0 : index
    %60 = vector.load %arg10[%c0_25, %c0_26] : memref<16x512xf32, #tpu.memory_space<vmem>>, vector<16x512xf32>
    %cst_27 = arith.constant dense<0.000000e+00> : vector<16x12xf32>
    %61 = tpu.matmul %60, %59, %cst_27 {dimension_numbers = #tpu.dot_dimension_numbers<[1], [0], [0], [1], [0, 0, 1, 1], [], []>} : vector<16x512xf32>, vector<512x12xf32>, vector<16x12xf32> -> vector<16x12xf32>
    %c0_28 = arith.constant 0 : index
    %c0_29 = arith.constant 0 : index
    %62 = vector.load %arg11[%c0_28, %c0_29] : memref<512x16xf32, #tpu.memory_space<vmem>>, vector<512x16xf32>
    %cst_30 = arith.constant dense<0.000000e+00> : vector<512x12xf32>
    %63 = tpu.matmul %62, %61, %cst_30 {dimension_numbers = #tpu.dot_dimension_numbers<[1], [0], [0], [1], [0, 0, 1, 1], [], []>} : vector<512x16xf32>, vector<16x12xf32>, vector<512x12xf32> -> vector<512x12xf32>
    %64 = arith.addf %59, %63 : vector<512x12xf32>
    %c0_31 = arith.constant 0 : index
    %c0_32 = arith.constant 0 : index
    %65 = vector.load %arg7[%c0_31, %c0_32] : memref<2x12xf32, #tpu.memory_space<vmem>>, vector<1x12xf32>
    %66 = vector.broadcast %65 : vector<1x12xf32> to vector<512x12xf32>
    %67 = arith.mulf %64, %66 : vector<512x12xf32>
    %c1_33 = arith.constant 1 : index
    %c0_34 = arith.constant 0 : index
    %68 = vector.load %arg7[%c1_33, %c0_34] : memref<2x12xf32, #tpu.memory_space<vmem>>, vector<1x12xf32>
    %69 = vector.broadcast %68 : vector<1x12xf32> to vector<512x12xf32>
    %70 = arith.addf %67, %69 : vector<512x12xf32>
    %cst_35 = arith.constant 0.000000e+00 : f32
    %71 = vector.broadcast %cst_35 : f32 to vector<512x12xf32>
    %72 = arith.maximumf %70, %71 : vector<512x12xf32>
    %c0_36 = arith.constant 0 : index
    %c0_37 = arith.constant 0 : index
    %73 = vector.load %arg8[%c0_36, %c0_37] : memref<12x12xf32, #tpu.memory_space<vmem>>, vector<12x12xf32>
    %cst_38 = arith.constant dense<0.000000e+00> : vector<512x12xf32>
    %74 = tpu.matmul %72, %73, %cst_38 {dimension_numbers = #tpu.dot_dimension_numbers<[1], [0], [0], [1], [0, 0, 1, 1], [], []>} : vector<512x12xf32>, vector<12x12xf32>, vector<512x12xf32> -> vector<512x12xf32>
    %c0_39 = arith.constant 0 : index
    %c0_40 = arith.constant 0 : index
    %75 = vector.load %arg9[%c0_39, %c0_40] : memref<1x12xf32, #tpu.memory_space<vmem>>, vector<1x12xf32>
    %76 = vector.broadcast %75 : vector<1x12xf32> to vector<512x12xf32>
    %77 = arith.addf %74, %76 : vector<512x12xf32>
    %c0_41 = arith.constant 0 : index
    %c0_42 = arith.constant 0 : index
    %c0_43 = arith.constant 0 : index
    %78 = vector.load %arg12[%c0_41, %c0_42, %c0_43] : memref<1x512x12xf32, #tpu.memory_space<vmem>>, vector<1x512x12xf32>
    %79 = vector.shape_cast %78 : vector<1x512x12xf32> to vector<512x12xf32>
    %80 = vector.shape_cast %77 : vector<512x12xf32> to vector<1x512x12xf32>
    tpu.vector_store %arg12[%c0_41, %c0_42, %c0_43], %80 {strides = array<i32>} : memref<1x512x12xf32, #tpu.memory_space<vmem>>, vector<1x512x12xf32>,
    return
  }
  func.func @transform_0(%arg0: i32) -> (i32, i32, i32) {
    %c0_i32 = arith.constant 0 : i32
    %c0_i32_0 = arith.constant 0 : i32
    %c0_i32_1 = arith.constant 0 : i32
    return %arg0, %c0_i32, %c0_i32_0 : i32, i32, i32
  }
  func.func @transform_1(%arg0: i32) -> (i32, i32) {
    %c0_i32 = arith.constant 0 : i32
    %c0_i32_0 = arith.constant 0 : i32
    %c0_i32_1 = arith.constant 0 : i32
    return %c0_i32, %c0_i32_0 : i32, i32
  }
  func.func @transform_2(%arg0: i32) -> (i32, i32) {
    %c0_i32 = arith.constant 0 : i32
    %c0_i32_0 = arith.constant 0 : i32
    %c0_i32_1 = arith.constant 0 : i32
    return %c0_i32, %c0_i32_0 : i32, i32
  }
  func.func @transform_3(%arg0: i32) -> (i32, i32) {
    %c0_i32 = arith.constant 0 : i32
    %c0_i32_0 = arith.constant 0 : i32
    %c0_i32_1 = arith.constant 0 : i32
    return %c0_i32, %c0_i32_0 : i32, i32
  }
  func.func @transform_4(%arg0: i32) -> (i32, i32) {
    %c0_i32 = arith.constant 0 : i32
    %c0_i32_0 = arith.constant 0 : i32
    %c0_i32_1 = arith.constant 0 : i32
    return %c0_i32, %c0_i32_0 : i32, i32
  }
  func.func @transform_5(%arg0: i32) -> (i32, i32) {
    %c0_i32 = arith.constant 0 : i32
    %c0_i32_0 = arith.constant 0 : i32
    %c0_i32_1 = arith.constant 0 : i32
    return %c0_i32, %c0_i32_0 : i32, i32
  }
  func.func @transform_6(%arg0: i32) -> (i32, i32) {
    %c0_i32 = arith.constant 0 : i32
    %c0_i32_0 = arith.constant 0 : i32
    %c0_i32_1 = arith.constant 0 : i32
    return %c0_i32, %c0_i32_0 : i32, i32
  }
  func.func @transform_7(%arg0: i32) -> (i32, i32) {
    %c0_i32 = arith.constant 0 : i32
    %c0_i32_0 = arith.constant 0 : i32
    %c0_i32_1 = arith.constant 0 : i32
    return %c0_i32, %c0_i32_0 : i32, i32
  }
  func.func @transform_8(%arg0: i32) -> (i32, i32) {
    %c0_i32 = arith.constant 0 : i32
    %c0_i32_0 = arith.constant 0 : i32
    %c0_i32_1 = arith.constant 0 : i32
    return %c0_i32, %c0_i32_0 : i32, i32
  }
  func.func @transform_9(%arg0: i32) -> (i32, i32) {
    %c0_i32 = arith.constant 0 : i32
    %c0_i32_0 = arith.constant 0 : i32
    %c0_i32_1 = arith.constant 0 : i32
    return %c0_i32, %c0_i32_0 : i32, i32
  }
  func.func @transform_10(%arg0: i32) -> (i32, i32) {
    %c0_i32 = arith.constant 0 : i32
    %c0_i32_0 = arith.constant 0 : i32
    %c0_i32_1 = arith.constant 0 : i32
    return %c0_i32, %c0_i32_0 : i32, i32
  }
  func.func @transform_11(%arg0: i32) -> (i32, i32, i32) {
    %c0_i32 = arith.constant 0 : i32
    %c0_i32_0 = arith.constant 0 : i32
    %c0_i32_1 = arith.constant 0 : i32
    return %arg0, %c0_i32, %c0_i32_0 : i32, i32, i32
  }
}

</mosaic_0001>

<bundles_post_ra>
// kernel: tpu_custom_call.1
= control target key start
LH: loop header
LB: loop body
LE: loop exit
PB: predicated region body
PF: predicated region fallthrough
CT: control target
= control target key end

     0   :  { %s6904_s17 = smov 0   ;;  %s13013_s0 = inlined_call_operand.vmem [shape: f32[2,512,8], index: 0, kind: input, shape index: {}]   ;;  %s13014_s1 = inlined_call_operand.vmem [shape: f32[8,12], index: 1, kind: input, shape index: {}]   ;;  %s13015_s2 = inlined_call_operand.vmem [shape: f32[1,12], index: 2, kind: input, shape index: {}]   ;;  %s13016_s3 = inlined_call_operand.vmem [shape: f32[24,8], index: 3, kind: input, shape index: {}]   ;;  %s13017_s4 = inlined_call_operand.vmem [shape: f32[1,8], index: 4, kind: input, shape index: {}]   ;;  %s13018_s5 = inlined_call_operand.vmem [shape: f32[2,2], index: 5, kind: input, shape index: {}]   ;;  %s13019_s6 = inlined_call_operand.vmem [shape: f32[2,12], index: 6, kind: input, shape index: {}]   ;;  %s13020_s7 = inlined_call_operand.vmem [shape: f32[12,12], index: 7, kind: input, shape index: {}]   ;;  %s13021_s8 = inlined_call_operand.vmem [shape: f32[1,12], index: 8, kind: input, shape index: {}]   ;;  %s13022_s9 = inlined_call_operand.vmem [shape: f32[16,512], index: 9, kind: input, shape index: {}]   ;;  %s13023_s10 = inlined_call_operand.vmem [shape: f32[512,16], index: 10, kind: input, shape index: {}]   ;;  %s13024_s11 = inlined_call_operand.vmem [shape: f32[2,512,12], index: 11, kind: output, shape index: {}]  }
   0x1 LB: > { %s6511_s18 = sadd.s32 4294967295, %s6827_s17   ;;  %p6515_p0 = scmp.ge.s32.totalorder %s6827_s17, 1  ;;  %s6827_s17 = sphi %s6904_s17, %s21_s17  }
   0x2   : > { %p337_p1 = scmp.lt.s32.totalorder %s6827_s17, 3 }
   0x4   : > { %p338_p2 = pnand %p6515_p0, %p337_p1 }
   0x6   : > { %341 = sbr.rel (%p338_p2) target bundleno = 3652 (0xe44), region = 64 }
   0xb   : > { %v451_v0 = vld [vmem:[%s13014_s1] sm:$0xff]  ;;  %p377_p3 = scmp.lt.s32.totalorder %s6511_s18, 1  ;;  %vm456_vm0 = vcmask 64512   ;;  %s6829_s27 = smov 124   ;;  %vm3201_vm1 = vcmask 15360   ;;  %vm3331_vm2 = vcmask 48128  }
   0xc   : > { %664 = vmatpush.msra.mxu0 %v451_v0  ;;  %v6958_v16 = vld [vmem:[%s13015_s2] ss:$0 sm:$0xff]  ;;  %s6830_s28 = smov 126   ;;  %s6831_s29 = smov 122   ;;  %vm3266_vm3 = vcmask 31744   ;;  %vm3460_vm4 = vcmask 80896  }
   0xd   : > { %s14306_s18 = smov (!%p377_p3, %s6511_s18), 1  ;;  %s6832_s30 = smov 2   ;;  %vm3525_vm5 = vcmask 97280   ;;  %vm3590_vm6 = vcmask 113664   ;;  %vm3655_vm7 = vcmask 130048   ;;  %vm3720_vm8 = vcmask 146432  }
   0xe   : > { %s6779_s21 = sshll.u32 %s14306_s18, 9  ;;  %s6833_s12 = smov 4   ;;  %vm3785_vm9 = vcmask 162816   ;;  %vm3850_vm10 = vcmask 179200   ;;  %vm3922_vm11 = vcmask 195584   ;;  %vm6179_vm12 = vcmask 1043456  }
   0xf   : > { %s6923_s24 = scalar_lea.vmem %s13013_s0, %s6779_s21  ;;  %s6835_s15 = smov 6  }
  0x10   : > { %v387_v1 = vld [vmem:[%s6923_s24] sm:$0xff]  ;;  %v388_v2 = vld [vmem:[%s6923_s24 + $0x8] sm:$0xff]  ;;  %v389_v3 = vld [vmem:[%s6923_s24 + $0x10] sm:$0xff]  ;;  %s6836_s16 = smov 8   ;;  %s6837_s19 = smov 12  }
  0x11   : > { %6520 = vmatmul.msk.f32.vlgmr.msra.gmra.mxu0 %vm456_vm0, %v387_v1  ;;  %v390_v4 = vld [vmem:[%s6923_s24 + $0x18] sm:$0xff]  ;;  %v391_v5 = vld [vmem:[%s6923_s24 + $0x20] sm:$0xff]  ;;  %v392_v6 = vld [vmem:[%s6923_s24 + $0x28] sm:$0xff]  ;;  %s6838_s20 = smov 10   ;;  %s6839_s22 = smov 18  }
  0x12   : > { %v393_v7 = vld [vmem:[%s6923_s24 + $0x30] sm:$0xff]  ;;  %v394_v8 = vld [vmem:[%s6923_s24 + $0x38] sm:$0xff]  ;;  %v395_v9 = vld [vmem:[%s6923_s24 + $0x40] sm:$0xff]  ;;  %s6840_s23 = smov 16  }
  0x13   : > { %v396_v10 = vld [vmem:[%s6923_s24 + $0x48] sm:$0xff]  ;;  %v397_v11 = vld [vmem:[%s6923_s24 + $0x50] sm:$0xff]  ;;  %v398_v12 = vld [vmem:[%s6923_s24 + $0x58] sm:$0xff] }
  0x14   : > { %v399_v13 = vld [vmem:[%s6923_s24 + $0x60] sm:$0xff]  ;;  %v400_v14 = vld [vmem:[%s6923_s24 + $0x68] sm:$0xff]  ;;  %v401_v15 = vld [vmem:[%s6923_s24 + $0x70] sm:$0xff] }
  0x15   : > { %v402_v18 = vld [vmem:[%s6923_s24 + $0x78] sm:$0xff]  ;;  %v403_v24 = vld [vmem:[%s6923_s24 + $0x80] sm:$0xff]  ;;  %v404_v28 = vld [vmem:[%s6923_s24 + $0x88] sm:$0xff] }
  0x16   : > { %v405_v31 = vld [vmem:[%s6923_s24 + $0x90] sm:$0xff]  ;;  %v406_v38 = vld [vmem:[%s6923_s24 + $0x98] sm:$0xff]  ;;  %v407_v40 = vld [vmem:[%s6923_s24 + $0xa0] sm:$0xff] }
  0x17   : > { %v408_v43 = vld [vmem:[%s6923_s24 + $0xa8] sm:$0xff]  ;;  %v409_v47 = vld [vmem:[%s6923_s24 + $0xb0] sm:$0xff]  ;;  %v410_v51 = vld [vmem:[%s6923_s24 + $0xb8] sm:$0xff] }
  0x18   : > { %v411_v55 = vld [vmem:[%s6923_s24 + $0xc0] sm:$0xff]  ;;  %v412_v61 = vld [vmem:[%s6923_s24 + $0xc8] sm:$0xff] }
  0x19   : > { %6521 = vmatmul.msk.f32.gmra.mxu0 %vm456_vm0, %v388_v2 }
  0x21   : > { %6522 = vmatmul.msk.f32.gmra.mxu0 %vm456_vm0, %v389_v3  ;;  %v413_v3 = vld [vmem:[%s6923_s24 + $0xd0] sm:$0xff] }
  0x29   : > { %6523 = vmatmul.msk.f32.gmra.mxu0 %vm456_vm0, %v390_v4 }
  0x31   : > { %6524 = vmatmul.msk.f32.gmra.mxu0 %vm456_vm0, %v391_v5 }
  0x39   : > { %6525 = vmatmul.msk.f32.gmra.mxu0 %vm456_vm0, %v392_v6 }
  0x41   : > { %6526 = vmatmul.msk.f32.gmra.mxu0 %vm456_vm0, %v393_v7 }
  0x49   : > { %6527 = vmatmul.msk.f32.gmra.mxu0 %vm456_vm0, %v394_v8 }
  0x51   : > { %6528 = vmatmul.msk.f32.gmra.mxu0 %vm456_vm0, %v395_v9 }
  0x59   : > { %6529 = vmatmul.msk.f32.gmra.mxu0 %vm456_vm0, %v396_v10  ;;  %v414_v10 = vld [vmem:[%s6923_s24 + $0xd8] sm:$0xff] }
  0x61   : > { %6530 = vmatmul.msk.f32.gmra.mxu0 %vm456_vm0, %v397_v11 }
  0x69   : > { %6531 = vmatmul.msk.f32.gmra.mxu0 %vm456_vm0, %v398_v12 }
  0x71   : > { %6532 = vmatmul.msk.f32.gmra.mxu0 %vm456_vm0, %v399_v13 }
  0x79   : > { %6533 = vmatmul.msk.f32.gmra.mxu0 %vm456_vm0, %v400_v14 }
  0x81   : > { %6534 = vmatmul.msk.f32.gmra.mxu0 %vm456_vm0, %v401_v15 }
  0x89   : > { %6535 = vmatmul.msk.f32.gmra.mxu0 %vm456_vm0, %v402_v18 }
  0x8e   : > { %v666_v17 = vpop.f32.mrf.mxu0 }
  0x8f   : > { %v6962_v19 = vadd.f32 %v6958_v16, %v666_v17 }
  0x91   : > { %13235 = vst [vmem:[#allocation2_spill] sm:$0xff] %v6962_v19  ;;  %v6965_v20 = vmax.f32 %v6962_v19, 0.0  ;;  %6536 = vmatmul.msk.f32.gmra.mxu0 %vm456_vm0, %v403_v24 }
  0x93   : > { %13236 = vst [vmem:[#allocation3_spill] sm:$0xff] %v6965_v20  ;;  %1090 = vrot.lane.b32.xlu2 %v6965_v20, %s6829_s27  ;;  %978 = vrot.lane.b32.xlu0 %v6965_v20, %s6830_s28 }
  0x96   : > { %v669_v21 = vpop.f32.mrf.mxu0 }
  0x97   : > { %v6973_v22 = vadd.f32 %v6958_v16, %v669_v21 }
  0x99   : > { %13237 = vst [vmem:[#allocation4_spill] sm:$0xff] %v6973_v22  ;;  %v6976_v23 = vmax.f32 %v6973_v22, 0.0  ;;  %6537 = vmatmul.msk.f32.gmra.mxu0 %vm456_vm0, %v404_v28 }
  0x9b   : > { %13238 = vst [vmem:[#allocation5_spill] sm:$0xff] %v6976_v23  ;;  %1196 = vrot.lane.b32.xlu1 %v6976_v23, %s6831_s29  ;;  %1194 = vrot.lane.b32.xlu0 %v6965_v20, %s6831_s29 }
  0x9e   : > { %v672_v25 = vpop.f32.mrf.mxu0 }
  0x9f   : > { %v6985_v26 = vadd.f32 %v6958_v16, %v672_v25  ;;  %v415_v25 = vld [vmem:[%s6923_s24 + $0xe0] sm:$0xff] }
  0xa1   : > { %13239 = vst [vmem:[#allocation6_spill] sm:$0xff] %v6985_v26  ;;  %v6988_v27 = vmax.f32 %v6985_v26, 0.0  ;;  %6538 = vmatmul.msk.f32.gmra.mxu0 %vm456_vm0, %v405_v31 }
  0xa3   : > { %13240 = vst [vmem:[#allocation7_spill] sm:$0xff] %v6988_v27  ;;  %1300 = vrot.lane.b32.xlu1 %v6976_v23, %s6832_s30  ;;  %1198 = vrot.lane.b32.xlu2 %v6988_v27, %s6831_s29 }
  0xa4   : > { %1298 = vrot.lane.b32.xlu0 %v6965_v20, %s6832_s30 }
  0xa6   : > { %v675_v29 = vpop.f32.mrf.mxu0 }
  0xa7   : > { %v7003_v30 = vadd.f32 %v6958_v16, %v675_v29 }
  0xa9   : > { %13241 = vst [vmem:[#allocation8_spill] sm:$0xff] %v7003_v30  ;;  %v7010_v33 = vmax.f32 %v7003_v30, 0.0  ;;  %6539 = vmatmul.msk.f32.gmra.mxu0 %vm456_vm0, %v406_v38 }
  0xab   : > { %982 = vrot.lane.b32.xlu1 %v6988_v27, %s6830_s28  ;;  %1302 = vrot.lane.b32.xlu2 %v6988_v27, %s6832_s30  ;;  %13242 = vst [vmem:[#allocation9_spill] sm:$0xff] %v7010_v33 }
  0xac   : > { %980 = vrot.lane.b32.xlu0 %v6976_v23, %s6830_s28 }
  0xae   : > { %v678_v32 = vpop.f32.mrf.mxu0 }
  0xaf   : > { %v7017_v34 = vadd.f32 %v6958_v16, %v678_v32 }
  0xb1   : > { %13243 = vst [vmem:[#allocation10_spill] sm:$0xff] %v7017_v34  ;;  %v7022_v35 = vmax.f32 %v7017_v34, 0.0  ;;  %6540 = vmatmul.msk.f32.gmra.mxu0 %vm456_vm0, %v407_v40  ;;  %v416_v40 = vld [vmem:[%s6923_s24 + $0xe8] sm:$0xff] }
  0xb3   : > { %1094 = vrot.lane.b32.xlu1 %v6988_v27, %s6829_s27  ;;  %1096 = vrot.lane.b32.xlu2 %v7010_v33, %s6829_s27  ;;  %13244 = vst [vmem:[#allocation11_spill] sm:$0xff] %v7022_v35 }
  0xb4   : > { %1092 = vrot.lane.b32.xlu0 %v6976_v23, %s6829_s27 }
  0xb6   : > { %v681_v36 = vpop.f32.mrf.mxu0 }
  0xb7   : > { %v7029_v37 = vadd.f32 %v6958_v16, %v681_v36 }
  0xb9   : > { %13245 = vst [vmem:[#allocation12_spill] sm:$0xff] %v7029_v37  ;;  %v7036_v39 = vmax.f32 %v7029_v37, 0.0  ;;  %6541 = vmatmul.msk.f32.gmra.mxu0 %vm456_vm0, %v408_v43 }
  0xbb   : > { %984 = vrot.lane.b32.xlu1 %v7010_v33, %s6830_s28  ;;  %986 = vrot.lane.b32.xlu2 %v7022_v35, %s6830_s28  ;;  %13246 = vst [vmem:[#allocation13_spill] sm:$0xff] %v7036_v39 }
  0xbc   : > { %1200 = vrot.lane.b32.xlu0 %v7010_v33, %s6831_s29 }
  0xbe   : > { %v684_v41 = vpop.f32.mrf.mxu0 }
  0xbf   : > { %v7053_v42 = vadd.f32 %v6958_v16, %v684_v41 }
  0xc1   : > { %13247 = vst [vmem:[#allocation14_spill] sm:$0xff] %v7053_v42  ;;  %v7058_v44 = vmax.f32 %v7053_v42, 0.0  ;;  %6542 = vmatmul.msk.f32.gmra.mxu0 %vm456_vm0, %v409_v47 }
  0xc3   : > { %1202 = vrot.lane.b32.xlu1 %v7022_v35, %s6831_s29  ;;  %988 = vrot.lane.b32.xlu2 %v7036_v39, %s6830_s28  ;;  %13248 = vst [vmem:[#allocation15_spill] sm:$0xff] %v7058_v44 }
  0xc4   : > { %1304 = vrot.lane.b32.xlu0 %v7010_v33, %s6832_s30 }
  0xc6   : > { %v687_v45 = vpop.f32.mrf.mxu0 }
  0xc7   : > { %v7071_v46 = vadd.f32 %v6958_v16, %v687_v45 }
  0xc9   : > { %13249 = vst [vmem:[#allocation16_spill] sm:$0xff] %v7071_v46  ;;  %v7078_v48 = vmax.f32 %v7071_v46, 0.0  ;;  %6543 = vmatmul.msk.f32.gmra.mxu0 %vm456_vm0, %v410_v51 }
  0xcb   : > { %1306 = vrot.lane.b32.xlu1 %v7022_v35, %s6832_s30  ;;  %1204 = vrot.lane.b32.xlu2 %v7036_v39, %s6831_s29  ;;  %13250 = vst [vmem:[#allocation17_spill] sm:$0xff] %v7078_v48 }
  0xcc   : > { %1098 = vrot.lane.b32.xlu0 %v7022_v35, %s6829_s27 }
  0xce   : > { %v690_v49 = vpop.f32.mrf.mxu0 }
  0xcf   : > { %v7085_v50 = vadd.f32 %v6958_v16, %v690_v49 }
  0xd1   : > { %13251 = vst [vmem:[#allocation18_spill] sm:$0xff] %v7085_v50  ;;  %v7091_v52 = vmax.f32 %v7085_v50, 0.0  ;;  %6544 = vmatmul.msk.f32.gmra.mxu0 %vm456_vm0, %v411_v55 }
  0xd3   : > { %1491 = vrot.lane.b32.xlu1 %v7022_v35, %s6833_s12  ;;  %1308 = vrot.lane.b32.xlu2 %v7036_v39, %s6832_s30  ;;  %13252 = vst [vmem:[#allocation19_spill] sm:$0xff] %v7091_v52 }
  0xd4   : > { %990 = vrot.lane.b32.xlu0 %v7058_v44, %s6830_s28 }
  0xd6   : > { %v693_v53 = vpop.f32.mrf.mxu0 }
  0xd7   : > { %v7101_v54 = vadd.f32 %v6958_v16, %v693_v53  ;;  %v417_v53 = vld [vmem:[%s6923_s24 + $0xf0] sm:$0xff] }
  0xd9   : > { %13253 = vst [vmem:[#allocation20_spill] sm:$0xff] %v7101_v54  ;;  %v7106_v56 = vmax.f32 %v7101_v54, 0.0  ;;  %6545 = vmatmul.msk.f32.gmra.mxu0 %vm456_vm0, %v412_v61 }
  0xdb   : > { %1100 = vrot.lane.b32.xlu1 %v7036_v39, %s6829_s27  ;;  %1493 = vrot.lane.b32.xlu2 %v7036_v39, %s6833_s12  ;;  %13254 = vst [vmem:[#allocation21_spill] sm:$0xff] %v7106_v56 }
  0xdc   : > { %1206 = vrot.lane.b32.xlu0 %v7058_v44, %s6831_s29 }
  0xde   : > { %v696_v58 = vpop.f32.mrf.mxu0 }
  0xdf   : > { %v7121_v59 = vadd.f32 %v6958_v16, %v696_v58 }
  0xe1   : > { %13256 = vst [vmem:[#allocation23_spill] sm:$0xff] %v7121_v59  ;;  %v7129_v62 = vmax.f32 %v7121_v59, 0.0  ;;  %6546 = vmatmul.msk.f32.gmra.mxu0 %vm456_vm0, %v413_v3 }
  0xe3   : > { %992 = vrot.lane.b32.xlu1 %v7078_v48, %s6830_s28  ;;  %1102 = vrot.lane.b32.xlu2 %v7058_v44, %s6829_s27 }
  0xe4   : > { %1310 = vrot.lane.b32.xlu0 %v7058_v44, %s6832_s30 }
  0xe6   : > { %v699_v63 = vpop.f32.mrf.mxu0 }
  0xe7   : > { %v7137_v0 = vadd.f32 %v6958_v16, %v699_v63 }
  0xe9   : > { %13258 = vst [vmem:[#allocation25_spill] sm:$0xff] %v7137_v0  ;;  %v7147_v4 = vmax.f32 %v7137_v0, 0.0  ;;  %6547 = vmatmul.msk.f32.gmra.mxu0 %vm456_vm0, %v414_v10 }
  0xeb   : > { %1208 = vrot.lane.b32.xlu1 %v7078_v48, %s6831_s29  ;;  %994 = vrot.lane.b32.xlu2 %v7091_v52, %s6830_s28  ;;  %13260 = vst [vmem:[#allocation27_spill] sm:$0xff] %v7147_v4 }
  0xec   : > { %1104 = vrot.lane.b32.xlu0 %v7078_v48, %s6829_s27 }
  0xed   : > { %v7114_v57 = vpop.permute.xlu2 %1090 }
  0xee   : > { %13255 = vst [vmem:[#allocation22_spill] sm:$0xff] %v7114_v57  ;;  %v702_v5 = vpop.f32.mrf.mxu0 }
  0xef   : > { %v7157_v6 = vadd.f32 %v6958_v16, %v702_v5 }
  0xf1   : > { %13261 = vst [vmem:[#allocation28_spill] sm:$0xff] %v7157_v6  ;;  %v7168_v11 = vmax.f32 %v7157_v6, 0.0  ;;  %6548 = vmatmul.msk.f32.gmra.mxu0 %vm456_vm0, %v415_v25  ;;  %v421_v6 = vld [vmem:[%s6923_s24 + $0x110] sm:$0xff] }
  0xf3   : > { %1312 = vrot.lane.b32.xlu1 %v7078_v48, %s6832_s30  ;;  %1210 = vrot.lane.b32.xlu2 %v7091_v52, %s6831_s29  ;;  %13265 = vst [vmem:[#allocation32_spill] sm:$0xff] %v7168_v11 }
  0xf4   : > { %996 = vrot.lane.b32.xlu0 %v7106_v56, %s6830_s28 }
  0xf6   : > { %v705_v12 = vpop.f32.mrf.mxu0 }
  0xf7   : > { %v7187_v17 = vadd.f32 %v6958_v16, %v705_v12 }
  0xf9   : > { %13268 = vst [vmem:[#allocation35_spill] sm:$0xff] %v7187_v17  ;;  %v7199_v28 = vmax.f32 %v7187_v17, 0.0  ;;  %6549 = vmatmul.msk.f32.gmra.mxu0 %vm456_vm0, %v416_v40 }
  0xfb   : > { %1106 = vrot.lane.b32.xlu1 %v7091_v52, %s6829_s27  ;;  %1314 = vrot.lane.b32.xlu2 %v7091_v52, %s6832_s30  ;;  %13269 = vst [vmem:[#allocation36_spill] sm:$0xff] %v7199_v28 }
  0xfc   : > { %1212 = vrot.lane.b32.xlu0 %v7106_v56, %s6831_s29 }
  0xfd   : > { %v7125_v60 = vpop.permute.xlu2 %1198 }
  0xfe   : > { %13257 = vst [vmem:[#allocation24_spill] sm:$0xff] %v7125_v60  ;;  %v708_v29 = vpop.f32.mrf.mxu0 }
  0xff   : > { %v7207_v31 = vadd.f32 %v6958_v16, %v708_v29  ;;  %v418_v29 = vld [vmem:[%s6923_s24 + $0xf8] sm:$0xff] }
 0x101   : > { %13270 = vst [vmem:[#allocation37_spill] sm:$0xff] %v7207_v31  ;;  %v7219_v41 = vmax.f32 %v7207_v31, 0.0  ;;  %6550 = vmatmul.msk.f32.gmra.mxu0 %vm456_vm0, %v417_v53 }
 0x103   : > { %998 = vrot.lane.b32.xlu1 %v7129_v62, %s6830_s28  ;;  %1108 = vrot.lane.b32.xlu2 %v7106_v56, %s6829_s27  ;;  %13274 = vst [vmem:[#allocation41_spill] sm:$0xff] %v7219_v41 }
 0x104   : > { %1316 = vrot.lane.b32.xlu0 %v7106_v56, %s6832_s30 }
 0x105   : > { %v7141_v1 = vpop.permute.xlu2 %1302  ;;  %v7143_v2 = vpop.permute.xlu0 %978 }
 0x106   : > { %13259 = vst [vmem:[#allocation26_spill] sm:$0xff] %v7141_v1  ;;  %v711_v43 = vpop.f32.mrf.mxu0  ;;  %v433_v1 = vld [vmem:[%s6923_s24 + $0x170] sm:$0xff] }
 0x107   : > { %v7229_v45 = vadd.f32 %v6958_v16, %v711_v43 }
 0x109   : > { %13275 = vst [vmem:[#allocation42_spill] sm:$0xff] %v7229_v45  ;;  %v7240_v55 = vmax.f32 %v7229_v45, 0.0  ;;  %6551 = vmatmul.msk.f32.gmra.mxu0 %vm456_vm0, %v418_v29  ;;  %v419_v29 = vld [vmem:[%s6923_s24 + $0x100] sm:$0xff] }
 0x10b   : > { %1214 = vrot.lane.b32.xlu1 %v7129_v62, %s6831_s29  ;;  %1000 = vrot.lane.b32.xlu2 %v7147_v4, %s6830_s28  ;;  %13278 = vst [vmem:[#allocation45_spill] sm:$0xff] %v7240_v55 }
 0x10c   : > { %1110 = vrot.lane.b32.xlu0 %v7129_v62, %s6829_s27 }
 0x10d   : > { %v7159_v7 = vpop.permute.xlu1 %1196  ;;  %v7161_v8 = vpop.permute.xlu2 %1096 }
 0x10e   : > { %13262 = vst [vmem:[#allocation29_spill] sm:$0xff] %v7159_v7  ;;  %v7163_v9 = vpop.permute.xlu0 %1194  ;;  %v714_v58 = vpop.f32.mrf.mxu0 }
 0x10f   : > { %13263 = vst [vmem:[#allocation30_spill] sm:$0xff] %v7161_v8  ;;  %v7259_v5 = vadd.f32 %v6958_v16, %v714_v58 }
 0x110   : > { %13264 = vst [vmem:[#allocation31_spill] sm:$0xff] %v7163_v9 }
 0x111   : > { %13282 = vst [vmem:[#allocation49_spill] sm:$0xff] %v7259_v5  ;;  %v7271_v40 = vmax.f32 %v7259_v5, 0.0  ;;  %6552 = vmatmul.msk.f32.gmra.mxu0 %vm456_vm0, %v419_v29  ;;  %v420_v29 = vld [vmem:[%s6923_s24 + $0x108] sm:$0xff] }
 0x113   : > { %1318 = vrot.lane.b32.xlu1 %v7129_v62, %s6832_s30  ;;  %1216 = vrot.lane.b32.xlu2 %v7147_v4, %s6831_s29  ;;  %13286 = vst [vmem:[#allocation53_spill] sm:$0xff] %v7271_v40 }
 0x114   : > { %1002 = vrot.lane.b32.xlu0 %v7168_v11, %s6830_s28 }
 0x115   : > { %v7176_v13 = vpop.permute.xlu1 %1300  ;;  %v7178_v14 = vpop.permute.xlu2 %986 }
 0x116   : > { %13266 = vst [vmem:[#allocation33_spill] sm:$0xff] %v7176_v13  ;;  %v7180_v15 = vpop.permute.xlu0 %1298  ;;  %v717_v43 = vpop.f32.mrf.mxu0 }
 0x117   : > { %13267 = vst [vmem:[#allocation34_spill] sm:$0xff] %v7180_v15  ;;  %v7279_v53 = vadd.f32 %v6958_v16, %v717_v43 }
 0x119   : > { %13287 = vst [vmem:[#allocation54_spill] sm:$0xff] %v7279_v53  ;;  %v7291_v26 = vmax.f32 %v7279_v53, 0.0  ;;  %6553 = vmatmul.msk.f32.gmra.mxu0 %vm456_vm0, %v420_v29 }
 0x11b   : > { %1112 = vrot.lane.b32.xlu1 %v7147_v4, %s6829_s27  ;;  %1320 = vrot.lane.b32.xlu2 %v7147_v4, %s6832_s30  ;;  %13291 = vst [vmem:[#allocation58_spill] sm:$0xff] %v7291_v26 }
 0x11c   : > { %1218 = vrot.lane.b32.xlu0 %v7168_v11, %s6831_s29 }
 0x11d   : > { %v7191_v18 = vpop.permute.xlu1 %982  ;;  %v7193_v21 = vpop.permute.xlu2 %988 }
 0x11e   : > { %v7195_v24 = vpop.permute.xlu0 %980  ;;  %v720_v30 = vpop.f32.mrf.mxu0 }
 0x11f   : > { %v7301_v43 = vadd.f32 %v6958_v16, %v720_v30 }
 0x121   : > { %13292 = vst [vmem:[#allocation59_spill] sm:$0xff] %v7301_v43  ;;  %v7312_v46 = vmax.f32 %v7301_v43, 0.0  ;;  %6554 = vmatmul.msk.f32.gmra.mxu0 %vm456_vm0, %v421_v6  ;;  %v422_v6 = vld [vmem:[%s6923_s24 + $0x118] sm:$0xff] }
 0x123   : > { %1004 = vrot.lane.b32.xlu1 %v7199_v28, %s6830_s28  ;;  %1114 = vrot.lane.b32.xlu2 %v7168_v11, %s6829_s27  ;;  %13296 = vst [vmem:[#allocation63_spill] sm:$0xff] %v7312_v46 }
 0x124   : > { %1322 = vrot.lane.b32.xlu0 %v7168_v11, %s6832_s30 }
 0x125   : > { %v7211_v32 = vpop.permute.xlu1 %1094  ;;  %v7213_v36 = vpop.permute.xlu2 %1204 }
 0x126   : > { %13271 = vst [vmem:[#allocation38_spill] sm:$0xff] %v7211_v32  ;;  %v7215_v38 = vpop.permute.xlu0 %1092  ;;  %v723_v30 = vpop.f32.mrf.mxu0 }
 0x127   : > { %13272 = vst [vmem:[#allocation39_spill] sm:$0xff] %v7213_v36  ;;  %v7331_v29 = vadd.f32 %v6958_v16, %v723_v30 }
 0x128   : > { %13273 = vst [vmem:[#allocation40_spill] sm:$0xff] %v7215_v38 }
 0x129   : > { %13300 = vst [vmem:[#allocation67_spill] sm:$0xff] %v7331_v29  ;;  %v7343_v43 = vmax.f32 %v7331_v29, 0.0  ;;  %6555 = vmatmul.msk.f32.gmra.mxu0 %vm456_vm0, %v422_v6  ;;  %v423_v6 = vld [vmem:[%s6923_s24 + $0x120] sm:$0xff] }
 0x12b   : > { %1220 = vrot.lane.b32.xlu1 %v7199_v28, %s6831_s29  ;;  %1006 = vrot.lane.b32.xlu2 %v7219_v41, %s6830_s28  ;;  %13304 = vst [vmem:[#allocation71_spill] sm:$0xff] %v7343_v43 }
 0x12c   : > { %1116 = vrot.lane.b32.xlu0 %v7199_v28, %s6829_s27 }
 0x12d   : > { %v7231_v47 = vpop.permute.xlu1 %984  ;;  %v7233_v49 = vpop.permute.xlu2 %1308 }
 0x12e   : > { %13276 = vst [vmem:[#allocation43_spill] sm:$0xff] %v7233_v49  ;;  %v7235_v51 = vpop.permute.xlu0 %1200  ;;  %v726_v17 = vpop.f32.mrf.mxu0 }
 0x12f   : > { %13277 = vst [vmem:[#allocation44_spill] sm:$0xff] %v7235_v51  ;;  %v7351_v30 = vadd.f32 %v6958_v16, %v726_v17 }
 0x131   : > { %13305 = vst [vmem:[#allocation72_spill] sm:$0xff] %v7351_v30  ;;  %6556 = vmatmul.msk.f32.gmra.mxu0 %vm456_vm0, %v423_v6 }
 0x133   : > { %1324 = vrot.lane.b32.xlu1 %v7199_v28, %s6832_s30  ;;  %1222 = vrot.lane.b32.xlu2 %v7219_v41, %s6831_s29 }
 0x134   : > { %1008 = vrot.lane.b32.xlu0 %v7240_v55, %s6830_s28 }
 0x135   : > { %v7248_v61 = vpop.permute.xlu1 %1202  ;;  %v7250_v63 = vpop.permute.xlu2 %1493 }
 0x136   : > { %13279 = vst [vmem:[#allocation46_spill] sm:$0xff] %v7248_v61  ;;  %v7252_v3 = vpop.permute.xlu0 %1304 }
 0x137   : > { %13280 = vst [vmem:[#allocation47_spill] sm:$0xff] %v7250_v63 }
 0x138   : > { %13281 = vst [vmem:[#allocation48_spill] sm:$0xff] %v7252_v3 }
 0x13b   : > { %1118 = vrot.lane.b32.xlu1 %v7219_v41, %s6829_s27  ;;  %1326 = vrot.lane.b32.xlu2 %v7219_v41, %s6832_s30 }
 0x13c   : > { %1224 = vrot.lane.b32.xlu0 %v7240_v55, %s6831_s29 }
 0x13d   : > { %v7263_v10 = vpop.permute.xlu1 %1306  ;;  %v7265_v12 = vpop.permute.xlu2 %1102 }
 0x13e   : > { %13283 = vst [vmem:[#allocation50_spill] sm:$0xff] %v7263_v10  ;;  %v7267_v25 = vpop.permute.xlu0 %1098 }
 0x13f   : > { %13284 = vst [vmem:[#allocation51_spill] sm:$0xff] %v7265_v12 }
 0x140   : > { %13285 = vst [vmem:[#allocation52_spill] sm:$0xff] %v7267_v25 }
 0x143   : > { %1010 = vrot.lane.b32.xlu1 %v7271_v40, %s6830_s28  ;;  %1120 = vrot.lane.b32.xlu2 %v7240_v55, %s6829_s27 }
 0x144   : > { %1328 = vrot.lane.b32.xlu0 %v7240_v55, %s6832_s30 }
 0x145   : > { %v7283_v58 = vpop.permute.xlu1 %1491  ;;  %v7285_v19 = vpop.permute.xlu2 %994 }
 0x146   : > { %13288 = vst [vmem:[#allocation55_spill] sm:$0xff] %v7283_v58  ;;  %v7287_v22 = vpop.permute.xlu0 %990 }
 0x147   : > { %13289 = vst [vmem:[#allocation56_spill] sm:$0xff] %v7285_v19 }
 0x148   : > { %13290 = vst [vmem:[#allocation57_spill] sm:$0xff] %v7287_v22 }
 0x14b   : > { %1226 = vrot.lane.b32.xlu1 %v7271_v40, %s6831_s29  ;;  %1012 = vrot.lane.b32.xlu2 %v7291_v26, %s6830_s28 }
 0x14c   : > { %1122 = vrot.lane.b32.xlu0 %v7271_v40, %s6829_s27 }
 0x14d   : > { %v7303_v34 = vpop.permute.xlu1 %1100  ;;  %v7305_v37 = vpop.permute.xlu2 %1210 }
 0x14e   : > { %13293 = vst [vmem:[#allocation60_spill] sm:$0xff] %v7303_v34  ;;  %v7307_v42 = vpop.permute.xlu0 %1206 }
 0x14f   : > { %13294 = vst [vmem:[#allocation61_spill] sm:$0xff] %v7305_v37  ;;  %v7363_v37 = vmax.f32 %v7351_v30, 0.0 }
 0x150   : > { %13295 = vst [vmem:[#allocation62_spill] sm:$0xff] %v7307_v42 }
 0x151   : > { %13309 = vst [vmem:[#allocation76_spill] sm:$0xff] %v7363_v37 }
 0x153   : > { %1330 = vrot.lane.b32.xlu1 %v7271_v40, %s6832_s30  ;;  %1228 = vrot.lane.b32.xlu2 %v7291_v26, %s6831_s29 }
 0x154   : > { %1014 = vrot.lane.b32.xlu0 %v7312_v46, %s6830_s28 }
 0x155   : > { %v7320_v50 = vpop.permute.xlu1 %992  ;;  %v7322_v54 = vpop.permute.xlu2 %1314 }
 0x156   : > { %13297 = vst [vmem:[#allocation64_spill] sm:$0xff] %v7320_v50  ;;  %v7324_v5 = vpop.permute.xlu0 %1310 }
 0x157   : > { %13298 = vst [vmem:[#allocation65_spill] sm:$0xff] %v7322_v54 }
 0x158   : > { %13299 = vst [vmem:[#allocation66_spill] sm:$0xff] %v7324_v5 }
 0x15b   : > { %1124 = vrot.lane.b32.xlu1 %v7291_v26, %s6829_s27  ;;  %1332 = vrot.lane.b32.xlu2 %v7291_v26, %s6832_s30 }
 0x15c   : > { %1230 = vrot.lane.b32.xlu0 %v7312_v46, %s6831_s29 }
 0x15d   : > { %v7335_v53 = vpop.permute.xlu1 %1208  ;;  %v7337_v59 = vpop.permute.xlu2 %1108 }
 0x15e   : > { %13301 = vst [vmem:[#allocation68_spill] sm:$0xff] %v7335_v53  ;;  %v7339_v0 = vpop.permute.xlu0 %1104  ;;  %v729_v53 = vpop.f32.mrf.mxu0 }
 0x15f   : > { %13302 = vst [vmem:[#allocation69_spill] sm:$0xff] %v7337_v59  ;;  %v7373_v17 = vadd.f32 %v6958_v16, %v729_v53 }
 0x160   : > { %13303 = vst [vmem:[#allocation70_spill] sm:$0xff] %v7339_v0  ;;  %v424_v0 = vld [vmem:[%s6923_s24 + $0x128] sm:$0xff] }
 0x161   : > { %13310 = vst [vmem:[#allocation77_spill] sm:$0xff] %v7373_v17  ;;  %v7384_v59 = vmax.f32 %v7373_v17, 0.0  ;;  %6557 = vmatmul.msk.f32.gmra.mxu0 %vm456_vm0, %v424_v0  ;;  %v425_v0 = vld [vmem:[%s6923_s24 + $0x130] sm:$0xff] }
 0x163   : > { %1016 = vrot.lane.b32.xlu1 %v7343_v43, %s6830_s28  ;;  %1126 = vrot.lane.b32.xlu2 %v7312_v46, %s6829_s27  ;;  %13314 = vst [vmem:[#allocation81_spill] sm:$0xff] %v7384_v59 }
 0x164   : > { %1334 = vrot.lane.b32.xlu0 %v7312_v46, %s6832_s30 }
 0x165   : > { %v7355_v31 = vpop.permute.xlu1 %1312  ;;  %v7357_v29 = vpop.permute.xlu2 %1000 }
 0x166   : > { %13306 = vst [vmem:[#allocation73_spill] sm:$0xff] %v7355_v31  ;;  %v7359_v45 = vpop.permute.xlu0 %996  ;;  %v732_v53 = vpop.f32.mrf.mxu0 }
 0x167   : > { %13307 = vst [vmem:[#allocation74_spill] sm:$0xff] %v7357_v29  ;;  %v7403_v6 = vadd.f32 %v6958_v16, %v732_v53 }
 0x168   : > { %13308 = vst [vmem:[#allocation75_spill] sm:$0xff] %v7359_v45 }
 0x169   : > { %13318 = vst [vmem:[#allocation85_spill] sm:$0xff] %v7403_v6  ;;  %v7415_v60 = vmax.f32 %v7403_v6, 0.0  ;;  %6558 = vmatmul.msk.f32.gmra.mxu0 %vm456_vm0, %v425_v0  ;;  %v426_v0 = vld [vmem:[%s6923_s24 + $0x138] sm:$0xff] }
 0x16b   : > { %1232 = vrot.lane.b32.xlu1 %v7343_v43, %s6831_s29  ;;  %1018 = vrot.lane.b32.xlu2 %v7363_v37, %s6830_s28 }
 0x16c   : > { %1128 = vrot.lane.b32.xlu0 %v7343_v43, %s6829_s27 }
 0x16d   : > { %v7375_v42 = vpop.permute.xlu1 %1106  ;;  %v7377_v36 = vpop.permute.xlu2 %1216 }
 0x16e   : > { %13311 = vst [vmem:[#allocation78_spill] sm:$0xff] %v7375_v42  ;;  %v7379_v30 = vpop.permute.xlu0 %1212  ;;  %v735_v12 = vpop.f32.mrf.mxu0 }
 0x16f   : > { %13312 = vst [vmem:[#allocation79_spill] sm:$0xff] %v7377_v36  ;;  %v7423_v53 = vadd.f32 %v6958_v16, %v735_v12 }
 0x170   : > { %13313 = vst [vmem:[#allocation80_spill] sm:$0xff] %v7379_v30 }
 0x171   : > { %13322 = vst [vmem:[#allocation89_spill] sm:$0xff] %v7423_v53  ;;  %6559 = vmatmul.msk.f32.gmra.mxu0 %vm456_vm0, %v426_v0 }
 0x173   : > { %1336 = vrot.lane.b32.xlu1 %v7343_v43, %s6832_s30  ;;  %1234 = vrot.lane.b32.xlu2 %v7363_v37, %s6831_s29 }
 0x174   : > { %1020 = vrot.lane.b32.xlu0 %v7384_v59, %s6830_s28 }
 0x175   : > { %v7392_v36 = vpop.permute.xlu1 %998  ;;  %v7394_v30 = vpop.permute.xlu2 %1320 }
 0x176   : > { %13315 = vst [vmem:[#allocation82_spill] sm:$0xff] %v7392_v36  ;;  %v7396_v61 = vpop.permute.xlu0 %1316 }
 0x177   : > { %13316 = vst [vmem:[#allocation83_spill] sm:$0xff] %v7394_v30  ;;  %v738_v30 = vpop.f32.mrf.mxu0 }
 0x178   : > { %13317 = vst [vmem:[#allocation84_spill] sm:$0xff] %v7396_v61  ;;  %v7445_v12 = vadd.f32 %v6958_v16, %v738_v30 }
 0x17a   : > { %13326 = vst [vmem:[#allocation93_spill] sm:$0xff] %v7445_v12  ;;  %v7456_v34 = vmax.f32 %v7445_v12, 0.0 }
 0x17b   : > { %1130 = vrot.lane.b32.xlu1 %v7363_v37, %s6829_s27  ;;  %1338 = vrot.lane.b32.xlu2 %v7363_v37, %s6832_s30 }
 0x17c   : > { %1236 = vrot.lane.b32.xlu0 %v7384_v59, %s6831_s29 }
 0x17d   : > { %v7407_v17 = vpop.permute.xlu1 %1214  ;;  %v7409_v42 = vpop.permute.xlu2 %1114 }
 0x17e   : > { %13319 = vst [vmem:[#allocation86_spill] sm:$0xff] %v7407_v17  ;;  %v7411_v51 = vpop.permute.xlu0 %1110 }
 0x17f   : > { %13320 = vst [vmem:[#allocation87_spill] sm:$0xff] %v7409_v42  ;;  %v741_v30 = vpop.f32.mrf.mxu0 }
 0x180   : > { %13321 = vst [vmem:[#allocation88_spill] sm:$0xff] %v7411_v51  ;;  %v7435_v51 = vmax.f32 %v7423_v53, 0.0  ;;  %v7475_v0 = vadd.f32 %v6958_v16, %v741_v30 }
 0x182   : > { %13333 = vst [vmem:[#allocation100_spill] sm:$0xff] %v7475_v0  ;;  %v7487_v61 = vmax.f32 %v7475_v0, 0.0 }
 0x183   : > { %1022 = vrot.lane.b32.xlu1 %v7415_v60, %s6830_s28  ;;  %1132 = vrot.lane.b32.xlu2 %v7384_v59, %s6829_s27 }
 0x184   : > { %1340 = vrot.lane.b32.xlu0 %v7384_v59, %s6832_s30 }
 0x185   : > { %v7427_v17 = vpop.permute.xlu1 %1318  ;;  %v7429_v6 = vpop.permute.xlu2 %1006 }
 0x186   : > { %13323 = vst [vmem:[#allocation90_spill] sm:$0xff] %v7427_v17  ;;  %v7431_v42 = vpop.permute.xlu0 %1002 }
 0x187   : > { %13324 = vst [vmem:[#allocation91_spill] sm:$0xff] %v7429_v6  ;;  %v744_v25 = vpop.f32.mrf.mxu0 }
 0x188   : > { %13325 = vst [vmem:[#allocation92_spill] sm:$0xff] %v7431_v42  ;;  %v7495_v30 = vadd.f32 %v6958_v16, %v744_v25 }
 0x18a   : > { %13337 = vst [vmem:[#allocation104_spill] sm:$0xff] %v7495_v30 }
 0x18b   : > { %1238 = vrot.lane.b32.xlu1 %v7415_v60, %s6831_s29  ;;  %1024 = vrot.lane.b32.xlu2 %v7435_v51, %s6830_s28 }
 0x18c   : > { %1134 = vrot.lane.b32.xlu0 %v7415_v60, %s6829_s27 }
 0x18d   : > { %v7447_v7 = vpop.permute.xlu1 %1112  ;;  %v7449_v17 = vpop.permute.xlu2 %1222 }
 0x18e   : > { %13327 = vst [vmem:[#allocation94_spill] sm:$0xff] %v7447_v7  ;;  %v7451_v53 = vpop.permute.xlu0 %1218 }
 0x18f   : > { %13328 = vst [vmem:[#allocation95_spill] sm:$0xff] %v7449_v17  ;;  %v747_v54 = vpop.f32.mrf.mxu0 }
 0x190   : > { %13329 = vst [vmem:[#allocation96_spill] sm:$0xff] %v7451_v53  ;;  %v7517_v25 = vadd.f32 %v6958_v16, %v747_v54 }
 0x192   : > { %13341 = vst [vmem:[#allocation108_spill] sm:$0xff] %v7517_v25  ;;  %v7528_v31 = vmax.f32 %v7517_v25, 0.0 }
 0x193   : > { %1342 = vrot.lane.b32.xlu1 %v7415_v60, %s6832_s30  ;;  %1240 = vrot.lane.b32.xlu2 %v7435_v51, %s6831_s29 }
 0x194   : > { %1026 = vrot.lane.b32.xlu0 %v7456_v34, %s6830_s28 }
 0x195   : > { %v7464_v17 = vpop.permute.xlu1 %1004  ;;  %v7466_v53 = vpop.permute.xlu2 %1326 }
 0x196   : > { %13330 = vst [vmem:[#allocation97_spill] sm:$0xff] %v7464_v17  ;;  %v7468_v7 = vpop.permute.xlu0 %1322 }
 0x197   : > { %13331 = vst [vmem:[#allocation98_spill] sm:$0xff] %v7466_v53  ;;  %v750_v54 = vpop.f32.mrf.mxu0 }
 0x198   : > { %13332 = vst [vmem:[#allocation99_spill] sm:$0xff] %v7468_v7  ;;  %v427_v7 = vld [vmem:[%s6923_s24 + $0x140] sm:$0xff] }
 0x199   : > { %6560 = vmatmul.msk.f32.gmra.mxu0 %vm456_vm0, %v427_v7  ;;  %v428_v7 = vld [vmem:[%s6923_s24 + $0x148] sm:$0xff] }
 0x19b   : > { %1136 = vrot.lane.b32.xlu1 %v7435_v51, %s6829_s27  ;;  %1344 = vrot.lane.b32.xlu2 %v7435_v51, %s6832_s30 }
 0x19c   : > { %1242 = vrot.lane.b32.xlu0 %v7456_v34, %s6831_s29 }
 0x19d   : > { %v7479_v12 = vpop.permute.xlu1 %1220  ;;  %v7481_v9 = vpop.permute.xlu2 %1120 }
 0x19e   : > { %13334 = vst [vmem:[#allocation101_spill] sm:$0xff] %v7479_v12  ;;  %v7483_v53 = vpop.permute.xlu0 %1116 }
 0x19f   : > { %13335 = vst [vmem:[#allocation102_spill] sm:$0xff] %v7481_v9  ;;  %v753_v49 = vpop.f32.mrf.mxu0 }
 0x1a0   : > { %13336 = vst [vmem:[#allocation103_spill] sm:$0xff] %v7483_v53  ;;  %v7507_v53 = vmax.f32 %v7495_v30, 0.0 }
 0x1a1   : > { %6561 = vmatmul.msk.f32.gmra.mxu0 %vm456_vm0, %v428_v7  ;;  %v429_v7 = vld [vmem:[%s6923_s24 + $0x150] sm:$0xff] }
 0x1a3   : > { %1028 = vrot.lane.b32.xlu1 %v7487_v61, %s6830_s28  ;;  %1138 = vrot.lane.b32.xlu2 %v7456_v34, %s6829_s27 }
 0x1a4   : > { %1346 = vrot.lane.b32.xlu0 %v7456_v34, %s6832_s30 }
 0x1a5   : > { %v7499_v12 = vpop.permute.xlu1 %1324  ;;  %v7501_v0 = vpop.permute.xlu2 %1012 }
 0x1a6   : > { %13338 = vst [vmem:[#allocation105_spill] sm:$0xff] %v7499_v12  ;;  %v7503_v9 = vpop.permute.xlu0 %1008 }
 0x1a7   : > { %13339 = vst [vmem:[#allocation106_spill] sm:$0xff] %v7501_v0  ;;  %v756_v38 = vpop.f32.mrf.mxu0 }
 0x1a8   : > { %13340 = vst [vmem:[#allocation107_spill] sm:$0xff] %v7503_v9 }
 0x1a9   : > { %6562 = vmatmul.msk.f32.gmra.mxu0 %vm456_vm0, %v429_v7  ;;  %v7547_v7 = vadd.f32 %v6958_v16, %v750_v54  ;;  %v7567_v54 = vadd.f32 %v6958_v16, %v753_v49  ;;  %v7589_v49 = vadd.f32 %v6958_v16, %v756_v38 }
 0x1ab   : > { %1244 = vrot.lane.b32.xlu1 %v7487_v61, %s6831_s29  ;;  %1030 = vrot.lane.b32.xlu2 %v7507_v53, %s6830_s28  ;;  %13348 = vst [vmem:[#allocation115_spill] sm:$0xff] %v7547_v7  ;;  %v7559_v5 = vmax.f32 %v7547_v7, 0.0  ;;  %v7600_v57 = vmax.f32 %v7589_v49, 0.0 }
 0x1ac   : > { %1140 = vrot.lane.b32.xlu0 %v7487_v61, %s6829_s27  ;;  %13352 = vst [vmem:[#allocation119_spill] sm:$0xff] %v7567_v54 }
 0x1ad   : > { %v7519_v12 = vpop.permute.xlu1 %1118  ;;  %v7521_v8 = vpop.permute.xlu2 %1228  ;;  %13357 = vst [vmem:[#allocation124_spill] sm:$0xff] %v7589_v49 }
 0x1ae   : > { %13342 = vst [vmem:[#allocation109_spill] sm:$0xff] %v7519_v12  ;;  %v7523_v30 = vpop.permute.xlu0 %1224 }
 0x1af   : > { %13343 = vst [vmem:[#allocation110_spill] sm:$0xff] %v7521_v8  ;;  %v759_v38 = vpop.f32.mrf.mxu0 }
 0x1b0   : > { %13344 = vst [vmem:[#allocation111_spill] sm:$0xff] %v7523_v30 }
 0x1b1   : > { %13361 = vst [vmem:[#allocation128_spill] sm:$0xff] %v7600_v57 }
 0x1b3   : > { %1348 = vrot.lane.b32.xlu1 %v7487_v61, %s6832_s30  ;;  %1246 = vrot.lane.b32.xlu2 %v7507_v53, %s6831_s29 }
 0x1b4   : > { %1032 = vrot.lane.b32.xlu0 %v7528_v31, %s6830_s28 }
 0x1b5   : > { %v7536_v8 = vpop.permute.xlu1 %1010  ;;  %v7538_v30 = vpop.permute.xlu2 %1332 }
 0x1b6   : > { %13345 = vst [vmem:[#allocation112_spill] sm:$0xff] %v7536_v8  ;;  %v7540_v12 = vpop.permute.xlu0 %1328 }
 0x1b7   : > { %13346 = vst [vmem:[#allocation113_spill] sm:$0xff] %v7538_v30 }
 0x1b8   : > { %13347 = vst [vmem:[#allocation114_spill] sm:$0xff] %v7540_v12  ;;  %v430_v12 = vld [vmem:[%s6923_s24 + $0x158] sm:$0xff] }
 0x1b9   : > { %6563 = vmatmul.msk.f32.gmra.mxu0 %vm456_vm0, %v430_v12  ;;  %v431_v12 = vld [vmem:[%s6923_s24 + $0x160] sm:$0xff] }
 0x1bb   : > { %1142 = vrot.lane.b32.xlu1 %v7507_v53, %s6829_s27  ;;  %1350 = vrot.lane.b32.xlu2 %v7507_v53, %s6832_s30 }
 0x1bc   : > { %1248 = vrot.lane.b32.xlu0 %v7528_v31, %s6831_s29 }
 0x1bd   : > { %v7551_v25 = vpop.permute.xlu1 %1226  ;;  %v7553_v32 = vpop.permute.xlu2 %1126 }
 0x1be   : > { %13349 = vst [vmem:[#allocation116_spill] sm:$0xff] %v7551_v25  ;;  %v7555_v30 = vpop.permute.xlu0 %1122 }
 0x1bf   : > { %13350 = vst [vmem:[#allocation117_spill] sm:$0xff] %v7553_v32 }
 0x1c0   : > { %13351 = vst [vmem:[#allocation118_spill] sm:$0xff] %v7555_v30  ;;  %v7579_v30 = vmax.f32 %v7567_v54, 0.0 }
 0x1c1   : > { %6564 = vmatmul.msk.f32.gmra.mxu0 %vm456_vm0, %v431_v12  ;;  %v432_v12 = vld [vmem:[%s6923_s24 + $0x168] sm:$0xff] }
 0x1c2   : > { %13356 = vst [vmem:[#allocation123_spill] sm:$0xff] %v7579_v30 }
 0x1c3   : > { %1034 = vrot.lane.b32.xlu1 %v7559_v5, %s6830_s28  ;;  %1144 = vrot.lane.b32.xlu2 %v7528_v31, %s6829_s27 }
 0x1c4   : > { %1352 = vrot.lane.b32.xlu0 %v7528_v31, %s6832_s30 }
 0x1c5   : > { %v7571_v25 = vpop.permute.xlu1 %1330  ;;  %v7573_v7 = vpop.permute.xlu2 %1018 }
 0x1c6   : > { %13353 = vst [vmem:[#allocation120_spill] sm:$0xff] %v7571_v25  ;;  %v7575_v32 = vpop.permute.xlu0 %1014 }
 0x1c7   : > { %13354 = vst [vmem:[#allocation121_spill] sm:$0xff] %v7573_v7 }
 0x1c8   : > { %13355 = vst [vmem:[#allocation122_spill] sm:$0xff] %v7575_v32 }
 0x1c9   : > { %6565 = vmatmul.msk.f32.gmra.mxu0 %vm456_vm0, %v432_v12  ;;  %v7619_v12 = vadd.f32 %v6958_v16, %v759_v38 }
 0x1cb   : > { %1250 = vrot.lane.b32.xlu1 %v7559_v5, %s6831_s29  ;;  %1036 = vrot.lane.b32.xlu2 %v7579_v30, %s6830_s28  ;;  %13365 = vst [vmem:[#allocation132_spill] sm:$0xff] %v7619_v12  ;;  %v7631_v63 = vmax.f32 %v7619_v12, 0.0 }
 0x1cc   : > { %1146 = vrot.lane.b32.xlu0 %v7559_v5, %s6829_s27 }
 0x1cd   : > { %v7591_v25 = vpop.permute.xlu1 %1124  ;;  %v7593_v10 = vpop.permute.xlu2 %1234 }
 0x1ce   : > { %13358 = vst [vmem:[#allocation125_spill] sm:$0xff] %v7591_v25  ;;  %v7595_v54 = vpop.permute.xlu0 %1230 }
 0x1cf   : > { %13359 = vst [vmem:[#allocation126_spill] sm:$0xff] %v7593_v10 }
 0x1d0   : > { %13360 = vst [vmem:[#allocation127_spill] sm:$0xff] %v7595_v54 }
 0x1d1   : > { %6566 = vmatmul.msk.f32.gmra.mxu0 %vm456_vm0, %v433_v1  ;;  %v434_v1 = vld [vmem:[%s6923_s24 + $0x178] sm:$0xff] }
 0x1d3   : > { %1354 = vrot.lane.b32.xlu1 %v7559_v5, %s6832_s30  ;;  %1252 = vrot.lane.b32.xlu2 %v7579_v30, %s6831_s29 }
 0x1d4   : > { %1038 = vrot.lane.b32.xlu0 %v7600_v57, %s6830_s28 }
 0x1d5   : > { %v7608_v10 = vpop.permute.xlu1 %1016  ;;  %v7610_v54 = vpop.permute.xlu2 %1338 }
 0x1d6   : > { %13362 = vst [vmem:[#allocation129_spill] sm:$0xff] %v7608_v10  ;;  %v7612_v25 = vpop.permute.xlu0 %1334 }
 0x1d7   : > { %13363 = vst [vmem:[#allocation130_spill] sm:$0xff] %v7610_v54 }
 0x1d8   : > { %13364 = vst [vmem:[#allocation131_spill] sm:$0xff] %v7612_v25  ;;  %v762_v25 = vpop.f32.mrf.mxu0 }
 0x1d9   : > { %v7639_v38 = vadd.f32 %v6958_v16, %v762_v25  ;;  %6567 = vmatmul.msk.f32.gmra.mxu0 %vm456_vm0, %v434_v1  ;;  %v435_v1 = vld [vmem:[%s6923_s24 + $0x180] sm:$0xff] }
 0x1db   : > { %1148 = vrot.lane.b32.xlu1 %v7579_v30, %s6829_s27  ;;  %1356 = vrot.lane.b32.xlu2 %v7579_v30, %s6832_s30  ;;  %13369 = vst [vmem:[#allocation136_spill] sm:$0xff] %v7639_v38 }
 0x1dc   : > { %1254 = vrot.lane.b32.xlu0 %v7600_v57, %s6831_s29 }
 0x1dd   : > { %v7623_v49 = vpop.permute.xlu1 %1232  ;;  %v7625_v3 = vpop.permute.xlu2 %1132 }
 0x1de   : > { %13366 = vst [vmem:[#allocation133_spill] sm:$0xff] %v7623_v49  ;;  %v7627_v54 = vpop.permute.xlu0 %1128 }
 0x1df   : > { %13367 = vst [vmem:[#allocation134_spill] sm:$0xff] %v7625_v3 }
 0x1e0   : > { %13368 = vst [vmem:[#allocation135_spill] sm:$0xff] %v7627_v54  ;;  %v7651_v54 = vmax.f32 %v7639_v38, 0.0  ;;  %v765_v13 = vpop.f32.mrf.mxu0 }
 0x1e1   : > { %v7661_v25 = vadd.f32 %v6958_v16, %v765_v13  ;;  %6568 = vmatmul.msk.f32.gmra.mxu0 %vm456_vm0, %v435_v1  ;;  %v436_v1 = vld [vmem:[%s6923_s24 + $0x188] sm:$0xff] }
 0x1e3   : > { %1040 = vrot.lane.b32.xlu1 %v7631_v63, %s6830_s28  ;;  %1150 = vrot.lane.b32.xlu2 %v7600_v57, %s6829_s27  ;;  %13373 = vst [vmem:[#allocation140_spill] sm:$0xff] %v7661_v25  ;;  %v7672_v15 = vmax.f32 %v7661_v25, 0.0 }
 0x1e4   : > { %1358 = vrot.lane.b32.xlu0 %v7600_v57, %s6832_s30 }
 0x1e5   : > { %v7643_v49 = vpop.permute.xlu1 %1336  ;;  %v7645_v3 = vpop.permute.xlu2 %1024  ;;  %13377 = vst [vmem:[#allocation144_spill] sm:$0xff] %v7672_v15 }
 0x1e6   : > { %13370 = vst [vmem:[#allocation137_spill] sm:$0xff] %v7643_v49  ;;  %v7647_v12 = vpop.permute.xlu0 %1020 }
 0x1e7   : > { %13371 = vst [vmem:[#allocation138_spill] sm:$0xff] %v7645_v3 }
 0x1e8   : > { %13372 = vst [vmem:[#allocation139_spill] sm:$0xff] %v7647_v12  ;;  %v768_v39 = vpop.f32.mrf.mxu0 }
 0x1e9   : > { %6569 = vmatmul.msk.f32.gmra.mxu0 %vm456_vm0, %v436_v1  ;;  %v437_v1 = vld [vmem:[%s6923_s24 + $0x190] sm:$0xff] }
 0x1eb   : > { %1256 = vrot.lane.b32.xlu1 %v7631_v63, %s6831_s29  ;;  %1042 = vrot.lane.b32.xlu2 %v7651_v54, %s6830_s28 }
 0x1ec   : > { %1152 = vrot.lane.b32.xlu0 %v7631_v63, %s6829_s27 }
 0x1ed   : > { %v7663_v49 = vpop.permute.xlu1 %1130  ;;  %v7665_v38 = vpop.permute.xlu2 %1240 }
 0x1ee   : > { %13374 = vst [vmem:[#allocation141_spill] sm:$0xff] %v7663_v49  ;;  %v7667_v58 = vpop.permute.xlu0 %1236  ;;  %v7693_v49 = vadd.f32 %v6958_v16, %v768_v39 }
 0x1ef   : > { %13375 = vst [vmem:[#allocation142_spill] sm:$0xff] %v7665_v38 }
 0x1f0   : > { %13376 = vst [vmem:[#allocation143_spill] sm:$0xff] %v7667_v58  ;;  %v771_v25 = vpop.f32.mrf.mxu0  ;;  %v7705_v27 = vmax.f32 %v7693_v49, 0.0 }
 0x1f1   : > { %13381 = vst [vmem:[#allocation148_spill] sm:$0xff] %v7693_v49  ;;  %6570 = vmatmul.msk.f32.gmra.mxu0 %vm456_vm0, %v437_v1  ;;  %v7713_v39 = vadd.f32 %v6958_v16, %v771_v25  ;;  %v438_v1 = vld [vmem:[%s6923_s24 + $0x198] sm:$0xff] }
 0x1f2   : > { %13385 = vst [vmem:[#allocation152_spill] sm:$0xff] %v7705_v27 }
 0x1f3   : > { %1360 = vrot.lane.b32.xlu1 %v7631_v63, %s6832_s30  ;;  %1258 = vrot.lane.b32.xlu2 %v7651_v54, %s6831_s29  ;;  %13386 = vst [vmem:[#allocation153_spill] sm:$0xff] %v7713_v39  ;;  %v7725_v33 = vmax.f32 %v7713_v39, 0.0 }
 0x1f4   : > { %1044 = vrot.lane.b32.xlu0 %v7672_v15, %s6830_s28 }
 0x1f5   : > { %v7680_v13 = vpop.permute.xlu1 %1022  ;;  %v7682_v38 = vpop.permute.xlu2 %1344  ;;  %13390 = vst [vmem:[#allocation157_spill] sm:$0xff] %v7725_v33 }
 0x1f6   : > { %13378 = vst [vmem:[#allocation145_spill] sm:$0xff] %v7680_v13  ;;  %v7684_v58 = vpop.permute.xlu0 %1340 }
 0x1f7   : > { %13379 = vst [vmem:[#allocation146_spill] sm:$0xff] %v7682_v38 }
 0x1f8   : > { %13380 = vst [vmem:[#allocation147_spill] sm:$0xff] %v7684_v58 }
 0x1f9   : > { %6571 = vmatmul.msk.f32.gmra.mxu0 %vm456_vm0, %v438_v1  ;;  %v439_v1 = vld [vmem:[%s6923_s24 + $0x1a0] sm:$0xff] }
 0x1fb   : > { %1154 = vrot.lane.b32.xlu1 %v7651_v54, %s6829_s27  ;;  %1362 = vrot.lane.b32.xlu2 %v7651_v54, %s6832_s30 }
 0x1fc   : > { %1260 = vrot.lane.b32.xlu0 %v7672_v15, %s6831_s29 }
 0x1fd   : > { %v7697_v38 = vpop.permute.xlu1 %1238  ;;  %v7699_v58 = vpop.permute.xlu2 %1138 }
 0x1fe   : > { %13382 = vst [vmem:[#allocation149_spill] sm:$0xff] %v7697_v38  ;;  %v7701_v35 = vpop.permute.xlu0 %1134  ;;  %v774_v38 = vpop.f32.mrf.mxu0 }
 0x1ff   : > { %13383 = vst [vmem:[#allocation150_spill] sm:$0xff] %v7699_v58  ;;  %v7735_v25 = vadd.f32 %v6958_v16, %v774_v38 }
 0x200   : > { %13384 = vst [vmem:[#allocation151_spill] sm:$0xff] %v7701_v35 }
 0x201   : > { %13391 = vst [vmem:[#allocation158_spill] sm:$0xff] %v7735_v25  ;;  %6572 = vmatmul.msk.f32.gmra.mxu0 %vm456_vm0, %v439_v1 }
 0x203   : > { %1046 = vrot.lane.b32.xlu1 %v7705_v27, %s6830_s28  ;;  %1156 = vrot.lane.b32.xlu2 %v7672_v15, %s6829_s27 }
 0x204   : > { %1364 = vrot.lane.b32.xlu0 %v7672_v15, %s6832_s30 }
 0x205   : > { %v7717_v58 = vpop.permute.xlu1 %1342  ;;  %v7719_v49 = vpop.permute.xlu2 %1030 }
 0x206   : > { %13387 = vst [vmem:[#allocation154_spill] sm:$0xff] %v7717_v58  ;;  %v7721_v35 = vpop.permute.xlu0 %1026  ;;  %v777_v58 = vpop.f32.mrf.mxu0 }
 0x207   : > { %13388 = vst [vmem:[#allocation155_spill] sm:$0xff] %v7719_v49  ;;  %v7745_v49 = vmax.f32 %v7735_v25, 0.0  ;;  %v7767_v1 = vadd.f32 %v6958_v16, %v777_v58 }
 0x208   : > { %13389 = vst [vmem:[#allocation156_spill] sm:$0xff] %v7721_v35  ;;  %v441_v35 = vld [vmem:[%s6923_s24 + $0x1b0] sm:$0xff] }
 0x209   : > { %13395 = vst [vmem:[#allocation162_spill] sm:$0xff] %v7745_v49 }
 0x20a   : > { %13399 = vst [vmem:[#allocation166_spill] sm:$0xff] %v7767_v1 }
 0x20b   : > { %1262 = vrot.lane.b32.xlu1 %v7705_v27, %s6831_s29  ;;  %1048 = vrot.lane.b32.xlu2 %v7725_v33, %s6830_s28 }
 0x20c   : > { %1158 = vrot.lane.b32.xlu0 %v7705_v27, %s6829_s27 }
 0x20d   : > { %v7737_v23 = vpop.permute.xlu1 %1136  ;;  %v7739_v39 = vpop.permute.xlu2 %1246 }
 0x20e   : > { %13392 = vst [vmem:[#allocation159_spill] sm:$0xff] %v7737_v23  ;;  %v7741_v20 = vpop.permute.xlu0 %1242  ;;  %v780_v25 = vpop.f32.mrf.mxu0  ;;  %v440_v23 = vld [vmem:[%s6923_s24 + $0x1a8] sm:$0xff] }
 0x20f   : > { %13393 = vst [vmem:[#allocation160_spill] sm:$0xff] %v7739_v39  ;;  %6573 = vmatmul.msk.f32.gmra.mxu0 %vm456_vm0, %v440_v23  ;;  %v7779_v23 = vmax.f32 %v7767_v1, 0.0  ;;  %v7787_v58 = vadd.f32 %v6958_v16, %v780_v25 }
 0x210   : > { %13394 = vst [vmem:[#allocation161_spill] sm:$0xff] %v7741_v20 }
 0x211   : > { %13403 = vst [vmem:[#allocation170_spill] sm:$0xff] %v7779_v23 }
 0x212   : > { %13404 = vst [vmem:[#allocation171_spill] sm:$0xff] %v7787_v58 }
 0x213   : > { %1366 = vrot.lane.b32.xlu1 %v7705_v27, %s6832_s30  ;;  %1264 = vrot.lane.b32.xlu2 %v7725_v33, %s6831_s29 }
 0x214   : > { %1050 = vrot.lane.b32.xlu0 %v7745_v49, %s6830_s28 }
 0x215   : > { %v7754_v38 = vpop.permute.xlu1 %1028  ;;  %v7756_v39 = vpop.permute.xlu2 %1350 }
 0x216   : > { %13396 = vst [vmem:[#allocation163_spill] sm:$0xff] %v7754_v38  ;;  %v7758_v20 = vpop.permute.xlu0 %1346  ;;  %v783_v13 = vpop.f32.mrf.mxu0 }
 0x217   : > { %13397 = vst [vmem:[#allocation164_spill] sm:$0xff] %v7756_v39  ;;  %6574 = vmatmul.msk.f32.gmra.mxu0 %vm456_vm0, %v441_v35  ;;  %v7798_v35 = vmax.f32 %v7787_v58, 0.0  ;;  %v7807_v25 = vadd.f32 %v6958_v16, %v783_v13 }
 0x218   : > { %13398 = vst [vmem:[#allocation165_spill] sm:$0xff] %v7758_v20 }
 0x219   : > { %13408 = vst [vmem:[#allocation175_spill] sm:$0xff] %v7798_v35  ;;  %v7818_v3 = vmax.f32 %v7807_v25, 0.0 }
 0x21a   : > { %13409 = vst [vmem:[#allocation176_spill] sm:$0xff] %v7807_v25 }
 0x21b   : > { %1160 = vrot.lane.b32.xlu1 %v7725_v33, %s6829_s27  ;;  %1368 = vrot.lane.b32.xlu2 %v7725_v33, %s6832_s30  ;;  %13413 = vst [vmem:[#allocation180_spill] sm:$0xff] %v7818_v3 }
 0x21c   : > { %1266 = vrot.lane.b32.xlu0 %v7745_v49, %s6831_s29 }
 0x21d   : > { %v7771_v38 = vpop.permute.xlu1 %1244  ;;  %v7773_v39 = vpop.permute.xlu2 %1144 }
 0x21e   : > { %13400 = vst [vmem:[#allocation167_spill] sm:$0xff] %v7771_v38  ;;  %v7775_v20 = vpop.permute.xlu0 %1140 }
 0x21f   : > { %13401 = vst [vmem:[#allocation168_spill] sm:$0xff] %v7773_v39 }
 0x220   : > { %13402 = vst [vmem:[#allocation169_spill] sm:$0xff] %v7775_v20  ;;  %v786_v20 = vpop.f32.mrf.mxu0 }
 0x221   : > { %v7839_v25 = vadd.f32 %v6958_v16, %v786_v20 }
 0x223   : > { %1052 = vrot.lane.b32.xlu1 %v7779_v23, %s6830_s28  ;;  %1162 = vrot.lane.b32.xlu2 %v7745_v49, %s6829_s27  ;;  %13417 = vst [vmem:[#allocation184_spill] sm:$0xff] %v7839_v25  ;;  %v7851_v10 = vmax.f32 %v7839_v25, 0.0 }
 0x224   : > { %1370 = vrot.lane.b32.xlu0 %v7745_v49, %s6832_s30 }
 0x225   : > { %v7791_v38 = vpop.permute.xlu1 %1348  ;;  %v7793_v1 = vpop.permute.xlu2 %1036  ;;  %13421 = vst [vmem:[#allocation188_spill] sm:$0xff] %v7851_v10 }
 0x226   : > { %13405 = vst [vmem:[#allocation172_spill] sm:$0xff] %v7791_v38  ;;  %v7795_v39 = vpop.permute.xlu0 %1032 }
 0x227   : > { %13406 = vst [vmem:[#allocation173_spill] sm:$0xff] %v7793_v1 }
 0x228   : > { %13407 = vst [vmem:[#allocation174_spill] sm:$0xff] %v7795_v39  ;;  %v442_v39 = vld [vmem:[%s6923_s24 + $0x1b8] sm:$0xff]  ;;  %v789_v12 = vpop.f32.mrf.mxu0 }
 0x229   : > { %6575 = vmatmul.msk.f32.gmra.mxu0 %vm456_vm0, %v442_v39  ;;  %v443_v39 = vld [vmem:[%s6923_s24 + $0x1c0] sm:$0xff]  ;;  %v7859_v20 = vadd.f32 %v6958_v16, %v789_v12 }
 0x22a   : > { %v7883_v16 = vld [vmem:[%s13015_s2] ss:$0 sm:$0xff] }
 0x22b   : > { %1268 = vrot.lane.b32.xlu1 %v7779_v23, %s6831_s29  ;;  %1054 = vrot.lane.b32.xlu2 %v7798_v35, %s6830_s28  ;;  %13422 = vst [vmem:[#allocation189_spill] sm:$0xff] %v7859_v20  ;;  %v7871_v7 = vmax.f32 %v7859_v20, 0.0 }
 0x22c   : > { %1164 = vrot.lane.b32.xlu0 %v7779_v23, %s6829_s27 }
 0x22d   : > { %v7809_v38 = vpop.permute.xlu1 %1142  ;;  %v7811_v1 = vpop.permute.xlu2 %1252  ;;  %13426 = vst [vmem:[#allocation193_spill] sm:$0xff] %v7871_v7 }
 0x22e   : > { %13410 = vst [vmem:[#allocation177_spill] sm:$0xff] %v7809_v38  ;;  %v7813_v58 = vpop.permute.xlu0 %1248 }
 0x22f   : > { %13411 = vst [vmem:[#allocation178_spill] sm:$0xff] %v7811_v1 }
 0x230   : > { %13412 = vst [vmem:[#allocation179_spill] sm:$0xff] %v7813_v58  ;;  %v792_v38 = vpop.f32.mrf.mxu0 }
 0x231   : > { %6576 = vmatmul.msk.f32.gmra.mxu0 %vm456_vm0, %v443_v39  ;;  %v444_v39 = vld [vmem:[%s6923_s24 + $0x1c8] sm:$0xff]  ;;  %v7886_v12 = vadd.f32 %v7883_v16, %v792_v38 }
 0x233   : > { %1372 = vrot.lane.b32.xlu1 %v7779_v23, %s6832_s30  ;;  %1270 = vrot.lane.b32.xlu2 %v7798_v35, %s6831_s29  ;;  %13427 = vst [vmem:[#allocation194_spill] sm:$0xff] %v7886_v12  ;;  %v7896_v32 = vmax.f32 %v7886_v12, 0.0  ;;  %v447_v12 = vld [vmem:[%s6923_s24 + $0x1e0] sm:$0xff] }
 0x234   : > { %1056 = vrot.lane.b32.xlu0 %v7818_v3, %s6830_s28 }
 0x235   : > { %v7826_v13 = vpop.permute.xlu1 %1034  ;;  %v7828_v1 = vpop.permute.xlu2 %1356  ;;  %13431 = vst [vmem:[#allocation198_spill] sm:$0xff] %v7896_v32 }
 0x236   : > { %13414 = vst [vmem:[#allocation181_spill] sm:$0xff] %v7826_v13  ;;  %v7830_v58 = vpop.permute.xlu0 %1352 }
 0x237   : > { %13415 = vst [vmem:[#allocation182_spill] sm:$0xff] %v7828_v1 }
 0x238   : > { %13416 = vst [vmem:[#allocation183_spill] sm:$0xff] %v7830_v58 }
 0x239   : > { %6577 = vmatmul.msk.f32.gmra.mxu0 %vm456_vm0, %v444_v39  ;;  %v445_v39 = vld [vmem:[%s6923_s24 + $0x1d0] sm:$0xff] }
 0x23b   : > { %1166 = vrot.lane.b32.xlu1 %v7798_v35, %s6829_s27  ;;  %1374 = vrot.lane.b32.xlu2 %v7798_v35, %s6832_s30 }
 0x23c   : > { %1272 = vrot.lane.b32.xlu0 %v7818_v3, %s6831_s29 }
 0x23d   : > { %v7843_v1 = vpop.permute.xlu1 %1250  ;;  %v7845_v58 = vpop.permute.xlu2 %1150 }
 0x23e   : > { %13418 = vst [vmem:[#allocation185_spill] sm:$0xff] %v7843_v1  ;;  %v7847_v13 = vpop.permute.xlu0 %1146  ;;  %v795_v1 = vpop.f32.mrf.mxu0 }
 0x23f   : > { %13419 = vst [vmem:[#allocation186_spill] sm:$0xff] %v7845_v58 }
 0x240   : > { %13420 = vst [vmem:[#allocation187_spill] sm:$0xff] %v7847_v13 }
 0x241   : > { %6578 = vmatmul.msk.f32.gmra.mxu0 %vm456_vm0, %v445_v39 }
 0x243   : > { %1058 = vrot.lane.b32.xlu1 %v7851_v10, %s6830_s28  ;;  %1168 = vrot.lane.b32.xlu2 %v7818_v3, %s6829_s27 }
 0x244   : > { %1376 = vrot.lane.b32.xlu0 %v7818_v3, %s6832_s30 }
 0x245   : > { %v7863_v58 = vpop.permute.xlu1 %1354  ;;  %v7865_v25 = vpop.permute.xlu2 %1042 }
 0x246   : > { %13423 = vst [vmem:[#allocation190_spill] sm:$0xff] %v7863_v58  ;;  %v7867_v13 = vpop.permute.xlu0 %1038 }
 0x247   : > { %13424 = vst [vmem:[#allocation191_spill] sm:$0xff] %v7865_v25  ;;  %v798_v25 = vpop.f32.mrf.mxu0 }
 0x248   : > { %13425 = vst [vmem:[#allocation192_spill] sm:$0xff] %v7867_v13  ;;  %v446_v13 = vld [vmem:[%s6923_s24 + $0x1d8] sm:$0xff] }
 0x249   : > { %6579 = vmatmul.msk.f32.gmra.mxu0 %vm456_vm0, %v446_v13  ;;  %v7918_v13 = vadd.f32 %v7883_v16, %v795_v1  ;;  %v7938_v1 = vadd.f32 %v7883_v16, %v798_v25 }
 0x24b   : > { %1274 = vrot.lane.b32.xlu1 %v7851_v10, %s6831_s29  ;;  %1060 = vrot.lane.b32.xlu2 %v7871_v7, %s6830_s28  ;;  %13435 = vst [vmem:[#allocation202_spill] sm:$0xff] %v7918_v13  ;;  %v7930_v8 = vmax.f32 %v7918_v13, 0.0 }
 0x24c   : > { %1170 = vrot.lane.b32.xlu0 %v7851_v10, %s6829_s27  ;;  %13440 = vst [vmem:[#allocation207_spill] sm:$0xff] %v7938_v1 }
 0x24d   : > { %v7888_v20 = vpop.permute.xlu1 %1148  ;;  %v7890_v39 = vpop.permute.xlu2 %1258  ;;  %13439 = vst [vmem:[#allocation206_spill] sm:$0xff] %v7930_v8 }
 0x24e   : > { %13428 = vst [vmem:[#allocation195_spill] sm:$0xff] %v7888_v20  ;;  %v7892_v58 = vpop.permute.xlu0 %1254 }
 0x24f   : > { %13429 = vst [vmem:[#allocation196_spill] sm:$0xff] %v7890_v39  ;;  %v801_v20 = vpop.f32.mrf.mxu0 }
 0x250   : > { %13430 = vst [vmem:[#allocation197_spill] sm:$0xff] %v7892_v58  ;;  %v7960_v25 = vadd.f32 %v7883_v16, %v801_v20 }
 0x251   : > { %6580 = vmatmul.msk.f32.gmra.mxu0 %vm456_vm0, %v447_v12  ;;  %v448_v12 = vld [vmem:[%s6923_s24 + $0x1e8] sm:$0xff] }
 0x252   : > { %13445 = vst [vmem:[#allocation212_spill] sm:$0xff] %v7960_v25 }
 0x253   : > { %1378 = vrot.lane.b32.xlu1 %v7851_v10, %s6832_s30  ;;  %1276 = vrot.lane.b32.xlu2 %v7871_v7, %s6831_s29 }
 0x254   : > { %1062 = vrot.lane.b32.xlu0 %v7896_v32, %s6830_s28 }
 0x255   : > { %v7905_v38 = vpop.permute.xlu1 %1040  ;;  %v7907_v39 = vpop.permute.xlu2 %1362 }
 0x256   : > { %13432 = vst [vmem:[#allocation199_spill] sm:$0xff] %v7905_v38  ;;  %v7909_v58 = vpop.permute.xlu0 %1358 }
 0x257   : > { %13433 = vst [vmem:[#allocation200_spill] sm:$0xff] %v7907_v39  ;;  %v804_v0 = vpop.f32.mrf.mxu0 }
 0x258   : > { %13434 = vst [vmem:[#allocation201_spill] sm:$0xff] %v7909_v58 }
 0x259   : > { %6581 = vmatmul.msk.f32.gmra.mxu0 %vm456_vm0, %v448_v12  ;;  %v449_v12 = vld [vmem:[%s6923_s24 + $0x1f0] sm:$0xff] }
 0x25b   : > { %1172 = vrot.lane.b32.xlu1 %v7871_v7, %s6829_s27  ;;  %1380 = vrot.lane.b32.xlu2 %v7871_v7, %s6832_s30 }
 0x25c   : > { %1278 = vrot.lane.b32.xlu0 %v7896_v32, %s6831_s29 }
 0x25d   : > { %v7922_v39 = vpop.permute.xlu1 %1256  ;;  %v7924_v58 = vpop.permute.xlu2 %1156 }
 0x25e   : > { %13436 = vst [vmem:[#allocation203_spill] sm:$0xff] %v7922_v39  ;;  %v7926_v38 = vpop.permute.xlu0 %1152 }
 0x25f   : > { %13437 = vst [vmem:[#allocation204_spill] sm:$0xff] %v7924_v58  ;;  %v807_v9 = vpop.f32.mrf.mxu0 }
 0x260   : > { %13438 = vst [vmem:[#allocation205_spill] sm:$0xff] %v7926_v38  ;;  %v7950_v38 = vmax.f32 %v7938_v1, 0.0 }
 0x261   : > { %6582 = vmatmul.msk.f32.gmra.mxu0 %vm456_vm0, %v449_v12  ;;  %v450_v12 = vld [vmem:[%s6923_s24 + $0x1f8] sm:$0xff]  ;;  %s6841_s24 = smov 14  }
 0x262   : > { %13444 = vst [vmem:[#allocation211_spill] sm:$0xff] %v7950_v38 }
 0x263   : > { %1064 = vrot.lane.b32.xlu1 %v7930_v8, %s6830_s28  ;;  %1174 = vrot.lane.b32.xlu2 %v7896_v32, %s6829_s27 }
 0x264   : > { %1382 = vrot.lane.b32.xlu0 %v7896_v32, %s6832_s30 }
 0x265   : > { %v7942_v39 = vpop.permute.xlu1 %1360  ;;  %v7944_v13 = vpop.permute.xlu2 %1048 }
 0x266   : > { %13441 = vst [vmem:[#allocation208_spill] sm:$0xff] %v7942_v39  ;;  %v7946_v58 = vpop.permute.xlu0 %1044 }
 0x267   : > { %13442 = vst [vmem:[#allocation209_spill] sm:$0xff] %v7944_v13  ;;  %v810_v20 = vpop.f32.mrf.mxu0 }
 0x268   : > { %13443 = vst [vmem:[#allocation210_spill] sm:$0xff] %v7946_v58  ;;  %v7970_v58 = vmax.f32 %v7960_v25, 0.0 }
 0x269   : > { %6583 = vmatmul.msk.f32.gmra.mxu0 %vm456_vm0, %v450_v12  ;;  %v7990_v12 = vadd.f32 %v7883_v16, %v804_v0  ;;  %v8008_v0 = vadd.f32 %v7883_v16, %v807_v9  ;;  %v8028_v9 = vadd.f32 %v7883_v16, %v810_v20 }
 0x26a   : > { %13449 = vst [vmem:[#allocation216_spill] sm:$0xff] %v7970_v58 }
 0x26b   : > { %1280 = vrot.lane.b32.xlu1 %v7930_v8, %s6831_s29  ;;  %1066 = vrot.lane.b32.xlu2 %v7950_v38, %s6830_s28  ;;  %13453 = vst [vmem:[#allocation220_spill] sm:$0xff] %v7990_v12 }
 0x26c   : > { %1176 = vrot.lane.b32.xlu0 %v7930_v8, %s6829_s27  ;;  %13458 = vst [vmem:[#allocation225_spill] sm:$0xff] %v8008_v0 }
 0x26d   : > { %v7962_v39 = vpop.permute.xlu1 %1154  ;;  %v7964_v13 = vpop.permute.xlu2 %1264  ;;  %13463 = vst [vmem:[#allocation230_spill] sm:$0xff] %v8028_v9 }
 0x26e   : > { %13446 = vst [vmem:[#allocation213_spill] sm:$0xff] %v7962_v39  ;;  %v7966_v1 = vpop.permute.xlu0 %1260 }
 0x26f   : > { %13447 = vst [vmem:[#allocation214_spill] sm:$0xff] %v7964_v13 }
 0x270   : > { %13448 = vst [vmem:[#allocation215_spill] sm:$0xff] %v7966_v1 }
 0x273   : > { %1384 = vrot.lane.b32.xlu1 %v7930_v8, %s6832_s30  ;;  %1282 = vrot.lane.b32.xlu2 %v7950_v38, %s6831_s29 }
 0x274   : > { %1068 = vrot.lane.b32.xlu0 %v7970_v58, %s6830_s28 }
 0x275   : > { %v7979_v39 = vpop.permute.xlu1 %1046  ;;  %v7981_v13 = vpop.permute.xlu2 %1368 }
 0x276   : > { %13450 = vst [vmem:[#allocation217_spill] sm:$0xff] %v7979_v39  ;;  %v7983_v1 = vpop.permute.xlu0 %1364 }
 0x277   : > { %13451 = vst [vmem:[#allocation218_spill] sm:$0xff] %v7981_v13  ;;  %v813_v13 = vpop.f32.mrf.mxu0 }
 0x278   : > { %13452 = vst [vmem:[#allocation219_spill] sm:$0xff] %v7983_v1  ;;  %v8001_v1 = vmax.f32 %v7990_v12, 0.0  ;;  %v8019_v12 = vmax.f32 %v8008_v0, 0.0  ;;  %v8037_v0 = vmax.f32 %v8028_v9, 0.0 }
 0x27a   : > { %13457 = vst [vmem:[#allocation224_spill] sm:$0xff] %v8001_v1 }
 0x27b   : > { %1178 = vrot.lane.b32.xlu1 %v7950_v38, %s6829_s27  ;;  %1386 = vrot.lane.b32.xlu2 %v7950_v38, %s6832_s30  ;;  %13462 = vst [vmem:[#allocation229_spill] sm:$0xff] %v8019_v12 }
 0x27c   : > { %1284 = vrot.lane.b32.xlu0 %v7970_v58, %s6831_s29  ;;  %13467 = vst [vmem:[#allocation234_spill] sm:$0xff] %v8037_v0 }
 0x27d   : > { %v7994_v25 = vpop.permute.xlu1 %1262  ;;  %v7996_v17 = vpop.permute.xlu2 %1162 }
 0x27e   : > { %13454 = vst [vmem:[#allocation221_spill] sm:$0xff] %v7994_v25  ;;  %v7998_v39 = vpop.permute.xlu0 %1158 }
 0x27f   : > { %13455 = vst [vmem:[#allocation222_spill] sm:$0xff] %v7996_v17  ;;  %v816_v6 = vpop.f32.mrf.mxu0 }
 0x280   : > { %13456 = vst [vmem:[#allocation223_spill] sm:$0xff] %v7998_v39 }
 0x283   : > { %1070 = vrot.lane.b32.xlu1 %v8001_v1, %s6830_s28  ;;  %1180 = vrot.lane.b32.xlu2 %v7970_v58, %s6829_s27 }
 0x284   : > { %1388 = vrot.lane.b32.xlu0 %v7970_v58, %s6832_s30 }
 0x285   : > { %v8012_v25 = vpop.permute.xlu1 %1366  ;;  %v8014_v17 = vpop.permute.xlu2 %1054 }
 0x286   : > { %13459 = vst [vmem:[#allocation226_spill] sm:$0xff] %v8012_v25  ;;  %v8016_v39 = vpop.permute.xlu0 %1050 }
 0x287   : > { %13460 = vst [vmem:[#allocation227_spill] sm:$0xff] %v8014_v17  ;;  %v819_v42 = vpop.f32.mrf.mxu0 }
 0x288   : > { %13461 = vst [vmem:[#allocation228_spill] sm:$0xff] %v8016_v39 }
 0x28b   : > { %1286 = vrot.lane.b32.xlu1 %v8001_v1, %s6831_s29  ;;  %1072 = vrot.lane.b32.xlu2 %v8019_v12, %s6830_s28 }
 0x28c   : > { %1182 = vrot.lane.b32.xlu0 %v8001_v1, %s6829_s27 }
 0x28d   : > { %v8030_v25 = vpop.permute.xlu1 %1160  ;;  %v8032_v17 = vpop.permute.xlu2 %1270 }
 0x28e   : > { %13464 = vst [vmem:[#allocation231_spill] sm:$0xff] %v8030_v25  ;;  %v8034_v39 = vpop.permute.xlu0 %1266 }
 0x28f   : > { %13465 = vst [vmem:[#allocation232_spill] sm:$0xff] %v8032_v17  ;;  %v822_v9 = vpop.f32.mrf.mxu0 }
 0x290   : > { %13466 = vst [vmem:[#allocation233_spill] sm:$0xff] %v8034_v39  ;;  %v8052_v39 = vadd.f32 %v7883_v16, %v813_v13  ;;  %v8070_v13 = vadd.f32 %v7883_v16, %v816_v6 }
 0x292   : > { %13471 = vst [vmem:[#allocation238_spill] sm:$0xff] %v8052_v39  ;;  %v8088_v29 = vmax.f32 %v8070_v13, 0.0 }
 0x293   : > { %1390 = vrot.lane.b32.xlu1 %v8001_v1, %s6832_s30  ;;  %1288 = vrot.lane.b32.xlu2 %v8019_v12, %s6831_s29  ;;  %13476 = vst [vmem:[#allocation243_spill] sm:$0xff] %v8070_v13 }
 0x294   : > { %1074 = vrot.lane.b32.xlu0 %v8037_v0, %s6830_s28  ;;  %13481 = vst [vmem:[#allocation248_spill] sm:$0xff] %v8088_v29 }
 0x295   : > { %v8045_v20 = vpop.permute.xlu1 %1052  ;;  %v8047_v25 = vpop.permute.xlu2 %1374 }
 0x296   : > { %13468 = vst [vmem:[#allocation235_spill] sm:$0xff] %v8045_v20  ;;  %v8049_v17 = vpop.permute.xlu0 %1370 }
 0x297   : > { %13469 = vst [vmem:[#allocation236_spill] sm:$0xff] %v8047_v25  ;;  %v825_v6 = vpop.f32.mrf.mxu0 }
 0x298   : > { %13470 = vst [vmem:[#allocation237_spill] sm:$0xff] %v8049_v17  ;;  %v8067_v17 = vmax.f32 %v8052_v39, 0.0  ;;  %v8124_v50 = vadd.f32 %v7883_v16, %v825_v6 }
 0x29a   : > { %13475 = vst [vmem:[#allocation242_spill] sm:$0xff] %v8067_v17  ;;  %v8142_v6 = vmax.f32 %v8124_v50, 0.0 }
 0x29b   : > { %1184 = vrot.lane.b32.xlu1 %v8019_v12, %s6829_s27  ;;  %1392 = vrot.lane.b32.xlu2 %v8019_v12, %s6832_s30  ;;  %13491 = vst [vmem:[#allocation258_spill] sm:$0xff] %v8124_v50 }
 0x29c   : > { %1394 = vrot.lane.b32.xlu0 %v8037_v0, %s6832_s30  ;;  %13496 = vst [vmem:[#allocation263_spill] sm:$0xff] %v8142_v6 }
 0x29d   : > { %v8060_v36 = vpop.permute.xlu1 %1268  ;;  %v8062_v20 = vpop.permute.xlu2 %1168 }
 0x29e   : > { %13472 = vst [vmem:[#allocation239_spill] sm:$0xff] %v8060_v36  ;;  %v8064_v25 = vpop.permute.xlu0 %1164  ;;  %v8079_v36 = vadd.f32 %v7883_v16, %v819_v42 }
 0x29f   : > { %13473 = vst [vmem:[#allocation240_spill] sm:$0xff] %v8062_v20  ;;  %v828_v13 = vpop.f32.mrf.mxu0 }
 0x2a0   : > { %13474 = vst [vmem:[#allocation241_spill] sm:$0xff] %v8064_v25  ;;  %v8091_v45 = vmax.f32 %v8079_v36, 0.0 }
 0x2a1   : > { %13477 = vst [vmem:[#allocation244_spill] sm:$0xff] %v8079_v36 }
 0x2a2   : > { %13482 = vst [vmem:[#allocation249_spill] sm:$0xff] %v8091_v45 }
 0x2a3   : > { %1076 = vrot.lane.b32.xlu1 %v8067_v17, %s6830_s28  ;;  %1186 = vrot.lane.b32.xlu2 %v8037_v0, %s6829_s27 }
 0x2a4   : > { %1188 = vrot.lane.b32.xlu0 %v8067_v17, %s6829_s27 }
 0x2a5   : > { %v8081_v20 = vpop.permute.xlu1 %1372  ;;  %v8083_v25 = vpop.permute.xlu2 %1060 }
 0x2a6   : > { %13478 = vst [vmem:[#allocation245_spill] sm:$0xff] %v8081_v20  ;;  %v8085_v39 = vpop.permute.xlu0 %1056 }
 0x2a7   : > { %13479 = vst [vmem:[#allocation246_spill] sm:$0xff] %v8083_v25 }
 0x2a8   : > { %13480 = vst [vmem:[#allocation247_spill] sm:$0xff] %v8085_v39  ;;  %v8106_v39 = vadd.f32 %v7883_v16, %v822_v9  ;;  %v831_v9 = vpop.f32.mrf.mxu0 }
 0x2a9   : > { %v8164_v50 = vadd.f32 %v7883_v16, %v831_v9 }
 0x2aa   : > { %13486 = vst [vmem:[#allocation253_spill] sm:$0xff] %v8106_v39 }
 0x2ab   : > { %1396 = vrot.lane.b32.xlu1 %v8067_v17, %s6832_s30  ;;  %1078 = vrot.lane.b32.xlu2 %v8088_v29, %s6830_s28  ;;  %13500 = vst [vmem:[#allocation267_spill] sm:$0xff] %v8164_v50 }
 0x2ac   : > { %1080 = vrot.lane.b32.xlu0 %v8091_v45, %s6830_s28 }
 0x2ad   : > { %v8099_v42 = vpop.permute.xlu1 %1166  ;;  %v8101_v20 = vpop.permute.xlu2 %1276 }
 0x2ae   : > { %13483 = vst [vmem:[#allocation250_spill] sm:$0xff] %v8099_v42  ;;  %v8103_v25 = vpop.permute.xlu0 %1272 }
 0x2af   : > { %13484 = vst [vmem:[#allocation251_spill] sm:$0xff] %v8101_v20 }
 0x2b0   : > { %13485 = vst [vmem:[#allocation252_spill] sm:$0xff] %v8103_v25  ;;  %v8121_v25 = vmax.f32 %v8106_v39, 0.0  ;;  %v834_v22 = vpop.f32.mrf.mxu0 }
 0x2b2   : > { %13490 = vst [vmem:[#allocation257_spill] sm:$0xff] %v8121_v25 }
 0x2b3   : > { %1190 = vrot.lane.b32.xlu1 %v8088_v29, %s6829_s27  ;;  %1398 = vrot.lane.b32.xlu2 %v8088_v29, %s6832_s30 }
 0x2b4   : > { %1400 = vrot.lane.b32.xlu0 %v8091_v45, %s6832_s30 }
 0x2b5   : > { %v8114_v36 = vpop.permute.xlu1 %1058  ;;  %v8116_v42 = vpop.permute.xlu2 %1380 }
 0x2b6   : > { %13487 = vst [vmem:[#allocation254_spill] sm:$0xff] %v8114_v36  ;;  %v8118_v20 = vpop.permute.xlu0 %1376 }
 0x2b7   : > { %13488 = vst [vmem:[#allocation255_spill] sm:$0xff] %v8116_v42  ;;  %v8133_v42 = vadd.f32 %v7883_v16, %v828_v13 }
 0x2b8   : > { %13489 = vst [vmem:[#allocation256_spill] sm:$0xff] %v8118_v20 }
 0x2b9   : > { %13492 = vst [vmem:[#allocation259_spill] sm:$0xff] %v8133_v42  ;;  %v8145_v19 = vmax.f32 %v8133_v42, 0.0  ;;  %v837_v42 = vpop.f32.mrf.mxu0 }
 0x2bb   : > { %1082 = vrot.lane.b32.xlu1 %v8121_v25, %s6830_s28  ;;  %1192 = vrot.lane.b32.xlu2 %v8091_v45, %s6829_s27  ;;  %13497 = vst [vmem:[#allocation264_spill] sm:$0xff] %v8145_v19 }
 0x2bc   : > { %1495 = vrot.lane.b32.xlu0 %v7058_v44, %s6833_s12 }
 0x2bd   : > { %v8135_v20 = vpop.permute.xlu1 %1274  ;;  %v8137_v39 = vpop.permute.xlu2 %1174 }
 0x2be   : > { %13493 = vst [vmem:[#allocation260_spill] sm:$0xff] %v8135_v20  ;;  %v8139_v36 = vpop.permute.xlu0 %1170 }
 0x2bf   : > { %13494 = vst [vmem:[#allocation261_spill] sm:$0xff] %v8137_v39 }
 0x2c0   : > { %13495 = vst [vmem:[#allocation262_spill] sm:$0xff] %v8139_v36 }
 0x2c3   : > { %1402 = vrot.lane.b32.xlu1 %v8121_v25, %s6832_s30  ;;  %1084 = vrot.lane.b32.xlu2 %v8142_v6, %s6830_s28 }
 0x2c4   : > { %1086 = vrot.lane.b32.xlu0 %v8145_v19, %s6830_s28 }
 0x2c5   : > { %v8153_v13 = vpop.permute.xlu1 %1378  ;;  %v8155_v20 = vpop.permute.xlu2 %1066 }
 0x2c6   : > { %13498 = vst [vmem:[#allocation265_spill] sm:$0xff] %v8153_v13  ;;  %v8157_v39 = vpop.permute.xlu0 %1062 }
 0x2c7   : > { %13499 = vst [vmem:[#allocation266_spill] sm:$0xff] %v8155_v20  ;;  %v8175_v20 = vmax.f32 %v8164_v50, 0.0  ;;  %v8199_v50 = vadd.f32 %v7883_v16, %v837_v42 }
 0x2c9   : > { %13504 = vst [vmem:[#allocation271_spill] sm:$0xff] %v8175_v20 }
 0x2ca   : > { %13509 = vst [vmem:[#allocation276_spill] sm:$0xff] %v8199_v50 }
 0x2cb   : > { %1497 = vrot.lane.b32.xlu1 %v7078_v48, %s6833_s12  ;;  %1404 = vrot.lane.b32.xlu2 %v8142_v6, %s6832_s30 }
 0x2cc   : > { %1406 = vrot.lane.b32.xlu0 %v8145_v19, %s6832_s30 }
 0x2cd   : > { %v8168_v36 = vpop.permute.xlu1 %1172  ;;  %v8170_v13 = vpop.permute.xlu2 %1282 }
 0x2ce   : > { %13501 = vst [vmem:[#allocation268_spill] sm:$0xff] %v8168_v36  ;;  %v8172_v44 = vpop.permute.xlu0 %1278 }
 0x2cf   : > { %13502 = vst [vmem:[#allocation269_spill] sm:$0xff] %v8170_v13  ;;  %v840_v13 = vpop.f32.mrf.mxu0 }
 0x2d0   : > { %13503 = vst [vmem:[#allocation270_spill] sm:$0xff] %v8172_v44  ;;  %v8190_v44 = vadd.f32 %v7883_v16, %v834_v22 }
 0x2d2   : > { %13508 = vst [vmem:[#allocation275_spill] sm:$0xff] %v8190_v44  ;;  %v8208_v22 = vmax.f32 %v8190_v44, 0.0 }
 0x2d3   : > { %1088 = vrot.lane.b32.xlu1 %v8175_v20, %s6830_s28  ;;  %1499 = vrot.lane.b32.xlu2 %v7091_v52, %s6833_s12 }
 0x2d4   : > { %1501 = vrot.lane.b32.xlu0 %v7106_v56, %s6833_s12  ;;  %13513 = vst [vmem:[#allocation280_spill] sm:$0xff] %v8208_v22  ;;  %v8211_v56 = vmax.f32 %v8199_v50, 0.0  ;;  %v8226_v50 = vadd.f32 %v7883_v16, %v840_v13 }
 0x2d5   : > { %v8183_v9 = vpop.permute.xlu1 %1064  ;;  %v8185_v48 = vpop.permute.xlu2 %1386 }
 0x2d6   : > { %13505 = vst [vmem:[#allocation272_spill] sm:$0xff] %v8183_v9  ;;  %v8187_v36 = vpop.permute.xlu0 %1382 }
 0x2d7   : > { %13506 = vst [vmem:[#allocation273_spill] sm:$0xff] %v8185_v48  ;;  %v843_v9 = vpop.f32.mrf.mxu0 }
 0x2d8   : > { %13507 = vst [vmem:[#allocation274_spill] sm:$0xff] %v8187_v36  ;;  %v8244_v13 = vadd.f32 %v7883_v16, %v843_v9 }
 0x2d9   : > { %13514 = vst [vmem:[#allocation281_spill] sm:$0xff] %v8211_v56 }
 0x2da   : > { %13516 = vst [vmem:[#allocation283_spill] sm:$0xff] %v8226_v50  ;;  %v8262_v9 = vmax.f32 %v8244_v13, 0.0 }
 0x2db   : > { %1408 = vrot.lane.b32.xlu1 %v8175_v20, %s6832_s30  ;;  %1505 = vrot.lane.b32.xlu2 %v7147_v4, %s6833_s12  ;;  %13521 = vst [vmem:[#allocation288_spill] sm:$0xff] %v8244_v13 }
 0x2dc   : > { %1507 = vrot.lane.b32.xlu0 %v7168_v11, %s6833_s12  ;;  %v8241_v11 = vmax.f32 %v8226_v50, 0.0  ;;  %13525 = vst [vmem:[#allocation292_spill] sm:$0xff] %v8262_v9 }
 0x2dd   : > { %v8201_v52 = vpop.permute.xlu1 %1280  ;;  %v8203_v48 = vpop.permute.xlu2 %1180 }
 0x2de   : > { %13510 = vst [vmem:[#allocation277_spill] sm:$0xff] %v8201_v52  ;;  %v8205_v36 = vpop.permute.xlu0 %1176 }
 0x2df   : > { %13511 = vst [vmem:[#allocation278_spill] sm:$0xff] %v8203_v48  ;;  %v846_v44 = vpop.f32.mrf.mxu0 }
 0x2e0   : > { %13512 = vst [vmem:[#allocation279_spill] sm:$0xff] %v8205_v36 }
 0x2e1   : > { %13520 = vst [vmem:[#allocation287_spill] sm:$0xff] %v8241_v11 }
 0x2e3   : > { %1503 = vrot.lane.b32.xlu1 %v7129_v62, %s6833_s12  ;;  %1410 = vrot.lane.b32.xlu2 %v8208_v22, %s6832_s30 }
 0x2e4   : > { %1412 = vrot.lane.b32.xlu0 %v8211_v56, %s6832_s30 }
 0x2e5   : > { %v8219_v42 = vpop.permute.xlu1 %1384  ;;  %v8221_v52 = vpop.permute.xlu2 %1072 }
 0x2e6   : > { %13515 = vst [vmem:[#allocation282_spill] sm:$0xff] %v8219_v42  ;;  %v8223_v48 = vpop.permute.xlu0 %1068 }
 0x2eb   : > { %1509 = vrot.lane.b32.xlu1 %v7199_v28, %s6833_s12  ;;  %1511 = vrot.lane.b32.xlu2 %v7219_v41, %s6833_s12 }
 0x2ec   : > { %1513 = vrot.lane.b32.xlu0 %v7240_v55, %s6833_s12 }
 0x2ed   : > { %v8234_v36 = vpop.permute.xlu1 %1178  ;;  %v8236_v42 = vpop.permute.xlu2 %1288 }
 0x2ee   : > { %13517 = vst [vmem:[#allocation284_spill] sm:$0xff] %v8234_v36  ;;  %v8238_v4 = vpop.permute.xlu0 %1284  ;;  %v8253_v36 = vadd.f32 %v7883_v16, %v846_v44 }
 0x2ef   : > { %13518 = vst [vmem:[#allocation285_spill] sm:$0xff] %v8236_v42  ;;  %v849_v42 = vpop.f32.mrf.mxu0 }
 0x2f0   : > { %13519 = vst [vmem:[#allocation286_spill] sm:$0xff] %v8238_v4  ;;  %v8265_v55 = vmax.f32 %v8253_v36, 0.0 }
 0x2f1   : > { %13522 = vst [vmem:[#allocation289_spill] sm:$0xff] %v8253_v36 }
 0x2f2   : > { %13526 = vst [vmem:[#allocation293_spill] sm:$0xff] %v8265_v55 }
 0x2f3   : > { %1414 = vrot.lane.b32.xlu1 %v8241_v11, %s6832_s30  ;;  %1517 = vrot.lane.b32.xlu2 %v7291_v26, %s6833_s12  ;;  %v8280_v26 = vadd.f32 %v7883_v16, %v849_v42 }
 0x2f4   : > { %1519 = vrot.lane.b32.xlu0 %v7312_v46, %s6833_s12 }
 0x2f5   : > { %v8255_v4 = vpop.permute.xlu1 %1070  ;;  %v8257_v50 = vpop.permute.xlu2 %1392  ;;  %13530 = vst [vmem:[#allocation297_spill] sm:$0xff] %v8280_v26 }
 0x2f6   : > { %13523 = vst [vmem:[#allocation290_spill] sm:$0xff] %v8257_v50  ;;  %v8259_v41 = vpop.permute.xlu0 %1388 }
 0x2f7   : > { %13524 = vst [vmem:[#allocation291_spill] sm:$0xff] %v8259_v41  ;;  %v852_v13 = vpop.f32.mrf.mxu0 }
 0x2f8   : > { %v8298_v46 = vadd.f32 %v7883_v16, %v852_v13 }
 0x2fa   : > { %13533 = vst [vmem:[#allocation300_spill] sm:$0xff] %v8298_v46  ;;  %v8316_v13 = vmax.f32 %v8298_v46, 0.0 }
 0x2fb   : > { %1515 = vrot.lane.b32.xlu1 %v7271_v40, %s6833_s12  ;;  %1416 = vrot.lane.b32.xlu2 %v8262_v9, %s6832_s30 }
 0x2fc   : > { %1418 = vrot.lane.b32.xlu0 %v8265_v55, %s6832_s30  ;;  %13538 = vst [vmem:[#allocation305_spill] sm:$0xff] %v8316_v13 }
 0x2fd   : > { %v8273_v44 = vpop.permute.xlu1 %1286  ;;  %v8275_v50 = vpop.permute.xlu2 %1186 }
 0x2fe   : > { %13527 = vst [vmem:[#allocation294_spill] sm:$0xff] %v8273_v44  ;;  %v8277_v41 = vpop.permute.xlu0 %1182 }
 0x2ff   : > { %13528 = vst [vmem:[#allocation295_spill] sm:$0xff] %v8275_v50  ;;  %v855_v42 = vpop.f32.mrf.mxu0 }
 0x300   : > { %13529 = vst [vmem:[#allocation296_spill] sm:$0xff] %v8277_v41  ;;  %v8295_v41 = vmax.f32 %v8280_v26, 0.0 }
 0x302   : > { %13532 = vst [vmem:[#allocation299_spill] sm:$0xff] %v8295_v41 }
 0x303   : > { %1521 = vrot.lane.b32.xlu1 %v7343_v43, %s6833_s12  ;;  %1523 = vrot.lane.b32.xlu2 %v7363_v37, %s6833_s12 }
 0x304   : > { %1525 = vrot.lane.b32.xlu0 %v7384_v59, %s6833_s12 }
 0x305   : > { %v8288_v36 = vpop.permute.xlu1 %1390  ;;  %v8290_v44 = vpop.permute.xlu2 %1078 }
 0x306   : > { %13531 = vst [vmem:[#allocation298_spill] sm:$0xff] %v8288_v36  ;;  %v8292_v50 = vpop.permute.xlu0 %1074  ;;  %v8307_v36 = vadd.f32 %v7883_v16, %v855_v42 }
 0x308   : > { %13534 = vst [vmem:[#allocation301_spill] sm:$0xff] %v8307_v36  ;;  %v8319_v43 = vmax.f32 %v8307_v36, 0.0 }
 0x30a   : > { %13539 = vst [vmem:[#allocation306_spill] sm:$0xff] %v8319_v43 }
 0x30b   : > { %1420 = vrot.lane.b32.xlu1 %v8295_v41, %s6832_s30  ;;  %1529 = vrot.lane.b32.xlu2 %v7435_v51, %s6833_s12 }
 0x30c   : > { %1531 = vrot.lane.b32.xlu0 %v7456_v34, %s6833_s12 }
 0x30d   : > { %v8309_v37 = vpop.permute.xlu1 %1184  ;;  %v8311_v26 = vpop.permute.xlu2 %1398 }
 0x30e   : > { %13535 = vst [vmem:[#allocation302_spill] sm:$0xff] %v8309_v37  ;;  %v8313_v59 = vpop.permute.xlu0 %1394 }
 0x30f   : > { %13536 = vst [vmem:[#allocation303_spill] sm:$0xff] %v8311_v26 }
 0x310   : > { %13537 = vst [vmem:[#allocation304_spill] sm:$0xff] %v8313_v59 }
 0x313   : > { %1527 = vrot.lane.b32.xlu1 %v7415_v60, %s6833_s12  ;;  %1422 = vrot.lane.b32.xlu2 %v8316_v13, %s6832_s30 }
 0x314   : > { %1424 = vrot.lane.b32.xlu0 %v8319_v43, %s6832_s30 }
 0x315   : > { %v8327_v16 = vpop.permute.xlu1 %1076  ;;  %v8329_v42 = vpop.permute.xlu2 %1192 }
 0x316   : > { %13540 = vst [vmem:[#allocation307_spill] sm:$0xff] %v8329_v42  ;;  %v8331_v37 = vpop.permute.xlu0 %1188 }
 0x317   : > { %13541 = vst [vmem:[#allocation308_spill] sm:$0xff] %v8331_v37 }
 0x31b   : > { %1533 = vrot.lane.b32.xlu1 %v7487_v61, %s6833_s12  ;;  %1535 = vrot.lane.b32.xlu2 %v7507_v53, %s6833_s12 }
 0x31c   : > { %1537 = vrot.lane.b32.xlu0 %v7528_v31, %s6833_s12 }
 0x31d   : > { %v8339_v46 = vpop.permute.xlu1 %1396  ;;  %v8341_v36 = vpop.permute.xlu2 %1084 }
 0x31e   : > { %13542 = vst [vmem:[#allocation309_spill] sm:$0xff] %v8339_v46  ;;  %v8343_v26 = vpop.permute.xlu0 %1080 }
 0x323   : > { %1539 = vrot.lane.b32.xlu1 %v7559_v5, %s6833_s12  ;;  %1541 = vrot.lane.b32.xlu2 %v7579_v30, %s6833_s12 }
 0x324   : > { %1543 = vrot.lane.b32.xlu0 %v7600_v57, %s6833_s12 }
 0x325   : > { %v8351_v42 = vpop.permute.xlu1 %1190  ;;  %v8353_v37 = vpop.permute.xlu2 %1404 }
 0x326   : > { %13543 = vst [vmem:[#allocation310_spill] sm:$0xff] %v8351_v42  ;;  %v8355_v59 = vpop.permute.xlu0 %1400 }
 0x327   : > { %13544 = vst [vmem:[#allocation311_spill] sm:$0xff] %v8353_v37 }
 0x328   : > { %13545 = vst [vmem:[#allocation312_spill] sm:$0xff] %v8355_v59 }
 0x32b   : > { %1545 = vrot.lane.b32.xlu1 %v7631_v63, %s6833_s12  ;;  %1547 = vrot.lane.b32.xlu2 %v7651_v54, %s6833_s12 }
 0x32c   : > { %1549 = vrot.lane.b32.xlu0 %v7672_v15, %s6833_s12 }
 0x32d   : > { %v8363_v46 = vpop.permute.xlu1 %1082  ;;  %v8365_v30 = vpop.permute.xlu2 %1499 }
 0x32e   : > { %13546 = vst [vmem:[#allocation313_spill] sm:$0xff] %v8365_v30  ;;  %v8367_v57 = vpop.permute.xlu0 %1495 }
 0x32f   : > { %13547 = vst [vmem:[#allocation314_spill] sm:$0xff] %v8367_v57 }
 0x333   : > { %1551 = vrot.lane.b32.xlu1 %v7705_v27, %s6833_s12  ;;  %1553 = vrot.lane.b32.xlu2 %v7725_v33, %s6833_s12 }
 0x334   : > { %1555 = vrot.lane.b32.xlu0 %v7745_v49, %s6833_s12 }
 0x335   : > { %v8375_v42 = vpop.permute.xlu1 %1402  ;;  %v8377_v37 = vpop.permute.xlu2 %1505 }
 0x336   : > { %13548 = vst [vmem:[#allocation315_spill] sm:$0xff] %v8375_v42  ;;  %v8379_v59 = vpop.permute.xlu0 %1086 }
 0x337   : > { %13549 = vst [vmem:[#allocation316_spill] sm:$0xff] %v8377_v37 }
 0x33b   : > { %1557 = vrot.lane.b32.xlu1 %v7779_v23, %s6833_s12  ;;  %1559 = vrot.lane.b32.xlu2 %v7798_v35, %s6833_s12 }
 0x33c   : > { %1561 = vrot.lane.b32.xlu0 %v7818_v3, %s6833_s12 }
 0x33d   : > { %v8387_v30 = vpop.permute.xlu1 %1497  ;;  %v8389_v57 = vpop.permute.xlu2 %1410 }
 0x33e   : > { %13550 = vst [vmem:[#allocation317_spill] sm:$0xff] %v8389_v57  ;;  %v8391_v33 = vpop.permute.xlu0 %1406 }
 0x33f   : > { %13551 = vst [vmem:[#allocation318_spill] sm:$0xff] %v8391_v33 }
 0x343   : > { %1563 = vrot.lane.b32.xlu1 %v7851_v10, %s6833_s12  ;;  %1565 = vrot.lane.b32.xlu2 %v7871_v7, %s6833_s12 }
 0x344   : > { %1567 = vrot.lane.b32.xlu0 %v7896_v32, %s6833_s12 }
 0x345   : > { %v8399_v42 = vpop.permute.xlu1 %1088  ;;  %v8401_v37 = vpop.permute.xlu2 %1511 }
 0x346   : > { %13552 = vst [vmem:[#allocation319_spill] sm:$0xff] %v8401_v37  ;;  %v8403_v3 = vpop.permute.xlu0 %1501 }
 0x34b   : > { %1569 = vrot.lane.b32.xlu1 %v7930_v8, %s6833_s12  ;;  %1571 = vrot.lane.b32.xlu2 %v7950_v38, %s6833_s12 }
 0x34c   : > { %1573 = vrot.lane.b32.xlu0 %v7970_v58, %s6833_s12 }
 0x34d   : > { %v8411_v57 = vpop.permute.xlu1 %1408  ;;  %v8413_v33 = vpop.permute.xlu2 %1517 }
 0x34e   : > { %13553 = vst [vmem:[#allocation320_spill] sm:$0xff] %v8411_v57  ;;  %v8415_v32 = vpop.permute.xlu0 %1507 }
 0x34f   : > { %13554 = vst [vmem:[#allocation321_spill] sm:$0xff] %v8413_v33 }
 0x353   : > { %1575 = vrot.lane.b32.xlu1 %v8001_v1, %s6833_s12  ;;  %1577 = vrot.lane.b32.xlu2 %v8019_v12, %s6833_s12 }
 0x354   : > { %1579 = vrot.lane.b32.xlu0 %v8037_v0, %s6833_s12 }
 0x355   : > { %v8423_v8 = vpop.permute.xlu1 %1503  ;;  %v8425_v38 = vpop.permute.xlu2 %1416 }
 0x356   : > { %13555 = vst [vmem:[#allocation322_spill] sm:$0xff] %v8425_v38  ;;  %v8427_v58 = vpop.permute.xlu0 %1412 }
 0x357   : > { %13556 = vst [vmem:[#allocation323_spill] sm:$0xff] %v8427_v58 }
 0x35b   : > { %1581 = vrot.lane.b32.xlu1 %v8067_v17, %s6833_s12  ;;  %1583 = vrot.lane.b32.xlu2 %v8088_v29, %s6833_s12  ;;  %v13587_v29 = vld [vmem:[#allocation74_spill] sm:$0xff]  ;;  %v13593_v17 = vld [vmem:[#allocation91_spill] sm:$0xff] }
 0x35c   : > { %1585 = vrot.lane.b32.xlu0 %v8091_v45, %s6833_s12 }
 0x35d   : > { %v8435_v57 = vpop.permute.xlu1 %1509  ;;  %v8437_v12 = vpop.permute.xlu2 %1523 }
 0x35e   : > { %13557 = vst [vmem:[#allocation324_spill] sm:$0xff] %v8437_v12  ;;  %v8439_v0 = vpop.permute.xlu0 %1513 }
 0x35f   : > { %13558 = vst [vmem:[#allocation325_spill] sm:$0xff] %v8439_v0  ;;  %v13755_v0 = vld [vmem:[#allocation34_spill] sm:$0xff] }
 0x363   : > { %1587 = vrot.lane.b32.xlu1 %v8121_v25, %s6833_s12  ;;  %1589 = vrot.lane.b32.xlu2 %v8142_v6, %s6833_s12 }
 0x364   : > { %1591 = vrot.lane.b32.xlu0 %v8145_v19, %s6833_s12 }
 0x365   : > { %v8447_v38 = vpop.permute.xlu1 %1414  ;;  %v8449_v58 = vpop.permute.xlu2 %1529 }
 0x366   : > { %13559 = vst [vmem:[#allocation326_spill] sm:$0xff] %v8447_v38  ;;  %v8451_v45 = vpop.permute.xlu0 %1519 }
 0x367   : > { %13560 = vst [vmem:[#allocation327_spill] sm:$0xff] %v8449_v58 }
 0x368   : > { %13561 = vst [vmem:[#allocation328_spill] sm:$0xff] %v8451_v45 }
 0x36b   : > { %1593 = vrot.lane.b32.xlu1 %v8175_v20, %s6833_s12  ;;  %1595 = vrot.lane.b32.xlu2 %v8208_v22, %s6833_s12  ;;  %v13582_v20 = vld [vmem:[#allocation64_spill] sm:$0xff] }
 0x36c   : > { %1597 = vrot.lane.b32.xlu0 %v8211_v56, %s6833_s12 }
 0x36d   : > { %v8459_v25 = vpop.permute.xlu1 %1515  ;;  %v8461_v6 = vpop.permute.xlu2 %1422 }
 0x36e   : > { %13562 = vst [vmem:[#allocation329_spill] sm:$0xff] %v8459_v25  ;;  %v8463_v19 = vpop.permute.xlu0 %1418 }
 0x36f   : > { %13563 = vst [vmem:[#allocation330_spill] sm:$0xff] %v8461_v6 }
 0x370   : > { %13564 = vst [vmem:[#allocation331_spill] sm:$0xff] %v8463_v19 }
 0x373   : > { %1599 = vrot.lane.b32.xlu1 %v8241_v11, %s6833_s12  ;;  %1601 = vrot.lane.b32.xlu2 %v8262_v9, %s6833_s12  ;;  %v13169_v9 = vmov 0.0   ;;  %v13581_v11 = vld [vmem:[#allocation56_spill] sm:$0xff] }
 0x374   : > { %1603 = vrot.lane.b32.xlu0 %v8265_v55, %s6833_s12 }
 0x375   : > { %v8471_v38 = vpop.permute.xlu1 %1521  ;;  %v8473_v22 = vpop.permute.xlu2 %1535 }
 0x376   : > { %13565 = vst [vmem:[#allocation332_spill] sm:$0xff] %v8471_v38  ;;  %v8475_v56 = vpop.permute.xlu0 %1525 }
 0x377   : > { %13566 = vst [vmem:[#allocation333_spill] sm:$0xff] %v8473_v22 }
 0x378   : > { %13567 = vst [vmem:[#allocation334_spill] sm:$0xff] %v8475_v56 }
 0x37b   : > { %1605 = vrot.lane.b32.xlu1 %v8295_v41, %s6833_s12  ;;  %1607 = vrot.lane.b32.xlu2 %v8316_v13, %s6833_s12 }
 0x37c   : > { %1609 = vrot.lane.b32.xlu0 %v8319_v43, %s6833_s12 }
 0x37d   : > { %v8483_v6 = vpop.permute.xlu1 %1420  ;;  %v8485_v19 = vpop.permute.xlu2 %1541 }
 0x37e   : > { %13568 = vst [vmem:[#allocation335_spill] sm:$0xff] %v8483_v6  ;;  %v8487_v55 = vpop.permute.xlu0 %1531 }
 0x37f   : > { %13569 = vst [vmem:[#allocation336_spill] sm:$0xff] %v8485_v19  ;;  %v13670_v19 = vld [vmem:[#allocation11_spill] sm:$0xff] }
 0x380   : > { %13570 = vst [vmem:[#allocation337_spill] sm:$0xff] %v8487_v55 }
 0x383   : > { %1611 = vrot.lane.b32.xlu1 %v13169_v9, %s6833_s12  ;;  %1674 = vrot.lane.b32.xlu2 %v13169_v9, %s6835_s15  ;;  %s6842_s12 = smov 120  }
 0x384   : > { %1676 = vrot.lane.b32.xlu0 %v7143_v2, %s6835_s15 }
 0x385   : > { %v8495_v13 = vpop.permute.xlu1 %1527  ;;  %v8497_v43 = vpop.permute.xlu2 %1547 }
 0x386   : > { %13571 = vst [vmem:[#allocation338_spill] sm:$0xff] %v8495_v13  ;;  %v8499_v6 = vpop.permute.xlu0 %1424 }
 0x387   : > { %13572 = vst [vmem:[#allocation339_spill] sm:$0xff] %v8497_v43 }
 0x388   : > { %13573 = vst [vmem:[#allocation340_spill] sm:$0xff] %v8499_v6 }
 0x38b   : > { %1680 = vrot.lane.b32.xlu2 %v7191_v18, %s6835_s15  ;;  %1678 = vrot.lane.b32.xlu1 %v7195_v24, %s6835_s15  ;;  %v13577_v18 = vld [vmem:[#allocation57_spill] sm:$0xff] }
 0x38c   : > { %1682 = vrot.lane.b32.xlu0 %v7231_v47, %s6835_s15 }
 0x38d   : > { %v8507_v41 = vpop.permute.xlu1 %1533  ;;  %v8509_v9 = vpop.permute.xlu2 %1553 }
 0x38e   : > { %13574 = vst [vmem:[#allocation341_spill] sm:$0xff] %v8507_v41  ;;  %v8511_v2 = vpop.permute.xlu0 %1537 }
 0x38f   : > { %13575 = vst [vmem:[#allocation342_spill] sm:$0xff] %v8509_v9 }
 0x390   : > { %13576 = vst [vmem:[#allocation343_spill] sm:$0xff] %v8511_v2  ;;  %v13676_v2 = vld [vmem:[#allocation17_spill] sm:$0xff] }
 0x393   : > { %1686 = vrot.lane.b32.xlu2 %v7193_v21, %s6835_s15  ;;  %1684 = vrot.lane.b32.xlu1 %v7178_v14, %s6835_s15  ;;  %v13583_v21 = vld [vmem:[#allocation75_spill] sm:$0xff] }
 0x394   : > { %1688 = vrot.lane.b32.xlu0 %v13577_v18, %s6835_s15 }
 0x395   : > { %v8519_v6 = vpop.permute.xlu1 %1539  ;;  %v8521_v24 = vpop.permute.xlu2 %1559 }
 0x396   : > { %13578 = vst [vmem:[#allocation57_spill] sm:$0xff] %v8519_v6  ;;  %v8523_v47 = vpop.permute.xlu0 %1543 }
 0x397   : > { %13579 = vst [vmem:[#allocation344_spill] sm:$0xff] %v8521_v24  ;;  %v13588_v24 = vld [vmem:[#allocation82_spill] sm:$0xff] }
 0x398   : > { %13580 = vst [vmem:[#allocation345_spill] sm:$0xff] %v8523_v47 }
 0x39b   : > { %1692 = vrot.lane.b32.xlu2 %v13581_v11, %s6835_s15  ;;  %1690 = vrot.lane.b32.xlu1 %v13582_v20, %s6835_s15  ;;  %v13589_v11 = vld [vmem:[#allocation92_spill] sm:$0xff] }
 0x39c   : > { %1694 = vrot.lane.b32.xlu0 %v13583_v21, %s6835_s15 }
 0x39d   : > { %v8531_v9 = vpop.permute.xlu1 %1545  ;;  %v8533_v14 = vpop.permute.xlu2 %1565 }
 0x39e   : > { %13584 = vst [vmem:[#allocation56_spill] sm:$0xff] %v8531_v9  ;;  %v8535_v18 = vpop.permute.xlu0 %1549 }
 0x39f   : > { %13585 = vst [vmem:[#allocation64_spill] sm:$0xff] %v8533_v14  ;;  %v13594_v14 = vld [vmem:[#allocation97_spill] sm:$0xff] }
 0x3a0   : > { %13586 = vst [vmem:[#allocation75_spill] sm:$0xff] %v8535_v18 }
 0x3a3   : > { %1698 = vrot.lane.b32.xlu2 %v13587_v29, %s6835_s15  ;;  %1696 = vrot.lane.b32.xlu1 %v13588_v24, %s6835_s15  ;;  %v13595_v29 = vld [vmem:[#allocation107_spill] sm:$0xff] }
 0x3a4   : > { %1700 = vrot.lane.b32.xlu0 %v13589_v11, %s6835_s15 }
 0x3a5   : > { %v8543_v43 = vpop.permute.xlu1 %1551  ;;  %v8545_v20 = vpop.permute.xlu2 %1571 }
 0x3a6   : > { %13590 = vst [vmem:[#allocation74_spill] sm:$0xff] %v8543_v43  ;;  %v8547_v21 = vpop.permute.xlu0 %1555  ;;  %v13599_v43 = vld [vmem:[#allocation106_spill] sm:$0xff] }
 0x3a7   : > { %13591 = vst [vmem:[#allocation82_spill] sm:$0xff] %v8545_v20  ;;  %v13600_v20 = vld [vmem:[#allocation112_spill] sm:$0xff] }
 0x3a8   : > { %13592 = vst [vmem:[#allocation92_spill] sm:$0xff] %v8547_v21 }
 0x3ab   : > { %1704 = vrot.lane.b32.xlu2 %v13593_v17, %s6835_s15  ;;  %1702 = vrot.lane.b32.xlu1 %v13594_v14, %s6835_s15  ;;  %v13601_v17 = vld [vmem:[#allocation122_spill] sm:$0xff] }
 0x3ac   : > { %1706 = vrot.lane.b32.xlu0 %v13595_v29, %s6835_s15 }
 0x3ad   : > { %v8555_v18 = vpop.permute.xlu1 %1557  ;;  %v8557_v24 = vpop.permute.xlu2 %1577 }
 0x3ae   : > { %13596 = vst [vmem:[#allocation91_spill] sm:$0xff] %v8555_v18  ;;  %v8559_v11 = vpop.permute.xlu0 %1561  ;;  %v13605_v18 = vld [vmem:[#allocation121_spill] sm:$0xff] }
 0x3af   : > { %13597 = vst [vmem:[#allocation97_spill] sm:$0xff] %v8557_v24  ;;  %v13606_v24 = vld [vmem:[#allocation129_spill] sm:$0xff] }
 0x3b0   : > { %13598 = vst [vmem:[#allocation107_spill] sm:$0xff] %v8559_v11 }
 0x3b3   : > { %1710 = vrot.lane.b32.xlu2 %v13599_v43, %s6835_s15  ;;  %1708 = vrot.lane.b32.xlu1 %v13600_v20, %s6835_s15  ;;  %v13607_v43 = vld [vmem:[#allocation139_spill] sm:$0xff] }
 0x3b4   : > { %1712 = vrot.lane.b32.xlu0 %v13601_v17, %s6835_s15 }
 0x3b5   : > { %v8567_v21 = vpop.permute.xlu1 %1563  ;;  %v8569_v14 = vpop.permute.xlu2 %1583 }
 0x3b6   : > { %13602 = vst [vmem:[#allocation106_spill] sm:$0xff] %v8567_v21  ;;  %v8571_v29 = vpop.permute.xlu0 %1567  ;;  %v13611_v21 = vld [vmem:[#allocation138_spill] sm:$0xff] }
 0x3b7   : > { %13603 = vst [vmem:[#allocation112_spill] sm:$0xff] %v8569_v14  ;;  %v13612_v14 = vld [vmem:[#allocation145_spill] sm:$0xff] }
 0x3b8   : > { %13604 = vst [vmem:[#allocation122_spill] sm:$0xff] %v8571_v29 }
 0x3bb   : > { %1716 = vrot.lane.b32.xlu2 %v13605_v18, %s6835_s15  ;;  %1714 = vrot.lane.b32.xlu1 %v13606_v24, %s6835_s15  ;;  %v13613_v18 = vld [vmem:[#allocation156_spill] sm:$0xff] }
 0x3bc   : > { %1718 = vrot.lane.b32.xlu0 %v13607_v43, %s6835_s15 }
 0x3bd   : > { %v8579_v11 = vpop.permute.xlu1 %1569  ;;  %v8581_v20 = vpop.permute.xlu2 %1589 }
 0x3be   : > { %13608 = vst [vmem:[#allocation121_spill] sm:$0xff] %v8579_v11  ;;  %v8583_v17 = vpop.permute.xlu0 %1573  ;;  %v13617_v11 = vld [vmem:[#allocation155_spill] sm:$0xff] }
 0x3bf   : > { %13609 = vst [vmem:[#allocation129_spill] sm:$0xff] %v8581_v20  ;;  %v13618_v20 = vld [vmem:[#allocation163_spill] sm:$0xff] }
 0x3c0   : > { %13610 = vst [vmem:[#allocation139_spill] sm:$0xff] %v8583_v17 }
 0x3c3   : > { %1722 = vrot.lane.b32.xlu2 %v13611_v21, %s6835_s15  ;;  %1720 = vrot.lane.b32.xlu1 %v13612_v14, %s6835_s15  ;;  %v13619_v21 = vld [vmem:[#allocation174_spill] sm:$0xff] }
 0x3c4   : > { %1724 = vrot.lane.b32.xlu0 %v13613_v18, %s6835_s15 }
 0x3c5   : > { %v8591_v29 = vpop.permute.xlu1 %1575  ;;  %v8593_v24 = vpop.permute.xlu2 %1595 }
 0x3c6   : > { %13614 = vst [vmem:[#allocation138_spill] sm:$0xff] %v8591_v29  ;;  %v8595_v43 = vpop.permute.xlu0 %1579  ;;  %v13623_v29 = vld [vmem:[#allocation173_spill] sm:$0xff] }
 0x3c7   : > { %13615 = vst [vmem:[#allocation145_spill] sm:$0xff] %v8593_v24  ;;  %v13624_v24 = vld [vmem:[#allocation181_spill] sm:$0xff] }
 0x3c8   : > { %13616 = vst [vmem:[#allocation156_spill] sm:$0xff] %v8595_v43 }
 0x3cb   : > { %1728 = vrot.lane.b32.xlu2 %v13617_v11, %s6835_s15  ;;  %1726 = vrot.lane.b32.xlu1 %v13618_v20, %s6835_s15  ;;  %v13625_v11 = vld [vmem:[#allocation192_spill] sm:$0xff] }
 0x3cc   : > { %1730 = vrot.lane.b32.xlu0 %v13619_v21, %s6835_s15 }
 0x3cd   : > { %v8603_v17 = vpop.permute.xlu1 %1581  ;;  %v8605_v14 = vpop.permute.xlu2 %1601 }
 0x3ce   : > { %13620 = vst [vmem:[#allocation155_spill] sm:$0xff] %v8603_v17  ;;  %v8607_v18 = vpop.permute.xlu0 %1585  ;;  %v13629_v17 = vld [vmem:[#allocation191_spill] sm:$0xff] }
 0x3cf   : > { %13621 = vst [vmem:[#allocation163_spill] sm:$0xff] %v8605_v14  ;;  %v13630_v14 = vld [vmem:[#allocation199_spill] sm:$0xff] }
 0x3d0   : > { %13622 = vst [vmem:[#allocation174_spill] sm:$0xff] %v8607_v18 }
 0x3d3   : > { %1734 = vrot.lane.b32.xlu2 %v13623_v29, %s6835_s15  ;;  %1732 = vrot.lane.b32.xlu1 %v13624_v24, %s6835_s15  ;;  %v13631_v29 = vld [vmem:[#allocation210_spill] sm:$0xff] }
 0x3d4   : > { %1736 = vrot.lane.b32.xlu0 %v13625_v11, %s6835_s15 }
 0x3d5   : > { %v8615_v43 = vpop.permute.xlu1 %1587  ;;  %v8617_v20 = vpop.permute.xlu2 %1607 }
 0x3d6   : > { %13626 = vst [vmem:[#allocation173_spill] sm:$0xff] %v8615_v43  ;;  %v8619_v21 = vpop.permute.xlu0 %1591  ;;  %v13634_v43 = vld [vmem:[#allocation209_spill] sm:$0xff] }
 0x3d7   : > { %13627 = vst [vmem:[#allocation181_spill] sm:$0xff] %v8617_v20  ;;  %v13635_v20 = vld [vmem:[#allocation217_spill] sm:$0xff] }
 0x3d8   : > { %13628 = vst [vmem:[#allocation192_spill] sm:$0xff] %v8619_v21 }
 0x3db   : > { %1740 = vrot.lane.b32.xlu2 %v13629_v17, %s6835_s15  ;;  %1738 = vrot.lane.b32.xlu1 %v13630_v14, %s6835_s15  ;;  %v13636_v17 = vld [vmem:[#allocation228_spill] sm:$0xff] }
 0x3dc   : > { %1742 = vrot.lane.b32.xlu0 %v13631_v29, %s6835_s15 }
 0x3dd   : > { %v8627_v18 = vpop.permute.xlu1 %1593  ;;  %v8629_v24 = vpop.permute.xlu2 %1674 }
 0x3de   : > { %13632 = vst [vmem:[#allocation191_spill] sm:$0xff] %v8627_v18  ;;  %v8631_v11 = vpop.permute.xlu0 %1597  ;;  %v13640_v18 = vld [vmem:[#allocation227_spill] sm:$0xff] }
 0x3df   : > { %13633 = vst [vmem:[#allocation199_spill] sm:$0xff] %v8631_v11  ;;  %v13641_v11 = vld [vmem:[#allocation235_spill] sm:$0xff] }
 0x3e3   : > { %1746 = vrot.lane.b32.xlu2 %v13634_v43, %s6835_s15  ;;  %1744 = vrot.lane.b32.xlu1 %v13635_v20, %s6835_s15  ;;  %v13642_v43 = vld [vmem:[#allocation247_spill] sm:$0xff] }
 0x3e4   : > { %1748 = vrot.lane.b32.xlu0 %v13636_v17, %s6835_s15 }
 0x3e5   : > { %v8639_v21 = vpop.permute.xlu1 %1599  ;;  %v8641_v14 = vpop.permute.xlu2 %1680 }
 0x3e6   : > { %13637 = vst [vmem:[#allocation210_spill] sm:$0xff] %v8639_v21  ;;  %v8643_v29 = vpop.permute.xlu0 %1603  ;;  %v13646_v21 = vld [vmem:[#allocation246_spill] sm:$0xff] }
 0x3e7   : > { %13638 = vst [vmem:[#allocation209_spill] sm:$0xff] %v8641_v14 }
 0x3e8   : > { %13639 = vst [vmem:[#allocation217_spill] sm:$0xff] %v8643_v29  ;;  %v13647_v29 = vld [vmem:[#allocation254_spill] sm:$0xff] }
 0x3eb   : > { %1752 = vrot.lane.b32.xlu2 %v13640_v18, %s6835_s15  ;;  %1750 = vrot.lane.b32.xlu1 %v13641_v11, %s6835_s15 }
 0x3ec   : > { %1754 = vrot.lane.b32.xlu0 %v13642_v43, %s6835_s15 }
 0x3ed   : > { %v8651_v9 = vpop.permute.xlu1 %1605  ;;  %v8653_v20 = vpop.permute.xlu2 %1686 }
 0x3ee   : > { %13643 = vst [vmem:[#allocation228_spill] sm:$0xff] %v8651_v9  ;;  %v8655_v17 = vpop.permute.xlu0 %1609  ;;  %v13650_v9 = vld [vmem:[#allocation266_spill] sm:$0xff] }
 0x3ef   : > { %13644 = vst [vmem:[#allocation227_spill] sm:$0xff] %v8653_v20 }
 0x3f0   : > { %13645 = vst [vmem:[#allocation235_spill] sm:$0xff] %v8655_v17  ;;  %v13651_v17 = vld [vmem:[#allocation272_spill] sm:$0xff] }
 0x3f3   : > { %1758 = vrot.lane.b32.xlu2 %v13646_v21, %s6835_s15  ;;  %1756 = vrot.lane.b32.xlu1 %v13647_v29, %s6835_s15 }
 0x3f4   : > { %1760 = vrot.lane.b32.xlu0 %v8157_v39, %s6835_s15 }
 0x3f5   : > { %v8663_v18 = vpop.permute.xlu1 %1611  ;;  %v8665_v11 = vpop.permute.xlu2 %1692 }
 0x3f6   : > { %13648 = vst [vmem:[#allocation247_spill] sm:$0xff] %v8663_v18  ;;  %v8667_v43 = vpop.permute.xlu0 %1676  ;;  %v13663_v18 = vld [vmem:[#allocation3_spill] sm:$0xff] }
 0x3f7   : > { %13649 = vst [vmem:[#allocation246_spill] sm:$0xff] %v8665_v11 }
 0x3fb   : > { %1764 = vrot.lane.b32.xlu2 %v13650_v9, %s6835_s15  ;;  %1762 = vrot.lane.b32.xlu1 %v13651_v17, %s6835_s15 }
 0x3fc   : > { %1766 = vrot.lane.b32.xlu0 %v8223_v48, %s6835_s15 }
 0x3fd   : > { %v8675_v21 = vpop.permute.xlu2 %1698  ;;  %v8677_v29 = vpop.permute.xlu1 %1678 }
 0x3fe   : > { %13652 = vst [vmem:[#allocation254_spill] sm:$0xff] %v8675_v21  ;;  %v8679_v39 = vpop.permute.xlu0 %1682 }
 0x3ff   : > { %13653 = vst [vmem:[#allocation266_spill] sm:$0xff] %v8679_v39 }
 0x403   : > { %1770 = vrot.lane.b32.xlu2 %v8221_v52, %s6835_s15  ;;  %1768 = vrot.lane.b32.xlu1 %v8255_v4, %s6835_s15 }
 0x404   : > { %1772 = vrot.lane.b32.xlu0 %v8292_v50, %s6835_s15 }
 0x405   : > { %v8687_v9 = vpop.permute.xlu2 %1704  ;;  %v8689_v17 = vpop.permute.xlu1 %1684 }
 0x406   : > { %13654 = vst [vmem:[#allocation272_spill] sm:$0xff] %v8687_v9  ;;  %v8691_v48 = vpop.permute.xlu0 %1688 }
 0x407   : > { %13655 = vst [vmem:[#allocation346_spill] sm:$0xff] %v8689_v17 }
 0x408   : > { %13656 = vst [vmem:[#allocation347_spill] sm:$0xff] %v8691_v48 }
 0x40b   : > { %1776 = vrot.lane.b32.xlu2 %v8290_v44, %s6835_s15  ;;  %1774 = vrot.lane.b32.xlu1 %v8327_v16, %s6835_s15 }
 0x40c   : > { %1778 = vrot.lane.b32.xlu0 %v8343_v26, %s6835_s15 }
 0x40d   : > { %v8699_v52 = vpop.permute.xlu2 %1710  ;;  %v8701_v4 = vpop.permute.xlu1 %1690 }
 0x40e   : > { %13657 = vst [vmem:[#allocation348_spill] sm:$0xff] %v8699_v52  ;;  %v8703_v50 = vpop.permute.xlu0 %1694  ;;  %v13669_v52 = vld [vmem:[#allocation7_spill] sm:$0xff] }
 0x40f   : > { %13658 = vst [vmem:[#allocation349_spill] sm:$0xff] %v8701_v4 }
 0x410   : > { %13659 = vst [vmem:[#allocation350_spill] sm:$0xff] %v8703_v50 }
 0x413   : > { %1782 = vrot.lane.b32.xlu2 %v8341_v36, %s6835_s15  ;;  %1780 = vrot.lane.b32.xlu1 %v8363_v46, %s6835_s15  ;;  %v13664_v36 = vld [vmem:[#allocation5_spill] sm:$0xff] }
 0x414   : > { %1784 = vrot.lane.b32.xlu0 %v8379_v59, %s6835_s15 }
 0x415   : > { %v8711_v44 = vpop.permute.xlu2 %1716  ;;  %v8713_v16 = vpop.permute.xlu1 %1696 }
 0x416   : > { %13660 = vst [vmem:[#allocation351_spill] sm:$0xff] %v8711_v44  ;;  %v8715_v26 = vpop.permute.xlu0 %1700  ;;  %v13668_v44 = vld [vmem:[#allocation9_spill] sm:$0xff] }
 0x417   : > { %13661 = vst [vmem:[#allocation352_spill] sm:$0xff] %v8713_v16 }
 0x418   : > { %13662 = vst [vmem:[#allocation353_spill] sm:$0xff] %v8715_v26 }
 0x41b   : > { %1845 = vrot.lane.b32.xlu2 %v13663_v18, %s6835_s15  ;;  %1786 = vrot.lane.b32.xlu1 %v8399_v42, %s6835_s15 }
 0x41c   : > { %1847 = vrot.lane.b32.xlu0 %v13664_v36, %s6835_s15 }
 0x41d   : > { %v8723_v47 = vpop.permute.xlu2 %1722  ;;  %v8725_v46 = vpop.permute.xlu1 %1702 }
 0x41e   : > { %13665 = vst [vmem:[#allocation354_spill] sm:$0xff] %v8723_v47  ;;  %v8727_v59 = vpop.permute.xlu0 %1706  ;;  %v13674_v47 = vld [vmem:[#allocation15_spill] sm:$0xff] }
 0x41f   : > { %13666 = vst [vmem:[#allocation355_spill] sm:$0xff] %v8725_v46 }
 0x420   : > { %13667 = vst [vmem:[#allocation356_spill] sm:$0xff] %v8727_v59  ;;  %v13675_v59 = vld [vmem:[#allocation13_spill] sm:$0xff] }
 0x423   : > { %1851 = vrot.lane.b32.xlu2 %v13668_v44, %s6835_s15  ;;  %1849 = vrot.lane.b32.xlu1 %v13669_v52, %s6835_s15 }
 0x424   : > { %1853 = vrot.lane.b32.xlu0 %v13670_v19, %s6835_s15 }
 0x425   : > { %v8735_v1 = vpop.permute.xlu2 %1728  ;;  %v8737_v42 = vpop.permute.xlu1 %1708 }
 0x426   : > { %13671 = vst [vmem:[#allocation357_spill] sm:$0xff] %v8735_v1  ;;  %v8739_v6 = vpop.permute.xlu0 %1712  ;;  %v13680_v1 = vld [vmem:[#allocation21_spill] sm:$0xff] }
 0x427   : > { %13672 = vst [vmem:[#allocation358_spill] sm:$0xff] %v8737_v42 }
 0x428   : > { %13673 = vst [vmem:[#allocation359_spill] sm:$0xff] %v8739_v6  ;;  %v13681_v6 = vld [vmem:[#allocation19_spill] sm:$0xff] }
 0x42b   : > { %1857 = vrot.lane.b32.xlu2 %v13674_v47, %s6835_s15  ;;  %1855 = vrot.lane.b32.xlu1 %v13675_v59, %s6835_s15 }
 0x42c   : > { %1859 = vrot.lane.b32.xlu0 %v13676_v2, %s6835_s15 }
 0x42d   : > { %v8747_v9 = vpop.permute.xlu2 %1734  ;;  %v8749_v22 = vpop.permute.xlu1 %1714 }
 0x42e   : > { %13677 = vst [vmem:[#allocation360_spill] sm:$0xff] %v8747_v9  ;;  %v8751_v46 = vpop.permute.xlu0 %1718  ;;  %v13685_v9 = vld [vmem:[#allocation32_spill] sm:$0xff] }
 0x42f   : > { %13678 = vst [vmem:[#allocation361_spill] sm:$0xff] %v8749_v22 }
 0x430   : > { %13679 = vst [vmem:[#allocation362_spill] sm:$0xff] %v8751_v46  ;;  %v13686_v46 = vld [vmem:[#allocation27_spill] sm:$0xff] }
 0x433   : > { %1863 = vrot.lane.b32.xlu2 %v13680_v1, %s6835_s15  ;;  %1861 = vrot.lane.b32.xlu1 %v13681_v6, %s6835_s15 }
 0x434   : > { %1865 = vrot.lane.b32.xlu0 %v7129_v62, %s6835_s15 }
 0x435   : > { %v8759_v42 = vpop.permute.xlu2 %1740  ;;  %v8761_v41 = vpop.permute.xlu1 %1720 }
 0x436   : > { %13682 = vst [vmem:[#allocation363_spill] sm:$0xff] %v8759_v42  ;;  %v8763_v26 = vpop.permute.xlu0 %1724  ;;  %v13690_v42 = vld [vmem:[#allocation45_spill] sm:$0xff] }
 0x437   : > { %13683 = vst [vmem:[#allocation364_spill] sm:$0xff] %v8761_v41 }
 0x438   : > { %13684 = vst [vmem:[#allocation365_spill] sm:$0xff] %v8763_v26  ;;  %v13691_v26 = vld [vmem:[#allocation41_spill] sm:$0xff] }
 0x43b   : > { %1869 = vrot.lane.b32.xlu2 %v13685_v9, %s6835_s15  ;;  %1867 = vrot.lane.b32.xlu1 %v13686_v46, %s6835_s15 }
 0x43c   : > { %1871 = vrot.lane.b32.xlu0 %v7199_v28, %s6835_s15 }
 0x43d   : > { %v8771_v22 = vpop.permute.xlu2 %1746  ;;  %v8773_v55 = vpop.permute.xlu1 %1726 }
 0x43e   : > { %13687 = vst [vmem:[#allocation27_spill] sm:$0xff] %v8771_v22  ;;  %v8775_v7 = vpop.permute.xlu0 %1730  ;;  %v13695_v22 = vld [vmem:[#allocation63_spill] sm:$0xff] }
 0x43f   : > { %13688 = vst [vmem:[#allocation366_spill] sm:$0xff] %v8773_v55  ;;  %v13697_v55 = vld [vmem:[#allocation71_spill] sm:$0xff] }
 0x440   : > { %13689 = vst [vmem:[#allocation367_spill] sm:$0xff] %v8775_v7  ;;  %v13696_v7 = vld [vmem:[#allocation58_spill] sm:$0xff] }
 0x443   : > { %1875 = vrot.lane.b32.xlu2 %v13690_v42, %s6835_s15  ;;  %1873 = vrot.lane.b32.xlu1 %v13691_v26, %s6835_s15 }
 0x444   : > { %1877 = vrot.lane.b32.xlu0 %v7271_v40, %s6835_s15 }
 0x445   : > { %v8783_v41 = vpop.permute.xlu2 %1752  ;;  %v8785_v21 = vpop.permute.xlu1 %1732 }
 0x446   : > { %13692 = vst [vmem:[#allocation45_spill] sm:$0xff] %v8783_v41  ;;  %v8787_v58 = vpop.permute.xlu0 %1736  ;;  %v13701_v41 = vld [vmem:[#allocation81_spill] sm:$0xff] }
 0x447   : > { %13693 = vst [vmem:[#allocation368_spill] sm:$0xff] %v8785_v21 }
 0x448   : > { %13694 = vst [vmem:[#allocation369_spill] sm:$0xff] %v8787_v58  ;;  %v13702_v58 = vld [vmem:[#allocation76_spill] sm:$0xff] }
 0x44b   : > { %1881 = vrot.lane.b32.xlu2 %v13695_v22, %s6835_s15  ;;  %1879 = vrot.lane.b32.xlu1 %v13696_v7, %s6835_s15 }
 0x44c   : > { %1883 = vrot.lane.b32.xlu0 %v13697_v55, %s6835_s15 }
 0x44d   : > { %v8795_v10 = vpop.permute.xlu2 %1758  ;;  %v8797_v16 = vpop.permute.xlu1 %1738 }
 0x44e   : > { %13698 = vst [vmem:[#allocation63_spill] sm:$0xff] %v8795_v10  ;;  %v8799_v13 = vpop.permute.xlu0 %1742 }
 0x44f   : > { %13699 = vst [vmem:[#allocation71_spill] sm:$0xff] %v8797_v16 }
 0x450   : > { %13700 = vst [vmem:[#allocation370_spill] sm:$0xff] %v8799_v13 }
 0x453   : > { %1887 = vrot.lane.b32.xlu2 %v13701_v41, %s6835_s15  ;;  %1885 = vrot.lane.b32.xlu1 %v13702_v58, %s6835_s15 }
 0x454   : > { %1889 = vrot.lane.b32.xlu0 %v7415_v60, %s6835_s15 }
 0x455   : > { %v8807_v21 = vpop.permute.xlu2 %1764  ;;  %v8809_v50 = vpop.permute.xlu1 %1744 }
 0x456   : > { %13703 = vst [vmem:[#allocation81_spill] sm:$0xff] %v8807_v21  ;;  %v8811_v56 = vpop.permute.xlu0 %1748 }
 0x457   : > { %13704 = vst [vmem:[#allocation76_spill] sm:$0xff] %v8809_v50 }
 0x458   : > { %13705 = vst [vmem:[#allocation371_spill] sm:$0xff] %v8811_v56 }
 0x45b   : > { %1893 = vrot.lane.b32.xlu2 %v7456_v34, %s6835_s15  ;;  %1891 = vrot.lane.b32.xlu1 %v7435_v51, %s6835_s15 }
 0x45c   : > { %1895 = vrot.lane.b32.xlu0 %v7487_v61, %s6835_s15 }
 0x45d   : > { %v8819_v10 = vpop.permute.xlu2 %1770  ;;  %v8821_v13 = vpop.permute.xlu1 %1750 }
 0x45e   : > { %13706 = vst [vmem:[#allocation372_spill] sm:$0xff] %v8819_v10  ;;  %v8823_v16 = vpop.permute.xlu0 %1754  ;;  %v13712_v10 = vld [vmem:[#allocation128_spill] sm:$0xff] }
 0x45f   : > { %13707 = vst [vmem:[#allocation373_spill] sm:$0xff] %v8821_v13 }
 0x460   : > { %13708 = vst [vmem:[#allocation374_spill] sm:$0xff] %v8823_v16  ;;  %v13713_v16 = vld [vmem:[#allocation123_spill] sm:$0xff] }
 0x463   : > { %1899 = vrot.lane.b32.xlu2 %v7528_v31, %s6835_s15  ;;  %1897 = vrot.lane.b32.xlu1 %v7507_v53, %s6835_s15 }
 0x464   : > { %1901 = vrot.lane.b32.xlu0 %v7559_v5, %s6835_s15 }
 0x465   : > { %v8831_v21 = vpop.permute.xlu2 %1776  ;;  %v8833_v56 = vpop.permute.xlu1 %1756 }
 0x466   : > { %13709 = vst [vmem:[#allocation375_spill] sm:$0xff] %v8831_v21  ;;  %v8835_v50 = vpop.permute.xlu0 %1760 }
 0x467   : > { %13710 = vst [vmem:[#allocation376_spill] sm:$0xff] %v8833_v56 }
 0x468   : > { %13711 = vst [vmem:[#allocation377_spill] sm:$0xff] %v8835_v50 }
 0x46b   : > { %1905 = vrot.lane.b32.xlu2 %v13712_v10, %s6835_s15  ;;  %1903 = vrot.lane.b32.xlu1 %v13713_v16, %s6835_s15 }
 0x46c   : > { %1907 = vrot.lane.b32.xlu0 %v7631_v63, %s6835_s15 }
 0x46d   : > { %v8843_v13 = vpop.permute.xlu2 %1782  ;;  %v8845_v11 = vpop.permute.xlu1 %1762 }
 0x46e   : > { %13714 = vst [vmem:[#allocation128_spill] sm:$0xff] %v8843_v13  ;;  %v8847_v12 = vpop.permute.xlu0 %1766  ;;  %v13719_v13 = vld [vmem:[#allocation157_spill] sm:$0xff] }
 0x46f   : > { %13715 = vst [vmem:[#allocation123_spill] sm:$0xff] %v8845_v11 }
 0x470   : > { %13716 = vst [vmem:[#allocation378_spill] sm:$0xff] %v8847_v12 }
 0x473   : > { %1911 = vrot.lane.b32.xlu2 %v7672_v15, %s6835_s15  ;;  %1909 = vrot.lane.b32.xlu1 %v7651_v54, %s6835_s15 }
 0x474   : > { %1913 = vrot.lane.b32.xlu0 %v7705_v27, %s6835_s15 }
 0x475   : > { %v8855_v21 = vpop.permute.xlu2 %1845  ;;  %v8857_v50 = vpop.permute.xlu1 %1768 }
 0x476   : > { %13717 = vst [vmem:[#allocation379_spill] sm:$0xff] %v8857_v50  ;;  %v8859_v56 = vpop.permute.xlu0 %1772 }
 0x477   : > { %13718 = vst [vmem:[#allocation380_spill] sm:$0xff] %v8859_v56  ;;  %v13722_v56 = vmov 0.0  }
 0x47b   : > { %1917 = vrot.lane.b32.xlu2 %v7745_v49, %s6835_s15  ;;  %1915 = vrot.lane.b32.xlu1 %v13719_v13, %s6835_s15 }
 0x47c   : > { %1919 = vrot.lane.b32.xlu0 %v7779_v23, %s6835_s15 }
 0x47d   : > { %v8867_v12 = vpop.permute.xlu2 %1851  ;;  %v8869_v11 = vpop.permute.xlu1 %1774 }
 0x47e   : > { %13720 = vst [vmem:[#allocation381_spill] sm:$0xff] %v8869_v11  ;;  %v8871_v4 = vpop.permute.xlu0 %1778 }
 0x47f   : > { %13721 = vst [vmem:[#allocation382_spill] sm:$0xff] %v8871_v4 }
 0x483   : > { %2037 = vrot.lane.b32.xlu2 %v13681_v6, %s6836_s16  ;;  %1921 = vrot.lane.b32.xlu1 %v7798_v35, %s6835_s15 }
 0x484   : > { %2208 = vrot.lane.b32.xlu0 %v13722_v56, %s6837_s19 }
 0x485   : > { %v8879_v50 = vpop.permute.xlu2 %1857  ;;  %v8881_v23 = vpop.permute.xlu1 %1780 }
 0x486   : > { %13723 = vst [vmem:[#allocation383_spill] sm:$0xff] %v8881_v23  ;;  %v8883_v38 = vpop.permute.xlu0 %1784 }
 0x487   : > { %13724 = vst [vmem:[#allocation384_spill] sm:$0xff] %v8883_v38 }
 0x48b   : > { %2559 = vrot.lane.b32.xlu2 %v13685_v9, %s6837_s19  ;;  %2367 = vrot.lane.b32.xlu1 %v13663_v18, %s6838_s20 }
 0x48c   : > { %2715 = vrot.lane.b32.xlu0 %v13722_v56, %s6839_s22 }
 0x48d   : > { %v8891_v4 = vpop.permute.xlu2 %1863  ;;  %v8893_v11 = vpop.permute.xlu1 %1786 }
 0x48e   : > { %13725 = vst [vmem:[#allocation385_spill] sm:$0xff] %v8893_v11  ;;  %v8895_v35 = vpop.permute.xlu0 %1847 }
 0x493   : > { %3054 = vrot.lane.b32.xlu2 %v7271_v40, %s6840_s23  ;;  %2862 = vrot.lane.b32.xlu1 %v13663_v18, %s6841_s24 }
 0x494   : > { %2039 = vrot.lane.b32.xlu0 %v13680_v1, %s6836_s16 }
 0x495   : > { %v8903_v38 = vpop.permute.xlu2 %1869  ;;  %v8905_v23 = vpop.permute.xlu1 %1849 }
 0x496   : > { %13726 = vst [vmem:[#allocation386_spill] sm:$0xff] %v8903_v38  ;;  %v8907_v56 = vpop.permute.xlu0 %1853 }
 0x49b   : > { %2561 = vrot.lane.b32.xlu2 %v7199_v28, %s6837_s19  ;;  %2369 = vrot.lane.b32.xlu1 %v13664_v36, %s6838_s20 }
 0x49c   : > { %2864 = vrot.lane.b32.xlu0 %v13664_v36, %s6841_s24 }
 0x49d   : > { %v8915_v11 = vpop.permute.xlu2 %1875  ;;  %v8917_v49 = vpop.permute.xlu1 %1855 }
 0x49e   : > { %13727 = vst [vmem:[#allocation387_spill] sm:$0xff] %v8915_v11  ;;  %v8919_v48 = vpop.permute.xlu0 %1859 }
 0x4a3   : > { %2041 = vrot.lane.b32.xlu2 %v7129_v62, %s6836_s16  ;;  %3056 = vrot.lane.b32.xlu1 %v13696_v7, %s6840_s23 }
 0x4a4   : > { %2371 = vrot.lane.b32.xlu0 %v13669_v52, %s6838_s20 }
 0x4a5   : > { %v8927_v45 = vpop.permute.xlu2 %1881  ;;  %v8929_v13 = vpop.permute.xlu1 %1861 }
 0x4a6   : > { %13728 = vst [vmem:[#allocation388_spill] sm:$0xff] %v8927_v45  ;;  %v8931_v20 = vpop.permute.xlu0 %1865 }
 0x4a7   : > { %13729 = vst [vmem:[#allocation389_spill] sm:$0xff] %v8931_v20 }
 0x4ab   : > { %2866 = vrot.lane.b32.xlu2 %v13669_v52, %s6841_s24  ;;  %2563 = vrot.lane.b32.xlu1 %v13691_v26, %s6837_s19 }
 0x4ac   : > { %3058 = vrot.lane.b32.xlu0 %v13695_v22, %s6840_s23 }
 0x4ad   : > { %v8939_v11 = vpop.permute.xlu2 %1887  ;;  %v8941_v33 = vpop.permute.xlu1 %1867 }
 0x4ae   : > { %13730 = vst [vmem:[#allocation390_spill] sm:$0xff] %v8939_v11  ;;  %v8943_v38 = vpop.permute.xlu0 %1871 }
 0x4af   : > { %13731 = vst [vmem:[#allocation391_spill] sm:$0xff] %v8941_v33 }
 0x4b0   : > { %13732 = vst [vmem:[#allocation392_spill] sm:$0xff] %v8943_v38 }
 0x4b3   : > { %2373 = vrot.lane.b32.xlu2 %v13668_v44, %s6838_s20  ;;  %2043 = vrot.lane.b32.xlu1 %v13686_v46, %s6836_s16 }
 0x4b4   : > { %2565 = vrot.lane.b32.xlu0 %v13690_v42, %s6837_s19 }
 0x4b5   : > { %v8951_v45 = vpop.permute.xlu2 %1893  ;;  %v8953_v17 = vpop.permute.xlu1 %1873 }
 0x4b6   : > { %13733 = vst [vmem:[#allocation393_spill] sm:$0xff] %v8951_v45  ;;  %v8955_v27 = vpop.permute.xlu0 %1877 }
 0x4b7   : > { %13734 = vst [vmem:[#allocation394_spill] sm:$0xff] %v8953_v17 }
 0x4b8   : > { %13735 = vst [vmem:[#allocation395_spill] sm:$0xff] %v8955_v27 }
 0x4bb   : > { %3060 = vrot.lane.b32.xlu2 %v13697_v55, %s6840_s23  ;;  %2868 = vrot.lane.b32.xlu1 %v13668_v44, %s6841_s24 }
 0x4bc   : > { %2045 = vrot.lane.b32.xlu0 %v13685_v9, %s6836_s16 }
 0x4bd   : > { %v8963_v11 = vpop.permute.xlu2 %1899  ;;  %v8965_v38 = vpop.permute.xlu1 %1879 }
 0x4be   : > { %13736 = vst [vmem:[#allocation396_spill] sm:$0xff] %v8963_v11  ;;  %v8967_v25 = vpop.permute.xlu0 %1883 }
 0x4bf   : > { %13737 = vst [vmem:[#allocation397_spill] sm:$0xff] %v8965_v38 }
 0x4c0   : > { %13738 = vst [vmem:[#allocation398_spill] sm:$0xff] %v8967_v25 }
 0x4c3   : > { %2567 = vrot.lane.b32.xlu2 %v7271_v40, %s6837_s19  ;;  %2375 = vrot.lane.b32.xlu1 %v13670_v19, %s6838_s20 }
 0x4c4   : > { %2870 = vrot.lane.b32.xlu0 %v13670_v19, %s6841_s24 }
 0x4c5   : > { %v8975_v45 = vpop.permute.xlu2 %1905  ;;  %v8977_v27 = vpop.permute.xlu1 %1885 }
 0x4c6   : > { %13739 = vst [vmem:[#allocation399_spill] sm:$0xff] %v8975_v45  ;;  %v8979_v17 = vpop.permute.xlu0 %1889 }
 0x4c7   : > { %13740 = vst [vmem:[#allocation400_spill] sm:$0xff] %v8977_v27 }
 0x4c8   : > { %13741 = vst [vmem:[#allocation401_spill] sm:$0xff] %v8979_v17 }
 0x4cb   : > { %2047 = vrot.lane.b32.xlu2 %v7199_v28, %s6836_s16  ;;  %3062 = vrot.lane.b32.xlu1 %v13702_v58, %s6840_s23 }
 0x4cc   : > { %2377 = vrot.lane.b32.xlu0 %v13675_v59, %s6838_s20 }
 0x4cd   : > { %v8987_v11 = vpop.permute.xlu2 %1911  ;;  %v8989_v25 = vpop.permute.xlu1 %1891 }
 0x4ce   : > { %13742 = vst [vmem:[#allocation402_spill] sm:$0xff] %v8987_v11  ;;  %v8991_v38 = vpop.permute.xlu0 %1895 }
 0x4cf   : > { %13743 = vst [vmem:[#allocation403_spill] sm:$0xff] %v8989_v25 }
 0x4d0   : > { %13744 = vst [vmem:[#allocation404_spill] sm:$0xff] %v8991_v38 }
 0x4d3   : > { %2872 = vrot.lane.b32.xlu2 %v13675_v59, %s6841_s24  ;;  %2569 = vrot.lane.b32.xlu1 %v13696_v7, %s6837_s19 }
 0x4d4   : > { %3064 = vrot.lane.b32.xlu0 %v13701_v41, %s6840_s23 }
 0x4d5   : > { %v8999_v45 = vpop.permute.xlu2 %1917  ;;  %v9001_v17 = vpop.permute.xlu1 %1897 }
 0x4d6   : > { %13745 = vst [vmem:[#allocation405_spill] sm:$0xff] %v8999_v45  ;;  %v9003_v27 = vpop.permute.xlu0 %1901  ;;  %v3917_v45 = vld [vmem:[%s13016_s3 + $0x10] sm:$0xff] }
 0x4d7   : > { %13746 = vst [vmem:[#allocation406_spill] sm:$0xff] %v9001_v17  ;;  %4128 = vmatpush.msra.mxu1 %v3917_v45  ;;  %v3915_v45 = vld [vmem:[%s13016_s3] sm:$0xff] }
 0x4d8   : > { %13747 = vst [vmem:[#allocation407_spill] sm:$0xff] %v9003_v27 }
 0x4db   : > { %2379 = vrot.lane.b32.xlu2 %v13674_v47, %s6838_s20  ;;  %2049 = vrot.lane.b32.xlu1 %v13691_v26, %s6836_s16 }
 0x4dc   : > { %2571 = vrot.lane.b32.xlu0 %v13695_v22, %s6837_s19 }
 0x4dd   : > { %v2038_v11 = vpop.permute.xlu2 %2037  ;;  %v9011_v38 = vpop.permute.xlu1 %1903 }
 0x4de   : > { %13748 = vst [vmem:[#allocation408_spill] sm:$0xff] %v9011_v38  ;;  %v9013_v25 = vpop.permute.xlu0 %1907  ;;  %v3916_v38 = vld [vmem:[%s13016_s3 + $0x8] sm:$0xff] }
 0x4df   : > { %13749 = vst [vmem:[#allocation409_spill] sm:$0xff] %v9013_v25  ;;  %4129 = vmatpush.msra.mxu1 %v3916_v38 }
 0x4e1   : > { %4130 = vmatpush.msra.mxu1 %v3915_v45 }
 0x4e3   : > { %3066 = vrot.lane.b32.xlu2 %v7415_v60, %s6840_s23  ;;  %2874 = vrot.lane.b32.xlu1 %v13674_v47, %s6841_s24 }
 0x4e4   : > { %2051 = vrot.lane.b32.xlu0 %v13690_v42, %s6836_s16 }
 0x4e5   : > { %v2560_v27 = vpop.permute.xlu2 %2559  ;;  %v9027_v25 = vpop.permute.xlu1 %1909 }
 0x4e6   : > { %13750 = vst [vmem:[#allocation410_spill] sm:$0xff] %v9027_v25  ;;  %v9029_v17 = vpop.permute.xlu0 %1913 }
 0x4e7   : > { %13751 = vst [vmem:[#allocation411_spill] sm:$0xff] %v9029_v17 }
 0x4eb   : > { %2573 = vrot.lane.b32.xlu2 %v13697_v55, %s6837_s19  ;;  %2381 = vrot.lane.b32.xlu1 %v13676_v2, %s6838_s20 }
 0x4ec   : > { %2876 = vrot.lane.b32.xlu0 %v13676_v2, %s6841_s24 }
 0x4ed   : > { %v3055_v33 = vpop.permute.xlu2 %3054  ;;  %v9040_v39 = vpop.permute.xlu1 %1915 }
 0x4ee   : > { %13752 = vst [vmem:[#allocation412_spill] sm:$0xff] %v9040_v39  ;;  %v9042_v38 = vpop.permute.xlu0 %1919  ;;  %v3202_v39 = vsel %vm3201_vm1, 0.0, %v13755_v0 }
 0x4ef   : > { %13753 = vst [vmem:[#allocation413_spill] sm:$0xff] %v9042_v38  ;;  %v13756_v38 = vld [vmem:[#allocation55_spill] sm:$0xff] }
 0x4f0   : > { %v3267_v2 = vsel %vm3266_vm3, %v3202_v39, %v13756_v38 }
 0x4f1   : > { %v3332_v15 = vsel %vm3331_vm2, %v3267_v2, %v8629_v24 }
 0x4f3   : > { %2053 = vrot.lane.b32.xlu2 %v7271_v40, %s6836_s16  ;;  %3068 = vrot.lane.b32.xlu1 %v7435_v51, %s6840_s23 }
 0x4f4   : > { %2383 = vrot.lane.b32.xlu0 %v13681_v6, %s6838_s20 }
 0x4f5   : > { %v2562_v45 = vpop.permute.xlu2 %2561  ;;  %v9050_v17 = vpop.permute.xlu1 %1921 }
 0x4f6   : > { %13754 = vst [vmem:[#allocation414_spill] sm:$0xff] %v9050_v17  ;;  %v9052_v25 = vpop.permute.xlu0 %2208  ;;  %v3396_v17 = vsel %vm456_vm0, %v3332_v15, %v8855_v21 }
 0x4f7   : > { %v3461_v0 = vsel %vm3460_vm4, %v3396_v17, %v2038_v11  ;;  %v13757_v17 = vld [vmem:[#allocation33_spill] sm:$0xff] }
 0x4f8   : > { %v3526_v2 = vsel %vm3525_vm5, %v3461_v0, %v9052_v25 }
 0x4fb   : > { %2878 = vrot.lane.b32.xlu2 %v13681_v6, %s6841_s24  ;;  %2575 = vrot.lane.b32.xlu1 %v13702_v58, %s6837_s19 }
 0x4fc   : > { %3070 = vrot.lane.b32.xlu0 %v7456_v34, %s6840_s23 }
 0x4fd   : > { %v2042_v39 = vpop.permute.xlu2 %2041  ;;  %v2368_v38 = vpop.permute.xlu1 %2367 }
 0x4fe   : > { %v9071_v20 = vpop.permute.xlu0 %2715  ;;  %v3591_v6 = vsel %vm3590_vm6, %v3526_v2, %v2368_v38  ;;  %v13758_v38 = vld [vmem:[#allocation47_spill] sm:$0xff] }
 0x4ff   : > { %v3656_v14 = vsel %vm3655_vm7, %v3591_v6, %v2560_v27  ;;  %v3203_v27 = vsel %vm3201_vm1, 0.0, %v13757_v17 }
 0x500   : > { %v3721_v21 = vsel %vm3720_vm8, %v3656_v14, %v9071_v20  ;;  %v3268_v2 = vsel %vm3266_vm3, %v3203_v27, %v13758_v38  ;;  %v13759_v27 = vld [vmem:[#allocation26_spill] sm:$0xff] }
 0x501   : > { %v3333_v37 = vsel %vm3331_vm2, %v3268_v2, %v8629_v24 }
 0x502   : > { %v3397_v14 = vsel %vm456_vm0, %v3333_v37, %v8895_v35 }
 0x503   : > { %2385 = vrot.lane.b32.xlu2 %v13680_v1, %s6838_s20  ;;  %2055 = vrot.lane.b32.xlu1 %v13696_v7, %s6836_s16 }
 0x504   : > { %2577 = vrot.lane.b32.xlu0 %v13701_v41, %s6837_s19 }
 0x505   : > { %v2867_v15 = vpop.permute.xlu2 %2866  ;;  %v2863_v11 = vpop.permute.xlu1 %2862 }
 0x506   : > { %v3786_v6 = vsel %vm3785_vm9, %v3721_v21, %v2863_v11  ;;  %v2040_v0 = vpop.permute.xlu0 %2039 }
 0x507   : > { %v3851_v7 = vsel %vm3850_vm10, %v3786_v6, %v3055_v33  ;;  %v3462_v47 = vsel %vm3460_vm4, %v3397_v14, %v2040_v0 }
 0x508   : > { %6584 = vmatmul.msk.f32.vlgmr.msra.gmra.mxu1 %vm3922_vm11, %v3851_v7  ;;  %v3527_v21 = vsel %vm3525_vm5, %v3462_v47, %v9052_v25  ;;  %v3204_v47 = vsel %vm3201_vm1, 0.0, %v13759_v27 }
 0x50b   : > { %3072 = vrot.lane.b32.xlu2 %v7487_v61, %s6840_s23  ;;  %2880 = vrot.lane.b32.xlu1 %v13680_v1, %s6841_s24 }
 0x50c   : > { %2057 = vrot.lane.b32.xlu0 %v13695_v22, %s6836_s16 }
 0x50d   : > { %v2374_v33 = vpop.permute.xlu2 %2373  ;;  %v2370_v11 = vpop.permute.xlu1 %2369 }
 0x50e   : > { %v3592_v7 = vsel %vm3590_vm6, %v3527_v21, %v2370_v11  ;;  %v2865_v17 = vpop.permute.xlu0 %2864 }
 0x50f   : > { %v3657_v37 = vsel %vm3655_vm7, %v3592_v7, %v2562_v45  ;;  %v13760_v45 = vld [vmem:[#allocation314_spill] sm:$0xff] }
 0x510   : > { %v3722_v35 = vsel %vm3720_vm8, %v3657_v37, %v9071_v20  ;;  %v3269_v2 = vsel %vm3266_vm3, %v3204_v47, %v13760_v45 }
 0x511   : > { %v3787_v6 = vsel %vm3785_vm9, %v3722_v35, %v2865_v17  ;;  %v3334_v21 = vsel %vm3331_vm2, %v3269_v2, %v8629_v24  ;;  %v13761_v2 = vld [vmem:[#allocation48_spill] sm:$0xff] }
 0x512   : > { %v3398_v7 = vsel %vm456_vm0, %v3334_v21, %v8905_v23 }
 0x513   : > { %2579 = vrot.lane.b32.xlu2 %v7415_v60, %s6837_s19  ;;  %2387 = vrot.lane.b32.xlu1 %v7129_v62, %s6838_s20  ;;  %v3463_v37 = vsel %vm3460_vm4, %v3398_v7, %v2042_v39 }
 0x514   : > { %2882 = vrot.lane.b32.xlu0 %v7129_v62, %s6841_s24  ;;  %v3528_v17 = vsel %vm3525_vm5, %v3463_v37, %v9052_v25 }
 0x515   : > { %v3061_v0 = vpop.permute.xlu2 %3060  ;;  %v3057_v38 = vpop.permute.xlu1 %3056 }
 0x516   : > { %v2372_v14 = vpop.permute.xlu0 %2371  ;;  %v3852_v11 = vsel %vm3850_vm10, %v3787_v6, %v3057_v38 }
 0x517   : > { %6585 = vmatmul.msk.f32.gmra.mxu1 %vm3922_vm11, %v3852_v11  ;;  %v3593_v35 = vsel %vm3590_vm6, %v3528_v17, %v2372_v14  ;;  %v3205_v11 = vsel %vm3201_vm1, 0.0, %v13761_v2 }
 0x518   : > { %v3270_v14 = vsel %vm3266_vm3, %v3205_v11, %v8387_v30 }
 0x519   : > { %v3335_v21 = vsel %vm3331_vm2, %v3270_v14, %v8629_v24  ;;  %v13764_v14 = vld [vmem:[#allocation313_spill] sm:$0xff] }
 0x51b   : > { %2059 = vrot.lane.b32.xlu2 %v13697_v55, %s6836_s16  ;;  %3074 = vrot.lane.b32.xlu1 %v7507_v53, %s6840_s23 }
 0x51c   : > { %2389 = vrot.lane.b32.xlu0 %v13686_v46, %s6838_s20 }
 0x51d   : > { %v2568_v27 = vpop.permute.xlu2 %2567  ;;  %v2564_v47 = vpop.permute.xlu1 %2563 }
 0x51e   : > { %v3658_v23 = vsel %vm3655_vm7, %v3593_v35, %v2564_v47  ;;  %v3059_v6 = vpop.permute.xlu0 %3058 }
 0x51f   : > { %v3723_v39 = vsel %vm3720_vm8, %v3658_v23, %v9071_v20 }
 0x520   : > { %v3788_v38 = vsel %vm3785_vm9, %v3723_v39, %v2867_v15  ;;  %v3399_v15 = vsel %vm456_vm0, %v3335_v21, %v8867_v12 }
 0x521   : > { %v3853_v45 = vsel %vm3850_vm10, %v3788_v38, %v3059_v6  ;;  %v13762_v6 = vld [vmem:[#allocation22_spill] sm:$0xff] }
 0x522   : > { %6586 = vmatmul.msk.f32.gmra.mxu1 %vm3922_vm11, %v3853_v45  ;;  %v13763_v45 = vld [vmem:[#allocation50_spill] sm:$0xff] }
 0x523   : > { %2884 = vrot.lane.b32.xlu2 %v13686_v46, %s6841_s24  ;;  %2581 = vrot.lane.b32.xlu1 %v7435_v51, %s6837_s19 }
 0x524   : > { %3076 = vrot.lane.b32.xlu0 %v7528_v31, %s6840_s23 }
 0x525   : > { %v2048_v7 = vpop.permute.xlu2 %2047  ;;  %v2044_v37 = vpop.permute.xlu1 %2043 }
 0x526   : > { %v3464_v17 = vsel %vm3460_vm4, %v3399_v15, %v2044_v37  ;;  %v2566_v30 = vpop.permute.xlu0 %2565 }
 0x527   : > { %v3529_v35 = vsel %vm3525_vm5, %v3464_v17, %v9052_v25 }
 0x528   : > { %v3594_v47 = vsel %vm3590_vm6, %v3529_v35, %v2374_v33  ;;  %v3206_v33 = vsel %vm3201_vm1, %v13663_v18, %v13763_v45  ;;  %v13766_v45 = vld [vmem:[#allocation43_spill] sm:$0xff] }
 0x529   : > { %v3659_v23 = vsel %vm3655_vm7, %v3594_v47, %v2566_v30  ;;  %v3271_v21 = vsel %vm3266_vm3, %v3206_v33, %v13764_v14  ;;  %v3207_v33 = vsel %vm3201_vm1, %v13664_v36, %v13766_v45  ;;  %v13894_v36 = vld [vmem:[#allocation359_spill] sm:$0xff] }
 0x52a   : > { %v3724_v38 = vsel %vm3720_vm8, %v3659_v23, %v9071_v20  ;;  %v3336_v37 = vsel %vm3331_vm2, %v3271_v21, %v8629_v24  ;;  %v3272_v14 = vsel %vm3266_vm3, %v3207_v33, %v8403_v3 }
 0x52b   : > { %2210 = vrot.lane.b32.xlu2 %v13762_v6, %s6837_s19  ;;  %2061 = vrot.lane.b32.xlu1 %v13702_v58, %s6836_s16  ;;  %v3400_v17 = vsel %vm456_vm0, %v3336_v37, %v8907_v56  ;;  %v3337_v37 = vsel %vm3331_vm2, %v3272_v14, %v8629_v24 }
 0x52c   : > { %2391 = vrot.lane.b32.xlu0 %v13685_v9, %s6838_s20 }
 0x52d   : > { %v2873_v12 = vpop.permute.xlu2 %2872  ;;  %v2869_v39 = vpop.permute.xlu1 %2868 }
 0x52e   : > { %v3789_v2 = vsel %vm3785_vm9, %v3724_v38, %v2869_v39  ;;  %v2046_v11 = vpop.permute.xlu0 %2045  ;;  %v13765_v38 = vld [vmem:[#allocation40_spill] sm:$0xff] }
 0x52f   : > { %v3854_v15 = vsel %vm3850_vm10, %v3789_v2, %v3061_v0  ;;  %v3465_v30 = vsel %vm3460_vm4, %v3400_v17, %v2046_v11  ;;  %v3401_v17 = vsel %vm456_vm0, %v3337_v37, %v8917_v49 }
 0x530   : > { %6587 = vmatmul.msk.f32.gmra.mxu1 %vm3922_vm11, %v3854_v15  ;;  %v3530_v47 = vsel %vm3525_vm5, %v3465_v30, %v9052_v25  ;;  %v3466_v30 = vsel %vm3460_vm4, %v3401_v17, %v2048_v7 }
 0x531   : > { %v3531_v3 = vsel %vm3525_vm5, %v3466_v30, %v9052_v25 }
 0x533   : > { %2886 = vrot.lane.b32.xlu2 %v13685_v9, %s6841_s24  ;;  %2583 = vrot.lane.b32.xlu1 %v7456_v34, %s6837_s19 }
 0x534   : > { %3078 = vrot.lane.b32.xlu0 %v7559_v5, %s6840_s23 }
 0x535   : > { %v2380_v0 = vpop.permute.xlu2 %2379  ;;  %v2376_v35 = vpop.permute.xlu1 %2375 }
 0x536   : > { %v3595_v23 = vsel %vm3590_vm6, %v3530_v47, %v2376_v35  ;;  %v2871_v6 = vpop.permute.xlu0 %2870 }
 0x537   : > { %v3660_v56 = vsel %vm3655_vm7, %v3595_v23, %v2568_v27 }
 0x538   : > { %v3725_v39 = vsel %vm3720_vm8, %v3660_v56, %v9071_v20 }
 0x539   : > { %v3790_v2 = vsel %vm3785_vm9, %v3725_v39, %v2871_v6 }
 0x53b   : > { %2063 = vrot.lane.b32.xlu1 %v13701_v41, %s6836_s16  ;;  %2212 = vrot.lane.b32.xlu2 %v13765_v38, %s6837_s19  ;;  %v13767_v38 = vld [vmem:[#allocation66_spill] sm:$0xff] }
 0x53c   : > { %2393 = vrot.lane.b32.xlu0 %v7199_v28, %s6838_s20  ;;  %v3208_v45 = vsel %vm3201_vm1, %v13669_v52, %v13767_v38 }
 0x53d   : > { %v3067_v11 = vpop.permute.xlu2 %3066  ;;  %v3063_v27 = vpop.permute.xlu1 %3062  ;;  %v3273_v33 = vsel %vm3266_vm3, %v3208_v45, %v8423_v8 }
 0x53e   : > { %v2378_v21 = vpop.permute.xlu0 %2377  ;;  %v3855_v15 = vsel %vm3850_vm10, %v3790_v2, %v3063_v27  ;;  %v13768_v2 = vld [vmem:[#allocation38_spill] sm:$0xff] }
 0x53f   : > { %6588 = vmatmul.msk.f32.gmra.mxu1 %vm3922_vm11, %v3855_v15  ;;  %v3596_v35 = vsel %vm3590_vm6, %v3531_v3, %v2378_v21 }
 0x543   : > { %2585 = vrot.lane.b32.xlu1 %v7487_v61, %s6837_s19  ;;  %2888 = vrot.lane.b32.xlu2 %v7199_v28, %s6841_s24 }
 0x544   : > { %3080 = vrot.lane.b32.xlu0 %v13713_v16, %s6840_s23 }
 0x545   : > { %v2574_v47 = vpop.permute.xlu2 %2573  ;;  %v2570_v23 = vpop.permute.xlu1 %2569 }
 0x546   : > { %v3661_v49 = vsel %vm3655_vm7, %v3596_v35, %v2570_v23  ;;  %v3065_v6 = vpop.permute.xlu0 %3064  ;;  %v13769_v23 = vld [vmem:[#allocation73_spill] sm:$0xff] }
 0x547   : > { %v3726_v7 = vsel %vm3720_vm8, %v3661_v49, %v9071_v20 }
 0x548   : > { %v3791_v56 = vsel %vm3785_vm9, %v3726_v7, %v2873_v12  ;;  %v3338_v12 = vsel %vm3331_vm2, %v3273_v33, %v8629_v24  ;;  %v13770_v7 = vld [vmem:[#allocation316_spill] sm:$0xff] }
 0x549   : > { %v3856_v39 = vsel %vm3850_vm10, %v3791_v56, %v3065_v6  ;;  %v3402_v27 = vsel %vm456_vm0, %v3338_v12, %v8879_v50 }
 0x54a   : > { %6589 = vmatmul.msk.f32.gmra.mxu1 %vm3922_vm11, %v3856_v39 }
 0x54b   : > { %2065 = vrot.lane.b32.xlu1 %v7415_v60, %s6836_s16  ;;  %2214 = vrot.lane.b32.xlu2 %v13768_v2, %s6837_s19  ;;  %v13771_v2 = vld [vmem:[#allocation30_spill] sm:$0xff] }
 0x54c   : > { %2395 = vrot.lane.b32.xlu0 %v13691_v26, %s6838_s20 }
 0x54d   : > { %v2054_v14 = vpop.permute.xlu2 %2053  ;;  %v2050_v21 = vpop.permute.xlu1 %2049 }
 0x54e   : > { %v3467_v15 = vsel %vm3460_vm4, %v3402_v27, %v2050_v21  ;;  %v2572_v8 = vpop.permute.xlu0 %2571 }
 0x54f   : > { %v3532_v37 = vsel %vm3525_vm5, %v3467_v15, %v9052_v25 }
 0x550   : > { %v3597_v17 = vsel %vm3590_vm6, %v3532_v37, %v2380_v0  ;;  %v3209_v0 = vsel %vm3201_vm1, %v13668_v44, %v13769_v23 }
 0x551   : > { %v3662_v30 = vsel %vm3655_vm7, %v3597_v17, %v2572_v8  ;;  %v3274_v56 = vsel %vm3266_vm3, %v3209_v0, %v13770_v7  ;;  %v13772_v8 = vld [vmem:[#allocation65_spill] sm:$0xff]  ;;  %v13773_v7 = vld [vmem:[#allocation52_spill] sm:$0xff] }
 0x552   : > { %v3727_v35 = vsel %vm3720_vm8, %v3662_v30, %v9071_v20  ;;  %v3339_v38 = vsel %vm3331_vm2, %v3274_v56, %v8629_v24  ;;  %v3210_v37 = vsel %vm3201_vm1, %v13670_v19, %v13772_v8  ;;  %v13918_v19 = vld [vmem:[#allocation362_spill] sm:$0xff] }
 0x553   : > { %2587 = vrot.lane.b32.xlu1 %v7507_v53, %s6837_s19  ;;  %2890 = vrot.lane.b32.xlu2 %v13691_v26, %s6841_s24  ;;  %v3403_v45 = vsel %vm456_vm0, %v3339_v38, %v8919_v48 }
 0x554   : > { %3082 = vrot.lane.b32.xlu0 %v13712_v10, %s6840_s23 }
 0x555   : > { %v2879_v50 = vpop.permute.xlu2 %2878  ;;  %v2875_v3 = vpop.permute.xlu1 %2874 }
 0x556   : > { %v3792_v49 = vsel %vm3785_vm9, %v3727_v35, %v2875_v3  ;;  %v2052_v6 = vpop.permute.xlu0 %2051  ;;  %v3275_v3 = vsel %vm3266_vm3, %v3210_v37, %v8415_v32 }
 0x557   : > { %v3857_v39 = vsel %vm3850_vm10, %v3792_v49, %v3067_v11  ;;  %v3468_v33 = vsel %vm3460_vm4, %v3403_v45, %v2052_v6  ;;  %v3340_v0 = vsel %vm3331_vm2, %v3275_v3, %v8667_v43 }
 0x558   : > { %6590 = vmatmul.msk.f32.gmra.mxu1 %vm3922_vm11, %v3857_v39  ;;  %v3533_v24 = vsel %vm3525_vm5, %v3468_v33, %v9052_v25  ;;  %v3404_v49 = vsel %vm456_vm0, %v3340_v0, %v8929_v13  ;;  %v13778_v0 = vld [vmem:[#allocation15_spill] sm:$0xff] }
 0x559   : > { %v3469_v6 = vsel %vm3460_vm4, %v3404_v49, %v2054_v14 }
 0x55a   : > { %v3534_v32 = vsel %vm3525_vm5, %v3469_v6, %v9052_v25 }
 0x55b   : > { %2067 = vrot.lane.b32.xlu1 %v7435_v51, %s6836_s16  ;;  %2216 = vrot.lane.b32.xlu2 %v13771_v2, %s6837_s19  ;;  %v13774_v2 = vld [vmem:[#allocation84_spill] sm:$0xff] }
 0x55c   : > { %2397 = vrot.lane.b32.xlu0 %v13690_v42, %s6838_s20 }
 0x55d   : > { %v2386_v11 = vpop.permute.xlu2 %2385  ;;  %v2382_v12 = vpop.permute.xlu1 %2381 }
 0x55e   : > { %v3598_v27 = vsel %vm3590_vm6, %v3533_v24, %v2382_v12  ;;  %v2877_v21 = vpop.permute.xlu0 %2876  ;;  %v3211_v12 = vsel %vm3201_vm1, %v13675_v59, %v13774_v2  ;;  %v13783_v2 = vld [vmem:[#allocation29_spill] sm:$0xff] }
 0x55f   : > { %v3663_v48 = vsel %vm3655_vm7, %v3598_v27, %v2574_v47  ;;  %v3276_v24 = vsel %vm3266_vm3, %v3211_v12, %v8435_v57  ;;  %v13775_v27 = vld [vmem:[#allocation31_spill] sm:$0xff] }
 0x560   : > { %v3728_v15 = vsel %vm3720_vm8, %v3663_v48, %v9071_v20 }
 0x561   : > { %v3793_v17 = vsel %vm3785_vm9, %v3728_v15, %v2877_v21 }
 0x563   : > { %2589 = vrot.lane.b32.xlu1 %v7528_v31, %s6837_s19  ;;  %2892 = vrot.lane.b32.xlu2 %v13690_v42, %s6841_s24 }
 0x564   : > { %3084 = vrot.lane.b32.xlu0 %v7631_v63, %s6840_s23 }
 0x565   : > { %v3073_v30 = vpop.permute.xlu2 %3072  ;;  %v3069_v47 = vpop.permute.xlu1 %3068 }
 0x566   : > { %v2384_v35 = vpop.permute.xlu0 %2383  ;;  %v3858_v23 = vsel %vm3850_vm10, %v3793_v17, %v3069_v47 }
 0x567   : > { %6591 = vmatmul.msk.f32.gmra.mxu1 %vm3922_vm11, %v3858_v23  ;;  %v3599_v43 = vsel %vm3590_vm6, %v3534_v32, %v2384_v35  ;;  %v13777_v23 = vld [vmem:[#allocation90_spill] sm:$0xff] }
 0x56b   : > { %2069 = vrot.lane.b32.xlu1 %v7456_v34, %s6836_s16  ;;  %2218 = vrot.lane.b32.xlu2 %v13773_v7, %s6837_s19  ;;  %v13779_v7 = vld [vmem:[#allocation319_spill] sm:$0xff] }
 0x56c   : > { %2399 = vrot.lane.b32.xlu0 %v7271_v40, %s6838_s20 }
 0x56d   : > { %v2580_v56 = vpop.permute.xlu2 %2579  ;;  %v2576_v39 = vpop.permute.xlu1 %2575 }
 0x56e   : > { %v3664_v13 = vsel %vm3655_vm7, %v3599_v43, %v2576_v39  ;;  %v3071_v38 = vpop.permute.xlu0 %3070  ;;  %v13780_v39 = vld [vmem:[#allocation209_spill] sm:$0xff] }
 0x56f   : > { %v3729_v14 = vsel %vm3720_vm8, %v3664_v13, %v9071_v20 }
 0x570   : > { %v3794_v45 = vsel %vm3785_vm9, %v3729_v14, %v2879_v50  ;;  %v3341_v50 = vsel %vm3331_vm2, %v3276_v24, %v8677_v29  ;;  %v13776_v29 = vld [vmem:[#allocation60_spill] sm:$0xff] }
 0x571   : > { %v3859_v33 = vsel %vm3850_vm10, %v3794_v45, %v3071_v38  ;;  %v3405_v21 = vsel %vm456_vm0, %v3341_v50, %v8891_v4  ;;  %v13781_v38 = vld [vmem:[#allocation389_spill] sm:$0xff] }
 0x572   : > { %6592 = vmatmul.msk.f32.gmra.mxu1 %vm3922_vm11, %v3859_v33  ;;  %v13782_v33 = vld [vmem:[#allocation58_spill] sm:$0xff] }
 0x573   : > { %2591 = vrot.lane.b32.xlu1 %v7559_v5, %s6837_s19  ;;  %2717 = vrot.lane.b32.xlu2 %v13775_v27, %s6839_s22 }
 0x574   : > { %2894 = vrot.lane.b32.xlu0 %v7271_v40, %s6841_s24 }
 0x575   : > { %v2060_v48 = vpop.permute.xlu2 %2059  ;;  %v2056_v15 = vpop.permute.xlu1 %2055 }
 0x576   : > { %v3470_v8 = vsel %vm3460_vm4, %v3405_v21, %v2056_v15  ;;  %v2578_v57 = vpop.permute.xlu0 %2577 }
 0x577   : > { %v3535_v37 = vsel %vm3525_vm5, %v3470_v8, %v9052_v25  ;;  %v13784_v8 = vld [vmem:[#allocation144_spill] sm:$0xff] }
 0x578   : > { %v3600_v17 = vsel %vm3590_vm6, %v3535_v37, %v2386_v11  ;;  %v3212_v11 = vsel %vm3201_vm1, %v13778_v0, %v13777_v23  ;;  %v13786_v37 = vld [vmem:[#allocation17_spill] sm:$0xff] }
 0x579   : > { %v3665_v47 = vsel %vm3655_vm7, %v3600_v17, %v2578_v57  ;;  %v3277_v32 = vsel %vm3266_vm3, %v3212_v11, %v13779_v7  ;;  %v13785_v57 = vld [vmem:[#allocation83_spill] sm:$0xff] }
 0x57a   : > { %v3730_v35 = vsel %vm3720_vm8, %v3665_v47, %v9071_v20  ;;  %v3342_v13 = vsel %vm3331_vm2, %v3277_v32, %v13780_v39  ;;  %v3213_v17 = vsel %vm3201_vm1, %v13786_v37, %v13785_v57  ;;  %v13789_v7 = vld [vmem:[#allocation391_spill] sm:$0xff]  ;;  %v13793_v57 = vld [vmem:[#allocation24_spill] sm:$0xff]  ;;  %v13942_v37 = vld [vmem:[#allocation365_spill] sm:$0xff] }
 0x57b   : > { %3086 = vrot.lane.b32.xlu1 %v7651_v54, %s6840_s23  ;;  %2071 = vrot.lane.b32.xlu2 %v7487_v61, %s6836_s16  ;;  %v3406_v14 = vsel %vm456_vm0, %v3342_v13, %v13781_v38  ;;  %v13790_v39 = vld [vmem:[#allocation51_spill] sm:$0xff] }
 0x57c   : > { %2220 = vrot.lane.b32.xlu0 %v13776_v29, %s6837_s19 }
 0x57d   : > { %v2885_v4 = vpop.permute.xlu2 %2884  ;;  %v2881_v3 = vpop.permute.xlu1 %2880 }
 0x57e   : > { %v3795_v49 = vsel %vm3785_vm9, %v3730_v35, %v2881_v3  ;;  %v2058_v6 = vpop.permute.xlu0 %2057  ;;  %v13787_v3 = vld [vmem:[#allocation325_spill] sm:$0xff] }
 0x57f   : > { %v3860_v43 = vsel %vm3850_vm10, %v3795_v49, %v3073_v30  ;;  %v3471_v45 = vsel %vm3460_vm4, %v3406_v14, %v2058_v6  ;;  %v3278_v35 = vsel %vm3266_vm3, %v3213_v17, %v13787_v3  ;;  %v13788_v49 = vld [vmem:[#allocation266_spill] sm:$0xff]  ;;  %v13794_v17 = vld [vmem:[#allocation329_spill] sm:$0xff] }
 0x580   : > { %6593 = vmatmul.msk.f32.gmra.mxu1 %vm3922_vm11, %v3860_v43  ;;  %v3536_v24 = vsel %vm3525_vm5, %v3471_v45, %v9052_v25  ;;  %v3343_v6 = vsel %vm3331_vm2, %v3278_v35, %v13788_v49 }
 0x581   : > { %v3407_v32 = vsel %vm456_vm0, %v3343_v6, %v13789_v7 }
 0x582   : > { %v3472_v43 = vsel %vm3460_vm4, %v3407_v32, %v2060_v48 }
 0x583   : > { %2401 = vrot.lane.b32.xlu1 %v13782_v33, %s6838_s20  ;;  %2593 = vrot.lane.b32.xlu2 %v13713_v16, %s6837_s19  ;;  %v3537_v13 = vsel %vm3525_vm5, %v3472_v43, %v9052_v25  ;;  %v13798_v43 = vld [vmem:[#allocation70_spill] sm:$0xff] }
 0x584   : > { %2719 = vrot.lane.b32.xlu0 %v13783_v2, %s6839_s22 }
 0x585   : > { %v2211_v30 = vpop.permute.xlu2 %2210  ;;  %v2388_v12 = vpop.permute.xlu1 %2387 }
 0x586   : > { %v3601_v27 = vsel %vm3590_vm6, %v3536_v24, %v2388_v12  ;;  %v2883_v50 = vpop.permute.xlu0 %2882 }
 0x587   : > { %v3666_v21 = vsel %vm3655_vm7, %v3601_v27, %v2580_v56 }
 0x588   : > { %v3731_v15 = vsel %vm3720_vm8, %v3666_v21, %v9071_v20  ;;  %v13792_v21 = vld [vmem:[#allocation19_spill] sm:$0xff] }
 0x589   : > { %v3796_v47 = vsel %vm3785_vm9, %v3731_v15, %v2883_v50  ;;  %v13791_v50 = vld [vmem:[#allocation99_spill] sm:$0xff] }
 0x58a   : > { %v3214_v15 = vsel %vm3201_vm1, %v13792_v21, %v13791_v50  ;;  %v13800_v50 = vld [vmem:[#allocation44_spill] sm:$0xff] }
 0x58b   : > { %2896 = vrot.lane.b32.xlu1 %v13782_v33, %s6841_s24  ;;  %3088 = vrot.lane.b32.xlu2 %v13784_v8, %s6840_s23 }
 0x58c   : > { %2073 = vrot.lane.b32.xlu0 %v7507_v53, %s6836_s16 }
 0x58d   : > { %v2887_v29 = vpop.permute.xlu2 %2886  ;;  %v3075_v56 = vpop.permute.xlu1 %3074 }
 0x58e   : > { %v2390_v23 = vpop.permute.xlu0 %2389  ;;  %v3861_v11 = vsel %vm3850_vm10, %v3796_v47, %v3075_v56  ;;  %v3279_v47 = vsel %vm3266_vm3, %v3214_v15, %v13794_v17  ;;  %v13795_v56 = vld [vmem:[#allocation152_spill] sm:$0xff]  ;;  %v13801_v15 = vld [vmem:[#allocation321_spill] sm:$0xff] }
 0x58f   : > { %6594 = vmatmul.msk.f32.gmra.mxu1 %vm3922_vm11, %v3861_v11  ;;  %v3602_v38 = vsel %vm3590_vm6, %v3537_v13, %v2390_v23  ;;  %v13797_v11 = vld [vmem:[#allocation386_spill] sm:$0xff] }
 0x593   : > { %2222 = vrot.lane.b32.xlu1 %v13790_v39, %s6837_s19  ;;  %2403 = vrot.lane.b32.xlu2 %v13695_v22, %s6838_s20 }
 0x594   : > { %2595 = vrot.lane.b32.xlu0 %v13712_v10, %s6837_s19 }
 0x595   : > { %v2582_v14 = vpop.permute.xlu1 %2581  ;;  %v2213_v45 = vpop.permute.xlu2 %2212 }
 0x596   : > { %v3667_v2 = vsel %vm3655_vm7, %v3602_v38, %v2582_v14  ;;  %v3077_v12 = vpop.permute.xlu0 %3076 }
 0x597   : > { %v3732_v48 = vsel %vm3720_vm8, %v3667_v2, %v9071_v20 }
 0x598   : > { %v3797_v24 = vsel %vm3785_vm9, %v3732_v48, %v2885_v4  ;;  %v13796_v4 = vld [vmem:[#allocation346_spill] sm:$0xff] }
 0x599   : > { %v3862_v27 = vsel %vm3850_vm10, %v3797_v24, %v3077_v12  ;;  %v3344_v3 = vsel %vm3331_vm2, %v3279_v47, %v13796_v4  ;;  %v13799_v24 = vld [vmem:[#allocation105_spill] sm:$0xff] }
 0x59a   : > { %6595 = vmatmul.msk.f32.gmra.mxu1 %vm3922_vm11, %v3862_v27  ;;  %v3408_v49 = vsel %vm456_vm0, %v3344_v3, %v13797_v11  ;;  %v3215_v27 = vsel %vm3201_vm1, %v13680_v1, %v13799_v24  ;;  %v13803_v3 = vld [vmem:[#allocation392_spill] sm:$0xff] }
 0x59b   : > { %2721 = vrot.lane.b32.xlu1 %v13793_v57, %s6839_s22  ;;  %2898 = vrot.lane.b32.xlu2 %v13695_v22, %s6841_s24  ;;  %v3280_v57 = vsel %vm3266_vm3, %v3215_v27, %v13801_v15  ;;  %v13807_v27 = vld [vmem:[#allocation328_spill] sm:$0xff]  ;;  %v13808_v15 = vld [vmem:[#allocation46_spill] sm:$0xff] }
 0x59c   : > { %3090 = vrot.lane.b32.xlu0 %v13795_v56, %s6840_s23 }
 0x59d   : > { %v2062_v35 = vpop.permute.xlu1 %2061  ;;  %v2889_v23 = vpop.permute.xlu2 %2888 }
 0x59e   : > { %v2392_v6 = vpop.permute.xlu0 %2391  ;;  %v3473_v7 = vsel %vm3460_vm4, %v3408_v49, %v2062_v35 }
 0x59f   : > { %v3538_v32 = vsel %vm3525_vm5, %v3473_v7, %v2211_v30  ;;  %v13804_v7 = vld [vmem:[#allocation157_spill] sm:$0xff] }
 0x5a0   : > { %v3603_v39 = vsel %vm3590_vm6, %v3538_v32, %v2392_v6  ;;  %v13805_v32 = vld [vmem:[#allocation78_spill] sm:$0xff] }
 0x5a3   : > { %2075 = vrot.lane.b32.xlu1 %v7528_v31, %s6836_s16  ;;  %2224 = vrot.lane.b32.xlu2 %v13798_v43, %s6837_s19 }
 0x5a4   : > { %2405 = vrot.lane.b32.xlu0 %v13697_v55, %s6838_s20 }
 0x5a5   : > { %v2584_v13 = vpop.permute.xlu1 %2583  ;;  %v2215_v38 = vpop.permute.xlu2 %2214 }
 0x5a6   : > { %v3668_v14 = vsel %vm3655_vm7, %v3603_v39, %v2584_v13  ;;  %v3079_v2 = vpop.permute.xlu0 %3078 }
 0x5a7   : > { %v3733_v12 = vsel %vm3720_vm8, %v3668_v14, %v9071_v20 }
 0x5a8   : > { %v3798_v30 = vsel %vm3785_vm9, %v3733_v12, %v2887_v29  ;;  %v13802_v29 = vld [vmem:[#allocation227_spill] sm:$0xff] }
 0x5a9   : > { %v3863_v48 = vsel %vm3850_vm10, %v3798_v30, %v3079_v2  ;;  %v3345_v17 = vsel %vm3331_vm2, %v3280_v57, %v13802_v29 }
 0x5aa   : > { %6596 = vmatmul.msk.f32.gmra.mxu1 %vm3922_vm11, %v3863_v48  ;;  %v3409_v35 = vsel %vm456_vm0, %v3345_v17, %v13803_v3  ;;  %v13806_v48 = vld [vmem:[#allocation98_spill] sm:$0xff] }
 0x5ab   : > { %2597 = vrot.lane.b32.xlu1 %v7631_v63, %s6837_s19  ;;  %2723 = vrot.lane.b32.xlu2 %v13800_v50, %s6839_s22  ;;  %v3216_v24 = vsel %vm3201_vm1, %v7129_v62, %v13806_v48 }
 0x5ac   : > { %2900 = vrot.lane.b32.xlu0 %v13697_v55, %s6841_s24  ;;  %v3281_v50 = vsel %vm3266_vm3, %v3216_v24, %v13807_v27  ;;  %v13813_v24 = vld [vmem:[#allocation69_spill] sm:$0xff]  ;;  %v13814_v27 = vld [vmem:[#allocation332_spill] sm:$0xff] }
 0x5ad   : > { %v2064_v47 = vpop.permute.xlu1 %2063  ;;  %v2891_v4 = vpop.permute.xlu2 %2890 }
 0x5ae   : > { %v2394_v11 = vpop.permute.xlu0 %2393  ;;  %v3474_v49 = vsel %vm3460_vm4, %v3409_v35, %v2064_v47  ;;  %v13810_v47 = vld [vmem:[#allocation394_spill] sm:$0xff] }
 0x5af   : > { %v3539_v6 = vsel %vm3525_vm5, %v3474_v49, %v2213_v45 }
 0x5b0   : > { %v3604_v43 = vsel %vm3590_vm6, %v3539_v6, %v2394_v11  ;;  %v13811_v6 = vld [vmem:[#allocation162_spill] sm:$0xff] }
 0x5b3   : > { %3092 = vrot.lane.b32.xlu1 %v13804_v7, %s6840_s23  ;;  %2077 = vrot.lane.b32.xlu2 %v7559_v5, %s6836_s16 }
 0x5b4   : > { %2226 = vrot.lane.b32.xlu0 %v13805_v32, %s6837_s19 }
 0x5b5   : > { %v2586_v39 = vpop.permute.xlu1 %2585  ;;  %v2217_v13 = vpop.permute.xlu2 %2216 }
 0x5b6   : > { %v3669_v14 = vsel %vm3655_vm7, %v3604_v43, %v2586_v39  ;;  %v3081_v2 = vpop.permute.xlu0 %3080 }
 0x5b7   : > { %v3734_v12 = vsel %vm3720_vm8, %v3669_v14, %v9071_v20 }
 0x5b8   : > { %v3799_v45 = vsel %vm3785_vm9, %v3734_v12, %v2889_v23  ;;  %v13809_v23 = vld [vmem:[#allocation347_spill] sm:$0xff] }
 0x5b9   : > { %v3864_v30 = vsel %vm3850_vm10, %v3799_v45, %v3081_v2  ;;  %v3346_v57 = vsel %vm3331_vm2, %v3281_v50, %v13809_v23 }
 0x5ba   : > { %6597 = vmatmul.msk.f32.gmra.mxu1 %vm3922_vm11, %v3864_v30  ;;  %v3410_v3 = vsel %vm456_vm0, %v3346_v57, %v13810_v47  ;;  %v13812_v30 = vld [vmem:[#allocation114_spill] sm:$0xff] }
 0x5bb   : > { %2407 = vrot.lane.b32.xlu1 %v13702_v58, %s6838_s20  ;;  %2599 = vrot.lane.b32.xlu2 %v7651_v54, %s6837_s19  ;;  %v3217_v48 = vsel %vm3201_vm1, %v13686_v46, %v13812_v30 }
 0x5bc   : > { %2725 = vrot.lane.b32.xlu0 %v13808_v15, %s6839_s22  ;;  %v3282_v50 = vsel %vm3266_vm3, %v3217_v48, %v13814_v27  ;;  %v13819_v48 = vld [vmem:[#allocation88_spill] sm:$0xff] }
 0x5bd   : > { %v2066_v29 = vpop.permute.xlu1 %2065  ;;  %v2893_v17 = vpop.permute.xlu2 %2892 }
 0x5be   : > { %v2396_v35 = vpop.permute.xlu0 %2395  ;;  %v3475_v11 = vsel %vm3460_vm4, %v3410_v3, %v2066_v29  ;;  %v13816_v29 = vld [vmem:[#allocation387_spill] sm:$0xff] }
 0x5bf   : > { %v3540_v49 = vsel %vm3525_vm5, %v3475_v11, %v2215_v38 }
 0x5c0   : > { %v3605_v32 = vsel %vm3590_vm6, %v3540_v49, %v2396_v35  ;;  %v13817_v49 = vld [vmem:[#allocation39_spill] sm:$0xff] }
 0x5c3   : > { %2902 = vrot.lane.b32.xlu1 %v13702_v58, %s6841_s24  ;;  %3094 = vrot.lane.b32.xlu2 %v13811_v6, %s6840_s23 }
 0x5c4   : > { %2079 = vrot.lane.b32.xlu0 %v13713_v16, %s6836_s16 }
 0x5c5   : > { %v2588_v43 = vpop.permute.xlu1 %2587  ;;  %v2219_v39 = vpop.permute.xlu2 %2218 }
 0x5c6   : > { %v3670_v14 = vsel %vm3655_vm7, %v3605_v32, %v2588_v43  ;;  %v3083_v2 = vpop.permute.xlu0 %3082  ;;  %v13818_v32 = vld [vmem:[#allocation170_spill] sm:$0xff] }
 0x5c7   : > { %v3735_v12 = vsel %vm3720_vm8, %v3670_v14, %v9071_v20 }
 0x5c8   : > { %v3800_v38 = vsel %vm3785_vm9, %v3735_v12, %v2891_v4  ;;  %v13815_v4 = vld [vmem:[#allocation349_spill] sm:$0xff] }
 0x5c9   : > { %v3865_v45 = vsel %vm3850_vm10, %v3800_v38, %v3083_v2  ;;  %v3347_v15 = vsel %vm3331_vm2, %v3282_v50, %v13815_v4 }
 0x5ca   : > { %6598 = vmatmul.msk.f32.gmra.mxu1 %vm3922_vm11, %v3865_v45  ;;  %v3411_v47 = vsel %vm456_vm0, %v3347_v15, %v13816_v29  ;;  %v13822_v15 = vld [vmem:[#allocation246_spill] sm:$0xff] }
 0x5cb   : > { %2228 = vrot.lane.b32.xlu1 %v13813_v24, %s6837_s19  ;;  %2409 = vrot.lane.b32.xlu2 %v13701_v41, %s6838_s20  ;;  %v13820_v24 = vld [vmem:[#allocation120_spill] sm:$0xff] }
 0x5cc   : > { %2601 = vrot.lane.b32.xlu0 %v13784_v8, %s6837_s19  ;;  %v3218_v27 = vsel %vm3201_vm1, %v13685_v9, %v13820_v24 }
 0x5cd   : > { %v2068_v23 = vpop.permute.xlu1 %2067  ;;  %v2718_v57 = vpop.permute.xlu2 %2717 }
 0x5ce   : > { %v2398_v3 = vpop.permute.xlu0 %2397  ;;  %v3476_v35 = vsel %vm3460_vm4, %v3411_v47, %v2068_v23  ;;  %v13823_v47 = vld [vmem:[#allocation395_spill] sm:$0xff] }
 0x5cf   : > { %v3541_v11 = vsel %vm3525_vm5, %v3476_v35, %v2217_v13 }
 0x5d0   : > { %v3606_v43 = vsel %vm3590_vm6, %v3541_v11, %v2398_v3 }
 0x5d3   : > { %2727 = vrot.lane.b32.xlu1 %v13817_v49, %s6839_s22  ;;  %2904 = vrot.lane.b32.xlu2 %v13701_v41, %s6841_s24  ;;  %v13824_v49 = vld [vmem:[#allocation62_spill] sm:$0xff] }
 0x5d4   : > { %3096 = vrot.lane.b32.xlu0 %v13818_v32, %s6840_s23 }
 0x5d5   : > { %v2590_v14 = vpop.permute.xlu1 %2589  ;;  %v2072_v2 = vpop.permute.xlu2 %2071 }
 0x5d6   : > { %v3671_v12 = vsel %vm3655_vm7, %v3606_v43, %v2590_v14  ;;  %v3085_v38 = vpop.permute.xlu0 %3084 }
 0x5d7   : > { %v3736_v45 = vsel %vm3720_vm8, %v3671_v12, %v9071_v20  ;;  %v13821_v20 = vld [vmem:[#allocation324_spill] sm:$0xff] }
 0x5d8   : > { %v3801_v13 = vsel %vm3785_vm9, %v3736_v45, %v2893_v17  ;;  %v3283_v17 = vsel %vm3266_vm3, %v3218_v27, %v13821_v20 }
 0x5d9   : > { %v3866_v30 = vsel %vm3850_vm10, %v3801_v13, %v3085_v38  ;;  %v3348_v23 = vsel %vm3331_vm2, %v3283_v17, %v13822_v15  ;;  %v13828_v15 = vld [vmem:[#allocation334_spill] sm:$0xff] }
 0x5da   : > { %6599 = vmatmul.msk.f32.gmra.mxu1 %vm3922_vm11, %v3866_v30  ;;  %v3412_v3 = vsel %vm456_vm0, %v3348_v23, %v13823_v47  ;;  %v13826_v30 = vld [vmem:[#allocation94_spill] sm:$0xff] }
 0x5db   : > { %2081 = vrot.lane.b32.xlu1 %v13712_v10, %s6836_s16  ;;  %2230 = vrot.lane.b32.xlu2 %v13819_v48, %s6837_s19 }
 0x5dc   : > { %2411 = vrot.lane.b32.xlu0 %v7415_v60, %s6838_s20 }
 0x5dd   : > { %v2070_v50 = vpop.permute.xlu1 %2069  ;;  %v2594_v4 = vpop.permute.xlu2 %2593 }
 0x5de   : > { %v2400_v29 = vpop.permute.xlu0 %2399  ;;  %v3477_v35 = vsel %vm3460_vm4, %v3412_v3, %v2070_v50  ;;  %v13827_v50 = vld [vmem:[#allocation113_spill] sm:$0xff] }
 0x5df   : > { %v3542_v11 = vsel %vm3525_vm5, %v3477_v35, %v2219_v39  ;;  %v13825_v39 = vld [vmem:[#allocation175_spill] sm:$0xff]  ;;  %v13830_v3 = vld [vmem:[#allocation397_spill] sm:$0xff] }
 0x5e0   : > { %v3607_v12 = vsel %vm3590_vm6, %v3542_v11, %v2400_v29  ;;  %v13829_v29 = vld [vmem:[#allocation350_spill] sm:$0xff]  ;;  %v13831_v11 = vld [vmem:[#allocation68_spill] sm:$0xff] }
 0x5e3   : > { %2603 = vrot.lane.b32.xlu1 %v13795_v56, %s6837_s19  ;;  %2729 = vrot.lane.b32.xlu2 %v13824_v49, %s6839_s22 }
 0x5e4   : > { %2906 = vrot.lane.b32.xlu0 %v7415_v60, %s6841_s24 }
 0x5e5   : > { %v2592_v43 = vpop.permute.xlu1 %2591  ;;  %v3089_v14 = vpop.permute.xlu2 %3088 }
 0x5e6   : > { %v2895_v38 = vpop.permute.xlu0 %2894  ;;  %v3672_v45 = vsel %vm3655_vm7, %v3607_v12, %v2592_v43 }
 0x5e7   : > { %v3737_v13 = vsel %vm3720_vm8, %v3672_v45, %v2718_v57  ;;  %v3219_v57 = vsel %vm3201_vm1, %v7199_v28, %v13827_v50 }
 0x5e8   : > { %v3802_v48 = vsel %vm3785_vm9, %v3737_v13, %v2895_v38  ;;  %v3284_v23 = vsel %vm3266_vm3, %v3219_v57, %v13828_v15 }
 0x5e9   : > { %v3349_v47 = vsel %vm3331_vm2, %v3284_v23, %v13829_v29  ;;  %v13834_v23 = vld [vmem:[#allocation338_spill] sm:$0xff] }
 0x5ea   : > { %v3413_v35 = vsel %vm456_vm0, %v3349_v47, %v13830_v3  ;;  %v13835_v47 = vld [vmem:[#allocation87_spill] sm:$0xff]  ;;  %v13836_v3 = vld [vmem:[#allocation352_spill] sm:$0xff] }
 0x5eb   : > { %3098 = vrot.lane.b32.xlu1 %v13825_v39, %s6840_s23  ;;  %2083 = vrot.lane.b32.xlu2 %v7631_v63, %s6836_s16  ;;  %v3478_v49 = vsel %vm3460_vm4, %v3413_v35, %v2072_v2 }
 0x5ec   : > { %2232 = vrot.lane.b32.xlu0 %v13826_v30, %s6837_s19 }
 0x5ed   : > { %v3087_v24 = vpop.permute.xlu1 %3086  ;;  %v2404_v27 = vpop.permute.xlu2 %2403 }
 0x5ee   : > { %v2221_v20 = vpop.permute.xlu0 %2220  ;;  %v3867_v17 = vsel %vm3850_vm10, %v3802_v48, %v3087_v24  ;;  %v13832_v48 = vld [vmem:[#allocation180_spill] sm:$0xff] }
 0x5ef   : > { %6600 = vmatmul.msk.f32.gmra.mxu1 %vm3922_vm11, %v3867_v17  ;;  %v3543_v38 = vsel %vm3525_vm5, %v3478_v49, %v2221_v20 }
 0x5f3   : > { %2413 = vrot.lane.b32.xlu1 %v7435_v51, %s6838_s20  ;;  %2605 = vrot.lane.b32.xlu2 %v13804_v7, %s6837_s19 }
 0x5f4   : > { %2731 = vrot.lane.b32.xlu0 %v13831_v11, %s6839_s22 }
 0x5f5   : > { %v2402_v43 = vpop.permute.xlu1 %2401  ;;  %v2899_v12 = vpop.permute.xlu2 %2898 }
 0x5f6   : > { %v2720_v45 = vpop.permute.xlu0 %2719  ;;  %v3608_v13 = vsel %vm3590_vm6, %v3543_v38, %v2402_v43 }
 0x5f7   : > { %v3673_v30 = vsel %vm3655_vm7, %v3608_v13, %v2594_v4  ;;  %v13833_v4 = vld [vmem:[#allocation131_spill] sm:$0xff] }
 0x5f8   : > { %v3738_v2 = vsel %vm3720_vm8, %v3673_v30, %v2720_v45  ;;  %v3220_v15 = vsel %vm3201_vm1, %v13691_v26, %v13833_v4 }
 0x5f9   : > { %v3285_v29 = vsel %vm3266_vm3, %v3220_v15, %v13834_v23 }
 0x5fa   : > { %v3350_v35 = vsel %vm3331_vm2, %v3285_v29, %v13836_v3  ;;  %v13840_v29 = vld [vmem:[#allocation103_spill] sm:$0xff] }
 0x5fb   : > { %2908 = vrot.lane.b32.xlu1 %v7435_v51, %s6841_s24  ;;  %3100 = vrot.lane.b32.xlu2 %v13832_v48, %s6840_s23 }
 0x5fc   : > { %2085 = vrot.lane.b32.xlu0 %v7651_v54, %s6836_s16 }
 0x5fd   : > { %v2897_v24 = vpop.permute.xlu1 %2896  ;;  %v2225_v17 = vpop.permute.xlu2 %2224 }
 0x5fe   : > { %v3803_v20 = vsel %vm3785_vm9, %v3738_v2, %v2897_v24  ;;  %v2074_v50 = vpop.permute.xlu0 %2073  ;;  %v13838_v2 = vld [vmem:[#allocation61_spill] sm:$0xff]  ;;  %v13839_v24 = vld [vmem:[#allocation188_spill] sm:$0xff] }
 0x5ff   : > { %v3868_v57 = vsel %vm3850_vm10, %v3803_v20, %v3089_v14  ;;  %v13837_v14 = vld [vmem:[#allocation388_spill] sm:$0xff] }
 0x600   : > { %6601 = vmatmul.msk.f32.gmra.mxu1 %vm3922_vm11, %v3868_v57  ;;  %v3414_v11 = vsel %vm456_vm0, %v3350_v35, %v13837_v14  ;;  %v13842_v35 = vld [vmem:[#allocation327_spill] sm:$0xff] }
 0x601   : > { %v3479_v38 = vsel %vm3460_vm4, %v3414_v11, %v2074_v50 }
 0x603   : > { %2234 = vrot.lane.b32.xlu1 %v13835_v47, %s6837_s19  ;;  %2415 = vrot.lane.b32.xlu2 %v7456_v34, %s6838_s20  ;;  %v13841_v47 = vld [vmem:[#allocation137_spill] sm:$0xff] }
 0x604   : > { %2607 = vrot.lane.b32.xlu0 %v13811_v6, %s6837_s19  ;;  %v3221_v3 = vsel %vm3201_vm1, %v13690_v42, %v13841_v47 }
 0x605   : > { %v2223_v49 = vpop.permute.xlu1 %2222  ;;  %v2724_v43 = vpop.permute.xlu2 %2723 }
 0x606   : > { %v2596_v45 = vpop.permute.xlu0 %2595  ;;  %v3544_v13 = vsel %vm3525_vm5, %v3479_v38, %v2223_v49  ;;  %v13843_v49 = vld [vmem:[#allocation254_spill] sm:$0xff] }
 0x607   : > { %v3609_v30 = vsel %vm3590_vm6, %v3544_v13, %v2404_v27  ;;  %v13844_v13 = vld [vmem:[#allocation398_spill] sm:$0xff] }
 0x608   : > { %v3674_v20 = vsel %vm3655_vm7, %v3609_v30, %v2596_v45 }
 0x60b   : > { %2733 = vrot.lane.b32.xlu1 %v13838_v2, %s6839_s22  ;;  %2910 = vrot.lane.b32.xlu2 %v7456_v34, %s6841_s24 }
 0x60c   : > { %3102 = vrot.lane.b32.xlu0 %v13839_v24, %s6840_s23 }
 0x60d   : > { %v2722_v57 = vpop.permute.xlu1 %2721  ;;  %v2078_v4 = vpop.permute.xlu2 %2077 }
 0x60e   : > { %v3739_v50 = vsel %vm3720_vm8, %v3674_v20, %v2722_v57  ;;  %v3091_v15 = vpop.permute.xlu0 %3090  ;;  %v13845_v57 = vld [vmem:[#allocation80_spill] sm:$0xff] }
 0x60f   : > { %v3804_v23 = vsel %vm3785_vm9, %v3739_v50, %v2899_v12  ;;  %v3286_v12 = vsel %vm3266_vm3, %v3221_v3, %v13842_v35  ;;  %v13847_v3 = vld [vmem:[#allocation109_spill] sm:$0xff] }
 0x610   : > { %v3869_v27 = vsel %vm3850_vm10, %v3804_v23, %v3091_v15  ;;  %v3351_v38 = vsel %vm3331_vm2, %v3286_v12, %v13843_v49 }
 0x611   : > { %6602 = vmatmul.msk.f32.gmra.mxu1 %vm3922_vm11, %v3869_v27  ;;  %v3415_v30 = vsel %vm456_vm0, %v3351_v38, %v13844_v13  ;;  %v13849_v13 = vld [vmem:[#allocation337_spill] sm:$0xff] }
 0x613   : > { %2087 = vrot.lane.b32.xlu1 %v13784_v8, %s6836_s16  ;;  %2236 = vrot.lane.b32.xlu2 %v13840_v29, %s6837_s19 }
 0x614   : > { %2417 = vrot.lane.b32.xlu0 %v7487_v61, %s6838_s20 }
 0x615   : > { %v2076_v14 = vpop.permute.xlu1 %2075  ;;  %v2600_v11 = vpop.permute.xlu2 %2599 }
 0x616   : > { %v2406_v45 = vpop.permute.xlu0 %2405  ;;  %v3480_v2 = vsel %vm3460_vm4, %v3415_v30, %v2076_v14 }
 0x617   : > { %v3545_v20 = vsel %vm3525_vm5, %v3480_v2, %v2225_v17  ;;  %v13846_v17 = vld [vmem:[#allocation193_spill] sm:$0xff] }
 0x618   : > { %v3610_v23 = vsel %vm3590_vm6, %v3545_v20, %v2406_v45  ;;  %v13848_v45 = vld [vmem:[#allocation130_spill] sm:$0xff]  ;;  %v13850_v2 = vld [vmem:[#allocation353_spill] sm:$0xff] }
 0x61b   : > { %2609 = vrot.lane.b32.xlu1 %v13818_v32, %s6837_s19  ;;  %2735 = vrot.lane.b32.xlu2 %v13845_v57, %s6839_s22  ;;  %v13851_v57 = vld [vmem:[#allocation400_spill] sm:$0xff] }
 0x61c   : > { %2912 = vrot.lane.b32.xlu0 %v7487_v61, %s6841_s24 }
 0x61d   : > { %v2598_v50 = vpop.permute.xlu1 %2597  ;;  %v3095_v15 = vpop.permute.xlu2 %3094 }
 0x61e   : > { %v2901_v27 = vpop.permute.xlu0 %2900  ;;  %v3675_v29 = vsel %vm3655_vm7, %v3610_v23, %v2598_v50  ;;  %v13852_v23 = vld [vmem:[#allocation86_spill] sm:$0xff] }
 0x61f   : > { %v3740_v47 = vsel %vm3720_vm8, %v3675_v29, %v2724_v43  ;;  %v3222_v43 = vsel %vm3201_vm1, %v7271_v40, %v13848_v45  ;;  %v13853_v45 = vld [vmem:[#allocation198_spill] sm:$0xff] }
 0x620   : > { %v3805_v35 = vsel %vm3785_vm9, %v3740_v47, %v2901_v27  ;;  %v3287_v30 = vsel %vm3266_vm3, %v3222_v43, %v13849_v13 }
 0x621   : > { %v3352_v20 = vsel %vm3331_vm2, %v3287_v30, %v13850_v2 }
 0x622   : > { %v3416_v50 = vsel %vm456_vm0, %v3352_v20, %v13851_v57  ;;  %v13855_v57 = vld [vmem:[#allocation341_spill] sm:$0xff] }
 0x623   : > { %3104 = vrot.lane.b32.xlu1 %v13846_v17, %s6840_s23  ;;  %2089 = vrot.lane.b32.xlu2 %v13795_v56, %s6836_s16  ;;  %v3481_v27 = vsel %vm3460_vm4, %v3416_v50, %v2078_v4 }
 0x624   : > { %2238 = vrot.lane.b32.xlu0 %v13847_v3, %s6837_s19 }
 0x625   : > { %v3093_v12 = vpop.permute.xlu1 %3092  ;;  %v2410_v14 = vpop.permute.xlu2 %2409 }
 0x626   : > { %v2227_v49 = vpop.permute.xlu0 %2226  ;;  %v3870_v38 = vsel %vm3850_vm10, %v3805_v35, %v3093_v12 }
 0x627   : > { %6603 = vmatmul.msk.f32.gmra.mxu1 %vm3922_vm11, %v3870_v38  ;;  %v3546_v3 = vsel %vm3525_vm5, %v3481_v27, %v2227_v49  ;;  %v13857_v27 = vld [vmem:[#allocation355_spill] sm:$0xff] }
 0x62b   : > { %2419 = vrot.lane.b32.xlu1 %v7507_v53, %s6838_s20  ;;  %2611 = vrot.lane.b32.xlu2 %v13825_v39, %s6837_s19 }
 0x62c   : > { %2737 = vrot.lane.b32.xlu0 %v13852_v23, %s6839_s22  ;;  %v13856_v23 = vld [vmem:[#allocation102_spill] sm:$0xff] }
 0x62d   : > { %v2408_v29 = vpop.permute.xlu1 %2407  ;;  %v2905_v47 = vpop.permute.xlu2 %2904 }
 0x62e   : > { %v2726_v35 = vpop.permute.xlu0 %2725  ;;  %v3611_v12 = vsel %vm3590_vm6, %v3546_v3, %v2408_v29 }
 0x62f   : > { %v3676_v38 = vsel %vm3655_vm7, %v3611_v12, %v2600_v11  ;;  %v13854_v11 = vld [vmem:[#allocation147_spill] sm:$0xff] }
 0x630   : > { %v3741_v4 = vsel %vm3720_vm8, %v3676_v38, %v2726_v35  ;;  %v3223_v20 = vsel %vm3201_vm1, %v13782_v33, %v13854_v11  ;;  %v13860_v11 = vld [vmem:[#allocation206_spill] sm:$0xff] }
 0x631   : > { %v3288_v50 = vsel %vm3266_vm3, %v3223_v20, %v13855_v57 }
 0x632   : > { %v3353_v29 = vsel %vm3331_vm2, %v3288_v50, %v13857_v27 }
 0x633   : > { %2914 = vrot.lane.b32.xlu1 %v7507_v53, %s6841_s24  ;;  %3106 = vrot.lane.b32.xlu2 %v13853_v45, %s6840_s23 }
 0x634   : > { %2091 = vrot.lane.b32.xlu0 %v13804_v7, %s6836_s16 }
 0x635   : > { %v2903_v43 = vpop.permute.xlu1 %2902  ;;  %v2231_v13 = vpop.permute.xlu2 %2230 }
 0x636   : > { %v3806_v49 = vsel %vm3785_vm9, %v3741_v4, %v2903_v43  ;;  %v2080_v30 = vpop.permute.xlu0 %2079 }
 0x637   : > { %v3871_v2 = vsel %vm3850_vm10, %v3806_v49, %v3095_v15  ;;  %v13858_v15 = vld [vmem:[#allocation390_spill] sm:$0xff] }
 0x638   : > { %6604 = vmatmul.msk.f32.gmra.mxu1 %vm3922_vm11, %v3871_v2  ;;  %v3417_v3 = vsel %vm456_vm0, %v3353_v29, %v13858_v15  ;;  %v13859_v2 = vld [vmem:[#allocation79_spill] sm:$0xff]  ;;  %v13861_v29 = vld [vmem:[#allocation118_spill] sm:$0xff] }
 0x639   : > { %v3482_v38 = vsel %vm3460_vm4, %v3417_v3, %v2080_v30  ;;  %v13862_v15 = vld [vmem:[#allocation154_spill] sm:$0xff] }
 0x63a   : > { %v3224_v3 = vsel %vm3201_vm1, %v13695_v22, %v13862_v15 }
 0x63b   : > { %2240 = vrot.lane.b32.xlu1 %v13856_v23, %s6837_s19  ;;  %2421 = vrot.lane.b32.xlu2 %v7528_v31, %s6838_s20 }
 0x63c   : > { %2613 = vrot.lane.b32.xlu0 %v13832_v48, %s6837_s19 }
 0x63d   : > { %v2229_v35 = vpop.permute.xlu1 %2228  ;;  %v2730_v12 = vpop.permute.xlu2 %2729 }
 0x63e   : > { %v2602_v4 = vpop.permute.xlu0 %2601  ;;  %v3547_v43 = vsel %vm3525_vm5, %v3482_v38, %v2229_v35  ;;  %v13863_v35 = vld [vmem:[#allocation333_spill] sm:$0xff] }
 0x63f   : > { %v3612_v49 = vsel %vm3590_vm6, %v3547_v43, %v2410_v14  ;;  %v13864_v43 = vld [vmem:[#allocation272_spill] sm:$0xff] }
 0x640   : > { %v3677_v20 = vsel %vm3655_vm7, %v3612_v49, %v2602_v4 }
 0x643   : > { %2739 = vrot.lane.b32.xlu1 %v13859_v2, %s6839_s22  ;;  %2916 = vrot.lane.b32.xlu2 %v7528_v31, %s6841_s24 }
 0x644   : > { %3108 = vrot.lane.b32.xlu0 %v13860_v11, %s6840_s23 }
 0x645   : > { %v2728_v57 = vpop.permute.xlu1 %2727  ;;  %v2084_v50 = vpop.permute.xlu2 %2083 }
 0x646   : > { %v3742_v30 = vsel %vm3720_vm8, %v3677_v20, %v2728_v57  ;;  %v3097_v23 = vpop.permute.xlu0 %3096  ;;  %v13865_v20 = vld [vmem:[#allocation401_spill] sm:$0xff] }
 0x647   : > { %v3807_v27 = vsel %vm3785_vm9, %v3742_v30, %v2905_v47  ;;  %v3289_v47 = vsel %vm3266_vm3, %v3224_v3, %v13863_v35 }
 0x648   : > { %v3872_v14 = vsel %vm3850_vm10, %v3807_v27, %v3097_v23  ;;  %v3354_v49 = vsel %vm3331_vm2, %v3289_v47, %v13864_v43  ;;  %v13866_v27 = vld [vmem:[#allocation96_spill] sm:$0xff] }
 0x649   : > { %6605 = vmatmul.msk.f32.gmra.mxu1 %vm3922_vm11, %v3872_v14  ;;  %v3418_v57 = vsel %vm456_vm0, %v3354_v49, %v13865_v20 }
 0x64b   : > { %2093 = vrot.lane.b32.xlu1 %v13811_v6, %s6836_s16  ;;  %2242 = vrot.lane.b32.xlu2 %v13861_v29, %s6837_s19 }
 0x64c   : > { %2423 = vrot.lane.b32.xlu0 %v7559_v5, %s6838_s20 }
 0x64d   : > { %v2082_v38 = vpop.permute.xlu1 %2081  ;;  %v2606_v4 = vpop.permute.xlu2 %2605 }
 0x64e   : > { %v2412_v2 = vpop.permute.xlu0 %2411  ;;  %v3483_v30 = vsel %vm3460_vm4, %v3418_v57, %v2082_v38  ;;  %v13868_v38 = vld [vmem:[#allocation125_spill] sm:$0xff] }
 0x64f   : > { %v3548_v23 = vsel %vm3525_vm5, %v3483_v30, %v2231_v13  ;;  %v13867_v13 = vld [vmem:[#allocation211_spill] sm:$0xff]  ;;  %v13869_v30 = vld [vmem:[#allocation146_spill] sm:$0xff] }
 0x650   : > { %v3613_v15 = vsel %vm3590_vm6, %v3548_v23, %v2412_v2  ;;  %v13870_v23 = vld [vmem:[#allocation343_spill] sm:$0xff] }
 0x653   : > { %2615 = vrot.lane.b32.xlu1 %v13839_v24, %s6837_s19  ;;  %2741 = vrot.lane.b32.xlu2 %v13866_v27, %s6839_s22 }
 0x654   : > { %2918 = vrot.lane.b32.xlu0 %v7559_v5, %s6841_s24 }
 0x655   : > { %v2604_v14 = vpop.permute.xlu1 %2603  ;;  %v3101_v29 = vpop.permute.xlu2 %3100 }
 0x656   : > { %v2907_v3 = vpop.permute.xlu0 %2906  ;;  %v3678_v35 = vsel %vm3655_vm7, %v3613_v15, %v2604_v14  ;;  %v13871_v14 = vld [vmem:[#allocation356_spill] sm:$0xff] }
 0x657   : > { %v3743_v47 = vsel %vm3720_vm8, %v3678_v35, %v2730_v12  ;;  %v3225_v12 = vsel %vm3201_vm1, %v13697_v55, %v13869_v30 }
 0x658   : > { %v3808_v43 = vsel %vm3785_vm9, %v3743_v47, %v2907_v3  ;;  %v3290_v27 = vsel %vm3266_vm3, %v3225_v12, %v13870_v23  ;;  %v13872_v3 = vld [vmem:[#allocation403_spill] sm:$0xff]  ;;  %v13873_v47 = vld [vmem:[#allocation101_spill] sm:$0xff] }
 0x659   : > { %v3355_v15 = vsel %vm3331_vm2, %v3290_v27, %v13871_v14  ;;  %v13874_v27 = vld [vmem:[#allocation216_spill] sm:$0xff] }
 0x65a   : > { %v3419_v35 = vsel %vm456_vm0, %v3355_v15, %v13872_v3 }
 0x65b   : > { %3110 = vrot.lane.b32.xlu1 %v13867_v13, %s6840_s23  ;;  %2095 = vrot.lane.b32.xlu2 %v13818_v32, %s6836_s16 }
 0x65c   : > { %2244 = vrot.lane.b32.xlu0 %v13868_v38, %s6837_s19  ;;  %v3484_v38 = vsel %vm3460_vm4, %v3419_v35, %v2084_v50 }
 0x65d   : > { %v3099_v49 = vpop.permute.xlu1 %3098  ;;  %v2416_v20 = vpop.permute.xlu2 %2415 }
 0x65e   : > { %v2233_v57 = vpop.permute.xlu0 %2232  ;;  %v3873_v2 = vsel %vm3850_vm10, %v3808_v43, %v3099_v49 }
 0x65f   : > { %6606 = vmatmul.msk.f32.gmra.mxu1 %vm3922_vm11, %v3873_v2  ;;  %v3549_v2 = vsel %vm3525_vm5, %v3484_v38, %v2233_v57  ;;  %v13876_v38 = vld [vmem:[#allocation57_spill] sm:$0xff] }
 0x663   : > { %2425 = vrot.lane.b32.xlu1 %v13713_v16, %s6838_s20  ;;  %2617 = vrot.lane.b32.xlu2 %v13846_v17, %s6837_s19 }
 0x664   : > { %2743 = vrot.lane.b32.xlu0 %v13873_v47, %s6839_s22 }
 0x665   : > { %v2414_v43 = vpop.permute.xlu1 %2413  ;;  %v2911_v49 = vpop.permute.xlu2 %2910 }
 0x666   : > { %v2732_v30 = vpop.permute.xlu0 %2731  ;;  %v3614_v12 = vsel %vm3590_vm6, %v3549_v2, %v2414_v43  ;;  %v13877_v2 = vld [vmem:[#allocation117_spill] sm:$0xff] }
 0x667   : > { %v3679_v23 = vsel %vm3655_vm7, %v3614_v12, %v2606_v4  ;;  %v13875_v4 = vld [vmem:[#allocation165_spill] sm:$0xff] }
 0x668   : > { %v3744_v50 = vsel %vm3720_vm8, %v3679_v23, %v2732_v30  ;;  %v3226_v47 = vsel %vm3201_vm1, %v13702_v58, %v13875_v4  ;;  %v13878_v30 = vld [vmem:[#allocation358_spill] sm:$0xff] }
 0x669   : > { %v3291_v43 = vsel %vm3266_vm3, %v3226_v47, %v13876_v38  ;;  %v13880_v38 = vld [vmem:[#allocation95_spill] sm:$0xff] }
 0x66a   : > { %v3356_v12 = vsel %vm3331_vm2, %v3291_v43, %v13878_v30  ;;  %v13881_v43 = vld [vmem:[#allocation224_spill] sm:$0xff] }
 0x66b   : > { %2920 = vrot.lane.b32.xlu1 %v13713_v16, %s6841_s24  ;;  %3112 = vrot.lane.b32.xlu2 %v13874_v27, %s6840_s23 }
 0x66c   : > { %2097 = vrot.lane.b32.xlu0 %v13825_v39, %s6836_s16 }
 0x66d   : > { %v2909_v14 = vpop.permute.xlu1 %2908  ;;  %v2237_v15 = vpop.permute.xlu2 %2236 }
 0x66e   : > { %v3809_v57 = vsel %vm3785_vm9, %v3744_v50, %v2909_v14  ;;  %v2086_v3 = vpop.permute.xlu0 %2085 }
 0x66f   : > { %v3874_v35 = vsel %vm3850_vm10, %v3809_v57, %v3101_v29  ;;  %v13879_v29 = vld [vmem:[#allocation393_spill] sm:$0xff] }
 0x670   : > { %6607 = vmatmul.msk.f32.gmra.mxu1 %vm3922_vm11, %v3874_v35  ;;  %v3420_v23 = vsel %vm456_vm0, %v3356_v12, %v13879_v29 }
 0x671   : > { %v3485_v57 = vsel %vm3460_vm4, %v3420_v23, %v2086_v3 }
 0x673   : > { %2246 = vrot.lane.b32.xlu1 %v13877_v2, %s6837_s19  ;;  %2427 = vrot.lane.b32.xlu2 %v13712_v10, %s6838_s20 }
 0x674   : > { %2619 = vrot.lane.b32.xlu0 %v13853_v45, %s6837_s19 }
 0x675   : > { %v2235_v50 = vpop.permute.xlu1 %2234  ;;  %v2736_v14 = vpop.permute.xlu2 %2735 }
 0x676   : > { %v2608_v35 = vpop.permute.xlu0 %2607  ;;  %v3550_v4 = vsel %vm3525_vm5, %v3485_v57, %v2235_v50  ;;  %v9798_v50 = vpop.f32.mrf.mxu1  ;;  %v13883_v57 = vld [vmem:[#allocation135_spill] sm:$0xff] }
 0x677   : > { %v3615_v47 = vsel %vm3590_vm6, %v3550_v4, %v2416_v20  ;;  %13882 = vst [vmem:[#allocation34_spill] sm:$0xff] %v9798_v50 }
 0x678   : > { %v3680_v2 = vsel %vm3655_vm7, %v3615_v47, %v2608_v35  ;;  %v13884_v35 = vld [vmem:[#allocation172_spill] sm:$0xff] }
 0x679   : > { %v3227_v4 = vsel %vm3201_vm1, %v13701_v41, %v13884_v35  ;;  %v13888_v35 = vld [vmem:[#allocation111_spill] sm:$0xff] }
 0x67b   : > { %2745 = vrot.lane.b32.xlu1 %v13880_v38, %s6839_s22  ;;  %2922 = vrot.lane.b32.xlu2 %v13712_v10, %s6841_s24 }
 0x67c   : > { %3114 = vrot.lane.b32.xlu0 %v13881_v43, %s6840_s23 }
 0x67d   : > { %v2734_v30 = vpop.permute.xlu1 %2733  ;;  %v2090_v12 = vpop.permute.xlu2 %2089 }
 0x67e   : > { %v3745_v3 = vsel %vm3720_vm8, %v3680_v2, %v2734_v30  ;;  %v3103_v29 = vpop.permute.xlu0 %3102  ;;  %v13886_v30 = vld [vmem:[#allocation348_spill] sm:$0xff]  ;;  %v9835_v18 = vpop.f32.mrf.mxu1 }
 0x67f   : > { %v3810_v23 = vsel %vm3785_vm9, %v3745_v3, %v2911_v49  ;;  %v13885_v49 = vld [vmem:[#allocation336_spill] sm:$0xff]  ;;  %13891 = vst [vmem:[#allocation55_spill] sm:$0xff] %v9835_v18  ;;  %v13897_v18 = vld [vmem:[#allocation234_spill] sm:$0xff] }
 0x680   : > { %v3875_v20 = vsel %vm3850_vm10, %v3810_v23, %v3103_v29  ;;  %v3292_v47 = vsel %vm3266_vm3, %v3227_v4, %v13885_v49  ;;  %v13887_v23 = vld [vmem:[#allocation404_spill] sm:$0xff] }
 0x681   : > { %6608 = vmatmul.msk.f32.gmra.mxu1 %vm3922_vm11, %v3875_v20  ;;  %v3357_v3 = vsel %vm3331_vm2, %v3292_v47, %v13886_v30 }
 0x682   : > { %v3421_v20 = vsel %vm456_vm0, %v3357_v3, %v13887_v23  ;;  %v13890_v23 = vld [vmem:[#allocation141_spill] sm:$0xff] }
 0x683   : > { %2099 = vrot.lane.b32.xlu1 %v13832_v48, %s6836_s16  ;;  %2248 = vrot.lane.b32.xlu2 %v13883_v57, %s6837_s19 }
 0x684   : > { %2429 = vrot.lane.b32.xlu0 %v7631_v63, %s6838_s20 }
 0x685   : > { %v2088_v38 = vpop.permute.xlu1 %2087  ;;  %v2612_v2 = vpop.permute.xlu2 %2611 }
 0x686   : > { %v2418_v29 = vpop.permute.xlu0 %2417  ;;  %v3486_v57 = vsel %vm3460_vm4, %v3421_v20, %v2088_v38 }
 0x687   : > { %v3551_v50 = vsel %vm3525_vm5, %v3486_v57, %v2237_v15  ;;  %v13889_v15 = vld [vmem:[#allocation229_spill] sm:$0xff] }
 0x688   : > { %v3616_v47 = vsel %vm3590_vm6, %v3551_v50, %v2418_v29 }
 0x68b   : > { %2621 = vrot.lane.b32.xlu1 %v13860_v11, %s6837_s19  ;;  %2747 = vrot.lane.b32.xlu2 %v13888_v35, %s6839_s22 }
 0x68c   : > { %2924 = vrot.lane.b32.xlu0 %v7631_v63, %s6841_s24 }
 0x68d   : > { %v2610_v4 = vpop.permute.xlu1 %2609  ;;  %v3107_v49 = vpop.permute.xlu2 %3106 }
 0x68e   : > { %v2913_v30 = vpop.permute.xlu0 %2912  ;;  %v3681_v3 = vsel %vm3655_vm7, %v3616_v47, %v2610_v4  ;;  %v13893_v47 = vld [vmem:[#allocation345_spill] sm:$0xff] }
 0x68f   : > { %v3746_v38 = vsel %vm3720_vm8, %v3681_v3, %v2736_v14  ;;  %v13892_v14 = vld [vmem:[#allocation164_spill] sm:$0xff] }
 0x690   : > { %v3811_v20 = vsel %vm3785_vm9, %v3746_v38, %v2913_v30  ;;  %v3228_v4 = vsel %vm3201_vm1, %v7415_v60, %v13892_v14  ;;  %v13895_v30 = vld [vmem:[#allocation406_spill] sm:$0xff] }
 0x691   : > { %v3293_v3 = vsel %vm3266_vm3, %v3228_v4, %v13893_v47 }
 0x693   : > { %3116 = vrot.lane.b32.xlu1 %v13889_v15, %s6840_s23  ;;  %2101 = vrot.lane.b32.xlu2 %v13839_v24, %s6836_s16 }
 0x694   : > { %2250 = vrot.lane.b32.xlu0 %v13890_v23, %s6837_s19  ;;  %v3358_v23 = vsel %vm3331_vm2, %v3293_v3, %v13894_v36 }
 0x695   : > { %v3105_v57 = vpop.permute.xlu1 %3104  ;;  %v2422_v35 = vpop.permute.xlu2 %2421  ;;  %v3422_v38 = vsel %vm456_vm0, %v3358_v23, %v13895_v30 }
 0x696   : > { %v3876_v50 = vsel %vm3850_vm10, %v3811_v20, %v3105_v57  ;;  %v2239_v29 = vpop.permute.xlu0 %2238  ;;  %v13896_v20 = vld [vmem:[#allocation116_spill] sm:$0xff]  ;;  %v3487_v57 = vsel %vm3460_vm4, %v3422_v38, %v2090_v12 }
 0x697   : > { %6609 = vmatmul.msk.f32.gmra.mxu1 %vm3922_vm11, %v3876_v50  ;;  %v3552_v4 = vsel %vm3525_vm5, %v3487_v57, %v2239_v29  ;;  %v9866_v57 = vpop.f32.mrf.mxu1 }
 0x698   : > { %13898 = vst [vmem:[#allocation33_spill] sm:$0xff] %v9866_v57  ;;  %v13904_v57 = vld [vmem:[#allocation110_spill] sm:$0xff] }
 0x69b   : > { %2431 = vrot.lane.b32.xlu1 %v7651_v54, %s6838_s20  ;;  %2623 = vrot.lane.b32.xlu2 %v13867_v13, %s6837_s19 }
 0x69c   : > { %2749 = vrot.lane.b32.xlu0 %v13896_v20, %s6839_s22 }
 0x69d   : > { %v2420_v50 = vpop.permute.xlu1 %2419  ;;  %v2917_v14 = vpop.permute.xlu2 %2916 }
 0x69e   : > { %v2738_v47 = vpop.permute.xlu0 %2737  ;;  %v3617_v36 = vsel %vm3590_vm6, %v3552_v4, %v2420_v50  ;;  %v13900_v4 = vld [vmem:[#allocation56_spill] sm:$0xff] }
 0x69f   : > { %v3682_v3 = vsel %vm3655_vm7, %v3617_v36, %v2612_v2  ;;  %v13899_v2 = vld [vmem:[#allocation183_spill] sm:$0xff] }
 0x6a0   : > { %v3747_v12 = vsel %vm3720_vm8, %v3682_v3, %v2738_v47  ;;  %v3229_v50 = vsel %vm3201_vm1, %v7435_v51, %v13899_v2  ;;  %v13901_v47 = vld [vmem:[#allocation134_spill] sm:$0xff]  ;;  %v13902_v3 = vld [vmem:[#allocation361_spill] sm:$0xff] }
 0x6a1   : > { %v3294_v36 = vsel %vm3266_vm3, %v3229_v50, %v13900_v4 }
 0x6a3   : > { %2926 = vrot.lane.b32.xlu1 %v7651_v54, %s6841_s24  ;;  %3118 = vrot.lane.b32.xlu2 %v13897_v18, %s6840_s23 }
 0x6a4   : > { %2103 = vrot.lane.b32.xlu0 %v13846_v17, %s6836_s16 }
 0x6a5   : > { %v2915_v23 = vpop.permute.xlu1 %2914  ;;  %v2243_v30 = vpop.permute.xlu2 %2242 }
 0x6a6   : > { %v3812_v29 = vsel %vm3785_vm9, %v3747_v12, %v2915_v23  ;;  %v2092_v38 = vpop.permute.xlu0 %2091  ;;  %v13903_v12 = vld [vmem:[#allocation396_spill] sm:$0xff] }
 0x6a7   : > { %v3877_v20 = vsel %vm3850_vm10, %v3812_v29, %v3107_v49  ;;  %v3359_v49 = vsel %vm3331_vm2, %v3294_v36, %v13902_v3  ;;  %v13905_v36 = vld [vmem:[#allocation242_spill] sm:$0xff] }
 0x6a8   : > { %6610 = vmatmul.msk.f32.gmra.mxu1 %vm3922_vm11, %v3877_v20  ;;  %v3423_v23 = vsel %vm456_vm0, %v3359_v49, %v13903_v12 }
 0x6a9   : > { %v3488_v2 = vsel %vm3460_vm4, %v3423_v23, %v2092_v38 }
 0x6ab   : > { %2252 = vrot.lane.b32.xlu1 %v13901_v47, %s6837_s19  ;;  %2433 = vrot.lane.b32.xlu2 %v13784_v8, %s6838_s20 }
 0x6ac   : > { %2625 = vrot.lane.b32.xlu0 %v13874_v27, %s6837_s19 }
 0x6ad   : > { %v2241_v29 = vpop.permute.xlu1 %2240  ;;  %v2742_v20 = vpop.permute.xlu2 %2741 }
 0x6ae   : > { %v2614_v50 = vpop.permute.xlu0 %2613  ;;  %v3553_v4 = vsel %vm3525_vm5, %v3488_v2, %v2241_v29  ;;  %v9897_v2 = vpop.f32.mrf.mxu1 }
 0x6af   : > { %v3618_v47 = vsel %vm3590_vm6, %v3553_v4, %v2422_v35  ;;  %13906 = vst [vmem:[#allocation47_spill] sm:$0xff] %v9897_v2 }
 0x6b0   : > { %v3683_v3 = vsel %vm3655_vm7, %v3618_v47, %v2614_v50  ;;  %v13908_v50 = vld [vmem:[#allocation190_spill] sm:$0xff] }
 0x6b1   : > { %v3230_v4 = vsel %vm3201_vm1, %v7456_v34, %v13908_v50  ;;  %v13912_v50 = vld [vmem:[#allocation127_spill] sm:$0xff] }
 0x6b3   : > { %2751 = vrot.lane.b32.xlu1 %v13904_v57, %s6839_s22  ;;  %2928 = vrot.lane.b32.xlu2 %v13784_v8, %s6841_s24  ;;  %v13907_v57 = vld [vmem:[#allocation151_spill] sm:$0xff] }
 0x6b4   : > { %3120 = vrot.lane.b32.xlu0 %v13905_v36, %s6840_s23 }
 0x6b5   : > { %v2740_v49 = vpop.permute.xlu1 %2739  ;;  %v2096_v12 = vpop.permute.xlu2 %2095 }
 0x6b6   : > { %v3748_v38 = vsel %vm3720_vm8, %v3683_v3, %v2740_v49  ;;  %v3109_v23 = vpop.permute.xlu0 %3108  ;;  %v9934_v44 = vpop.f32.mrf.mxu1 }
 0x6b7   : > { %v3813_v29 = vsel %vm3785_vm9, %v3748_v38, %v2917_v14  ;;  %v13909_v14 = vld [vmem:[#allocation339_spill] sm:$0xff]  ;;  %13915 = vst [vmem:[#allocation26_spill] sm:$0xff] %v9934_v44  ;;  %v13921_v44 = vld [vmem:[#allocation249_spill] sm:$0xff] }
 0x6b8   : > { %v3878_v35 = vsel %vm3850_vm10, %v3813_v29, %v3109_v23  ;;  %v3295_v47 = vsel %vm3266_vm3, %v3230_v4, %v13909_v14  ;;  %v13910_v38 = vld [vmem:[#allocation351_spill] sm:$0xff] }
 0x6b9   : > { %6611 = vmatmul.msk.f32.gmra.mxu1 %vm3922_vm11, %v3878_v35  ;;  %v3360_v23 = vsel %vm3331_vm2, %v3295_v47, %v13910_v38  ;;  %v13911_v35 = vld [vmem:[#allocation407_spill] sm:$0xff] }
 0x6ba   : > { %v3424_v2 = vsel %vm456_vm0, %v3360_v23, %v13911_v35 }
 0x6bb   : > { %2105 = vrot.lane.b32.xlu1 %v13853_v45, %s6836_s16  ;;  %2254 = vrot.lane.b32.xlu2 %v13907_v57, %s6837_s19 }
 0x6bc   : > { %2435 = vrot.lane.b32.xlu0 %v13795_v56, %s6838_s20 }
 0x6bd   : > { %v2094_v3 = vpop.permute.xlu1 %2093  ;;  %v2618_v49 = vpop.permute.xlu2 %2617 }
 0x6be   : > { %v2424_v29 = vpop.permute.xlu0 %2423  ;;  %v3489_v57 = vsel %vm3460_vm4, %v3424_v2, %v2094_v3  ;;  %v13914_v3 = vld [vmem:[#allocation159_spill] sm:$0xff] }
 0x6bf   : > { %v3554_v52 = vsel %vm3525_vm5, %v3489_v57, %v2243_v30  ;;  %v13913_v30 = vld [vmem:[#allocation248_spill] sm:$0xff] }
 0x6c0   : > { %v3619_v47 = vsel %vm3590_vm6, %v3554_v52, %v2424_v29 }
 0x6c3   : > { %2627 = vrot.lane.b32.xlu1 %v13881_v43, %s6837_s19  ;;  %2753 = vrot.lane.b32.xlu2 %v13912_v50, %s6839_s22 }
 0x6c4   : > { %2930 = vrot.lane.b32.xlu0 %v13795_v56, %s6841_s24 }
 0x6c5   : > { %v2616_v4 = vpop.permute.xlu1 %2615  ;;  %v3113_v14 = vpop.permute.xlu2 %3112 }
 0x6c6   : > { %v2919_v38 = vpop.permute.xlu0 %2918  ;;  %v3684_v23 = vsel %vm3655_vm7, %v3619_v47, %v2616_v4  ;;  %v13917_v47 = vld [vmem:[#allocation75_spill] sm:$0xff] }
 0x6c7   : > { %v3749_v2 = vsel %vm3720_vm8, %v3684_v23, %v2742_v20  ;;  %v13916_v20 = vld [vmem:[#allocation182_spill] sm:$0xff] }
 0x6c8   : > { %v3814_v35 = vsel %vm3785_vm9, %v3749_v2, %v2919_v38  ;;  %v3231_v4 = vsel %vm3201_vm1, %v7487_v61, %v13916_v20  ;;  %v13919_v38 = vld [vmem:[#allocation408_spill] sm:$0xff] }
 0x6c9   : > { %v3296_v23 = vsel %vm3266_vm3, %v3231_v4, %v13917_v47 }
 0x6cb   : > { %3122 = vrot.lane.b32.xlu1 %v13913_v30, %s6840_s23  ;;  %2107 = vrot.lane.b32.xlu2 %v13860_v11, %s6836_s16 }
 0x6cc   : > { %2256 = vrot.lane.b32.xlu0 %v13914_v3, %s6837_s19  ;;  %v3361_v3 = vsel %vm3331_vm2, %v3296_v23, %v13918_v19 }
 0x6cd   : > { %v3111_v57 = vpop.permute.xlu1 %3110  ;;  %v2428_v50 = vpop.permute.xlu2 %2427  ;;  %v3425_v2 = vsel %vm456_vm0, %v3361_v3, %v13919_v38 }
 0x6ce   : > { %v3879_v52 = vsel %vm3850_vm10, %v3814_v35, %v3111_v57  ;;  %v2245_v29 = vpop.permute.xlu0 %2244  ;;  %v13920_v35 = vld [vmem:[#allocation133_spill] sm:$0xff]  ;;  %v3490_v57 = vsel %vm3460_vm4, %v3425_v2, %v2096_v12 }
 0x6cf   : > { %6612 = vmatmul.msk.f32.gmra.mxu1 %vm3922_vm11, %v3879_v52  ;;  %v3555_v4 = vsel %vm3525_vm5, %v3490_v57, %v2245_v29  ;;  %v9965_v57 = vpop.f32.mrf.mxu1 }
 0x6d0   : > { %13922 = vst [vmem:[#allocation314_spill] sm:$0xff] %v9965_v57  ;;  %v13928_v57 = vld [vmem:[#allocation126_spill] sm:$0xff] }
 0x6d3   : > { %2437 = vrot.lane.b32.xlu1 %v13804_v7, %s6838_s20  ;;  %2629 = vrot.lane.b32.xlu2 %v13889_v15, %s6837_s19 }
 0x6d4   : > { %2755 = vrot.lane.b32.xlu0 %v13920_v35, %s6839_s22 }
 0x6d5   : > { %v2426_v52 = vpop.permute.xlu1 %2425  ;;  %v2923_v20 = vpop.permute.xlu2 %2922 }
 0x6d6   : > { %v2744_v47 = vpop.permute.xlu0 %2743  ;;  %v3620_v19 = vsel %vm3590_vm6, %v3555_v4, %v2426_v52  ;;  %v13924_v4 = vld [vmem:[#allocation74_spill] sm:$0xff] }
 0x6d7   : > { %v3685_v23 = vsel %vm3655_vm7, %v3620_v19, %v2618_v49  ;;  %v13923_v49 = vld [vmem:[#allocation201_spill] sm:$0xff] }
 0x6d8   : > { %v3750_v12 = vsel %vm3720_vm8, %v3685_v23, %v2744_v47  ;;  %v3232_v52 = vsel %vm3201_vm1, %v7507_v53, %v13923_v49  ;;  %v13925_v47 = vld [vmem:[#allocation150_spill] sm:$0xff]  ;;  %v13926_v23 = vld [vmem:[#allocation364_spill] sm:$0xff] }
 0x6d9   : > { %v3297_v19 = vsel %vm3266_vm3, %v3232_v52, %v13924_v4 }
 0x6db   : > { %2932 = vrot.lane.b32.xlu1 %v13804_v7, %s6841_s24  ;;  %3124 = vrot.lane.b32.xlu2 %v13921_v44, %s6840_s23 }
 0x6dc   : > { %2109 = vrot.lane.b32.xlu0 %v13867_v13, %s6836_s16 }
 0x6dd   : > { %v2921_v3 = vpop.permute.xlu1 %2920  ;;  %v2249_v38 = vpop.permute.xlu2 %2248 }
 0x6de   : > { %v3815_v29 = vsel %vm3785_vm9, %v3750_v12, %v2921_v3  ;;  %v2098_v2 = vpop.permute.xlu0 %2097  ;;  %v13927_v12 = vld [vmem:[#allocation399_spill] sm:$0xff] }
 0x6df   : > { %v3880_v35 = vsel %vm3850_vm10, %v3815_v29, %v3113_v14  ;;  %v3362_v14 = vsel %vm3331_vm2, %v3297_v19, %v13926_v23  ;;  %v13929_v19 = vld [vmem:[#allocation257_spill] sm:$0xff] }
 0x6e0   : > { %6613 = vmatmul.msk.f32.gmra.mxu1 %vm3922_vm11, %v3880_v35  ;;  %v3426_v3 = vsel %vm456_vm0, %v3362_v14, %v13927_v12 }
 0x6e1   : > { %v3491_v49 = vsel %vm3460_vm4, %v3426_v3, %v2098_v2 }
 0x6e3   : > { %2258 = vrot.lane.b32.xlu1 %v13925_v47, %s6837_s19  ;;  %2439 = vrot.lane.b32.xlu2 %v13811_v6, %s6838_s20 }
 0x6e4   : > { %2631 = vrot.lane.b32.xlu0 %v13897_v18, %s6837_s19 }
 0x6e5   : > { %v2247_v29 = vpop.permute.xlu1 %2246  ;;  %v2748_v35 = vpop.permute.xlu2 %2747 }
 0x6e6   : > { %v2620_v52 = vpop.permute.xlu0 %2619  ;;  %v3556_v4 = vsel %vm3525_vm5, %v3491_v49, %v2247_v29  ;;  %v9996_v49 = vpop.f32.mrf.mxu1 }
 0x6e7   : > { %v3621_v47 = vsel %vm3590_vm6, %v3556_v4, %v2428_v50  ;;  %13930 = vst [vmem:[#allocation48_spill] sm:$0xff] %v9996_v49 }
 0x6e8   : > { %v3686_v23 = vsel %vm3655_vm7, %v3621_v47, %v2620_v52  ;;  %v13932_v52 = vld [vmem:[#allocation208_spill] sm:$0xff] }
 0x6e9   : > { %v3233_v4 = vsel %vm3201_vm1, %v7528_v31, %v13932_v52  ;;  %v13936_v52 = vld [vmem:[#allocation143_spill] sm:$0xff] }
 0x6eb   : > { %2757 = vrot.lane.b32.xlu1 %v13928_v57, %s6839_s22  ;;  %2934 = vrot.lane.b32.xlu2 %v13811_v6, %s6841_s24  ;;  %v13931_v57 = vld [vmem:[#allocation169_spill] sm:$0xff] }
 0x6ec   : > { %3126 = vrot.lane.b32.xlu0 %v13929_v19, %s6840_s23 }
 0x6ed   : > { %v2746_v14 = vpop.permute.xlu1 %2745  ;;  %v2102_v12 = vpop.permute.xlu2 %2101 }
 0x6ee   : > { %v3751_v2 = vsel %vm3720_vm8, %v3686_v23, %v2746_v14  ;;  %v3115_v3 = vpop.permute.xlu0 %3114  ;;  %v10033_v0 = vpop.f32.mrf.mxu1 }
 0x6ef   : > { %v3816_v29 = vsel %vm3785_vm9, %v3751_v2, %v2923_v20  ;;  %v13933_v20 = vld [vmem:[#allocation342_spill] sm:$0xff]  ;;  %13939 = vst [vmem:[#allocation22_spill] sm:$0xff] %v10033_v0  ;;  %v13945_v0 = vld [vmem:[#allocation264_spill] sm:$0xff] }
 0x6f0   : > { %v3881_v50 = vsel %vm3850_vm10, %v3816_v29, %v3115_v3  ;;  %v3298_v47 = vsel %vm3266_vm3, %v3233_v4, %v13933_v20  ;;  %v13934_v2 = vld [vmem:[#allocation354_spill] sm:$0xff] }
 0x6f1   : > { %6614 = vmatmul.msk.f32.gmra.mxu1 %vm3922_vm11, %v3881_v50  ;;  %v3363_v3 = vsel %vm3331_vm2, %v3298_v47, %v13934_v2  ;;  %v13935_v50 = vld [vmem:[#allocation409_spill] sm:$0xff] }
 0x6f2   : > { %v3427_v49 = vsel %vm456_vm0, %v3363_v3, %v13935_v50 }
 0x6f3   : > { %2111 = vrot.lane.b32.xlu1 %v13874_v27, %s6836_s16  ;;  %2260 = vrot.lane.b32.xlu2 %v13931_v57, %s6837_s19 }
 0x6f4   : > { %2441 = vrot.lane.b32.xlu0 %v13818_v32, %s6838_s20 }
 0x6f5   : > { %v2100_v23 = vpop.permute.xlu1 %2099  ;;  %v2624_v14 = vpop.permute.xlu2 %2623 }
 0x6f6   : > { %v2430_v29 = vpop.permute.xlu0 %2429  ;;  %v3492_v57 = vsel %vm3460_vm4, %v3427_v49, %v2100_v23  ;;  %v13938_v23 = vld [vmem:[#allocation177_spill] sm:$0xff] }
 0x6f7   : > { %v3557_v59 = vsel %vm3525_vm5, %v3492_v57, %v2249_v38  ;;  %v13937_v38 = vld [vmem:[#allocation263_spill] sm:$0xff] }
 0x6f8   : > { %v3622_v47 = vsel %vm3590_vm6, %v3557_v59, %v2430_v29 }
 0x6fb   : > { %2633 = vrot.lane.b32.xlu1 %v13905_v36, %s6837_s19  ;;  %2759 = vrot.lane.b32.xlu2 %v13936_v52, %s6839_s22 }
 0x6fc   : > { %2936 = vrot.lane.b32.xlu0 %v13818_v32, %s6841_s24 }
 0x6fd   : > { %v2622_v4 = vpop.permute.xlu1 %2621  ;;  %v3119_v20 = vpop.permute.xlu2 %3118 }
 0x6fe   : > { %v2925_v2 = vpop.permute.xlu0 %2924  ;;  %v3687_v3 = vsel %vm3655_vm7, %v3622_v47, %v2622_v4  ;;  %v13941_v47 = vld [vmem:[#allocation92_spill] sm:$0xff] }
 0x6ff   : > { %v3752_v49 = vsel %vm3720_vm8, %v3687_v3, %v2748_v35  ;;  %v13940_v35 = vld [vmem:[#allocation200_spill] sm:$0xff] }
 0x700   : > { %v3817_v50 = vsel %vm3785_vm9, %v3752_v49, %v2925_v2  ;;  %v3234_v4 = vsel %vm3201_vm1, %v7559_v5, %v13940_v35  ;;  %v13943_v2 = vld [vmem:[#allocation410_spill] sm:$0xff] }
 0x701   : > { %v3299_v3 = vsel %vm3266_vm3, %v3234_v4, %v13941_v47 }
 0x703   : > { %3128 = vrot.lane.b32.xlu1 %v13937_v38, %s6840_s23  ;;  %2113 = vrot.lane.b32.xlu2 %v13881_v43, %s6836_s16 }
 0x704   : > { %2262 = vrot.lane.b32.xlu0 %v13938_v23, %s6837_s19  ;;  %v3364_v23 = vsel %vm3331_vm2, %v3299_v3, %v13942_v37 }
 0x705   : > { %v3117_v57 = vpop.permute.xlu1 %3116  ;;  %v2434_v52 = vpop.permute.xlu2 %2433  ;;  %v3428_v49 = vsel %vm456_vm0, %v3364_v23, %v13943_v2 }
 0x706   : > { %v3882_v59 = vsel %vm3850_vm10, %v3817_v50, %v3117_v57  ;;  %v2251_v29 = vpop.permute.xlu0 %2250  ;;  %v13944_v50 = vld [vmem:[#allocation149_spill] sm:$0xff]  ;;  %v3493_v57 = vsel %vm3460_vm4, %v3428_v49, %v2102_v12 }
 0x707   : > { %6615 = vmatmul.msk.f32.gmra.mxu1 %vm3922_vm11, %v3882_v59  ;;  %v3558_v4 = vsel %vm3525_vm5, %v3493_v57, %v2251_v29  ;;  %v10064_v57 = vpop.f32.mrf.mxu1 }
 0x708   : > { %13946 = vst [vmem:[#allocation50_spill] sm:$0xff] %v10064_v57 }
 0x70b   : > { %2443 = vrot.lane.b32.xlu1 %v13825_v39, %s6838_s20  ;;  %2635 = vrot.lane.b32.xlu2 %v13913_v30, %s6837_s19 }
 0x70c   : > { %2761 = vrot.lane.b32.xlu0 %v13944_v50, %s6839_s22 }
 0x70d   : > { %v2432_v59 = vpop.permute.xlu1 %2431  ;;  %v2929_v35 = vpop.permute.xlu2 %2928 }
 0x70e   : > { %v2750_v47 = vpop.permute.xlu0 %2749  ;;  %v3623_v37 = vsel %vm3590_vm6, %v3558_v4, %v2432_v59  ;;  %v13948_v4 = vld [vmem:[#allocation91_spill] sm:$0xff] }
 0x70f   : > { %v3688_v3 = vsel %vm3655_vm7, %v3623_v37, %v2624_v14  ;;  %v13947_v14 = vld [vmem:[#allocation219_spill] sm:$0xff] }
 0x710   : > { %v3753_v12 = vsel %vm3720_vm8, %v3688_v3, %v2750_v47  ;;  %v3235_v59 = vsel %vm3201_vm1, %v13713_v16, %v13947_v14  ;;  %v13949_v47 = vld [vmem:[#allocation168_spill] sm:$0xff]  ;;  %v13950_v3 = vld [vmem:[#allocation366_spill] sm:$0xff] }
 0x711   : > { %v3300_v37 = vsel %vm3266_vm3, %v3235_v59, %v13948_v4 }
 0x713   : > { %2938 = vrot.lane.b32.xlu1 %v13825_v39, %s6841_s24  ;;  %3130 = vrot.lane.b32.xlu2 %v13945_v0, %s6840_s23 }
 0x714   : > { %1923 = vrot.lane.b32.xlu0 %v13832_v48, %s6835_s15 }
 0x715   : > { %v2927_v23 = vpop.permute.xlu1 %2926  ;;  %v2255_v2 = vpop.permute.xlu2 %2254 }
 0x716   : > { %v3818_v29 = vsel %vm3785_vm9, %v3753_v12, %v2927_v23  ;;  %v2104_v49 = vpop.permute.xlu0 %2103  ;;  %v13951_v12 = vld [vmem:[#allocation402_spill] sm:$0xff] }
 0x717   : > { %v3883_v50 = vsel %vm3850_vm10, %v3818_v29, %v3119_v20  ;;  %v3365_v20 = vsel %vm3331_vm2, %v3300_v37, %v13950_v3  ;;  %v13952_v37 = vld [vmem:[#allocation142_spill] sm:$0xff] }
 0x718   : > { %6616 = vmatmul.msk.f32.gmra.mxu1 %vm3922_vm11, %v3883_v50  ;;  %v3429_v23 = vsel %vm456_vm0, %v3365_v20, %v13951_v12 }
 0x719   : > { %v3494_v14 = vsel %vm3460_vm4, %v3429_v23, %v2104_v49 }
 0x71b   : > { %2115 = vrot.lane.b32.xlu1 %v13889_v15, %s6836_s16  ;;  %2264 = vrot.lane.b32.xlu2 %v13949_v47, %s6837_s19 }
 0x71c   : > { %2445 = vrot.lane.b32.xlu0 %v13832_v48, %s6838_s20 }
 0x71d   : > { %v2253_v29 = vpop.permute.xlu1 %2252  ;;  %v2754_v50 = vpop.permute.xlu2 %2753 }
 0x71e   : > { %v2626_v59 = vpop.permute.xlu0 %2625  ;;  %v3559_v4 = vsel %vm3525_vm5, %v3494_v14, %v2253_v29  ;;  %v10095_v29 = vpop.f32.mrf.mxu1  ;;  %v13954_v14 = vld [vmem:[#allocation271_spill] sm:$0xff] }
 0x71f   : > { %v3624_v57 = vsel %vm3590_vm6, %v3559_v4, %v2434_v52  ;;  %13953 = vst [vmem:[#allocation313_spill] sm:$0xff] %v10095_v29 }
 0x720   : > { %v3689_v47 = vsel %vm3655_vm7, %v3624_v57, %v2626_v59  ;;  %v13955_v57 = vld [vmem:[#allocation226_spill] sm:$0xff] }
 0x721   : > { %v3236_v59 = vsel %vm3201_vm1, %v13712_v10, %v13955_v57  ;;  %v13959_v57 = vld [vmem:[#allocation187_spill] sm:$0xff] }
 0x723   : > { %2637 = vrot.lane.b32.xlu1 %v13921_v44, %s6837_s19  ;;  %2763 = vrot.lane.b32.xlu2 %v13952_v37, %s6839_s22 }
 0x724   : > { %2940 = vrot.lane.b32.xlu0 %v13832_v48, %s6841_s24 }
 0x725   : > { %v2752_v3 = vpop.permute.xlu1 %2751  ;;  %v2108_v20 = vpop.permute.xlu2 %2107 }
 0x726   : > { %v3754_v49 = vsel %vm3720_vm8, %v3689_v47, %v2752_v3  ;;  %v3121_v12 = vpop.permute.xlu0 %3120  ;;  %v13957_v3 = vld [vmem:[#allocation357_spill] sm:$0xff]  ;;  %v10132_v21 = vpop.f32.mrf.mxu1 }
 0x727   : > { %v3819_v23 = vsel %vm3785_vm9, %v3754_v49, %v2929_v35  ;;  %v13956_v35 = vld [vmem:[#allocation344_spill] sm:$0xff]  ;;  %13962 = vst [vmem:[#allocation40_spill] sm:$0xff] %v10132_v21 }
 0x728   : > { %v3884_v52 = vsel %vm3850_vm10, %v3819_v23, %v3121_v12  ;;  %v3301_v4 = vsel %vm3266_vm3, %v3236_v59, %v13956_v35  ;;  %v13958_v23 = vld [vmem:[#allocation411_spill] sm:$0xff] }
 0x729   : > { %6617 = vmatmul.msk.f32.gmra.mxu1 %vm3922_vm11, %v3884_v52  ;;  %v3366_v49 = vsel %vm3331_vm2, %v3301_v4, %v13957_v3 }
 0x72a   : > { %v3430_v52 = vsel %vm456_vm0, %v3366_v49, %v13958_v23 }
 0x72b   : > { %3132 = vrot.lane.b32.xlu1 %v13954_v14, %s6840_s23  ;;  %1925 = vrot.lane.b32.xlu2 %v13839_v24, %s6835_s15 }
 0x72c   : > { %2117 = vrot.lane.b32.xlu0 %v13897_v18, %s6836_s16 }
 0x72d   : > { %v2106_v37 = vpop.permute.xlu1 %2105  ;;  %v2630_v47 = vpop.permute.xlu2 %2629 }
 0x72e   : > { %v2436_v12 = vpop.permute.xlu0 %2435  ;;  %v3495_v29 = vsel %vm3460_vm4, %v3430_v52, %v2106_v37 }
 0x72f   : > { %v3560_v9 = vsel %vm3525_vm5, %v3495_v29, %v2255_v2  ;;  %v13960_v2 = vld [vmem:[#allocation161_spill] sm:$0xff]  ;;  %v13961_v29 = vld [vmem:[#allocation280_spill] sm:$0xff] }
 0x730   : > { %v3625_v4 = vsel %vm3590_vm6, %v3560_v9, %v2436_v12 }
 0x733   : > { %2447 = vrot.lane.b32.xlu2 %v13839_v24, %s6838_s20  ;;  %2266 = vrot.lane.b32.xlu1 %v13959_v57, %s6837_s19 }
 0x734   : > { %2639 = vrot.lane.b32.xlu0 %v13929_v19, %s6837_s19 }
 0x735   : > { %v2628_v59 = vpop.permute.xlu1 %2627  ;;  %v3125_v35 = vpop.permute.xlu2 %3124 }
 0x736   : > { %v2931_v3 = vpop.permute.xlu0 %2930  ;;  %v3690_v49 = vsel %vm3655_vm7, %v3625_v4, %v2628_v59  ;;  %v13964_v4 = vld [vmem:[#allocation107_spill] sm:$0xff] }
 0x737   : > { %v3755_v37 = vsel %vm3720_vm8, %v3690_v49, %v2754_v50  ;;  %v13963_v50 = vld [vmem:[#allocation218_spill] sm:$0xff] }
 0x738   : > { %v3820_v23 = vsel %vm3785_vm9, %v3755_v37, %v2931_v3  ;;  %v3237_v59 = vsel %vm3201_vm1, %v7631_v63, %v13963_v50  ;;  %v13966_v3 = vld [vmem:[#allocation412_spill] sm:$0xff] }
 0x739   : > { %v3302_v49 = vsel %vm3266_vm3, %v3237_v59, %v13964_v4 }
 0x73b   : > { %2942 = vrot.lane.b32.xlu2 %v13839_v24, %s6841_s24  ;;  %2765 = vrot.lane.b32.xlu1 %v13960_v2, %s6839_s22  ;;  %v13965_v2 = vld [vmem:[#allocation367_spill] sm:$0xff] }
 0x73c   : > { %3134 = vrot.lane.b32.xlu0 %v13961_v29, %s6840_s23  ;;  %v3367_v40 = vsel %vm3331_vm2, %v3302_v49, %v13965_v2 }
 0x73d   : > { %v3123_v52 = vpop.permute.xlu1 %3122  ;;  %v2440_v57 = vpop.permute.xlu2 %2439  ;;  %v3431_v37 = vsel %vm456_vm0, %v3367_v40, %v13966_v3  ;;  %v13968_v40 = vld [vmem:[#allocation167_spill] sm:$0xff] }
 0x73e   : > { %v3885_v9 = vsel %vm3850_vm10, %v3820_v23, %v3123_v52  ;;  %v2257_v12 = vpop.permute.xlu0 %2256  ;;  %v13967_v23 = vld [vmem:[#allocation195_spill] sm:$0xff]  ;;  %v3496_v52 = vsel %vm3460_vm4, %v3431_v37, %v2108_v20 }
 0x73f   : > { %6618 = vmatmul.msk.f32.gmra.mxu1 %vm3922_vm11, %v3885_v9  ;;  %v3561_v59 = vsel %vm3525_vm5, %v3496_v52, %v2257_v12 }
 0x743   : > { %2119 = vrot.lane.b32.xlu2 %v13905_v36, %s6836_s16  ;;  %1927 = vrot.lane.b32.xlu1 %v13846_v17, %s6835_s15 }
 0x744   : > { %2268 = vrot.lane.b32.xlu0 %v13967_v23, %s6837_s19 }
 0x745   : > { %v2438_v9 = vpop.permute.xlu1 %2437  ;;  %v2935_v50 = vpop.permute.xlu2 %2934 }
 0x746   : > { %v2756_v4 = vpop.permute.xlu0 %2755  ;;  %v3626_v49 = vsel %vm3590_vm6, %v3561_v59, %v2438_v9  ;;  %v10163_v9 = vpop.f32.mrf.mxu1 }
 0x747   : > { %v3691_v2 = vsel %vm3655_vm7, %v3626_v49, %v2630_v47  ;;  %13969 = vst [vmem:[#allocation43_spill] sm:$0xff] %v10163_v9  ;;  %v13970_v47 = vld [vmem:[#allocation237_spill] sm:$0xff]  ;;  %v13971_v49 = vld [vmem:[#allocation106_spill] sm:$0xff] }
 0x748   : > { %v3756_v20 = vsel %vm3720_vm8, %v3691_v2, %v2756_v4  ;;  %v3238_v59 = vsel %vm3201_vm1, %v7651_v54, %v13970_v47  ;;  %v13972_v4 = vld [vmem:[#allocation281_spill] sm:$0xff]  ;;  %v13973_v2 = vld [vmem:[#allocation368_spill] sm:$0xff]  ;;  %v13975_v9 = vld [vmem:[#allocation186_spill] sm:$0xff] }
 0x74b   : > { %2641 = vrot.lane.b32.xlu2 %v13937_v38, %s6837_s19  ;;  %2449 = vrot.lane.b32.xlu1 %v13846_v17, %s6838_s20 }
 0x74c   : > { %2767 = vrot.lane.b32.xlu0 %v13968_v40, %s6839_s22  ;;  %v3303_v40 = vsel %vm3266_vm3, %v3238_v59, %v13971_v49 }
 0x74d   : > { %v2933_v3 = vpop.permute.xlu1 %2932  ;;  %v2261_v37 = vpop.permute.xlu2 %2260 }
 0x74e   : > { %v3821_v12 = vsel %vm3785_vm9, %v3756_v20, %v2933_v3  ;;  %v2110_v23 = vpop.permute.xlu0 %2109  ;;  %v13974_v20 = vld [vmem:[#allocation405_spill] sm:$0xff] }
 0x74f   : > { %v3886_v52 = vsel %vm3850_vm10, %v3821_v12, %v3125_v35  ;;  %v3368_v35 = vsel %vm3331_vm2, %v3303_v40, %v13973_v2 }
 0x750   : > { %6619 = vmatmul.msk.f32.gmra.mxu1 %vm3922_vm11, %v3886_v52  ;;  %v3432_v3 = vsel %vm456_vm0, %v3368_v35, %v13974_v20 }
 0x751   : > { %v3497_v47 = vsel %vm3460_vm4, %v3432_v3, %v2110_v23 }
 0x753   : > { %3136 = vrot.lane.b32.xlu2 %v13972_v4, %s6840_s23  ;;  %2944 = vrot.lane.b32.xlu1 %v13846_v17, %s6841_s24 }
 0x754   : > { %1929 = vrot.lane.b32.xlu0 %v13853_v45, %s6835_s15 }
 0x755   : > { %v2259_v12 = vpop.permute.xlu1 %2258  ;;  %v2760_v52 = vpop.permute.xlu2 %2759 }
 0x756   : > { %v2632_v59 = vpop.permute.xlu0 %2631  ;;  %v3562_v49 = vsel %vm3525_vm5, %v3497_v47, %v2259_v12  ;;  %v10194_v12 = vpop.f32.mrf.mxu1 }
 0x757   : > { %v3627_v21 = vsel %vm3590_vm6, %v3562_v49, %v2440_v57  ;;  %13976 = vst [vmem:[#allocation66_spill] sm:$0xff] %v10194_v12 }
 0x758   : > { %v3692_v40 = vsel %vm3655_vm7, %v3627_v21, %v2632_v59  ;;  %v13978_v21 = vld [vmem:[#allocation245_spill] sm:$0xff] }
 0x759   : > { %v3239_v47 = vsel %vm3201_vm1, %v13784_v8, %v13978_v21  ;;  %v13982_v21 = vld [vmem:[#allocation287_spill] sm:$0xff] }
 0x75b   : > { %2270 = vrot.lane.b32.xlu2 %v13975_v9, %s6837_s19  ;;  %2121 = vrot.lane.b32.xlu1 %v13913_v30, %s6836_s16  ;;  %v13977_v9 = vld [vmem:[#allocation160_spill] sm:$0xff] }
 0x75c   : > { %2451 = vrot.lane.b32.xlu0 %v13853_v45, %s6838_s20 }
 0x75d   : > { %v2758_v2 = vpop.permute.xlu1 %2757  ;;  %v2114_v35 = vpop.permute.xlu2 %2113 }
 0x75e   : > { %v3757_v23 = vsel %vm3720_vm8, %v3692_v40, %v2758_v2  ;;  %v3127_v20 = vpop.permute.xlu0 %3126  ;;  %v13980_v2 = vld [vmem:[#allocation360_spill] sm:$0xff]  ;;  %v10231_v28 = vpop.f32.mrf.mxu1 }
 0x75f   : > { %v3822_v3 = vsel %vm3785_vm9, %v3757_v23, %v2935_v50  ;;  %v13979_v50 = vld [vmem:[#allocation64_spill] sm:$0xff]  ;;  %13984 = vst [vmem:[#allocation38_spill] sm:$0xff] %v10231_v28 }
 0x760   : > { %v3887_v57 = vsel %vm3850_vm10, %v3822_v3, %v3127_v20  ;;  %v3304_v59 = vsel %vm3266_vm3, %v3239_v47, %v13979_v50  ;;  %v13981_v3 = vld [vmem:[#allocation413_spill] sm:$0xff] }
 0x761   : > { %6620 = vmatmul.msk.f32.gmra.mxu1 %vm3922_vm11, %v3887_v57  ;;  %v3369_v23 = vsel %vm3331_vm2, %v3304_v59, %v13980_v2 }
 0x762   : > { %v3433_v57 = vsel %vm456_vm0, %v3369_v23, %v13981_v3 }
 0x763   : > { %2769 = vrot.lane.b32.xlu2 %v13977_v9, %s6839_s22  ;;  %2643 = vrot.lane.b32.xlu1 %v13945_v0, %s6837_s19 }
 0x764   : > { %2946 = vrot.lane.b32.xlu0 %v13853_v45, %s6841_s24 }
 0x765   : > { %v2112_v49 = vpop.permute.xlu1 %2111  ;;  %v2636_v40 = vpop.permute.xlu2 %2635 }
 0x766   : > { %v2442_v20 = vpop.permute.xlu0 %2441  ;;  %v3498_v9 = vsel %vm3460_vm4, %v3433_v57, %v2112_v49 }
 0x767   : > { %v3563_v12 = vsel %vm3525_vm5, %v3498_v9, %v2261_v37  ;;  %v13983_v37 = vld [vmem:[#allocation205_spill] sm:$0xff] }
 0x768   : > { %v3628_v59 = vsel %vm3590_vm6, %v3563_v12, %v2442_v20 }
 0x76b   : > { %1931 = vrot.lane.b32.xlu2 %v13860_v11, %s6835_s15  ;;  %3138 = vrot.lane.b32.xlu1 %v13982_v21, %s6840_s23 }
 0x76c   : > { %2123 = vrot.lane.b32.xlu0 %v13921_v44, %s6836_s16 }
 0x76d   : > { %v2634_v47 = vpop.permute.xlu1 %2633  ;;  %v3131_v50 = vpop.permute.xlu2 %3130 }
 0x76e   : > { %v2937_v2 = vpop.permute.xlu0 %2936  ;;  %v3693_v23 = vsel %vm3655_vm7, %v3628_v59, %v2634_v47  ;;  %v13986_v59 = vld [vmem:[#allocation122_spill] sm:$0xff] }
 0x76f   : > { %v3758_v49 = vsel %vm3720_vm8, %v3693_v23, %v2760_v52  ;;  %v13985_v52 = vld [vmem:[#allocation236_spill] sm:$0xff] }
 0x770   : > { %v3823_v3 = vsel %vm3785_vm9, %v3758_v49, %v2937_v2  ;;  %v3240_v47 = vsel %vm3201_vm1, %v13795_v56, %v13985_v52  ;;  %v13988_v2 = vld [vmem:[#allocation179_spill] sm:$0xff]  ;;  %v13989_v49 = vld [vmem:[#allocation414_spill] sm:$0xff] }
 0x771   : > { %v3305_v23 = vsel %vm3266_vm3, %v3240_v47, %v13986_v59 }
 0x773   : > { %2453 = vrot.lane.b32.xlu2 %v13860_v11, %s6838_s20  ;;  %2272 = vrot.lane.b32.xlu1 %v13983_v37, %s6837_s19  ;;  %v13987_v37 = vld [vmem:[#allocation369_spill] sm:$0xff] }
 0x774   : > { %2645 = vrot.lane.b32.xlu0 %v13954_v14, %s6837_s19  ;;  %v3370_v1 = vsel %vm3331_vm2, %v3305_v23, %v13987_v37 }
 0x775   : > { %v3129_v57 = vpop.permute.xlu1 %3128  ;;  %v2265_v9 = vpop.permute.xlu2 %2264 }
 0x776   : > { %v3888_v12 = vsel %vm3850_vm10, %v3823_v3, %v3129_v57  ;;  %v2263_v20 = vpop.permute.xlu0 %2262  ;;  %v3434_v3 = vsel %vm456_vm0, %v3370_v1, %v13989_v49  ;;  %v13990_v57 = vld [vmem:[#allocation292_spill] sm:$0xff]  ;;  %v13991_v1 = vld [vmem:[#allocation213_spill] sm:$0xff] }
 0x777   : > { %6621 = vmatmul.msk.f32.gmra.mxu1 %vm3922_vm11, %v3888_v12  ;;  %v3499_v12 = vsel %vm3460_vm4, %v3434_v3, %v2114_v35 }
 0x778   : > { %v3564_v47 = vsel %vm3525_vm5, %v3499_v12, %v2263_v20 }
 0x77b   : > { %2948 = vrot.lane.b32.xlu2 %v13860_v11, %s6841_s24  ;;  %2771 = vrot.lane.b32.xlu1 %v13988_v2, %s6839_s22 }
 0x77c   : > { %3140 = vrot.lane.b32.xlu0 %v13990_v57, %s6840_s23 }
 0x77d   : > { %v2444_v52 = vpop.permute.xlu1 %2443  ;;  %v2764_v28 = vpop.permute.xlu2 %2763 }
 0x77e   : > { %v2762_v59 = vpop.permute.xlu0 %2761  ;;  %v3629_v23 = vsel %vm3590_vm6, %v3564_v47, %v2444_v52  ;;  %v10262_v52 = vpop.f32.mrf.mxu1 }
 0x77f   : > { %v3694_v37 = vsel %vm3655_vm7, %v3629_v23, %v2636_v40  ;;  %13992 = vst [vmem:[#allocation73_spill] sm:$0xff] %v10262_v52  ;;  %v13993_v40 = vld [vmem:[#allocation256_spill] sm:$0xff]  ;;  %v13995_v23 = vld [vmem:[#allocation121_spill] sm:$0xff] }
 0x780   : > { %v3759_v35 = vsel %vm3720_vm8, %v3694_v37, %v2762_v59  ;;  %v3241_v47 = vsel %vm3201_vm1, %v13804_v7, %v13993_v40  ;;  %v13994_v59 = vld [vmem:[#allocation185_spill] sm:$0xff] }
 0x781   : > { %v13997_v40 = vld [vmem:[#allocation293_spill] sm:$0xff] }
 0x783   : > { %2125 = vrot.lane.b32.xlu2 %v13929_v19, %s6836_s16  ;;  %1933 = vrot.lane.b32.xlu1 %v13867_v13, %s6835_s15 }
 0x784   : > { %2274 = vrot.lane.b32.xlu0 %v13991_v1, %s6837_s19 }
 0x785   : > { %v2939_v2 = vpop.permute.xlu1 %2938  ;;  %v1926_v49 = vpop.permute.xlu2 %1925 }
 0x786   : > { %v3824_v20 = vsel %vm3785_vm9, %v3759_v35, %v2939_v2  ;;  %v1924_v3 = vpop.permute.xlu0 %1923  ;;  %v13996_v35 = vld [vmem:[#allocation71_spill] sm:$0xff] }
 0x787   : > { %v3889_v12 = vsel %vm3850_vm10, %v3824_v20, %v3131_v50  ;;  %v3306_v50 = vsel %vm3266_vm3, %v3241_v47, %v13995_v23 }
 0x788   : > { %6622 = vmatmul.msk.f32.gmra.mxu1 %vm3922_vm11, %v3889_v12  ;;  %v3371_v2 = vsel %vm3331_vm2, %v3306_v50, %v13996_v35 }
 0x789   : > { %v3435_v12 = vsel %vm456_vm0, %v3371_v2, %v1924_v3 }
 0x78b   : > { %2647 = vrot.lane.b32.xlu2 %v13961_v29, %s6837_s19  ;;  %2455 = vrot.lane.b32.xlu1 %v13867_v13, %s6838_s20 }
 0x78c   : > { %2773 = vrot.lane.b32.xlu0 %v13994_v59, %s6839_s22 }
 0x78d   : > { %v2116_v37 = vpop.permute.xlu1 %2115  ;;  %v2448_v1 = vpop.permute.xlu2 %2447 }
 0x78e   : > { %v2446_v20 = vpop.permute.xlu0 %2445  ;;  %v3500_v52 = vsel %vm3460_vm4, %v3435_v12, %v2116_v37  ;;  %v10298_v12 = vpop.f32.mrf.mxu1 }
 0x78f   : > { %v3565_v33 = vsel %vm3525_vm5, %v3500_v52, %v2265_v9  ;;  %v13998_v9 = vld [vmem:[#allocation204_spill] sm:$0xff]  ;;  %13999 = vst [vmem:[#allocation316_spill] sm:$0xff] %v10298_v12 }
 0x790   : > { %v3630_v23 = vsel %vm3590_vm6, %v3565_v33, %v2446_v20 }
 0x793   : > { %3142 = vrot.lane.b32.xlu2 %v13997_v40, %s6840_s23  ;;  %2950 = vrot.lane.b32.xlu1 %v13867_v13, %s6841_s24 }
 0x794   : > { %1935 = vrot.lane.b32.xlu0 %v13874_v27, %s6835_s15 }
 0x795   : > { %v2638_v47 = vpop.permute.xlu1 %2637  ;;  %v2943_v59 = vpop.permute.xlu2 %2942 }
 0x796   : > { %v2941_v50 = vpop.permute.xlu0 %2940  ;;  %v3695_v3 = vsel %vm3655_vm7, %v3630_v23, %v2638_v47  ;;  %v14001_v23 = vld [vmem:[#allocation82_spill] sm:$0xff] }
 0x797   : > { %v3760_v37 = vsel %vm3720_vm8, %v3695_v3, %v2764_v28  ;;  %v14000_v28 = vld [vmem:[#allocation265_spill] sm:$0xff] }
 0x798   : > { %v3825_v52 = vsel %vm3785_vm9, %v3760_v37, %v2941_v50  ;;  %v3242_v47 = vsel %vm3201_vm1, %v13811_v6, %v14000_v28  ;;  %v14003_v50 = vld [vmem:[#allocation363_spill] sm:$0xff] }
 0x799   : > { %v3307_v3 = vsel %vm3266_vm3, %v3242_v47, %v14001_v23 }
 0x79a   : > { %v3372_v37 = vsel %vm3331_vm2, %v3307_v3, %v14003_v50 }
 0x79b   : > { %2276 = vrot.lane.b32.xlu2 %v13998_v9, %s6837_s19  ;;  %2127 = vrot.lane.b32.xlu1 %v13937_v38, %s6836_s16  ;;  %v14002_v9 = vld [vmem:[#allocation178_spill] sm:$0xff] }
 0x79c   : > { %2457 = vrot.lane.b32.xlu0 %v13874_v27, %s6838_s20 }
 0x79d   : > { %v3133_v35 = vpop.permute.xlu1 %3132  ;;  %v2120_v2 = vpop.permute.xlu2 %2119 }
 0x79e   : > { %v3890_v33 = vsel %vm3850_vm10, %v3825_v52, %v3133_v35  ;;  %v2118_v20 = vpop.permute.xlu0 %2117  ;;  %v3436_v52 = vsel %vm456_vm0, %v3372_v37, %v1926_v49 }
 0x79f   : > { %6623 = vmatmul.msk.f32.gmra.mxu1 %vm3922_vm11, %v3890_v33  ;;  %v3501_v28 = vsel %vm3460_vm4, %v3436_v52, %v2118_v20 }
 0x7a3   : > { %2775 = vrot.lane.b32.xlu2 %v14002_v9, %s6839_s22  ;;  %2649 = vrot.lane.b32.xlu1 %v13972_v4, %s6837_s19  ;;  %v14004_v9 = vld [vmem:[#allocation299_spill] sm:$0xff] }
 0x7a4   : > { %2952 = vrot.lane.b32.xlu0 %v13874_v27, %s6841_s24 }
 0x7a5   : > { %v2642_v35 = vpop.permute.xlu2 %2641  ;;  %v2267_v33 = vpop.permute.xlu1 %2266 }
 0x7a6   : > { %v2640_v12 = vpop.permute.xlu0 %2639  ;;  %v3566_v47 = vsel %vm3525_vm5, %v3501_v28, %v2267_v33  ;;  %v10328_v33 = vpop.f32.mrf.mxu1  ;;  %v14006_v28 = vld [vmem:[#allocation223_spill] sm:$0xff] }
 0x7a7   : > { %v3631_v23 = vsel %vm3590_vm6, %v3566_v47, %v2448_v1  ;;  %14005 = vst [vmem:[#allocation30_spill] sm:$0xff] %v10328_v33  ;;  %v14010_v33 = vld [vmem:[#allocation197_spill] sm:$0xff] }
 0x7a8   : > { %v3696_v49 = vsel %vm3655_vm7, %v3631_v23, %v2640_v12  ;;  %v14007_v12 = vld [vmem:[#allocation255_spill] sm:$0xff] }
 0x7a9   : > { %v3243_v47 = vsel %vm3201_vm1, %v13818_v32, %v14007_v12  ;;  %v14011_v12 = vld [vmem:[#allocation305_spill] sm:$0xff] }
 0x7ab   : > { %1937 = vrot.lane.b32.xlu2 %v13881_v43, %s6835_s15  ;;  %3144 = vrot.lane.b32.xlu1 %v14004_v9, %s6840_s23 }
 0x7ac   : > { %2129 = vrot.lane.b32.xlu0 %v13945_v0, %s6836_s16 }
 0x7ad   : > { %v3137_v3 = vpop.permute.xlu2 %3136  ;;  %v2766_v50 = vpop.permute.xlu1 %2765 }
 0x7ae   : > { %v3761_v20 = vsel %vm3720_vm8, %v3696_v49, %v2766_v50  ;;  %v3135_v37 = vpop.permute.xlu0 %3134  ;;  %v14008_v49 = vld [vmem:[#allocation139_spill] sm:$0xff] }
 0x7af   : > { %v3826_v52 = vsel %vm3785_vm9, %v3761_v20, %v2943_v59  ;;  %v3308_v50 = vsel %vm3266_vm3, %v3243_v47, %v14008_v49 }
 0x7b0   : > { %v3891_v1 = vsel %vm3850_vm10, %v3826_v52, %v3135_v37  ;;  %v14009_v37 = vld [vmem:[#allocation370_spill] sm:$0xff] }
 0x7b1   : > { %6624 = vmatmul.msk.f32.gmra.mxu1 %vm3922_vm11, %v3891_v1  ;;  %v3373_v52 = vsel %vm3331_vm2, %v3308_v50, %v14009_v37 }
 0x7b3   : > { %2459 = vrot.lane.b32.xlu2 %v13881_v43, %s6838_s20  ;;  %2278 = vrot.lane.b32.xlu1 %v14006_v28, %s6837_s19 }
 0x7b4   : > { %2651 = vrot.lane.b32.xlu0 %v13982_v21, %s6837_s19 }
 0x7b5   : > { %v2271_v59 = vpop.permute.xlu2 %2270  ;;  %v1928_v23 = vpop.permute.xlu1 %1927 }
 0x7b6   : > { %v2269_v20 = vpop.permute.xlu0 %2268  ;;  %v3437_v1 = vsel %vm456_vm0, %v3373_v52, %v1928_v23 }
 0x7b7   : > { %v3502_v28 = vsel %vm3460_vm4, %v3437_v1, %v2120_v2  ;;  %v14012_v2 = vld [vmem:[#allocation231_spill] sm:$0xff] }
 0x7b8   : > { %v3567_v47 = vsel %vm3525_vm5, %v3502_v28, %v2269_v20  ;;  %v10364_v28 = vpop.f32.mrf.mxu1 }
 0x7b9   : > { %14013 = vst [vmem:[#allocation65_spill] sm:$0xff] %v10364_v28 }
 0x7bb   : > { %2954 = vrot.lane.b32.xlu2 %v13881_v43, %s6841_s24  ;;  %2777 = vrot.lane.b32.xlu1 %v14010_v33, %s6839_s22 }
 0x7bc   : > { %3146 = vrot.lane.b32.xlu0 %v14011_v12, %s6840_s23 }
 0x7bd   : > { %v2770_v6 = vpop.permute.xlu2 %2769  ;;  %v2450_v32 = vpop.permute.xlu1 %2449 }
 0x7be   : > { %v2768_v49 = vpop.permute.xlu0 %2767  ;;  %v3632_v50 = vsel %vm3590_vm6, %v3567_v47, %v2450_v32 }
 0x7bf   : > { %v3697_v23 = vsel %vm3655_vm7, %v3632_v50, %v2642_v35  ;;  %v14014_v35 = vld [vmem:[#allocation274_spill] sm:$0xff] }
 0x7c0   : > { %v3762_v33 = vsel %vm3720_vm8, %v3697_v23, %v2768_v49  ;;  %v3244_v47 = vsel %vm3201_vm1, %v13825_v39, %v14014_v35  ;;  %v14015_v49 = vld [vmem:[#allocation203_spill] sm:$0xff]  ;;  %v14016_v50 = vld [vmem:[#allocation138_spill] sm:$0xff] }
 0x7c1   : > { %v14018_v35 = vld [vmem:[#allocation306_spill] sm:$0xff] }
 0x7c3   : > { %2131 = vrot.lane.b32.xlu2 %v13954_v14, %s6836_s16  ;;  %1939 = vrot.lane.b32.xlu1 %v13889_v15, %s6835_s15 }
 0x7c4   : > { %2280 = vrot.lane.b32.xlu0 %v14012_v2, %s6837_s19 }
 0x7c5   : > { %v1932_v37 = vpop.permute.xlu2 %1931  ;;  %v2945_v52 = vpop.permute.xlu1 %2944 }
 0x7c6   : > { %v3827_v20 = vsel %vm3785_vm9, %v3762_v33, %v2945_v52  ;;  %v1930_v1 = vpop.permute.xlu0 %1929  ;;  %v14017_v33 = vld [vmem:[#allocation76_spill] sm:$0xff] }
 0x7c7   : > { %v3892_v32 = vsel %vm3850_vm10, %v3827_v20, %v3137_v3  ;;  %v3309_v3 = vsel %vm3266_vm3, %v3244_v47, %v14016_v50 }
 0x7c8   : > { %6625 = vmatmul.msk.f32.gmra.mxu1 %vm3922_vm11, %v3892_v32  ;;  %v3374_v52 = vsel %vm3331_vm2, %v3309_v3, %v14017_v33 }
 0x7c9   : > { %v3438_v32 = vsel %vm456_vm0, %v3374_v52, %v1930_v1 }
 0x7cb   : > { %2653 = vrot.lane.b32.xlu2 %v13990_v57, %s6837_s19  ;;  %2461 = vrot.lane.b32.xlu1 %v13889_v15, %s6838_s20 }
 0x7cc   : > { %2779 = vrot.lane.b32.xlu0 %v14015_v49, %s6839_s22 }
 0x7cd   : > { %v2454_v23 = vpop.permute.xlu2 %2453  ;;  %v2122_v2 = vpop.permute.xlu1 %2121 }
 0x7ce   : > { %v2452_v20 = vpop.permute.xlu0 %2451  ;;  %v3503_v28 = vsel %vm3460_vm4, %v3438_v32, %v2122_v2  ;;  %v10400_v32 = vpop.f32.mrf.mxu1 }
 0x7cf   : > { %v3568_v26 = vsel %vm3525_vm5, %v3503_v28, %v2271_v59  ;;  %v14019_v59 = vld [vmem:[#allocation222_spill] sm:$0xff]  ;;  %14020 = vst [vmem:[#allocation52_spill] sm:$0xff] %v10400_v32 }
 0x7d0   : > { %v3633_v50 = vsel %vm3590_vm6, %v3568_v26, %v2452_v20 }
 0x7d3   : > { %3148 = vrot.lane.b32.xlu2 %v14018_v35, %s6840_s23  ;;  %2956 = vrot.lane.b32.xlu1 %v13889_v15, %s6841_s24 }
 0x7d4   : > { %1941 = vrot.lane.b32.xlu0 %v13897_v18, %s6835_s15 }
 0x7d5   : > { %v2949_v47 = vpop.permute.xlu2 %2948  ;;  %v2644_v49 = vpop.permute.xlu1 %2643 }
 0x7d6   : > { %v2947_v3 = vpop.permute.xlu0 %2946  ;;  %v3698_v1 = vsel %vm3655_vm7, %v3633_v50, %v2644_v49  ;;  %v14022_v50 = vld [vmem:[#allocation97_spill] sm:$0xff] }
 0x7d7   : > { %v3763_v2 = vsel %vm3720_vm8, %v3698_v1, %v2770_v6  ;;  %v14021_v6 = vld [vmem:[#allocation282_spill] sm:$0xff] }
 0x7d8   : > { %v3828_v28 = vsel %vm3785_vm9, %v3763_v2, %v2947_v3  ;;  %v3245_v49 = vsel %vm3201_vm1, %v13832_v48, %v14021_v6  ;;  %v14024_v3 = vld [vmem:[#allocation27_spill] sm:$0xff] }
 0x7d9   : > { %v3310_v1 = vsel %vm3266_vm3, %v3245_v49, %v14022_v50 }
 0x7da   : > { %v3375_v2 = vsel %vm3331_vm2, %v3310_v1, %v14024_v3 }
 0x7db   : > { %2282 = vrot.lane.b32.xlu2 %v14019_v59, %s6837_s19  ;;  %2133 = vrot.lane.b32.xlu1 %v13961_v29, %s6836_s16  ;;  %v14023_v59 = vld [vmem:[#allocation196_spill] sm:$0xff] }
 0x7dc   : > { %2463 = vrot.lane.b32.xlu0 %v13897_v18, %s6838_s20 }
 0x7dd   : > { %v2126_v33 = vpop.permute.xlu2 %2125  ;;  %v3139_v52 = vpop.permute.xlu1 %3138 }
 0x7de   : > { %v3893_v26 = vsel %vm3850_vm10, %v3828_v28, %v3139_v52  ;;  %v2124_v20 = vpop.permute.xlu0 %2123  ;;  %v3439_v28 = vsel %vm456_vm0, %v3375_v2, %v1932_v37 }
 0x7df   : > { %6626 = vmatmul.msk.f32.gmra.mxu1 %vm3922_vm11, %v3893_v26  ;;  %v3504_v6 = vsel %vm3460_vm4, %v3439_v28, %v2124_v20 }
 0x7e3   : > { %2781 = vrot.lane.b32.xlu2 %v14023_v59, %s6839_s22  ;;  %2655 = vrot.lane.b32.xlu1 %v13997_v40, %s6837_s19  ;;  %v14025_v59 = vmov 0.0  }
 0x7e4   : > { %2958 = vrot.lane.b32.xlu0 %v13897_v18, %s6841_s24 }
 0x7e5   : > { %v2648_v52 = vpop.permute.xlu2 %2647  ;;  %v2273_v26 = vpop.permute.xlu1 %2272 }
 0x7e6   : > { %v2646_v32 = vpop.permute.xlu0 %2645  ;;  %v3569_v49 = vsel %vm3525_vm5, %v3504_v6, %v2273_v26  ;;  %v10430_v26 = vpop.f32.mrf.mxu1  ;;  %v14027_v6 = vld [vmem:[#allocation241_spill] sm:$0xff] }
 0x7e7   : > { %v3634_v50 = vsel %vm3590_vm6, %v3569_v49, %v2454_v23  ;;  %14026 = vst [vmem:[#allocation84_spill] sm:$0xff] %v10430_v26  ;;  %v14031_v26 = vld [vmem:[#allocation215_spill] sm:$0xff] }
 0x7e8   : > { %v3699_v37 = vsel %vm3655_vm7, %v3634_v50, %v2646_v32  ;;  %v14028_v32 = vld [vmem:[#allocation273_spill] sm:$0xff] }
 0x7e9   : > { %v3246_v49 = vsel %vm3201_vm1, %v13839_v24, %v14028_v32 }
 0x7eb   : > { %1943 = vrot.lane.b32.xlu2 %v13905_v36, %s6835_s15  ;;  %3150 = vrot.lane.b32.xlu1 %v14025_v59, %s6840_s23 }
 0x7ec   : > { %2135 = vrot.lane.b32.xlu0 %v13972_v4, %s6836_s16 }
 0x7ed   : > { %v3143_v1 = vpop.permute.xlu2 %3142  ;;  %v2772_v3 = vpop.permute.xlu1 %2771 }
 0x7ee   : > { %v3764_v20 = vsel %vm3720_vm8, %v3699_v37, %v2772_v3  ;;  %v3141_v2 = vpop.permute.xlu0 %3140  ;;  %v14029_v37 = vld [vmem:[#allocation156_spill] sm:$0xff] }
 0x7ef   : > { %v3829_v28 = vsel %vm3785_vm9, %v3764_v20, %v2949_v47  ;;  %v3311_v3 = vsel %vm3266_vm3, %v3246_v49, %v14029_v37 }
 0x7f0   : > { %v3894_v23 = vsel %vm3850_vm10, %v3829_v28, %v3141_v2  ;;  %v14030_v2 = vld [vmem:[#allocation371_spill] sm:$0xff] }
 0x7f1   : > { %6627 = vmatmul.msk.f32.gmra.mxu1 %vm3922_vm11, %v3894_v23  ;;  %v3376_v28 = vsel %vm3331_vm2, %v3311_v3, %v14030_v2 }
 0x7f3   : > { %2465 = vrot.lane.b32.xlu2 %v13905_v36, %s6838_s20  ;;  %2284 = vrot.lane.b32.xlu1 %v14027_v6, %s6837_s19 }
 0x7f4   : > { %2657 = vrot.lane.b32.xlu0 %v14004_v9, %s6837_s19 }
 0x7f5   : > { %v2277_v47 = vpop.permute.xlu2 %2276  ;;  %v1934_v50 = vpop.permute.xlu1 %1933 }
 0x7f6   : > { %v2275_v20 = vpop.permute.xlu0 %2274  ;;  %v3440_v23 = vsel %vm456_vm0, %v3376_v28, %v1934_v50 }
 0x7f7   : > { %v3505_v6 = vsel %vm3460_vm4, %v3440_v23, %v2126_v33  ;;  %v14032_v33 = vld [vmem:[#allocation250_spill] sm:$0xff] }
 0x7f8   : > { %v3570_v49 = vsel %vm3525_vm5, %v3505_v6, %v2275_v20  ;;  %v10466_v6 = vpop.f32.mrf.mxu1 }
 0x7f9   : > { %14033 = vst [vmem:[#allocation31_spill] sm:$0xff] %v10466_v6 }
 0x7fb   : > { %2960 = vrot.lane.b32.xlu2 %v13905_v36, %s6841_s24  ;;  %2783 = vrot.lane.b32.xlu1 %v14031_v26, %s6839_s22 }
 0x7fc   : > { %1945 = vrot.lane.b32.xlu0 %v13913_v30, %s6835_s15 }
 0x7fd   : > { %v2776_v32 = vpop.permute.xlu2 %2775  ;;  %v2456_v39 = vpop.permute.xlu1 %2455 }
 0x7fe   : > { %v2774_v37 = vpop.permute.xlu0 %2773  ;;  %v3635_v3 = vsel %vm3590_vm6, %v3570_v49, %v2456_v39  ;;  %v14035_v49 = vld [vmem:[#allocation291_spill] sm:$0xff] }
 0x7ff   : > { %v3700_v50 = vsel %vm3655_vm7, %v3635_v3, %v2648_v52  ;;  %v14034_v52 = vld [vmem:[#allocation221_spill] sm:$0xff]  ;;  %v14036_v3 = vld [vmem:[#allocation155_spill] sm:$0xff] }
 0x800   : > { %v3765_v26 = vsel %vm3720_vm8, %v3700_v50, %v2774_v37  ;;  %v3247_v37 = vsel %vm3201_vm1, %v13846_v17, %v14035_v49  ;;  %v14038_v49 = vld [vmem:[#allocation240_spill] sm:$0xff] }
 0x803   : > { %2286 = vrot.lane.b32.xlu2 %v14032_v33, %s6837_s19  ;;  %2137 = vrot.lane.b32.xlu1 %v13982_v21, %s6836_s16 }
 0x804   : > { %2467 = vrot.lane.b32.xlu0 %v13913_v30, %s6838_s20 }
 0x805   : > { %v1938_v2 = vpop.permute.xlu2 %1937  ;;  %v2951_v28 = vpop.permute.xlu1 %2950 }
 0x806   : > { %v3830_v20 = vsel %vm3785_vm9, %v3765_v26, %v2951_v28  ;;  %v1936_v23 = vpop.permute.xlu0 %1935  ;;  %v14037_v26 = vld [vmem:[#allocation373_spill] sm:$0xff] }
 0x807   : > { %v3895_v39 = vsel %vm3850_vm10, %v3830_v20, %v3143_v1  ;;  %v3312_v1 = vsel %vm3266_vm3, %v3247_v37, %v14036_v3 }
 0x808   : > { %6628 = vmatmul.msk.f32.gmra.mxu1 %vm3922_vm11, %v3895_v39  ;;  %v3377_v28 = vsel %vm3331_vm2, %v3312_v1, %v14037_v26 }
 0x809   : > { %v3441_v39 = vsel %vm456_vm0, %v3377_v28, %v1936_v23 }
 0x80b   : > { %2785 = vrot.lane.b32.xlu2 %v14034_v52, %s6839_s22  ;;  %2659 = vrot.lane.b32.xlu1 %v14011_v12, %s6837_s19 }
 0x80c   : > { %2962 = vrot.lane.b32.xlu0 %v13913_v30, %s6841_s24 }
 0x80d   : > { %v2460_v50 = vpop.permute.xlu2 %2459  ;;  %v2128_v33 = vpop.permute.xlu1 %2127 }
 0x80e   : > { %v2458_v20 = vpop.permute.xlu0 %2457  ;;  %v3506_v52 = vsel %vm3460_vm4, %v3441_v39, %v2128_v33 }
 0x80f   : > { %v3571_v6 = vsel %vm3525_vm5, %v3506_v52, %v2277_v47  ;;  %v14039_v47 = vld [vmem:[#allocation214_spill] sm:$0xff] }
 0x810   : > { %v3636_v1 = vsel %vm3590_vm6, %v3571_v6, %v2458_v20 }
 0x813   : > { %2139 = vrot.lane.b32.xlu2 %v13990_v57, %s6836_s16  ;;  %1947 = vrot.lane.b32.xlu1 %v13921_v44, %s6835_s15 }
 0x814   : > { %2288 = vrot.lane.b32.xlu0 %v14038_v49, %s6837_s19  ;;  %v10502_v49 = vpop.f32.mrf.mxu1 }
 0x815   : > { %v2955_v37 = vpop.permute.xlu2 %2954  ;;  %v2650_v3 = vpop.permute.xlu1 %2649  ;;  %14040 = vst [vmem:[#allocation60_spill] sm:$0xff] %v10502_v49  ;;  %v14044_v49 = vld [vmem:[#allocation262_spill] sm:$0xff] }
 0x816   : > { %v2953_v26 = vpop.permute.xlu0 %2952  ;;  %v3701_v23 = vsel %vm3655_vm7, %v3636_v1, %v2650_v3  ;;  %v14042_v1 = vld [vmem:[#allocation112_spill] sm:$0xff] }
 0x817   : > { %v3766_v33 = vsel %vm3720_vm8, %v3701_v23, %v2776_v32  ;;  %v14041_v32 = vld [vmem:[#allocation298_spill] sm:$0xff] }
 0x818   : > { %v3831_v28 = vsel %vm3785_vm9, %v3766_v33, %v2953_v26  ;;  %v3248_v3 = vsel %vm3201_vm1, %v13853_v45, %v14041_v32  ;;  %v14043_v26 = vld [vmem:[#allocation45_spill] sm:$0xff] }
 0x819   : > { %v3313_v23 = vsel %vm3266_vm3, %v3248_v3, %v14042_v1 }
 0x81a   : > { %v3378_v33 = vsel %vm3331_vm2, %v3313_v23, %v14043_v26  ;;  %v14045_v23 = vld [vmem:[#allocation233_spill] sm:$0xff] }
 0x81b   : > { %2661 = vrot.lane.b32.xlu2 %v14018_v35, %s6837_s19  ;;  %2469 = vrot.lane.b32.xlu1 %v13921_v44, %s6838_s20 }
 0x81c   : > { %2787 = vrot.lane.b32.xlu0 %v14039_v47, %s6839_s22  ;;  %v3442_v47 = vsel %vm456_vm0, %v3378_v33, %v1938_v2 }
 0x81d   : > { %v2132_v39 = vpop.permute.xlu2 %2131  ;;  %v3145_v52 = vpop.permute.xlu1 %3144 }
 0x81e   : > { %v3896_v6 = vsel %vm3850_vm10, %v3831_v28, %v3145_v52  ;;  %v2130_v20 = vpop.permute.xlu0 %2129 }
 0x81f   : > { %6629 = vmatmul.msk.f32.gmra.mxu1 %vm3922_vm11, %v3896_v6  ;;  %v3507_v6 = vsel %vm3460_vm4, %v3442_v47, %v2130_v20 }
 0x823   : > { %1949 = vrot.lane.b32.xlu2 %v13929_v19, %s6835_s15  ;;  %2964 = vrot.lane.b32.xlu1 %v13921_v44, %s6841_s24 }
 0x824   : > { %2141 = vrot.lane.b32.xlu0 %v13997_v40, %s6836_s16 }
 0x825   : > { %v2654_v28 = vpop.permute.xlu2 %2653  ;;  %v2279_v52 = vpop.permute.xlu1 %2278 }
 0x826   : > { %v2652_v32 = vpop.permute.xlu0 %2651  ;;  %v3572_v3 = vsel %vm3525_vm5, %v3507_v6, %v2279_v52  ;;  %v10532_v6 = vpop.f32.mrf.mxu1 }
 0x827   : > { %v3637_v1 = vsel %vm3590_vm6, %v3572_v3, %v2460_v50  ;;  %14046 = vst [vmem:[#allocation90_spill] sm:$0xff] %v10532_v6 }
 0x828   : > { %v3702_v2 = vsel %vm3655_vm7, %v3637_v1, %v2652_v32  ;;  %v14048_v1 = vld [vmem:[#allocation174_spill] sm:$0xff] }
 0x82b   : > { %2471 = vrot.lane.b32.xlu2 %v13929_v19, %s6838_s20  ;;  %2290 = vrot.lane.b32.xlu1 %v14044_v49, %s6837_s19  ;;  %v14047_v49 = vld [vmem:[#allocation290_spill] sm:$0xff] }
 0x82c   : > { %2789 = vrot.lane.b32.xlu0 %v14045_v23, %s6839_s22  ;;  %v3249_v32 = vsel %vm3201_vm1, %v13860_v11, %v14047_v49  ;;  %v14051_v49 = vld [vmem:[#allocation239_spill] sm:$0xff] }
 0x82d   : > { %v3149_v26 = vpop.permute.xlu2 %3148  ;;  %v2778_v33 = vpop.permute.xlu1 %2777  ;;  %v3314_v23 = vsel %vm3266_vm3, %v3249_v32, %v14048_v1 }
 0x82e   : > { %v3767_v20 = vsel %vm3720_vm8, %v3702_v2, %v2778_v33  ;;  %v3147_v47 = vpop.permute.xlu0 %3146  ;;  %v14049_v33 = vld [vmem:[#allocation374_spill] sm:$0xff] }
 0x82f   : > { %v3832_v52 = vsel %vm3785_vm9, %v3767_v20, %v2955_v37  ;;  %v3379_v20 = vsel %vm3331_vm2, %v3314_v23, %v14049_v33 }
 0x830   : > { %v3897_v50 = vsel %vm3850_vm10, %v3832_v52, %v3147_v47 }
 0x831   : > { %6630 = vmatmul.msk.f32.gmra.mxu1 %vm3922_vm11, %v3897_v50  ;;  %v14050_v50 = vld [vmem:[#allocation268_spill] sm:$0xff] }
 0x833   : > { %1951 = vrot.lane.b32.xlu2 %v13937_v38, %s6835_s15  ;;  %2966 = vrot.lane.b32.xlu1 %v13929_v19, %s6841_s24 }
 0x834   : > { %2143 = vrot.lane.b32.xlu0 %v14004_v9, %s6836_s16 }
 0x835   : > { %v2283_v37 = vpop.permute.xlu2 %2282  ;;  %v1940_v3 = vpop.permute.xlu1 %1939 }
 0x836   : > { %v2281_v2 = vpop.permute.xlu0 %2280  ;;  %v3443_v47 = vsel %vm456_vm0, %v3379_v20, %v1940_v3 }
 0x837   : > { %v3508_v52 = vsel %vm3460_vm4, %v3443_v47, %v2132_v39 }
 0x838   : > { %v3573_v32 = vsel %vm3525_vm5, %v3508_v52, %v2281_v2  ;;  %v10568_v52 = vpop.f32.mrf.mxu1 }
 0x839   : > { %14052 = vst [vmem:[#allocation319_spill] sm:$0xff] %v10568_v52 }
 0x83b   : > { %2473 = vrot.lane.b32.xlu2 %v13937_v38, %s6838_s20  ;;  %2292 = vrot.lane.b32.xlu1 %v14050_v50, %s6837_s19  ;;  %v14054_v50 = vld [vmem:[#allocation304_spill] sm:$0xff] }
 0x83c   : > { %2791 = vrot.lane.b32.xlu0 %v14051_v49, %s6839_s22  ;;  %v3250_v49 = vsel %vm3201_vm1, %v13867_v13, %v14054_v50 }
 0x83d   : > { %v2782_v6 = vpop.permute.xlu2 %2781  ;;  %v2462_v48 = vpop.permute.xlu1 %2461 }
 0x83e   : > { %v2780_v1 = vpop.permute.xlu0 %2779  ;;  %v3638_v23 = vsel %vm3590_vm6, %v3573_v32, %v2462_v48  ;;  %v14055_v32 = vld [vmem:[#allocation232_spill] sm:$0xff] }
 0x83f   : > { %v3703_v3 = vsel %vm3655_vm7, %v3638_v23, %v2654_v28  ;;  %v14053_v28 = vld [vmem:[#allocation261_spill] sm:$0xff] }
 0x840   : > { %v3768_v39 = vsel %vm3720_vm8, %v3703_v3, %v2780_v1  ;;  %v14056_v1 = vld [vmem:[#allocation173_spill] sm:$0xff] }
 0x843   : > { %1953 = vrot.lane.b32.xlu2 %v13945_v0, %s6835_s15  ;;  %2968 = vrot.lane.b32.xlu1 %v13937_v38, %s6841_s24 }
 0x844   : > { %2145 = vrot.lane.b32.xlu0 %v14011_v12, %s6836_s16 }
 0x845   : > { %v1944_v33 = vpop.permute.xlu2 %1943  ;;  %v2957_v20 = vpop.permute.xlu1 %2956 }
 0x846   : > { %v3833_v2 = vsel %vm3785_vm9, %v3768_v39, %v2957_v20  ;;  %v1942_v47 = vpop.permute.xlu0 %1941  ;;  %v14057_v39 = vld [vmem:[#allocation376_spill] sm:$0xff] }
 0x847   : > { %v3898_v48 = vsel %vm3850_vm10, %v3833_v2, %v3149_v26  ;;  %v3315_v26 = vsel %vm3266_vm3, %v3250_v49, %v14056_v1 }
 0x848   : > { %6631 = vmatmul.msk.f32.gmra.mxu1 %vm3922_vm11, %v3898_v48  ;;  %v3380_v20 = vsel %vm3331_vm2, %v3315_v26, %v14057_v39 }
 0x849   : > { %v3444_v48 = vsel %vm456_vm0, %v3380_v20, %v1942_v47 }
 0x84b   : > { %2475 = vrot.lane.b32.xlu2 %v13945_v0, %s6838_s20  ;;  %2294 = vrot.lane.b32.xlu1 %v14053_v28, %s6837_s19 }
 0x84c   : > { %2793 = vrot.lane.b32.xlu0 %v14055_v32, %s6839_s22 }
 0x84d   : > { %v2466_v23 = vpop.permute.xlu2 %2465  ;;  %v2134_v3 = vpop.permute.xlu1 %2133 }
 0x84e   : > { %v2464_v2 = vpop.permute.xlu0 %2463  ;;  %v3509_v28 = vsel %vm3460_vm4, %v3444_v48, %v2134_v3  ;;  %v14059_v3 = vld [vmem:[#allocation252_spill] sm:$0xff] }
 0x84f   : > { %v3574_v52 = vsel %vm3525_vm5, %v3509_v28, %v2283_v37  ;;  %v14058_v37 = vld [vmem:[#allocation279_spill] sm:$0xff]  ;;  %v10607_v28 = vpop.f32.mrf.mxu1 }
 0x850   : > { %v3639_v32 = vsel %vm3590_vm6, %v3574_v52, %v2464_v2  ;;  %14060 = vst [vmem:[#allocation209_spill] sm:$0xff] %v10607_v28  ;;  %v14064_v28 = vld [vmem:[#allocation284_spill] sm:$0xff] }
 0x853   : > { %1955 = vrot.lane.b32.xlu2 %v13954_v14, %s6835_s15  ;;  %2970 = vrot.lane.b32.xlu1 %v13945_v0, %s6841_s24 }
 0x854   : > { %2147 = vrot.lane.b32.xlu0 %v14018_v35, %s6836_s16 }
 0x855   : > { %v2961_v50 = vpop.permute.xlu2 %2960  ;;  %v2656_v49 = vpop.permute.xlu1 %2655 }
 0x856   : > { %v2959_v1 = vpop.permute.xlu0 %2958  ;;  %v3704_v47 = vsel %vm3655_vm7, %v3639_v32, %v2656_v49  ;;  %v14062_v32 = vld [vmem:[#allocation129_spill] sm:$0xff] }
 0x857   : > { %v3769_v26 = vsel %vm3720_vm8, %v3704_v47, %v2782_v6  ;;  %v14061_v6 = vld [vmem:[#allocation309_spill] sm:$0xff] }
 0x858   : > { %v3834_v39 = vsel %vm3785_vm9, %v3769_v26, %v2959_v1  ;;  %v3251_v49 = vsel %vm3201_vm1, %v13874_v27, %v14061_v6  ;;  %v14063_v1 = vld [vmem:[#allocation63_spill] sm:$0xff] }
 0x859   : > { %v3316_v47 = vsel %vm3266_vm3, %v3251_v49, %v14062_v32 }
 0x85a   : > { %v3381_v26 = vsel %vm3331_vm2, %v3316_v47, %v14063_v1  ;;  %v14065_v47 = vld [vmem:[#allocation260_spill] sm:$0xff] }
 0x85b   : > { %2477 = vrot.lane.b32.xlu2 %v13954_v14, %s6838_s20  ;;  %2296 = vrot.lane.b32.xlu1 %v14058_v37, %s6837_s19  ;;  %v3445_v37 = vsel %vm456_vm0, %v3381_v26, %v1944_v33 }
 0x85c   : > { %2795 = vrot.lane.b32.xlu0 %v14059_v3, %s6839_s22 }
 0x85d   : > { %v2287_v20 = vpop.permute.xlu2 %2286  ;;  %v10603_v48 = vpop.permute.xlu1 %3150 }
 0x85e   : > { %v2136_v52 = vpop.permute.xlu0 %2135  ;;  %v3899_v2 = vsel %vm3850_vm10, %v3834_v39, %v10603_v48 }
 0x85f   : > { %6632 = vmatmul.msk.f32.gmra.mxu1 %vm3922_vm11, %v3899_v2  ;;  %v3510_v2 = vsel %vm3460_vm4, %v3445_v37, %v2136_v52 }
 0x863   : > { %1957 = vrot.lane.b32.xlu2 %v13961_v29, %s6835_s15  ;;  %2972 = vrot.lane.b32.xlu1 %v13954_v14, %s6841_s24 }
 0x864   : > { %2149 = vrot.lane.b32.xlu0 %v14025_v59, %s6836_s16 }
 0x865   : > { %v2786_v3 = vpop.permute.xlu2 %2785  ;;  %v2285_v39 = vpop.permute.xlu1 %2284 }
 0x866   : > { %v2658_v6 = vpop.permute.xlu0 %2657  ;;  %v3575_v49 = vsel %vm3525_vm5, %v3510_v2, %v2285_v39  ;;  %v10638_v39 = vpop.f32.mrf.mxu1 }
 0x867   : > { %v3640_v32 = vsel %vm3590_vm6, %v3575_v49, %v2466_v23  ;;  %14066 = vst [vmem:[#allocation389_spill] sm:$0xff] %v10638_v39  ;;  %v14069_v49 = vld [vmem:[#allocation278_spill] sm:$0xff]  ;;  %v14071_v39 = vld [vmem:[#allocation251_spill] sm:$0xff] }
 0x868   : > { %v3705_v59 = vsel %vm3655_vm7, %v3640_v32, %v2658_v6  ;;  %v14068_v6 = vld [vmem:[#allocation192_spill] sm:$0xff]  ;;  %v14070_v32 = vld [vmem:[#allocation377_spill] sm:$0xff] }
 0x86b   : > { %2479 = vrot.lane.b32.xlu2 %v13961_v29, %s6838_s20  ;;  %2298 = vrot.lane.b32.xlu1 %v14064_v28, %s6837_s19  ;;  %v14067_v28 = vld [vmem:[#allocation303_spill] sm:$0xff] }
 0x86c   : > { %2797 = vrot.lane.b32.xlu0 %v14065_v47, %s6839_s22  ;;  %v3252_v2 = vsel %vm3201_vm1, %v13881_v43, %v14067_v28 }
 0x86d   : > { %v2140_v33 = vpop.permute.xlu2 %2139  ;;  %v2784_v1 = vpop.permute.xlu1 %2783 }
 0x86e   : > { %v3770_v52 = vsel %vm3720_vm8, %v3705_v59, %v2784_v1  ;;  %v1946_v26 = vpop.permute.xlu0 %1945 }
 0x86f   : > { %v3835_v37 = vsel %vm3785_vm9, %v3770_v52, %v2961_v50  ;;  %v3317_v50 = vsel %vm3266_vm3, %v3252_v2, %v14068_v6 }
 0x870   : > { %v3900_v23 = vsel %vm3850_vm10, %v3835_v37, %v10603_v48  ;;  %v3382_v47 = vsel %vm3331_vm2, %v3317_v50, %v14070_v32 }
 0x871   : > { %6633 = vmatmul.msk.f32.gmra.mxu1 %vm3922_vm11, %v3900_v23  ;;  %v3446_v52 = vsel %vm456_vm0, %v3382_v47, %v1946_v26  ;;  %v10669_v47 = vpop.f32.mrf.mxu1 }
 0x872   : > { %14072 = vst [vmem:[#allocation29_spill] sm:$0xff] %v10669_v47  ;;  %v14091_v47 = vld [vmem:[#allocation286_spill] sm:$0xff] }
 0x873   : > { %1959 = vrot.lane.b32.xlu2 %v13972_v4, %s6835_s15  ;;  %2974 = vrot.lane.b32.xlu1 %v13961_v29, %s6841_s24 }
 0x874   : > { %2300 = vrot.lane.b32.xlu0 %v14069_v49, %s6837_s19 }
 0x875   : > { %v2662_v59 = vpop.permute.xlu2 %2661  ;;  %v2138_v1 = vpop.permute.xlu1 %2137 }
 0x876   : > { %v2468_v37 = vpop.permute.xlu0 %2467  ;;  %v3511_v23 = vsel %vm3460_vm4, %v3446_v52, %v2138_v1  ;;  %v14073_v1 = vld [vmem:[#allocation296_spill] sm:$0xff] }
 0x877   : > { %v3576_v28 = vsel %vm3525_vm5, %v3511_v23, %v2287_v20  ;;  %v14074_v52 = vld [vmem:[#allocation312_spill] sm:$0xff] }
 0x878   : > { %v3641_v2 = vsel %vm3590_vm6, %v3576_v28, %v2468_v37  ;;  %v14075_v28 = vld [vmem:[#allocation191_spill] sm:$0xff] }
 0x87b   : > { %2799 = vrot.lane.b32.xlu2 %v14071_v39, %s6839_s22  ;;  %2481 = vrot.lane.b32.xlu1 %v13972_v4, %s6838_s20 }
 0x87c   : > { %2976 = vrot.lane.b32.xlu0 %v13972_v4, %s6841_s24 }
 0x87d   : > { %v1950_v6 = vpop.permute.xlu2 %1949  ;;  %v2660_v50 = vpop.permute.xlu1 %2659 }
 0x87e   : > { %v3706_v26 = vsel %vm3655_vm7, %v3641_v2, %v2660_v50  ;;  %v2963_v49 = vpop.permute.xlu0 %2962 }
 0x87f   : > { %v3771_v32 = vsel %vm3720_vm8, %v3706_v26, %v2786_v3  ;;  %v3253_v3 = vsel %vm3201_vm1, %v13889_v15, %v14074_v52  ;;  %v14076_v26 = vld [vmem:[#allocation123_spill] sm:$0xff] }
 0x880   : > { %v3836_v20 = vsel %vm3785_vm9, %v3771_v32, %v2963_v49  ;;  %v3318_v2 = vsel %vm3266_vm3, %v3253_v3, %v14075_v28 }
 0x881   : > { %v3901_v39 = vsel %vm3850_vm10, %v3836_v20, %v10603_v48  ;;  %v3383_v49 = vsel %vm3331_vm2, %v3318_v2, %v14076_v26  ;;  %v14079_v26 = vld [vmem:[#allocation277_spill] sm:$0xff] }
 0x882   : > { %6634 = vmatmul.msk.f32.gmra.mxu1 %vm3922_vm11, %v3901_v39  ;;  %v14077_v39 = vld [vmem:[#allocation270_spill] sm:$0xff] }
 0x883   : > { %1961 = vrot.lane.b32.xlu1 %v13982_v21, %s6835_s15  ;;  %2302 = vrot.lane.b32.xlu2 %v14073_v1, %s6837_s19 }
 0x884   : > { %2483 = vrot.lane.b32.xlu0 %v13982_v21, %s6838_s20 }
 0x885   : > { %v2472_v37 = vpop.permute.xlu2 %2471  ;;  %v1948_v23 = vpop.permute.xlu1 %1947 }
 0x886   : > { %v2289_v50 = vpop.permute.xlu0 %2288  ;;  %v3447_v32 = vsel %vm456_vm0, %v3383_v49, %v1948_v23 }
 0x887   : > { %v3512_v20 = vsel %vm3460_vm4, %v3447_v32, %v2140_v33  ;;  %v14078_v33 = vld [vmem:[#allocation302_spill] sm:$0xff] }
 0x888   : > { %v3577_v3 = vsel %vm3525_vm5, %v3512_v20, %v2289_v50 }
 0x88b   : > { %2801 = vrot.lane.b32.xlu1 %v14077_v39, %s6839_s22  ;;  %2978 = vrot.lane.b32.xlu2 %v13982_v21, %s6841_s24 }
 0x88c   : > { %1963 = vrot.lane.b32.xlu0 %v13990_v57, %s6835_s15 }
 0x88d   : > { %v1952_v1 = vpop.permute.xlu2 %1951  ;;  %v2470_v52 = vpop.permute.xlu1 %2469 }
 0x88e   : > { %v2788_v28 = vpop.permute.xlu0 %2787  ;;  %v3642_v2 = vsel %vm3590_vm6, %v3577_v3, %v2470_v52  ;;  %v14081_v3 = vld [vmem:[#allocation315_spill] sm:$0xff] }
 0x88f   : > { %v3707_v23 = vsel %vm3655_vm7, %v3642_v2, %v2662_v59  ;;  %v10706_v59 = vpop.f32.mrf.mxu1  ;;  %v3254_v2 = vsel %vm3201_vm1, %v13897_v18, %v14081_v3 }
 0x890   : > { %v3772_v49 = vsel %vm3720_vm8, %v3707_v23, %v2788_v28  ;;  %14080 = vst [vmem:[#allocation144_spill] sm:$0xff] %v10706_v59  ;;  %v14083_v28 = vld [vmem:[#allocation81_spill] sm:$0xff] }
 0x893   : > { %2304 = vrot.lane.b32.xlu1 %v14078_v33, %s6837_s19  ;;  %2485 = vrot.lane.b32.xlu2 %v13990_v57, %s6838_s20  ;;  %v14082_v33 = vld [vmem:[#allocation145_spill] sm:$0xff] }
 0x894   : > { %2803 = vrot.lane.b32.xlu0 %v14079_v26, %s6839_s22  ;;  %v3319_v26 = vsel %vm3266_vm3, %v3254_v2, %v14082_v33 }
 0x895   : > { %v2474_v32 = vpop.permute.xlu2 %2473  ;;  %v2965_v39 = vpop.permute.xlu1 %2964  ;;  %v3384_v23 = vsel %vm3331_vm2, %v3319_v26, %v14083_v28 }
 0x896   : > { %v3837_v50 = vsel %vm3785_vm9, %v3772_v49, %v2965_v39  ;;  %v2142_v20 = vpop.permute.xlu0 %2141  ;;  %v3448_v49 = vsel %vm456_vm0, %v3384_v23, %v1950_v6  ;;  %v14084_v39 = vld [vmem:[#allocation295_spill] sm:$0xff]  ;;  %v14085_v6 = vld [vmem:[#allocation269_spill] sm:$0xff] }
 0x897   : > { %v3902_v52 = vsel %vm3850_vm10, %v3837_v50, %v10603_v48  ;;  %v3513_v50 = vsel %vm3460_vm4, %v3448_v49, %v2142_v20 }
 0x898   : > { %6635 = vmatmul.msk.f32.gmra.mxu1 %vm3922_vm11, %v3902_v52 }
 0x89b   : > { %2980 = vrot.lane.b32.xlu1 %v13990_v57, %s6841_s24  ;;  %1965 = vrot.lane.b32.xlu2 %v13997_v40, %s6835_s15 }
 0x89c   : > { %2306 = vrot.lane.b32.xlu0 %v14084_v39, %s6837_s19 }
 0x89d   : > { %v1954_v52 = vpop.permute.xlu2 %1953  ;;  %v2291_v3 = vpop.permute.xlu1 %2290 }
 0x89e   : > { %v3578_v2 = vsel %vm3525_vm5, %v3513_v50, %v2291_v3  ;;  %v2790_v33 = vpop.permute.xlu0 %2789  ;;  %v10738_v3 = vpop.f32.mrf.mxu1 }
 0x89f   : > { %v3643_v26 = vsel %vm3590_vm6, %v3578_v2, %v2472_v37  ;;  %14086 = vst [vmem:[#allocation83_spill] sm:$0xff] %v10738_v3  ;;  %v14087_v2 = vld [vmem:[#allocation311_spill] sm:$0xff] }
 0x8a0   : > { %v3708_v28 = vsel %vm3655_vm7, %v3643_v26, %v9052_v25  ;;  %v3255_v26 = vsel %vm3201_vm1, %v13905_v36, %v14087_v2 }
 0x8a1   : > { %v3773_v20 = vsel %vm3720_vm8, %v3708_v28, %v2790_v33  ;;  %v14089_v33 = vld [vmem:[#allocation378_spill] sm:$0xff] }
 0x8a3   : > { %2487 = vrot.lane.b32.xlu1 %v13997_v40, %s6838_s20  ;;  %2805 = vrot.lane.b32.xlu2 %v14085_v6, %s6839_s22  ;;  %v14088_v6 = vld [vmem:[#allocation199_spill] sm:$0xff] }
 0x8a4   : > { %2982 = vrot.lane.b32.xlu0 %v13997_v40, %s6841_s24  ;;  %v3320_v59 = vsel %vm3266_vm3, %v3255_v26, %v14088_v6 }
 0x8a5   : > { %v2476_v23 = vpop.permute.xlu2 %2475  ;;  %v2967_v49 = vpop.permute.xlu1 %2966  ;;  %v3385_v28 = vsel %vm3331_vm2, %v3320_v59, %v14089_v33 }
 0x8a6   : > { %v3838_v39 = vsel %vm3785_vm9, %v3773_v20, %v2967_v49  ;;  %v2144_v50 = vpop.permute.xlu0 %2143  ;;  %v14090_v20 = vld [vmem:[#allocation308_spill] sm:$0xff]  ;;  %v3449_v49 = vsel %vm456_vm0, %v3385_v28, %v1952_v1 }
 0x8a7   : > { %v3903_v37 = vsel %vm3850_vm10, %v3838_v39, %v10603_v48  ;;  %v3514_v39 = vsel %vm3460_vm4, %v3449_v49, %v2144_v50 }
 0x8a8   : > { %6636 = vmatmul.msk.f32.gmra.mxu1 %vm3922_vm11, %v3903_v37 }
 0x8ab   : > { %1967 = vrot.lane.b32.xlu1 %v14004_v9, %s6835_s15  ;;  %2308 = vrot.lane.b32.xlu2 %v14090_v20, %s6837_s19 }
 0x8ac   : > { %2489 = vrot.lane.b32.xlu0 %v14004_v9, %s6838_s20 }
 0x8ad   : > { %v1956_v37 = vpop.permute.xlu2 %1955  ;;  %v2293_v2 = vpop.permute.xlu1 %2292 }
 0x8ae   : > { %v3579_v26 = vsel %vm3525_vm5, %v3514_v39, %v2293_v2  ;;  %v2792_v6 = vpop.permute.xlu0 %2791  ;;  %v10770_v39 = vpop.f32.mrf.mxu1 }
 0x8af   : > { %v3644_v59 = vsel %vm3590_vm6, %v3579_v26, %v2474_v32  ;;  %v14093_v26 = vld [vmem:[#allocation210_spill] sm:$0xff] }
 0x8b0   : > { %v3709_v33 = vsel %vm3655_vm7, %v3644_v59, %v9052_v25 }
 0x8b1   : > { %v3774_v1 = vsel %vm3720_vm8, %v3709_v33, %v2792_v6  ;;  %v14094_v6 = vld [vmem:[#allocation379_spill] sm:$0xff] }
 0x8b3   : > { %2807 = vrot.lane.b32.xlu1 %v14091_v47, %s6839_s22  ;;  %2984 = vrot.lane.b32.xlu2 %v14004_v9, %s6841_s24  ;;  %v14092_v47 = vld [vmem:[#allocation318_spill] sm:$0xff] }
 0x8b4   : > { %1969 = vrot.lane.b32.xlu0 %v14011_v12, %s6835_s15  ;;  %v3256_v2 = vsel %vm3201_vm1, %v13913_v30, %v14092_v47 }
 0x8b5   : > { %v2478_v50 = vpop.permute.xlu2 %2477  ;;  %v2969_v28 = vpop.permute.xlu1 %2968  ;;  %v3321_v59 = vsel %vm3266_vm3, %v3256_v2, %v14093_v26 }
 0x8b6   : > { %v3839_v20 = vsel %vm3785_vm9, %v3774_v1, %v2969_v28  ;;  %v2146_v49 = vpop.permute.xlu0 %2145  ;;  %v3386_v33 = vsel %vm3331_vm2, %v3321_v59, %v14094_v6  ;;  %v14095_v1 = vld [vmem:[#allocation310_spill] sm:$0xff] }
 0x8b7   : > { %v3904_v32 = vsel %vm3850_vm10, %v3839_v20, %v10603_v48  ;;  %v3450_v28 = vsel %vm456_vm0, %v3386_v33, %v1954_v52  ;;  %v14096_v20 = vld [vmem:[#allocation294_spill] sm:$0xff]  ;;  %v14097_v52 = vld [vmem:[#allocation307_spill] sm:$0xff] }
 0x8b8   : > { %6637 = vmatmul.msk.f32.gmra.mxu1 %vm3922_vm11, %v3904_v32  ;;  %v3515_v32 = vsel %vm3460_vm4, %v3450_v28, %v2146_v49 }
 0x8bb   : > { %2310 = vrot.lane.b32.xlu1 %v14095_v1, %s6837_s19  ;;  %2491 = vrot.lane.b32.xlu2 %v14011_v12, %s6838_s20 }
 0x8bc   : > { %2809 = vrot.lane.b32.xlu0 %v14096_v20, %s6839_s22  ;;  %v10802_v20 = vpop.f32.mrf.mxu1 }
 0x8bd   : > { %v1958_v47 = vpop.permute.xlu2 %1957  ;;  %v2295_v3 = vpop.permute.xlu1 %2294 }
 0x8be   : > { %v3580_v2 = vsel %vm3525_vm5, %v3515_v32, %v2295_v3  ;;  %v2794_v26 = vpop.permute.xlu0 %2793  ;;  %v14098_v32 = vld [vmem:[#allocation320_spill] sm:$0xff] }
 0x8bf   : > { %v3645_v59 = vsel %vm3590_vm6, %v3580_v2, %v2476_v23  ;;  %v3257_v2 = vsel %vm3201_vm1, %v13921_v44, %v14098_v32 }
 0x8c0   : > { %v3710_v6 = vsel %vm3655_vm7, %v3645_v59, %v9052_v25  ;;  %v14099_v59 = vld [vmem:[#allocation163_spill] sm:$0xff] }
 0x8c1   : > { %v3775_v49 = vsel %vm3720_vm8, %v3710_v6, %v2794_v26  ;;  %v14100_v26 = vld [vmem:[#allocation372_spill] sm:$0xff] }
 0x8c3   : > { %2986 = vrot.lane.b32.xlu1 %v14011_v12, %s6841_s24  ;;  %1971 = vrot.lane.b32.xlu2 %v14018_v35, %s6835_s15 }
 0x8c4   : > { %2312 = vrot.lane.b32.xlu0 %v14097_v52, %s6837_s19  ;;  %v3322_v52 = vsel %vm3266_vm3, %v3257_v2, %v14099_v59 }
 0x8c5   : > { %v2480_v33 = vpop.permute.xlu2 %2479  ;;  %v2971_v1 = vpop.permute.xlu1 %2970  ;;  %v3387_v6 = vsel %vm3331_vm2, %v3322_v52, %v14100_v26 }
 0x8c6   : > { %v3840_v3 = vsel %vm3785_vm9, %v3775_v49, %v2971_v1  ;;  %v2148_v28 = vpop.permute.xlu0 %2147  ;;  %v14101_v49 = vld [vmem:[#allocation285_spill] sm:$0xff]  ;;  %v3451_v1 = vsel %vm456_vm0, %v3387_v6, %v1956_v37 }
 0x8c7   : > { %v3905_v23 = vsel %vm3850_vm10, %v3840_v3, %v10603_v48  ;;  %v3516_v3 = vsel %vm3460_vm4, %v3451_v1, %v2148_v28 }
 0x8c8   : > { %6638 = vmatmul.msk.f32.gmra.mxu1 %vm3922_vm11, %v3905_v23 }
 0x8cb   : > { %2493 = vrot.lane.b32.xlu1 %v14018_v35, %s6838_s20  ;;  %2811 = vrot.lane.b32.xlu2 %v14101_v49, %s6839_s22 }
 0x8cc   : > { %2988 = vrot.lane.b32.xlu0 %v14018_v35, %s6841_s24 }
 0x8cd   : > { %v1960_v23 = vpop.permute.xlu2 %1959  ;;  %v2297_v32 = vpop.permute.xlu1 %2296 }
 0x8ce   : > { %v3581_v2 = vsel %vm3525_vm5, %v3516_v3, %v2297_v32  ;;  %v2796_v59 = vpop.permute.xlu0 %2795  ;;  %v10836_v3 = vpop.f32.mrf.mxu1 }
 0x8cf   : > { %v3646_v52 = vsel %vm3590_vm6, %v3581_v2, %v2478_v50  ;;  %v14104_v2 = vld [vmem:[#allocation380_spill] sm:$0xff] }
 0x8d0   : > { %v3711_v26 = vsel %vm3655_vm7, %v3646_v52, %v9052_v25 }
 0x8d1   : > { %v3776_v37 = vsel %vm3720_vm8, %v3711_v26, %v2796_v59 }
 0x8d3   : > { %4378 = vrot.lane.b32.xlu1 %v7528_v31, %s6842_s12  ;;  %4386 = vrot.lane.b32.xlu2 %v7631_v63, %s6842_s12  ;;  %v14102_v31 = vld [vmem:[#allocation317_spill] sm:$0xff] }
 0x8d4   : > { %4376 = vrot.lane.b32.xlu0 %v7507_v53, %s6842_s12  ;;  %v3258_v63 = vsel %vm3201_vm1, %v13929_v19, %v14102_v31  ;;  %v14103_v53 = vld [vmem:[#allocation217_spill] sm:$0xff] }
 0x8d5   : > { %v2800_v28 = vpop.permute.xlu2 %2799  ;;  %v2973_v6 = vpop.permute.xlu1 %2972  ;;  %v3323_v32 = vsel %vm3266_vm3, %v3258_v63, %v14103_v53 }
 0x8d6   : > { %v3841_v49 = vsel %vm3785_vm9, %v3776_v37, %v2973_v6  ;;  %v10832_v50 = vpop.permute.xlu0 %2149  ;;  %v3388_v59 = vsel %vm3331_vm2, %v3323_v32, %v14104_v2  ;;  %v14105_v32 = vld [vmem:[#allocation323_spill] sm:$0xff]  ;;  %v10872_v2 = vpop.f32.mrf.mxu1 }
 0x8d7   : > { %v3906_v1 = vsel %vm3850_vm10, %v3841_v49, %v10603_v48  ;;  %v3452_v52 = vsel %vm456_vm0, %v3388_v59, %v1958_v47  ;;  %14106 = vst [vmem:[#allocation325_spill] sm:$0xff] %v10872_v2  ;;  %v14108_v59 = vld [vmem:[#allocation381_spill] sm:$0xff] }
 0x8d8   : > { %6639 = vmatmul.msk.f32.gmra.mxu1 %vm3922_vm11, %v3906_v1  ;;  %v3517_v37 = vsel %vm3460_vm4, %v3452_v52, %v10832_v50 }
 0x8db   : > { %4384 = vrot.lane.b32.xlu1 %v13712_v10, %s6842_s12  ;;  %4394 = vrot.lane.b32.xlu2 %v13804_v7, %s6842_s12 }
 0x8dc   : > { %4374 = vrot.lane.b32.xlu0 %v7487_v61, %s6842_s12 }
 0x8dd   : > { %v2299_v26 = vpop.permute.xlu1 %2298  ;;  %v2303_v6 = vpop.permute.xlu2 %2302 }
 0x8de   : > { %v3582_v49 = vsel %vm3525_vm5, %v3517_v37, %v2299_v26  ;;  %v2798_v1 = vpop.permute.xlu0 %2797 }
 0x8df   : > { %v3647_v31 = vsel %vm3590_vm6, %v3582_v49, %v2480_v33 }
 0x8e0   : > { %v3712_v10 = vsel %vm3655_vm7, %v3647_v31, %v9052_v25 }
 0x8e1   : > { %v3777_v61 = vsel %vm3720_vm8, %v3712_v10, %v2798_v1 }
 0x8e3   : > { %4382 = vrot.lane.b32.xlu1 %v13713_v16, %s6842_s12  ;;  %4392 = vrot.lane.b32.xlu2 %v13795_v56, %s6842_s12  ;;  %v3259_v16 = vsel %vm3201_vm1, %v13937_v38, %v14105_v32  ;;  %v14107_v56 = vld [vmem:[#allocation228_spill] sm:$0xff]  ;;  %v10905_v32 = vpop.f32.mrf.mxu1 }
 0x8e4   : > { %4372 = vrot.lane.b32.xlu0 %v7456_v34, %s6842_s12  ;;  %v3324_v34 = vsel %vm3266_vm3, %v3259_v16, %v14107_v56  ;;  %14111 = vst [vmem:[#allocation266_spill] sm:$0xff] %v10905_v32 }
 0x8e5   : > { %v2975_v7 = vpop.permute.xlu1 %2974  ;;  %v2979_v47 = vpop.permute.xlu2 %2978  ;;  %v3389_v52 = vsel %vm3331_vm2, %v3324_v34, %v14108_v59 }
 0x8e6   : > { %v3842_v63 = vsel %vm3785_vm9, %v3777_v61, %v2975_v7  ;;  %v2301_v53 = vpop.permute.xlu0 %2300  ;;  %v3453_v26 = vsel %vm456_vm0, %v3389_v52, %v1960_v23 }
 0x8e7   : > { %v3907_v33 = vsel %vm3850_vm10, %v3842_v63, %v10603_v48  ;;  %v3518_v37 = vsel %vm3460_vm4, %v3453_v26, %v10832_v50  ;;  %v14109_v63 = vld [vmem:[#allocation326_spill] sm:$0xff] }
 0x8e8   : > { %6640 = vmatmul.msk.f32.gmra.mxu1 %vm3922_vm11, %v3907_v33  ;;  %v3583_v49 = vsel %vm3525_vm5, %v3518_v37, %v2301_v53  ;;  %v14110_v53 = vld [vmem:[#allocation181_spill] sm:$0xff] }
 0x8eb   : > { %4380 = vrot.lane.b32.xlu1 %v7559_v5, %s6842_s12  ;;  %4390 = vrot.lane.b32.xlu2 %v13784_v8, %s6842_s12 }
 0x8ec   : > { %4370 = vrot.lane.b32.xlu0 %v7435_v51, %s6842_s12  ;;  %v3260_v51 = vsel %vm3201_vm1, %v13945_v0, %v14109_v63 }
 0x8ed   : > { %v2482_v1 = vpop.permute.xlu1 %2481  ;;  %v2486_v31 = vpop.permute.xlu2 %2485  ;;  %v3325_v33 = vsel %vm3266_vm3, %v3260_v51, %v14110_v53 }
 0x8ee   : > { %v3648_v10 = vsel %vm3590_vm6, %v3583_v49, %v2482_v1  ;;  %v2977_v61 = vpop.permute.xlu0 %2976 }
 0x8ef   : > { %v3713_v23 = vsel %vm3655_vm7, %v3648_v10, %v9052_v25 }
 0x8f0   : > { %v3778_v5 = vsel %vm3720_vm8, %v3713_v23, %v2800_v28  ;;  %v14112_v28 = vld [vmem:[#allocation375_spill] sm:$0xff] }
 0x8f1   : > { %v3843_v8 = vsel %vm3785_vm9, %v3778_v5, %v2977_v61  ;;  %v3390_v16 = vsel %vm3331_vm2, %v3325_v33, %v14112_v28  ;;  %v14114_v23 = vld [vmem:[#allocation235_spill] sm:$0xff]  ;;  %v14115_v5 = vld [vmem:[#allocation382_spill] sm:$0xff] }
 0x8f2   : > { %v3908_v7 = vsel %vm3850_vm10, %v3843_v8, %v10603_v48 }
 0x8f3   : > { %4388 = vrot.lane.b32.xlu1 %v7651_v54, %s6842_s12  ;;  %4368 = vrot.lane.b32.xlu2 %v7415_v60, %s6842_s12 }
 0x8f4   : > { %4366 = vrot.lane.b32.xlu0 %v13701_v41, %s6842_s12  ;;  %6641 = vmatmul.msk.f32.gmra.mxu1 %vm3922_vm11, %v3908_v7  ;;  %v10936_v7 = vpop.f32.mrf.mxu1 }
 0x8f5   : > { %v1962_v56 = vpop.permute.xlu1 %1961  ;;  %v1966_v34 = vpop.permute.xlu2 %1965  ;;  %14116 = vst [vmem:[#allocation391_spill] sm:$0xff] %v10936_v7 }
 0x8f6   : > { %v3454_v54 = vsel %vm456_vm0, %v3390_v16, %v1962_v56  ;;  %v2484_v59 = vpop.permute.xlu0 %2483 }
 0x8f7   : > { %v3519_v60 = vsel %vm3460_vm4, %v3454_v54, %v10832_v50  ;;  %v14117_v54 = vld [vmem:[#allocation331_spill] sm:$0xff] }
 0x8f8   : > { %v3584_v52 = vsel %vm3525_vm5, %v3519_v60, %v2303_v6  ;;  %v14113_v6 = vld [vmem:[#allocation322_spill] sm:$0xff] }
 0x8f9   : > { %v3649_v26 = vsel %vm3590_vm6, %v3584_v52, %v2484_v59  ;;  %v3261_v61 = vsel %vm3201_vm1, %v13954_v14, %v14113_v6  ;;  %v14118_v52 = vld [vmem:[#allocation247_spill] sm:$0xff] }
 0x8fa   : > { %v3714_v37 = vsel %vm3655_vm7, %v3649_v26, %v9052_v25 }
 0x8fb   : > { %4364 = vrot.lane.b32.xlu1 %v13702_v58, %s6842_s12  ;;  %4410 = vrot.lane.b32.xlu2 %v13860_v11, %s6842_s12  ;;  %v3326_v11 = vsel %vm3266_vm3, %v3261_v61, %v14114_v23 }
 0x8fc   : > { %4418 = vrot.lane.b32.xlu0 %v13889_v15, %s6842_s12  ;;  %v3391_v8 = vsel %vm3331_vm2, %v3326_v11, %v14115_v5  ;;  %v14121_v5 = vld [vmem:[#allocation335_spill] sm:$0xff] }
 0x8fd   : > { %v2802_v41 = vpop.permute.xlu1 %2801  ;;  %v2806_v49 = vpop.permute.xlu2 %2805 }
 0x8fe   : > { %v3779_v1 = vsel %vm3720_vm8, %v3714_v37, %v2802_v41  ;;  %v1964_v10 = vpop.permute.xlu0 %1963  ;;  %v14119_v41 = vld [vmem:[#allocation383_spill] sm:$0xff]  ;;  %v10969_v37 = vpop.f32.mrf.mxu1 }
 0x8ff   : > { %v3844_v58 = vsel %vm3785_vm9, %v3779_v1, %v2979_v47  ;;  %v3455_v63 = vsel %vm456_vm0, %v3391_v8, %v1964_v10  ;;  %14120 = vst [vmem:[#allocation51_spill] sm:$0xff] %v10969_v37 }
 0x900   : > { %v3909_v15 = vsel %vm3850_vm10, %v3844_v58, %v10603_v48  ;;  %v3520_v51 = vsel %vm3460_vm4, %v3455_v63, %v10832_v50 }
 0x901   : > { %6642 = vmatmul.msk.f32.gmra.mxu1 %vm3922_vm11, %v3909_v15 }
 0x903   : > { %4362 = vrot.lane.b32.xlu1 %v13697_v55, %s6842_s12  ;;  %4408 = vrot.lane.b32.xlu2 %v13853_v45, %s6842_s12 }
 0x904   : > { %4416 = vrot.lane.b32.xlu0 %v13881_v43, %s6842_s12 }
 0x905   : > { %v2305_v47 = vpop.permute.xlu1 %2304  ;;  %v2309_v53 = vpop.permute.xlu2 %2308 }
 0x906   : > { %v3585_v33 = vsel %vm3525_vm5, %v3520_v51, %v2305_v47  ;;  %v2804_v28 = vpop.permute.xlu0 %2803  ;;  %v10998_v63 = vpop.f32.mrf.mxu1 }
 0x907   : > { %v3650_v16 = vsel %vm3590_vm6, %v3585_v33, %v2486_v31  ;;  %v3262_v31 = vsel %vm3201_vm1, %v13961_v29, %v14117_v54  ;;  %14122 = vst [vmem:[#allocation99_spill] sm:$0xff] %v10998_v63 }
 0x908   : > { %v3715_v56 = vsel %vm3655_vm7, %v3650_v16, %v9052_v25 }
 0x909   : > { %v3780_v55 = vsel %vm3720_vm8, %v3715_v56, %v2804_v28 }
 0x90b   : > { %4426 = vrot.lane.b32.xlu1 %v13921_v44, %s6842_s12  ;;  %4442 = vrot.lane.b32.xlu2 %v13990_v57, %s6842_s12  ;;  %v3327_v44 = vsel %vm3266_vm3, %v3262_v31, %v14118_v52 }
 0x90c   : > { %4510 = vrot.lane.b32.xlu0 %v14018_v35, %s6842_s12  ;;  %v3392_v35 = vsel %vm3331_vm2, %v3327_v44, %v14119_v41  ;;  %v14125_v41 = vld [vmem:[#allocation384_spill] sm:$0xff] }
 0x90d   : > { %v2981_v45 = vpop.permute.xlu1 %2980  ;;  %v2985_v43 = vpop.permute.xlu2 %2984  ;;  %v3456_v1 = vsel %vm456_vm0, %v3392_v35, %v1966_v34 }
 0x90e   : > { %v3845_v59 = vsel %vm3785_vm9, %v3780_v55, %v2981_v45  ;;  %v2307_v60 = vpop.permute.xlu0 %2306  ;;  %v3521_v10 = vsel %vm3460_vm4, %v3456_v1, %v10832_v50  ;;  %v11028_v1 = vpop.f32.mrf.mxu1 }
 0x90f   : > { %v3910_v26 = vsel %vm3850_vm10, %v3845_v59, %v10603_v48  ;;  %v3586_v6 = vsel %vm3525_vm5, %v3521_v10, %v2307_v60  ;;  %14126 = vst [vmem:[#allocation24_spill] sm:$0xff] %v11028_v1 }
 0x910   : > { %6643 = vmatmul.msk.f32.gmra.mxu1 %vm3922_vm11, %v3910_v26 }
 0x913   : > { %4346 = vrot.lane.b32.xlu1 %v13686_v46, %s6842_s12  ;;  %4354 = vrot.lane.b32.xlu2 %v13690_v42, %s6842_s12 }
 0x914   : > { %4360 = vrot.lane.b32.xlu0 %v13695_v22, %s6842_s12  ;;  %v3263_v22 = vsel %vm3201_vm1, %v13972_v4, %v14121_v5 }
 0x915   : > { %v2488_v61 = vpop.permute.xlu1 %2487  ;;  %v2492_v58 = vpop.permute.xlu2 %2491  ;;  %v3328_v8 = vsel %vm3266_vm3, %v3263_v22, %v14118_v52  ;;  %v14129_v22 = vld [vmem:[#allocation340_spill] sm:$0xff] }
 0x916   : > { %v3651_v23 = vsel %vm3590_vm6, %v3586_v6, %v2488_v61  ;;  %v2983_v11 = vpop.permute.xlu0 %2982 }
 0x917   : > { %v3716_v34 = vsel %vm3655_vm7, %v3651_v23, %v9052_v25 }
 0x918   : > { %v3781_v46 = vsel %vm3720_vm8, %v3716_v34, %v2806_v49  ;;  %v14123_v49 = vld [vmem:[#allocation128_spill] sm:$0xff] }
 0x919   : > { %v3846_v42 = vsel %vm3785_vm9, %v3781_v46, %v2983_v11  ;;  %v3393_v47 = vsel %vm3331_vm2, %v3328_v8, %v14123_v49 }
 0x91a   : > { %v3911_v15 = vsel %vm3850_vm10, %v3846_v42, %v10603_v48 }
 0x91b   : > { %4406 = vrot.lane.b32.xlu1 %v13846_v17, %s6842_s12  ;;  %4414 = vrot.lane.b32.xlu2 %v13874_v27, %s6842_s12 }
 0x91c   : > { %4424 = vrot.lane.b32.xlu0 %v13913_v30, %s6842_s12  ;;  %6644 = vmatmul.msk.f32.gmra.mxu1 %vm3922_vm11, %v3911_v15  ;;  %v6843_v30 = vmov -inf  }
 0x91d   : > { %v1968_v51 = vpop.permute.xlu1 %1967  ;;  %v1972_v33 = vpop.permute.xlu2 %1971 }
 0x91e   : > { %v3457_v17 = vsel %vm456_vm0, %v3393_v47, %v1968_v51  ;;  %v2490_v28 = vpop.permute.xlu0 %2489  ;;  %v14130_v47 = vld [vmem:[#allocation385_spill] sm:$0xff]  ;;  %v11065_v51 = vpop.f32.mrf.mxu1 }
 0x91f   : > { %v3522_v27 = vsel %vm3460_vm4, %v3457_v17, %v10832_v50  ;;  %14131 = vst [vmem:[#allocation329_spill] sm:$0xff] %v11065_v51 }
 0x920   : > { %v3587_v16 = vsel %vm3525_vm5, %v3522_v27, %v2309_v53  ;;  %v14124_v53 = vld [vmem:[#allocation330_spill] sm:$0xff] }
 0x921   : > { %v3652_v56 = vsel %vm3590_vm6, %v3587_v16, %v2490_v28  ;;  %v3264_v60 = vsel %vm3201_vm1, %v13982_v21, %v14124_v53 }
 0x922   : > { %v3717_v45 = vsel %vm3655_vm7, %v3652_v56, %v9052_v25 }
 0x923   : > { %4440 = vrot.lane.b32.xlu1 %v13982_v21, %s6842_s12  ;;  %4508 = vrot.lane.b32.xlu2 %v14011_v12, %s6842_s12  ;;  %v3329_v12 = vsel %vm3266_vm3, %v3264_v60, %v14118_v52  ;;  %v14127_v21 = vld [vmem:[#allocation41_spill] sm:$0xff] }
 0x924   : > { %4577 = vrot.lane.b32.xlu0 %v6843_v30, %s6842_s12  ;;  %v3394_v35 = vsel %vm3331_vm2, %v3329_v12, %v14125_v41  ;;  %v14137_v12 = vld [vmem:[#allocation19_spill] sm:$0xff] }
 0x925   : > { %v2808_v55 = vpop.permute.xlu1 %2807  ;;  %v2812_v54 = vpop.permute.xlu2 %2811 }
 0x926   : > { %v3782_v31 = vsel %vm3720_vm8, %v3717_v45, %v2808_v55  ;;  %v1970_v59 = vpop.permute.xlu0 %1969  ;;  %v14133_v55 = vld [vmem:[#allocation36_spill] sm:$0xff]  ;;  %v14134_v45 = vld [vmem:[#allocation53_spill] sm:$0xff] }
 0x927   : > { %v3847_v44 = vsel %vm3785_vm9, %v3782_v31, %v2985_v43  ;;  %v3458_v10 = vsel %vm456_vm0, %v3394_v35, %v1970_v59  ;;  %v14128_v43 = vld [vmem:[#allocation58_spill] sm:$0xff]  ;;  %v11091_v31 = vpop.f32.mrf.mxu1  ;;  %v14136_v59 = vld [vmem:[#allocation180_spill] sm:$0xff]  ;;  %v14140_v35 = vld [vmem:[#allocation17_spill] sm:$0xff] }
 0x928   : > { %v3912_v26 = vsel %vm3850_vm10, %v3847_v44, %v10603_v48  ;;  %v3523_v61 = vsel %vm3460_vm4, %v3458_v10, %v10832_v50  ;;  %14135 = vst [vmem:[#allocation152_spill] sm:$0xff] %v11091_v31  ;;  %v14141_v10 = vld [vmem:[#allocation170_spill] sm:$0xff] }
 0x929   : > { %6645 = vmatmul.msk.f32.gmra.mxu1 %vm3922_vm11, %v3912_v26  ;;  %v14138_v26 = vld [vmem:[#allocation32_spill] sm:$0xff] }
 0x92b   : > { %4344 = vrot.lane.b32.xlu1 %v7129_v62, %s6842_s12  ;;  %4352 = vrot.lane.b32.xlu2 %v14127_v21, %s6842_s12 }
 0x92c   : > { %4358 = vrot.lane.b32.xlu0 %v14128_v43, %s6842_s12 }
 0x92d   : > { %v2311_v6 = vpop.permute.xlu1 %2310  ;;  %v11040_v23 = vpop.permute.xlu2 %4386 }
 0x92e   : > { %v3588_v11 = vsel %vm3525_vm5, %v3523_v61, %v2311_v6  ;;  %v2810_v34 = vpop.permute.xlu0 %2809  ;;  %v14142_v61 = vld [vmem:[#allocation15_spill] sm:$0xff] }
 0x92f   : > { %v3653_v46 = vsel %vm3590_vm6, %v3588_v11, %v2492_v58  ;;  %v3265_v58 = vsel %vm3201_vm1, %v13990_v57, %v14129_v22 }
 0x930   : > { %v3718_v62 = vsel %vm3655_vm7, %v3653_v46, %v9052_v25 }
 0x931   : > { %v3783_v42 = vsel %vm3720_vm8, %v3718_v62, %v2810_v34  ;;  %v14144_v62 = vld [vmem:[#allocation13_spill] sm:$0xff] }
 0x933   : > { %4404 = vrot.lane.b32.xlu1 %v13839_v24, %s6842_s12  ;;  %4412 = vrot.lane.b32.xlu2 %v13867_v13, %s6842_s12  ;;  %v3330_v24 = vsel %vm3266_vm3, %v3265_v58, %v14118_v52  ;;  %v14132_v52 = vld [vmem:[#allocation21_spill] sm:$0xff]  ;;  %v11167_v58 = vld [vmem:[%s13018_s5] ss:$0 sm:$0xff] }
 0x934   : > { %4422 = vrot.lane.b32.xlu0 %v13905_v36, %s6842_s12  ;;  %v3395_v36 = vsel %vm3331_vm2, %v3330_v24, %v14130_v47 }
 0x935   : > { %v2987_v15 = vpop.permute.xlu1 %2986  ;;  %v11053_v5 = vpop.permute.xlu2 %4394  ;;  %v3459_v17 = vsel %vm456_vm0, %v3395_v36, %v1972_v33 }
 0x936   : > { %v3848_v8 = vsel %vm3785_vm9, %v3783_v42, %v2987_v15  ;;  %v2313_v49 = vpop.permute.xlu0 %2312  ;;  %v3524_v57 = vsel %vm3460_vm4, %v3459_v17, %v10832_v50 }
 0x937   : > { %v3913_v13 = vsel %vm3850_vm10, %v3848_v8, %v10603_v48  ;;  %v3589_v28 = vsel %vm3525_vm5, %v3524_v57, %v2313_v49  ;;  %v14146_v8 = vld [vmem:[#allocation11_spill] sm:$0xff] }
 0x938   : > { %6646 = vmatmul.msk.f32.gmra.mxu1 %vm3922_vm11, %v3913_v13  ;;  %v14148_v49 = vld [vmem:[#allocation7_spill] sm:$0xff] }
 0x93b   : > { %4438 = vrot.lane.b32.xlu1 %v13972_v4, %s6842_s12  ;;  %4506 = vrot.lane.b32.xlu2 %v14004_v9, %s6842_s12 }
 0x93c   : > { %4342 = vrot.lane.b32.xlu0 %v14132_v52, %s6842_s12 }
 0x93d   : > { %v2494_v27 = vpop.permute.xlu1 %2493  ;;  %v11078_v16 = vpop.permute.xlu2 %4392 }
 0x93e   : > { %v3654_v56 = vsel %vm3590_vm6, %v3589_v28, %v2494_v27  ;;  %v2989_v33 = vpop.permute.xlu0 %2988  ;;  %v11192_v28 = vld [vmem:[%s13018_s5 + $0x1] ss:$0 sm:$0xff] }
 0x93f   : > { %v3719_v4 = vsel %vm3655_vm7, %v3654_v56, %v9052_v25 }
 0x940   : > { %v3784_v30 = vsel %vm3720_vm8, %v3719_v4, %v2812_v54 }
 0x941   : > { %v3849_v9 = vsel %vm3785_vm9, %v3784_v30, %v2989_v33 }
 0x942   : > { %v3914_v50 = vsel %vm3850_vm10, %v3849_v9, %v10603_v48 }
 0x943   : > { %4350 = vrot.lane.b32.xlu1 %v14133_v55, %s6842_s12  ;;  %4356 = vrot.lane.b32.xlu2 %v14134_v45, %s6842_s12  ;;  %v14151_v55 = vld [vmem:[#allocation3_spill] sm:$0xff] }
 0x944   : > { %4402 = vrot.lane.b32.xlu0 %v14136_v59, %s6842_s12  ;;  %6647 = vmatmul.msk.f32.gmra.mxu1 %vm3922_vm11, %v3914_v50  ;;  %v14150_v50 = vld [vmem:[#allocation5_spill] sm:$0xff] }
 0x945   : > { %v11096_v25 = vpop.permute.xlu1 %4378  ;;  %v11098_v54 = vpop.permute.xlu2 %4390 }
 0x946   : > { %v11100_v53 = vpop.permute.xlu0 %4376  ;;  %v4543_v15 = vmax.f32 %v11096_v25, %v11040_v23 }
 0x94b   : > { %4420 = vrot.lane.b32.xlu1 %v13897_v18, %s6842_s12  ;;  %4436 = vrot.lane.b32.xlu2 %v13961_v29, %s6842_s12  ;;  %v14139_v18 = vld [vmem:[#allocation175_spill] sm:$0xff] }
 0x94c   : > { %4504 = vrot.lane.b32.xlu0 %v13997_v40, %s6842_s12 }
 0x94d   : > { %v11108_v48 = vpop.permute.xlu1 %4384  ;;  %v11110_v60 = vpop.permute.xlu2 %4368 }
 0x94e   : > { %v11112_v44 = vpop.permute.xlu0 %4374  ;;  %v4542_v24 = vmax.f32 %v11100_v53, %v11108_v48  ;;  %v4538_v45 = vmax.f32 %v11110_v60, %v11100_v53 }
 0x950   : > { %v4606_v33 = vmax.f32 %v4542_v24, %v11078_v16 }
 0x953   : > { %4340 = vrot.lane.b32.xlu1 %v14137_v12, %s6842_s12  ;;  %4348 = vrot.lane.b32.xlu2 %v14138_v26, %s6842_s12  ;;  %v4672_v12 = vmul.f32 %v11167_v58, %v4606_v33 }
 0x954   : > { %4400 = vrot.lane.b32.xlu0 %v14139_v18, %s6842_s12 }
 0x955   : > { %v11120_v41 = vpop.permute.xlu1 %4382  ;;  %v11122_v29 = vpop.permute.xlu2 %4410 }
 0x956   : > { %v11124_v40 = vpop.permute.xlu0 %4372  ;;  %v4541_v13 = vmax.f32 %v11112_v44, %v11120_v41 }
 0x958   : > { %v4605_v4 = vmax.f32 %v4541_v13, %v11098_v54 }
 0x95a   : > { %v4671_v26 = vmul.f32 %v11167_v58, %v4605_v4 }
 0x95b   : > { %4434 = vrot.lane.b32.xlu1 %v13954_v14, %s6842_s12  ;;  %4338 = vrot.lane.b32.xlu2 %v14140_v35, %s6842_s12  ;;  %v14143_v14 = vld [vmem:[#allocation162_spill] sm:$0xff] }
 0x95c   : > { %4398 = vrot.lane.b32.xlu0 %v14141_v10, %s6842_s12 }
 0x95d   : > { %v11132_v21 = vpop.permute.xlu1 %4380  ;;  %v11134_v43 = vpop.permute.xlu2 %4408 }
 0x95e   : > { %v11136_v6 = vpop.permute.xlu0 %4370  ;;  %v4540_v27 = vmax.f32 %v11124_v40, %v11132_v21 }
 0x95f   : > { %v4539_v59 = vmax.f32 %v11136_v6, %v11096_v25 }
 0x963   : > { %4432 = vrot.lane.b32.xlu1 %v13945_v0, %s6842_s12  ;;  %4336 = vrot.lane.b32.xlu2 %v14142_v61, %s6842_s12 }
 0x964   : > { %4396 = vrot.lane.b32.xlu0 %v14143_v14, %s6842_s12 }
 0x965   : > { %v11144_v11 = vpop.permute.xlu1 %4388  ;;  %v11146_v34 = vpop.permute.xlu2 %4442 }
 0x966   : > { %v11148_v46 = vpop.permute.xlu0 %4366  ;;  %v4604_v30 = vmax.f32 %v4540_v27, %v11144_v11 }
 0x967   : > { %v4537_v61 = vmax.f32 %v11148_v46, %v11112_v44 }
 0x968   : > { %v4670_v10 = vmul.f32 %v11167_v58, %v4604_v30 }
 0x96b   : > { %4430 = vrot.lane.b32.xlu1 %v13937_v38, %s6842_s12  ;;  %4334 = vrot.lane.b32.xlu2 %v14144_v62, %s6842_s12  ;;  %v4607_v38 = vmax.f32 %v4543_v15, %v11053_v5  ;;  %v4602_v62 = vmax.f32 %v4538_v45, %v11108_v48  ;;  %v4603_v15 = vmax.f32 %v4539_v59, %v11040_v23 }
 0x96c   : > { %4428 = vrot.lane.b32.xlu0 %v13929_v19, %s6842_s12  ;;  %v14147_v19 = vld [vmem:[#allocation9_spill] sm:$0xff] }
 0x96d   : > { %v11156_v0 = vpop.permute.xlu1 %4364  ;;  %v11158_v42 = vpop.permute.xlu2 %4354  ;;  %v4673_v17 = vmul.f32 %v11167_v58, %v4607_v38  ;;  %v4738_v38 = vadd.f32 %v11192_v28, %v4672_v12  ;;  %v4668_v24 = vmul.f32 %v11167_v58, %v4602_v62  ;;  %v4669_v13 = vmul.f32 %v11167_v58, %v4603_v15 }
 0x96e   : > { %v11162_v22 = vpop.permute.xlu0 %4418 }
 0x96f   : > { %14145 = vst [vmem:[#allocation346_spill] sm:$0xff] %v11162_v22  ;;  %v4739_v9 = vadd.f32 %v11192_v28, %v4673_v17  ;;  %v4536_v17 = vmax.f32 %v11156_v0, %v11124_v40  ;;  %v4734_v45 = vadd.f32 %v11192_v28, %v4668_v24  ;;  %v4735_v59 = vadd.f32 %v11192_v28, %v4669_v13 }
 0x971   : > { %v4600_v12 = vmax.f32 %v4536_v17, %v11132_v21 }
 0x973   : > { %4332 = vrot.lane.b32.xlu1 %v14146_v8, %s6842_s12  ;;  %4330 = vrot.lane.b32.xlu2 %v14147_v19, %s6842_s12  ;;  %v4737_v8 = vadd.f32 %v11192_v28, %v4671_v26  ;;  %v4601_v19 = vmax.f32 %v4537_v61, %v11120_v41  ;;  %v4666_v15 = vmul.f32 %v11167_v58, %v4600_v12 }
 0x974   : > { %4328 = vrot.lane.b32.xlu0 %v14148_v49, %s6842_s12  ;;  %v4736_v49 = vadd.f32 %v11192_v28, %v4670_v10 }
 0x975   : > { %v11180_v47 = vpop.permute.xlu1 %4362  ;;  %v11182_v36 = vpop.permute.xlu2 %4414  ;;  %v4667_v33 = vmul.f32 %v11167_v58, %v4601_v19  ;;  %v4732_v13 = vadd.f32 %v11192_v28, %v4666_v15 }
 0x976   : > { %v4531_v57 = vmax.f32 %v11158_v42, %v11180_v47  ;;  %v11187_v52 = vpop.permute.xlu0 %4416  ;;  %v4535_v4 = vmax.f32 %v11180_v47, %v11136_v6 }
 0x977   : > { %14149 = vst [vmem:[#allocation386_spill] sm:$0xff] %v11187_v52  ;;  %v4733_v62 = vadd.f32 %v11192_v28, %v4667_v33 }
 0x978   : > { %v11197_v56 = vmax.f32 %v4531_v57, %v11136_v6  ;;  %v4599_v61 = vmax.f32 %v4535_v4, %v11096_v25 }
 0x97b   : > { %4326 = vrot.lane.b32.xlu1 %v14150_v50, %s6842_s12  ;;  %4324 = vrot.lane.b32.xlu2 %v14151_v55, %s6842_s12 }
 0x97c   : > { %4898 = vrot.lane.b32.xlu0 %v4739_v9, %s6836_s16  ;;  %v4559_v9 = vmax.f32 %v11122_v29, %v11162_v22 }
 0x97d   : > { %v11214_v18 = vpop.permute.xlu1 %4426  ;;  %v11216_v35 = vpop.permute.xlu2 %4508 }
 0x97e   : > { %v11221_v14 = vpop.permute.xlu0 %4510  ;;  %v4623_v26 = vmax.f32 %v4559_v9, %v11214_v18 }
 0x97f   : > { %v4575_v9 = vmax.f32 %v11146_v34, %v11221_v14 }
 0x983   : > { %4896 = vrot.lane.b32.xlu1 %v4738_v38, %s6836_s16  ;;  %4894 = vrot.lane.b32.xlu2 %v4737_v8, %s6836_s16  ;;  %v4689_v38 = vmul.f32 %v11167_v58, %v4623_v26 }
 0x984   : > { %4892 = vrot.lane.b32.xlu0 %v4736_v49, %s6836_s16  ;;  %v4558_v49 = vmax.f32 %v11134_v43, %v11187_v52 }
 0x985   : > { %v11236_v57 = vpop.permute.xlu1 %4346  ;;  %v11238_v27 = vpop.permute.xlu2 %4352  ;;  %v4755_v17 = vadd.f32 %v11192_v28, %v4689_v38 }
 0x986   : > { %v4361_v30 = vpop.permute.xlu0 %4360  ;;  %v4527_v25 = vmax.f32 %v11236_v57, %v11158_v42 }
 0x987   : > { %v4530_v50 = vmax.f32 %v11238_v27, %v4361_v30  ;;  %v4534_v55 = vmax.f32 %v4361_v30, %v11110_v60 }
 0x988   : > { %v4591_v33 = vmax.f32 %v4527_v25, %v11180_v47 }
 0x989   : > { %v11252_v10 = vmax.f32 %v4530_v50, %v11110_v60  ;;  %v4598_v6 = vmax.f32 %v4534_v55, %v11100_v53  ;;  %v4665_v53 = vmul.f32 %v11167_v58, %v4599_v61 }
 0x98b   : > { %4888 = vrot.lane.b32.xlu2 %v4734_v45, %s6836_s16  ;;  %4890 = vrot.lane.b32.xlu1 %v4735_v59, %s6836_s16  ;;  %v4731_v4 = vadd.f32 %v11192_v28, %v4665_v53  ;;  %v4657_v59 = vmul.f32 %v11167_v58, %v4591_v33  ;;  %v4664_v25 = vmul.f32 %v11167_v58, %v4598_v6 }
 0x98c   : > { %4886 = vrot.lane.b32.xlu0 %v4733_v62, %s6836_s16 }
 0x98d   : > { %v11262_v8 = vpop.permute.xlu1 %4406  ;;  %v11264_v60 = vpop.permute.xlu2 %4412  ;;  %v4723_v38 = vadd.f32 %v11192_v28, %v4657_v59 }
 0x98e   : > { %v11269_v19 = vpop.permute.xlu0 %4424  ;;  %v11314_v59 = vpop.f32.mrf.mxu1  ;;  %v4557_v6 = vmax.f32 %v11262_v8, %v11182_v36 }
 0x98f   : > { %v4622_v24 = vmax.f32 %v4558_v49, %v11269_v19  ;;  %14152 = vst [vmem:[#allocation70_spill] sm:$0xff] %v11314_v59  ;;  %v4661_v59 = vmul.f32 %v11167_v58, %v11197_v56 }
 0x991   : > { %v4688_v50 = vmul.f32 %v11167_v58, %v4622_v24 }
 0x993   : > { %4884 = vrot.lane.b32.xlu1 %v4732_v13, %s6836_s16  ;;  %4930 = vrot.lane.b32.xlu2 %v4755_v17, %s6836_s16  ;;  %v4754_v62 = vadd.f32 %v11192_v28, %v4688_v50 }
 0x994   : > { %4882 = vrot.lane.b32.xlu0 %v4731_v4, %s6836_s16 }
 0x995   : > { %v11284_v55 = vpop.permute.xlu1 %4440  ;;  %v11286_v45 = vpop.permute.xlu2 %4506 }
 0x996   : > { %v4574_v47 = vmax.f32 %v11284_v55, %v11216_v35  ;;  %v11291_v12 = vpop.permute.xlu0 %4577 }
 0x997   : > { %v4639_v26 = vmax.f32 %v4575_v9, %v11291_v12  ;;  %v4730_v9 = vadd.f32 %v11192_v28, %v4664_v25  ;;  %v11332_v25 = vpop.f32.mrf.mxu1 }
 0x998   : > { %v4638_v15 = vmax.f32 %v4574_v47, %v11291_v12  ;;  %14153 = vst [vmem:[#allocation105_spill] sm:$0xff] %v11332_v25 }
 0x999   : > { %v4705_v61 = vmul.f32 %v11167_v58, %v4639_v26 }
 0x99a   : > { %v4704_v13 = vmul.f32 %v11167_v58, %v4638_v15 }
 0x99b   : > { %4928 = vrot.lane.b32.xlu1 %v4754_v62, %s6836_s16  ;;  %v4771_v53 = vadd.f32 %v11192_v28, %v4705_v61 }
 0x99c   : > { %4866 = vrot.lane.b32.xlu0 %v4723_v38, %s6836_s16  ;;  %v4770_v50 = vadd.f32 %v11192_v28, %v4704_v13 }
 0x99d   : > { %4962 = vrot.lane.b32.xlu2 %v4771_v53, %s6836_s16  ;;  %v11303_v49 = vpop.permute.xlu1 %4344  ;;  %v11305_v24 = vpop.permute.xlu2 %4356 }
 0x99e   : > { %v4526_v17 = vmax.f32 %v11303_v49, %v11238_v27  ;;  %v11310_v33 = vpop.permute.xlu0 %4358 }
 0x99f   : > { %v4533_v62 = vmax.f32 %v11310_v33, %v11148_v46 }
 0x9a0   : > { %v4590_v4 = vmax.f32 %v4526_v17, %v4361_v30 }
 0x9a1   : > { %v4597_v13 = vmax.f32 %v4533_v62, %v11112_v44  ;;  %v11349_v62 = vpop.f32.mrf.mxu1 }
 0x9a2   : > { %v4656_v47 = vmul.f32 %v11167_v58, %v4590_v4  ;;  %14154 = vst [vmem:[#allocation44_spill] sm:$0xff] %v11349_v62 }
 0x9a3   : > { %4880 = vrot.lane.b32.xlu1 %v4730_v9, %s6836_s16 }
 0x9a4   : > { %4960 = vrot.lane.b32.xlu0 %v4770_v50, %s6836_s16  ;;  %v4722_v53 = vadd.f32 %v11192_v28, %v4656_v47  ;;  %v4663_v47 = vmul.f32 %v11167_v58, %v4597_v13 }
 0x9a5   : > { %v11321_v26 = vpop.permute.xlu1 %4404  ;;  %v11323_v61 = vpop.permute.xlu2 %4436 }
 0x9a6   : > { %v11325_v30 = vpop.permute.xlu0 %4422  ;;  %v4556_v63 = vmax.f32 %v11321_v26, %v11264_v60 }
 0x9a7   : > { %v4621_v15 = vmax.f32 %v4557_v6, %v11325_v30 }
 0x9a9   : > { %v4687_v38 = vmul.f32 %v11167_v58, %v4621_v15  ;;  %v11373_v7 = vpop.f32.mrf.mxu1 }
 0x9aa   : > { %14155 = vst [vmem:[#allocation321_spill] sm:$0xff] %v11373_v7 }
 0x9ab   : > { %4864 = vrot.lane.b32.xlu1 %v4722_v53, %s6836_s16  ;;  %v4753_v17 = vadd.f32 %v11192_v28, %v4687_v38  ;;  %v4729_v38 = vadd.f32 %v11192_v28, %v4663_v47 }
 0x9ad   : > { %4926 = vrot.lane.b32.xlu2 %v4753_v17, %s6836_s16  ;;  %v11338_v4 = vpop.permute.xlu1 %4438  ;;  %v11340_v9 = vpop.permute.xlu2 %4348  ;;  %v4547_v17 = vmax.f32 %v11040_v23, %v11053_v5 }
 0x9ae   : > { %v4573_v50 = vmax.f32 %v11338_v4, %v11286_v45  ;;  %v11344_v6 = vpop.permute.xlu0 %4342 }
 0x9b0   : > { %v4637_v15 = vmax.f32 %v4573_v50, %v11291_v12 }
 0x9b2   : > { %v4703_v44 = vmul.f32 %v11167_v58, %v4637_v15 }
 0x9b4   : > { %v4769_v53 = vadd.f32 %v11192_v28, %v4703_v44 }
 0x9b5   : > { %4878 = vrot.lane.b32.xlu2 %v4729_v38, %s6836_s16  ;;  %v11356_v2 = vpop.permute.xlu1 %4350  ;;  %v11358_v32 = vpop.permute.xlu2 %4338 }
 0x9b6   : > { %v4525_v13 = vmax.f32 %v11344_v6, %v11356_v2  ;;  %v11362_v50 = vpop.permute.xlu0 %4402  ;;  %4958 = vrot.lane.b32.xlu1 %v4769_v53, %s6836_s16 }
 0x9b7   : > { %v4555_v47 = vmax.f32 %v11362_v50, %v11122_v29  ;;  %v11368_v15 = vmax.f32 %v4547_v17, %v11362_v50 }
 0x9b8   : > { %v4589_v23 = vmax.f32 %v4525_v13, %v11310_v33  ;;  %v4532_v13 = vmax.f32 %v11305_v24, %v11156_v0 }
 0x9b9   : > { %v4619_v44 = vmax.f32 %v4555_v47, %v11162_v22 }
 0x9ba   : > { %v4655_v38 = vmul.f32 %v11167_v58, %v4589_v23 }
 0x9bb   : > { %v4685_v37 = vmul.f32 %v11167_v58, %v4619_v44 }
 0x9bc   : > { %v4721_v53 = vadd.f32 %v11192_v28, %v4655_v38 }
 0x9bd   : > { %v11379_v1 = vpop.permute.xlu1 %4420  ;;  %v11381_v51 = vpop.permute.xlu2 %4336  ;;  %v4751_v17 = vadd.f32 %v11192_v28, %v4685_v37  ;;  %v4523_v37 = vmax.f32 %v11358_v32, %v11236_v57 }
 0x9be   : > { %v4620_v47 = vmax.f32 %v4556_v63, %v11379_v1  ;;  %v11387_v23 = vpop.permute.xlu0 %4504  ;;  %4862 = vrot.lane.b32.xlu2 %v4721_v53, %s6836_s16  ;;  %v4596_v63 = vmax.f32 %v4532_v13, %v11124_v40  ;;  %v11401_v53 = vpop.f32.mrf.mxu1 }
 0x9bf   : > { %v4572_v44 = vmax.f32 %v11323_v61, %v11387_v23  ;;  %4922 = vrot.lane.b32.xlu1 %v4751_v17, %s6836_s16  ;;  %14156 = vst [vmem:[#allocation227_spill] sm:$0xff] %v11401_v53  ;;  %v4546_v17 = vmax.f32 %v11108_v48, %v11078_v16  ;;  %v4587_v56 = vmax.f32 %v4523_v37, %v11158_v42 }
 0x9c0   : > { %v4686_v38 = vmul.f32 %v11167_v58, %v4620_v47  ;;  %v4662_v13 = vmul.f32 %v11167_v58, %v4596_v63 }
 0x9c1   : > { %v4636_v31 = vmax.f32 %v4572_v44, %v11291_v12  ;;  %v4727_v12 = vadd.f32 %v11192_v28, %v4661_v59  ;;  %v4653_v59 = vmul.f32 %v11167_v58, %v4587_v56 }
 0x9c2   : > { %v4752_v25 = vadd.f32 %v11192_v28, %v4686_v38  ;;  %v4728_v38 = vadd.f32 %v11192_v28, %v4662_v13 }
 0x9c3   : > { %v4702_v62 = vmul.f32 %v11167_v58, %v4636_v31  ;;  %v4719_v56 = vadd.f32 %v11192_v28, %v4653_v59  ;;  %v4522_v59 = vmax.f32 %v11381_v51, %v11303_v49 }
 0x9c4   : > { %4924 = vrot.lane.b32.xlu0 %v4752_v25, %s6836_s16 }
 0x9c5   : > { %v11408_v47 = vpop.permute.xlu1 %4340  ;;  %v11410_v7 = vpop.permute.xlu2 %4334  ;;  %v4768_v40 = vadd.f32 %v11192_v28, %v4702_v62 }
 0x9c6   : > { %v4524_v31 = vmax.f32 %v11408_v47, %v11340_v9  ;;  %v11417_v44 = vpop.permute.xlu0 %4400  ;;  %v11430_v37 = vpop.f32.mrf.mxu1 }
 0x9c7   : > { %v4554_v48 = vmax.f32 %v11417_v44, %v11134_v43  ;;  %v11422_v42 = vmax.f32 %v4546_v17, %v11417_v44  ;;  %4874 = vrot.lane.b32.xlu1 %v4727_v12, %s6836_s16  ;;  %4956 = vrot.lane.b32.xlu2 %v4768_v40, %s6836_s16  ;;  %v4545_v17 = vmax.f32 %v11120_v41, %v11098_v54 }
 0x9c8   : > { %v4588_v62 = vmax.f32 %v4524_v31, %v11305_v24  ;;  %v4660_v41 = vmul.f32 %v11167_v58, %v11252_v10 }
 0x9c9   : > { %14157 = vst [vmem:[#allocation392_spill] sm:$0xff] %v11422_v42  ;;  %v4618_v25 = vmax.f32 %v4554_v48, %v11187_v52 }
 0x9ca   : > { %v4654_v31 = vmul.f32 %v11167_v58, %v4588_v62  ;;  %v4726_v10 = vadd.f32 %v11192_v28, %v4660_v41 }
 0x9cb   : > { %v4684_v63 = vmul.f32 %v11167_v58, %v4618_v25 }
 0x9cc   : > { %4876 = vrot.lane.b32.xlu0 %v4728_v38, %s6836_s16  ;;  %v4720_v38 = vadd.f32 %v11192_v28, %v4654_v31 }
 0x9cd   : > { %v11436_v12 = vpop.permute.xlu1 %4434  ;;  %v11438_v40 = vpop.permute.xlu2 %4330  ;;  %v4750_v48 = vadd.f32 %v11192_v28, %v4684_v63 }
 0x9ce   : > { %v4571_v13 = vmax.f32 %v11436_v12, %v11146_v34  ;;  %v11445_v53 = vpop.permute.xlu0 %4398  ;;  %v11458_v63 = vpop.f32.mrf.mxu1 }
 0x9cf   : > { %v11448_v25 = vmax.f32 %v4545_v17, %v11445_v53  ;;  %4858 = vrot.lane.b32.xlu1 %v4719_v56, %s6836_s16  ;;  %4920 = vrot.lane.b32.xlu2 %v4750_v48, %s6836_s16  ;;  %14159 = vst [vmem:[#allocation78_spill] sm:$0xff] %v11458_v63  ;;  %v4544_v17 = vmax.f32 %v11132_v21, %v11144_v11 }
 0x9d0   : > { %v4635_v62 = vmax.f32 %v4571_v13, %v11221_v14  ;;  %v4586_v56 = vmax.f32 %v4522_v59, %v11238_v27  ;;  %v4553_v14 = vmax.f32 %v11445_v53, %v11262_v8 }
 0x9d1   : > { %14158 = vst [vmem:[#allocation157_spill] sm:$0xff] %v11448_v25 }
 0x9d2   : > { %v4701_v25 = vmul.f32 %v11167_v58, %v4635_v62  ;;  %v4652_v59 = vmul.f32 %v11167_v58, %v4586_v56  ;;  %v4617_v62 = vmax.f32 %v4553_v14, %v11182_v36  ;;  %v4560_v56 = vmax.f32 %v11264_v60, %v11379_v1 }
 0x9d4   : > { %4860 = vrot.lane.b32.xlu0 %v4720_v38, %s6836_s16  ;;  %v4767_v22 = vadd.f32 %v11192_v28, %v4701_v25  ;;  %v4718_v25 = vadd.f32 %v11192_v28, %v4652_v59 }
 0x9d5   : > { %v11464_v48 = vpop.permute.xlu1 %4432  ;;  %v11466_v52 = vpop.permute.xlu2 %4324 }
 0x9d6   : > { %v4570_v31 = vmax.f32 %v11464_v48, %v11284_v55  ;;  %v11474_v13 = vpop.permute.xlu0 %4396  ;;  %v4273_v42 = vpop.f32.mrf.mxu1 }
 0x9d7   : > { %v11477_v21 = vmax.f32 %v4544_v17, %v11474_v13  ;;  %4872 = vrot.lane.b32.xlu2 %v4726_v10, %s6836_s16  ;;  %v4552_v41 = vmax.f32 %v11474_v13, %v11321_v26  ;;  %v4561_v17 = vmax.f32 %v11182_v36, %v11325_v30  ;;  %v4529_v10 = vmax.f32 %v11356_v2, %v11310_v33 }
 0x9d8   : > { %v4634_v27 = vmax.f32 %v4570_v31, %v11216_v35 }
 0x9d9   : > { %14160 = vst [vmem:[#allocation98_spill] sm:$0xff] %v11477_v21  ;;  %v4616_v21 = vmax.f32 %v4552_v41, %v11264_v60  ;;  %v4528_v60 = vmax.f32 %v11340_v9, %v11305_v24 }
 0x9da   : > { %v4700_v38 = vmul.f32 %v11167_v58, %v4634_v27  ;;  %v4683_v27 = vmul.f32 %v11167_v58, %v4617_v62 }
 0x9db   : > { %v4682_v59 = vmul.f32 %v11167_v58, %v4616_v21  ;;  %v4592_v21 = vmax.f32 %v4528_v60, %v11156_v0 }
 0x9dc   : > { %4954 = vrot.lane.b32.xlu0 %v4767_v22, %s6836_s16  ;;  %v4766_v35 = vadd.f32 %v11192_v28, %v4700_v38 }
 0x9dd   : > { %v4431_v14 = vpop.permute.xlu1 %4430  ;;  %v11496_v31 = vpop.permute.xlu2 %4894  ;;  %v4658_v0 = vmul.f32 %v11167_v58, %v4592_v21 }
 0x9de   : > { %v4565_v36 = vmax.f32 %v11325_v30, %v4431_v14  ;;  %v4569_v41 = vmax.f32 %v4431_v14, %v11338_v4  ;;  %v11502_v22 = vmax.f32 %v4561_v17, %v4431_v14  ;;  %v4429_v38 = vpop.permute.xlu0 %4428  ;;  %4952 = vrot.lane.b32.xlu1 %v4766_v35, %s6836_s16  ;;  %v4551_v17 = vmax.f32 %v11053_v5, %v11362_v50  ;;  %v11524_v24 = vpop.f32.mrf.mxu1 }
 0x9df   : > { %v4564_v33 = vmax.f32 %v11379_v1, %v4429_v38  ;;  %v11506_v63 = vmax.f32 %v4560_v56, %v4429_v38  ;;  %4856 = vrot.lane.b32.xlu2 %v4718_v25, %s6836_s16  ;;  %v4593_v1 = vmax.f32 %v4529_v10, %v11148_v46  ;;  %v4749_v14 = vadd.f32 %v11192_v28, %v4683_v27 }
 0x9e0   : > { %v11513_v30 = vmax.f32 %v4565_v36, %v11338_v4  ;;  %v4633_v62 = vmax.f32 %v4569_v41, %v11286_v45  ;;  %v4748_v4 = vadd.f32 %v11192_v28, %v4682_v59  ;;  %v4615_v5 = vmax.f32 %v4551_v17, %v11122_v29 }
 0x9e1   : > { %v11519_v35 = vmax.f32 %v4564_v33, %v11323_v61  ;;  %v4659_v46 = vmul.f32 %v11167_v58, %v4593_v1  ;;  %v4521_v10 = vmax.f32 %v11410_v7, %v11344_v6  ;;  %v4550_v41 = vmax.f32 %v11078_v16, %v11417_v44  ;;  %v11549_v33 = vld [vmem:[%s13017_s4] ss:$0 sm:$0xff] }
 0x9e2   : > { %v4699_v56 = vmul.f32 %v11167_v58, %v4633_v62  ;;  %v4681_v29 = vmul.f32 %v11167_v58, %v4615_v5  ;;  %v4274_v17 = vadd.f32 %v11549_v33, %v4273_v42  ;;  %v4226_v16 = vadd.f32 %v11549_v33, %v10836_v3 }
 0x9e3   : > { %v4585_v60 = vmax.f32 %v4521_v10, %v11356_v2  ;;  %v4725_v59 = vadd.f32 %v11192_v28, %v4659_v46  ;;  %v4614_v44 = vmax.f32 %v4550_v41, %v11134_v43  ;;  %v14161_v43 = vld [vmem:[#allocation225_spill] sm:$0xff]  ;;  %v11578_v10 = vmax.f32 %v11438_v40, %v11358_v32 }
 0x9e4   : > { %4918 = vrot.lane.b32.xlu0 %v4749_v14, %s6836_s16  ;;  %v4765_v45 = vadd.f32 %v11192_v28, %v4699_v56  ;;  %v4724_v56 = vadd.f32 %v11192_v28, %v4658_v0  ;;  %v4747_v2 = vadd.f32 %v11192_v28, %v4681_v29  ;;  %v4549_v29 = vmax.f32 %v11098_v54, %v11445_v53  ;;  %v14164_v53 = vld [vmem:[#allocation83_spill] sm:$0xff] }
 0x9e5   : > { %v11531_v50 = vpop.permute.xlu1 %4332  ;;  %v11533_v25 = vpop.permute.xlu2 %4888 }
 0x9e6   : > { %v4329_v27 = vpop.permute.xlu0 %4328  ;;  %4916 = vrot.lane.b32.xlu1 %v4748_v4, %s6836_s16  ;;  %v4520_v36 = vmax.f32 %v11531_v50, %v11408_v47  ;;  %v11553_v62 = vpop.f32.mrf.mxu1  ;;  %v4568_v4 = vmax.f32 %v4429_v38, %v11323_v61  ;;  %v14163_v38 = vld [vmem:[#allocation132_spill] sm:$0xff] }
 0x9e7   : > { %4950 = vrot.lane.b32.xlu2 %v4765_v45, %s6836_s16  ;;  %v4651_v45 = vmul.f32 %v11167_v58, %v4585_v60  ;;  %v4220_v60 = vadd.f32 %v11549_v33, %v10770_v39  ;;  %v4567_v39 = vmax.f32 %v11214_v18, %v11436_v12 }
 0x9e8   : > { %v4584_v1 = vmax.f32 %v4520_v36, %v11340_v9  ;;  %v4680_v36 = vmul.f32 %v11167_v58, %v4614_v44  ;;  %v4632_v32 = vmax.f32 %v4568_v4, %v11387_v23  ;;  %v4217_v23 = vadd.f32 %v11549_v33, %v14164_v53 }
 0x9e9   : > { %v4717_v40 = vadd.f32 %v11192_v28, %v4651_v45  ;;  %v11622_v45 = vmax.f32 %v4329_v27, %v11381_v51  ;;  %v14167_v27 = vld [vmem:[#allocation29_spill] sm:$0xff] }
 0x9ec   : > { %4870 = vrot.lane.b32.xlu0 %v4725_v59, %s6836_s16  ;;  %v4223_v59 = vadd.f32 %v11549_v33, %v10802_v20  ;;  %v5057_v20 = vsel %vm456_vm0, %v4220_v60, %v11496_v31 }
 0x9ed   : > { %v4327_v14 = vpop.permute.xlu1 %4326  ;;  %v4931_v21 = vpop.permute.xlu2 %4930 }
 0x9ee   : > { %v11566_v42 = vmax.f32 %v4327_v14, %v11410_v7  ;;  %v5075_v9 = vsel %vm456_vm0, %v4274_v17, %v4931_v21  ;;  %v4899_v5 = vpop.permute.xlu0 %4898  ;;  %4868 = vrot.lane.b32.xlu1 %v4724_v56, %s6836_s16  ;;  %v4650_v7 = vmul.f32 %v11167_v58, %v4584_v1  ;;  %v11594_v41 = vpop.f32.mrf.mxu1  ;;  %v4583_v17 = vmax.f32 %v11578_v10, %v11236_v57  ;;  %v14165_v21 = vld [vmem:[#allocation124_spill] sm:$0xff] }
 0x9ef   : > { %v5059_v3 = vsel %vm456_vm0, %v4226_v16, %v4899_v5  ;;  %4914 = vrot.lane.b32.xlu2 %v4747_v2, %s6836_s16  ;;  %v11574_v46 = vsel %vm3460_vm4, %v5075_v9, %v14161_v43  ;;  %v4613_v1 = vmax.f32 %v4549_v29, %v11262_v8  ;;  %v4746_v16 = vadd.f32 %v11192_v28, %v4680_v36  ;;  %v14166_v5 = vld [vmem:[#allocation119_spill] sm:$0xff] }
 0x9f0   : > { %14162 = vst [vmem:[#allocation328_spill] sm:$0xff] %v11574_v46  ;;  %v4581_v61 = vmax.f32 %v11566_v42, %v11344_v6  ;;  %v11585_v0 = vsel %vm3460_vm4, %v5059_v3, %v14163_v38  ;;  %5210 = vmatpush.msra.mxu2 %v11574_v46  ;;  %v4716_v54 = vadd.f32 %v11192_v28, %v4650_v7  ;;  %v14168_v36 = vld [vmem:[#allocation115_spill] sm:$0xff] }
 0x9f1   : > { %5187 = vmatpush.msra.mxu3 %v11585_v0  ;;  %v4698_v57 = vmul.f32 %v11167_v58, %v4632_v32  ;;  %v4649_v2 = vmul.f32 %v11167_v58, %v4583_v17  ;;  %v4679_v4 = vmul.f32 %v11167_v58, %v4613_v1  ;;  %v4548_v9 = vmax.f32 %v11144_v11, %v11474_v13  ;;  %v14169_v11 = vld [vmem:[#allocation144_spill] sm:$0xff] }
 0x9f2   : > { %v11631_v3 = vsel %vm3460_vm4, %v5057_v20, %v14166_v5  ;;  %v4631_v43 = vmax.f32 %v4567_v39, %v11146_v34  ;;  %v4211_v7 = vadd.f32 %v11549_v33, %v14167_v27  ;;  %v4214_v13 = vadd.f32 %v11549_v33, %v14169_v11  ;;  %v14174_v5 = vld [vmem:[#allocation209_spill] sm:$0xff] }
 0x9f3   : > { %v4764_v51 = vadd.f32 %v11192_v28, %v4698_v57  ;;  %v4715_v32 = vadd.f32 %v11192_v28, %v4649_v2  ;;  %v4582_v34 = vmax.f32 %v11622_v45, %v11303_v49  ;;  %v4268_v6 = vadd.f32 %v11549_v33, %v11430_v37 }
 0x9f4   : > { %4854 = vrot.lane.b32.xlu0 %v4717_v40, %s6836_s16  ;;  %v14170_v40 = vld [vmem:[#allocation389_spill] sm:$0xff]  ;;  %v4697_v53 = vmul.f32 %v11167_v58, %v4631_v43  ;;  %v5054_v49 = vsel %vm456_vm0, %v4211_v7, %v11533_v25  ;;  %v4205_v43 = vadd.f32 %v11549_v33, %v14174_v5 }
 0x9f5   : > { %v4897_v56 = vpop.permute.xlu1 %4896  ;;  %v4208_v60 = vadd.f32 %v11549_v33, %v14170_v40  ;;  %v4648_v20 = vmul.f32 %v11167_v58, %v4582_v34 }
 0x9f6   : > { %v5058_v44 = vsel %vm456_vm0, %v4223_v59, %v4897_v56  ;;  %v4893_v14 = vpop.permute.xlu0 %4892  ;;  %4852 = vrot.lane.b32.xlu1 %v4716_v54, %s6836_s16  ;;  %v11638_v38 = vpop.f32.mrf.mxu1  ;;  %v4612_v59 = vmax.f32 %v4548_v9, %v11321_v26  ;;  %v4745_v54 = vadd.f32 %v11192_v28, %v4679_v4  ;;  %v14171_v26 = vld [vmem:[#allocation108_spill] sm:$0xff]  ;;  %v4763_v2 = vadd.f32 %v11192_v28, %v4697_v53 }
 0x9f7   : > { %4912 = vrot.lane.b32.xlu2 %v4746_v16, %s6836_s16  ;;  %v11618_v8 = vsel %vm3460_vm4, %v5058_v44, %v14165_v21  ;;  %v5056_v31 = vsel %vm456_vm0, %v4217_v23, %v4893_v14  ;;  %v4566_v23 = vmax.f32 %v11269_v19, %v11464_v48  ;;  %v11662_v16 = vpop.permute.xlu2 %4962  ;;  %v14172_v44 = vld [vmem:[#allocation104_spill] sm:$0xff]  ;;  %v4677_v53 = vmul.f32 %v11167_v58, %v11368_v15 }
 0x9f8   : > { %5188 = vmatpush.msra.mxu3 %v11618_v8  ;;  %v11642_v29 = vsel %vm3460_vm4, %v5056_v31, %v14168_v36  ;;  %v4678_v25 = vmul.f32 %v11167_v58, %v4612_v59  ;;  %v11675_v14 = vsel %vm3460_vm4, %v5054_v49, %v14172_v44  ;;  %v14173_v4 = vld [vmem:[#allocation100_spill] sm:$0xff]  ;;  %v4695_v44 = vmul.f32 %v11167_v58, %v11513_v30 }
 0x9f9   : > { %v4630_v21 = vmax.f32 %v4566_v23, %v11284_v55  ;;  %v14175_v55 = vld [vmem:[#allocation319_spill] sm:$0xff]  ;;  %v14177_v23 = vld [vmem:[#allocation89_spill] sm:$0xff] }
 0x9fa   : > { %5189 = vmatpush.msra.mxu3 %v11631_v3  ;;  %v4202_v27 = vadd.f32 %v11549_v33, %v14175_v55  ;;  %v4744_v36 = vadd.f32 %v11192_v28, %v4678_v25  ;;  %v4743_v25 = vadd.f32 %v11192_v28, %v4677_v53  ;;  %v14182_v55 = vld [vmem:[#allocation42_spill] sm:$0xff] }
 0x9fb   : > { %v4696_v11 = vmul.f32 %v11167_v58, %v4630_v21 }
 0x9fc   : > { %4948 = vrot.lane.b32.xlu0 %v4764_v51, %s6836_s16  ;;  %5190 = vmatpush.msra.mxu3 %v11642_v29  ;;  %v4714_v51 = vadd.f32 %v11192_v28, %v4648_v20 }
 0x9fd   : > { %v4891_v17 = vpop.permute.xlu1 %4890 }
 0x9fe   : > { %v5055_v1 = vsel %vm456_vm0, %v4214_v13, %v4891_v17  ;;  %v4887_v56 = vpop.permute.xlu0 %4886  ;;  %4850 = vrot.lane.b32.xlu1 %v4715_v32, %s6836_s16  ;;  %v11680_v31 = vpop.f32.mrf.mxu1  ;;  %v11705_v17 = vmax.f32 %v11466_v52, %v11531_v50  ;;  %v14178_v50 = vld [vmem:[#allocation78_spill] sm:$0xff] }
 0x9ff   : > { %4910 = vrot.lane.b32.xlu2 %v4745_v54, %s6836_s16  ;;  %v11667_v39 = vsel %vm3460_vm4, %v5055_v1, %v14171_v26  ;;  %v5053_v57 = vsel %vm456_vm0, %v4208_v60, %v4887_v56  ;;  %v14176_v60 = vld [vmem:[#allocation93_spill] sm:$0xff]  ;;  %v4647_v54 = vmul.f32 %v11167_v58, %v4581_v61  ;;  %v4762_v1 = vadd.f32 %v11192_v28, %v4696_v11  ;;  %v14179_v26 = vld [vmem:[#allocation316_spill] sm:$0xff] }
 0xa00   : > { %5191 = vmatpush.msra.mxu3 %v11667_v39  ;;  %v11684_v9 = vsel %vm3460_vm4, %v5053_v57, %v14173_v4  ;;  %v4271_v61 = vadd.f32 %v11549_v33, %v14178_v50  ;;  %v4580_v56 = vmax.f32 %v11705_v17, %v11408_v47  ;;  %v4178_v20 = vadd.f32 %v11549_v33, %v14179_v26  ;;  %v14180_v4 = vld [vmem:[#allocation220_spill] sm:$0xff]  ;;  %v14189_v26 = vld [vmem:[#allocation346_spill] sm:$0xff] }
 0xa01   : > { %v4713_v15 = vadd.f32 %v11192_v28, %v4647_v54 }
 0xa02   : > { %5192 = vmatpush.msra.mxu3 %v11675_v14 }
 0xa04   : > { %4946 = vrot.lane.b32.xlu0 %v4763_v2, %s6836_s16  ;;  %5193 = vmatpush.msra.mxu3 %v11684_v9 }
 0xa05   : > { %v4885_v7 = vpop.permute.xlu1 %4884 }
 0xa06   : > { %v5052_v13 = vsel %vm456_vm0, %v4205_v43, %v4885_v7  ;;  %v4883_v32 = vpop.permute.xlu0 %4882  ;;  %4848 = vrot.lane.b32.xlu1 %v4714_v51, %s6836_s16  ;;  %v11720_v52 = vpop.f32.mrf.mxu1  ;;  %v4646_v43 = vmul.f32 %v11167_v58, %v4580_v56  ;;  %v14188_v56 = vld [vmem:[#allocation85_spill] sm:$0xff] }
 0xa07   : > { %v5051_v34 = vsel %vm456_vm0, %v4202_v27, %v4883_v32  ;;  %v4927_v40 = vpop.permute.xlu2 %4926  ;;  %4908 = vrot.lane.b32.xlu2 %v4744_v36, %s6836_s16  ;;  %v11701_v59 = vsel %vm3460_vm4, %v5052_v13, %v14176_v60  ;;  %v14183_v27 = vld [vmem:[#allocation392_spill] sm:$0xff]  ;;  %v4761_v13 = vadd.f32 %v11192_v28, %v4695_v44  ;;  %v14187_v60 = vld [vmem:[#allocation90_spill] sm:$0xff] }
 0xa08   : > { %5194 = vmatpush.msra.mxu3 %v11701_v59  ;;  %v11716_v49 = vsel %vm3460_vm4, %v5051_v34, %v14177_v23  ;;  %v5073_v37 = vsel %vm456_vm0, %v4268_v6, %v4927_v40  ;;  %v4676_v7 = vmul.f32 %v11167_v58, %v14183_v27  ;;  %v14184_v36 = vld [vmem:[#allocation212_spill] sm:$0xff]  ;;  %v4199_v54 = vadd.f32 %v11549_v33, %v14187_v60  ;;  %v14195_v60 = vld [vmem:[#allocation386_spill] sm:$0xff] }
 0xa09   : > { %v11755_v11 = vsel %vm3460_vm4, %v5073_v37, %v14184_v36  ;;  %v14186_v34 = vld [vmem:[#allocation60_spill] sm:$0xff]  ;;  %v4712_v53 = vadd.f32 %v11192_v28, %v4646_v43  ;;  %v4694_v6 = vmul.f32 %v11167_v58, %v11519_v35  ;;  %v14190_v35 = vld [vmem:[#allocation157_spill] sm:$0xff] }
 0xa0a   : > { %5195 = vmatpush.msra.mxu3 %v11716_v49  ;;  %14185 = vst [vmem:[#allocation347_spill] sm:$0xff] %v11755_v11  ;;  %v4196_v40 = vadd.f32 %v11549_v33, %v14186_v34  ;;  %v4675_v44 = vmul.f32 %v11167_v58, %v14190_v35  ;;  %v14191_v37 = vld [vmem:[#allocation77_spill] sm:$0xff]  ;;  %v4690_v35 = vmul.f32 %v11167_v58, %v11506_v63 }
 0xa0b   : > { %v14193_v43 = vld [vmem:[#allocation73_spill] sm:$0xff] }
 0xa0c   : > { %4944 = vrot.lane.b32.xlu0 %v4762_v1, %s6836_s16  ;;  %v4742_v1 = vadd.f32 %v11192_v28, %v4676_v7  ;;  %v4741_v7 = vadd.f32 %v11192_v28, %v4675_v44  ;;  %v14194_v34 = vld [vmem:[#allocation37_spill] sm:$0xff] }
 0xa0d   : > { %v4929_v57 = vpop.permute.xlu1 %4928 }
 0xa0e   : > { %v5074_v21 = vsel %vm456_vm0, %v4271_v61, %v4929_v57  ;;  %v4867_v2 = vpop.permute.xlu0 %4866  ;;  %4846 = vrot.lane.b32.xlu1 %v4713_v15, %s6836_s16  ;;  %v11759_v32 = vpop.f32.mrf.mxu1  ;;  %v4645_v57 = vmul.f32 %v11167_v58, %v11578_v10 }
 0xa0f   : > { %v5043_v47 = vsel %vm456_vm0, %v4178_v20, %v4867_v2  ;;  %4906 = vrot.lane.b32.xlu2 %v4743_v25, %s6836_s16  ;;  %v11742_v5 = vsel %vm3460_vm4, %v5074_v21, %v14180_v4  ;;  %v4879_v51 = vpop.permute.xlu2 %4878  ;;  %v4563_v20 = vmax.f32 %v14189_v26, %v11214_v18  ;;  %v14192_v4 = vld [vmem:[#allocation38_spill] sm:$0xff] }
 0xa10   : > { %14181 = vst [vmem:[#allocation46_spill] sm:$0xff] %v11742_v5  ;;  %v11747_v30 = vsel %vm3460_vm4, %v5043_v47, %v14182_v55  ;;  %5211 = vmatpush.msra.mxu2 %v11742_v5  ;;  %v5049_v50 = vsel %vm456_vm0, %v4196_v40, %v4879_v51  ;;  %v4760_v47 = vadd.f32 %v11192_v28, %v4694_v6 }
 0xa11   : > { %5164 = vmatpush.msrb.mxu0 %v11747_v30  ;;  %v11787_v21 = vsel %vm3460_vm4, %v5049_v50, %v14191_v37  ;;  %v4627_v2 = vmax.f32 %v4563_v20, %v11436_v12  ;;  %v4172_v10 = vadd.f32 %v11549_v33, %v14192_v4  ;;  %v4175_v51 = vadd.f32 %v11549_v33, %v14193_v43  ;;  %v14197_v50 = vld [vmem:[#allocation35_spill] sm:$0xff] }
 0xa12   : > { %5212 = vmatpush.msra.mxu2 %v11755_v11  ;;  %v4711_v55 = vadd.f32 %v11192_v28, %v4645_v57  ;;  %v4756_v4 = vadd.f32 %v11192_v28, %v4690_v35  ;;  %v14206_v35 = vld [vmem:[#allocation84_spill] sm:$0xff] }
 0xa13   : > { %v4693_v12 = vmul.f32 %v11167_v58, %v4627_v2 }
 0xa14   : > { %4942 = vrot.lane.b32.xlu0 %v4761_v13, %s6836_s16 }
 0xa15   : > { %v4881_v23 = vpop.permute.xlu1 %4880 }
 0xa16   : > { %v5050_v61 = vsel %vm456_vm0, %v4199_v54, %v4881_v23  ;;  %4844 = vrot.lane.b32.xlu1 %v4712_v53, %s6836_s16  ;;  %v11792_v18 = vpop.f32.mrf.mxu1  ;;  %v4562_v54 = vmax.f32 %v14195_v60, %v11269_v19  ;;  %v4644_v53 = vmul.f32 %v11167_v58, %v11622_v45  ;;  %v14196_v23 = vld [vmem:[#allocation98_spill] sm:$0xff]  ;;  %v4759_v19 = vadd.f32 %v11192_v28, %v4693_v12  ;;  %v14199_v12 = vld [vmem:[#allocation227_spill] sm:$0xff] }
 0xa17   : > { %4904 = vrot.lane.b32.xlu2 %v4742_v1, %s6836_s16  ;;  %v11776_v15 = vsel %vm3460_vm4, %v5050_v61, %v14188_v56  ;;  %v4674_v1 = vmul.f32 %v11167_v58, %v14196_v23  ;;  %v14201_v23 = vld [vmem:[#allocation207_spill] sm:$0xff] }
 0xa18   : > { %v4863_v25 = vpop.permute.xlu2 %4862  ;;  %5196 = vmatpush.msra.mxu3 %v11776_v15  ;;  %v4626_v56 = vmax.f32 %v4562_v54, %v11464_v48  ;;  %v4710_v45 = vadd.f32 %v11192_v28, %v4644_v53  ;;  %v4643_v48 = vmul.f32 %v11167_v58, %v11566_v42  ;;  %v11848_v42 = vpop.permute.xlu0 %4960 }
 0xa19   : > { %v5041_v36 = vsel %vm456_vm0, %v4172_v10, %v4863_v25  ;;  %v4740_v20 = vadd.f32 %v11192_v28, %v4674_v1  ;;  %v4691_v10 = vmul.f32 %v11167_v58, %v11502_v22  ;;  %v4265_v22 = vadd.f32 %v11549_v33, %v14199_v12 }
 0xa1a   : > { %5197 = vmatpush.msra.mxu3 %v11787_v21  ;;  %v11821_v61 = vsel %vm3460_vm4, %v5041_v36, %v14197_v50  ;;  %v4692_v57 = vmul.f32 %v11167_v58, %v4626_v56  ;;  %v4642_v36 = vmul.f32 %v11167_v58, %v11705_v17  ;;  %v14203_v17 = vld [vmem:[#allocation202_spill] sm:$0xff] }
 0xa1c   : > { %4940 = vrot.lane.b32.xlu0 %v4760_v47, %s6836_s16  ;;  %v4758_v37 = vadd.f32 %v11192_v28, %v4692_v57  ;;  %v4709_v47 = vadd.f32 %v11192_v28, %v4643_v48  ;;  %v14205_v57 = vld [vmem:[#allocation194_spill] sm:$0xff] }
 0xa1d   : > { %v4865_v27 = vpop.permute.xlu1 %4864 }
 0xa1e   : > { %v5042_v13 = vsel %vm456_vm0, %v4175_v51, %v4865_v27  ;;  %4842 = vrot.lane.b32.xlu1 %v4711_v55, %s6836_s16  ;;  %v11826_v26 = vpop.f32.mrf.mxu1  ;;  %v4757_v51 = vadd.f32 %v11192_v28, %v4691_v10  ;;  %v14198_v27 = vld [vmem:[#allocation321_spill] sm:$0xff] }
 0xa1f   : > { %4902 = vrot.lane.b32.xlu2 %v4741_v7, %s6836_s16  ;;  %v11808_v40 = vsel %vm3460_vm4, %v5042_v13, %v14194_v34  ;;  %v4262_v7 = vadd.f32 %v11549_v33, %v14198_v27  ;;  %v14200_v34 = vld [vmem:[#allocation44_spill] sm:$0xff] }
 0xa20   : > { %5165 = vmatpush.msrb.mxu0 %v11808_v40  ;;  %v4259_v60 = vadd.f32 %v11549_v33, %v14200_v34  ;;  %v14209_v27 = vld [vmem:[#allocation72_spill] sm:$0xff] }
 0xa21   : > { %v11817_v6 = vpop.permute.xlu2 %4956 }
 0xa22   : > { %5166 = vmatpush.msrb.mxu0 %v11821_v61 }
 0xa24   : > { %4938 = vrot.lane.b32.xlu0 %v4759_v19, %s6836_s16  ;;  %v4708_v19 = vadd.f32 %v11192_v28, %v4642_v36  ;;  %v14210_v36 = vld [vmem:[#allocation67_spill] sm:$0xff] }
 0xa26   : > { %4840 = vrot.lane.b32.xlu1 %v4710_v45, %s6836_s16  ;;  %v11841_v2 = vpop.f32.mrf.mxu1 }
 0xa27   : > { %4900 = vrot.lane.b32.xlu2 %v4740_v20, %s6836_s16 }
 0xa28   : > { %v11836_v25 = vpop.permute.xlu1 %4958 }
 0xa29   : > { %v4921_v44 = vpop.permute.xlu2 %4920 }
 0xa2a   : > { %v5070_v50 = vsel %vm456_vm0, %v4259_v60, %v4921_v44  ;;  %v4190_v44 = vadd.f32 %v11549_v33, %v14206_v35 }
 0xa2b   : > { %v11883_v48 = vsel %vm3460_vm4, %v5070_v50, %v14205_v57  ;;  %v14213_v50 = vld [vmem:[#allocation66_spill] sm:$0xff] }
 0xa2c   : > { %4936 = vrot.lane.b32.xlu0 %v4758_v37, %s6836_s16  ;;  %v14207_v37 = vld [vmem:[#allocation31_spill] sm:$0xff] }
 0xa2d   : > { %v4193_v28 = vadd.f32 %v11549_v33, %v14207_v37  ;;  %v14215_v37 = vld [vmem:[#allocation28_spill] sm:$0xff] }
 0xa2e   : > { %4838 = vrot.lane.b32.xlu1 %v4709_v47, %s6836_s16  ;;  %v11853_v55 = vpop.f32.mrf.mxu1 }
 0xa2f   : > { %4932 = vrot.lane.b32.xlu2 %v4756_v4, %s6836_s16  ;;  %v14208_v4 = vld [vmem:[#allocation52_spill] sm:$0xff] }
 0xa30   : > { %v4187_v10 = vadd.f32 %v11549_v33, %v14208_v4 }
 0xa31   : > { %v4923_v63 = vpop.permute.xlu1 %4922  ;;  %v4873_v43 = vpop.permute.xlu2 %4872 }
 0xa32   : > { %v5071_v54 = vsel %vm456_vm0, %v4262_v7, %v4923_v63  ;;  %v5046_v12 = vsel %vm456_vm0, %v4187_v10, %v4873_v43  ;;  %v14216_v10 = vld [vmem:[#allocation25_spill] sm:$0xff] }
 0xa33   : > { %v11875_v45 = vsel %vm3460_vm4, %v5071_v54, %v14203_v17  ;;  %v14211_v54 = vld [vmem:[#allocation59_spill] sm:$0xff]  ;;  %v14214_v17 = vld [vmem:[#allocation40_spill] sm:$0xff] }
 0xa34   : > { %4934 = vrot.lane.b32.xlu0 %v4757_v51, %s6836_s16  ;;  %14204 = vst [vmem:[#allocation114_spill] sm:$0xff] %v11875_v45  ;;  %v4163_v57 = vadd.f32 %v11549_v33, %v14214_v17  ;;  %v14220_v17 = vld [vmem:[#allocation70_spill] sm:$0xff] }
 0xa36   : > { %v4925_v13 = vpop.permute.xlu0 %4924  ;;  %v11877_v20 = vpop.f32.mrf.mxu1 }
 0xa37   : > { %v5072_v53 = vsel %vm456_vm0, %v4265_v22, %v4925_v13 }
 0xa38   : > { %v11868_v1 = vsel %vm3460_vm4, %v5072_v53, %v14201_v23  ;;  %v11911_v53 = vsel %vm3460_vm4, %v5046_v12, %v14211_v54  ;;  %v14212_v23 = vld [vmem:[#allocation43_spill] sm:$0xff] }
 0xa39   : > { %14202 = vst [vmem:[#allocation394_spill] sm:$0xff] %v11868_v1  ;;  %v4857_v56 = vpop.permute.xlu2 %4856  ;;  %5213 = vmatpush.msra.mxu2 %v11868_v1  ;;  %v4875_v58 = vpop.permute.xlu1 %4874  ;;  %v4166_v43 = vadd.f32 %v11549_v33, %v14212_v23  ;;  %v14218_v23 = vld [vmem:[#allocation105_spill] sm:$0xff]  ;;  %v14229_v1 = vld [vmem:[#allocation99_spill] sm:$0xff] }
 0xa3a   : > { %v5047_v63 = vsel %vm456_vm0, %v4190_v44, %v4875_v58 }
 0xa3b   : > { %5214 = vmatpush.msra.mxu2 %v11875_v45  ;;  %v11904_v13 = vsel %vm3460_vm4, %v5047_v63, %v14210_v36 }
 0xa3c   : > { %4836 = vrot.lane.b32.xlu0 %v4708_v19, %s6836_s16  ;;  %v4169_v19 = vadd.f32 %v11549_v33, %v14213_v50  ;;  %s12503_s16 = scalar_lea.vmem %s13024_s11, %s6779_s21 }
 0xa3d   : > { %5215 = vmatpush.msra.mxu2 %v11883_v48 }
 0xa3e   : > { %v4877_v47 = vpop.permute.xlu0 %4876  ;;  %v11906_v34 = vpop.f32.mrf.mxu1 }
 0xa3f   : > { %v5048_v51 = vsel %vm456_vm0, %v4193_v28, %v4877_v47  ;;  %v5038_v47 = vsel %vm456_vm0, %v4163_v57, %v4857_v56  ;;  %v4253_v57 = vadd.f32 %v11549_v33, %v14220_v17 }
 0xa40   : > { %v11896_v7 = vsel %vm3460_vm4, %v5048_v51, %v14209_v27  ;;  %v14217_v27 = vld [vmem:[#allocation23_spill] sm:$0xff] }
 0xa41   : > { %v11899_v22 = vpop.permute.xlu2 %4950  ;;  %5198 = vmatpush.msra.mxu3 %v11896_v7  ;;  %v4859_v60 = vpop.permute.xlu1 %4858  ;;  %v11935_v12 = vsel %vm3460_vm4, %v5038_v47, %v14217_v27 }
 0xa42   : > { %v5039_v35 = vsel %vm456_vm0, %v4166_v43, %v4859_v60  ;;  %v4256_v43 = vadd.f32 %v11549_v33, %v14218_v23 }
 0xa43   : > { %5199 = vmatpush.msra.mxu3 %v11904_v13  ;;  %v11930_v63 = vsel %vm3460_vm4, %v5039_v35, %v14216_v10  ;;  %v14222_v10 = vld [vmem:[#allocation329_spill] sm:$0xff] }
 0xa44   : > { %v4247_v27 = vadd.f32 %v11549_v33, %v14222_v10 }
 0xa45   : > { %5200 = vmatpush.msra.mxu3 %v11911_v53 }
 0xa46   : > { %v4861_v58 = vpop.permute.xlu0 %4860  ;;  %v4315_v51 = vpop.f32.mrf.mxu1 }
 0xa47   : > { %v5040_v44 = vsel %vm456_vm0, %v4169_v19, %v4861_v58  ;;  %v14219_v19 = vld [vmem:[#allocation152_spill] sm:$0xff] }
 0xa48   : > { %v11924_v28 = vsel %vm3460_vm4, %v5040_v44, %v14215_v37  ;;  %v4250_v58 = vadd.f32 %v11549_v33, %v14219_v19  ;;  %v14221_v37 = vld [vmem:[#allocation189_spill] sm:$0xff]  ;;  %v14223_v19 = vld [vmem:[#allocation184_spill] sm:$0xff] }
 0xa49   : > { %v4915_v4 = vpop.permute.xlu2 %4914  ;;  %5167 = vmatpush.msrb.mxu0 %v11924_v28 }
 0xa4a   : > { %v5067_v46 = vsel %vm456_vm0, %v4250_v58, %v4915_v4  ;;  %v14226_v58 = vld [vmem:[#allocation65_spill] sm:$0xff] }
 0xa4b   : > { %5168 = vmatpush.msrb.mxu0 %v11930_v63 }
 0xa4d   : > { %5169 = vmatpush.msrb.mxu0 %v11935_v12 }
 0xa4e   : > { %v11938_v36 = vpop.permute.xlu0 %4954  ;;  %v4318_v54 = vpop.f32.mrf.mxu1 }
 0xa50   : > { %v11940_v60 = vpop.permute.xlu1 %4952 }
 0xa51   : > { %v4913_v56 = vpop.permute.xlu2 %4912 }
 0xa56   : > { %v4919_v50 = vpop.permute.xlu0 %4918  ;;  %v4321_v11 = vpop.f32.mrf.mxu1 }
 0xa57   : > { %v5069_v35 = vsel %vm456_vm0, %v4256_v43, %v4919_v50  ;;  %v14224_v43 = vld [vmem:[#allocation24_spill] sm:$0xff] }
 0xa58   : > { %v4917_v44 = vpop.permute.xlu1 %4916  ;;  %v11951_v47 = vsel %vm3460_vm4, %v5069_v35, %v14221_v37  ;;  %v4244_v50 = vadd.f32 %v11549_v33, %v14224_v43  ;;  %v5066_v35 = vsel %vm456_vm0, %v4247_v27, %v4913_v56  ;;  %v14225_v37 = vld [vmem:[#allocation176_spill] sm:$0xff]  ;;  %v14228_v56 = vld [vmem:[#allocation30_spill] sm:$0xff] }
 0xa59   : > { %v4911_v23 = vpop.permute.xlu2 %4910  ;;  %v5068_v5 = vsel %vm456_vm0, %v4253_v57, %v4917_v44  ;;  %5216 = vmatpush.msra.mxu2 %v11951_v47  ;;  %v11968_v4 = vsel %vm3460_vm4, %v5067_v46, %v14225_v37  ;;  %v4184_v57 = vadd.f32 %v11549_v33, %v14226_v58  ;;  %v4181_v27 = vadd.f32 %v11549_v33, %v14228_v56  ;;  %v14230_v58 = vld [vmem:[#allocation54_spill] sm:$0xff] }
 0xa5a   : > { %v11960_v17 = vsel %vm3460_vm4, %v5068_v5, %v14223_v19  ;;  %v5065_v44 = vsel %vm456_vm0, %v4244_v50, %v4911_v23  ;;  %v4322_v5 = vadd.f32 %v11549_v33, %v4321_v11  ;;  %v14227_v19 = vld [vmem:[#allocation171_spill] sm:$0xff]  ;;  %v4241_v46 = vadd.f32 %v11549_v33, %v14229_v1 }
 0xa5b   : > { %5217 = vmatpush.msra.mxu2 %v11960_v17  ;;  %v11977_v43 = vsel %vm3460_vm4, %v5066_v35, %v14227_v19  ;;  %v4319_v23 = vadd.f32 %v11549_v33, %v4318_v54  ;;  %v14231_v19 = vld [vmem:[#allocation166_spill] sm:$0xff]  ;;  %v4316_v54 = vadd.f32 %v11549_v33, %v4315_v51  ;;  %v4313_v51 = vadd.f32 %v11549_v33, %v11906_v34 }
 0xa5c   : > { %v5091_v11 = vsel %vm456_vm0, %v4322_v5, %v11662_v16  ;;  %v11994_v56 = vsel %vm3460_vm4, %v5065_v44, %v14231_v19  ;;  %v14232_v5 = vld [vmem:[#allocation49_spill] sm:$0xff]  ;;  %v14233_v44 = vld [vmem:[#allocation158_spill] sm:$0xff] }
 0xa5d   : > { %5218 = vmatpush.msra.mxu2 %v11968_v4  ;;  %v5090_v16 = vsel %vm456_vm0, %v4319_v23, %v11848_v42  ;;  %v5089_v42 = vsel %vm456_vm0, %v4316_v54, %v11836_v25  ;;  %v14237_v23 = vld [vmem:[#allocation300_spill] sm:$0xff]  ;;  %v5088_v34 = vsel %vm456_vm0, %v4313_v51, %v11817_v6  ;;  %v14239_v25 = vld [vmem:[#allocation50_spill] sm:$0xff] }
 0xa5e   : > { %v4871_v10 = vpop.permute.xlu0 %4870  ;;  %v14243_v51 = vld [vmem:[#allocation20_spill] sm:$0xff] }
 0xa5f   : > { %v5045_v37 = vsel %vm456_vm0, %v4184_v57, %v4871_v10  ;;  %5219 = vmatpush.msra.mxu2 %v11977_v43 }
 0xa60   : > { %v4869_v50 = vpop.permute.xlu1 %4868  ;;  %v11990_v35 = vsel %vm3460_vm4, %v5045_v37, %v14230_v58  ;;  %v14234_v37 = vld [vmem:[#allocation301_spill] sm:$0xff]  ;;  %v12026_v58 = vsel %vm3460_vm4, %v5090_v16, %v14237_v23  ;;  %v14242_v16 = vld [vmem:[#allocation51_spill] sm:$0xff] }
 0xa61   : > { %v5044_v1 = vsel %vm456_vm0, %v4181_v27, %v4869_v50  ;;  %v4909_v45 = vpop.permute.xlu2 %4908  ;;  %5201 = vmatpush.msra.mxu3 %v11990_v35  ;;  %5220 = vmatpush.msra.mxu2 %v11994_v56  ;;  %v12014_v50 = vsel %vm3460_vm4, %v5091_v11, %v14234_v37  ;;  %14238 = vst [vmem:[#allocation332_spill] sm:$0xff] %v12026_v58  ;;  %v14244_v23 = vld [vmem:[#allocation289_spill] sm:$0xff] }
 0xa62   : > { %v5064_v57 = vsel %vm456_vm0, %v4241_v46, %v4909_v45  ;;  %v12005_v10 = vsel %vm3460_vm4, %v5044_v1, %v14232_v5  ;;  %14235 = vst [vmem:[#allocation69_spill] sm:$0xff] %v12014_v50  ;;  %v14236_v45 = vld [vmem:[#allocation313_spill] sm:$0xff]  ;;  %v4310_v11 = vadd.f32 %v11549_v33, %v11877_v20  ;;  %v4157_v1 = vadd.f32 %v11549_v33, %v14239_v25  ;;  %v14246_v25 = vld [vmem:[#allocation18_spill] sm:$0xff] }
 0xa63   : > { %5202 = vmatpush.msra.mxu3 %v12005_v10  ;;  %v12010_v27 = vsel %vm3460_vm4, %v5064_v57, %v14233_v44  ;;  %v4160_v46 = vadd.f32 %v11549_v33, %v14236_v45  ;;  %v14240_v57 = vld [vmem:[#allocation297_spill] sm:$0xff]  ;;  %v4238_v44 = vadd.f32 %v11549_v33, %v14242_v16  ;;  %v4307_v20 = vadd.f32 %v11549_v33, %v11853_v55 }
 0xa64   : > { %5221 = vmatpush.msra.mxu2 %v12010_v27  ;;  %v12038_v5 = vsel %vm3460_vm4, %v5089_v42, %v14240_v57  ;;  %v5087_v6 = vsel %vm456_vm0, %v4310_v11, %v11938_v36  ;;  %v4304_v55 = vadd.f32 %v11549_v33, %v11841_v2  ;;  %v14248_v57 = vld [vmem:[#allocation288_spill] sm:$0xff]  ;;  %v4301_v16 = vadd.f32 %v11549_v33, %v11826_v26 }
 0xa65   : > { %5233 = vmatpush.msrb.mxu3 %v12014_v50  ;;  %14241 = vst [vmem:[#allocation349_spill] sm:$0xff] %v12038_v5  ;;  %v5086_v36 = vsel %vm456_vm0, %v4307_v20, %v11940_v60  ;;  %v12074_v2 = vsel %vm3460_vm4, %v5087_v6, %v14248_v57 }
 0xa66   : > { %v4855_v19 = vpop.permute.xlu0 %4854  ;;  %14249 = vst [vmem:[#allocation39_spill] sm:$0xff] %v12074_v2  ;;  %v5085_v60 = vsel %vm456_vm0, %v4304_v55, %v11899_v22  ;;  %v14253_v22 = vld [vmem:[#allocation276_spill] sm:$0xff] }
 0xa67   : > { %5234 = vmatpush.msrb.mxu3 %v12026_v58  ;;  %v5037_v54 = vsel %vm456_vm0, %v4160_v46, %v4855_v19  ;;  %v12055_v19 = vsel %vm3460_vm4, %v5088_v34, %v14244_v23  ;;  %v14255_v23 = vld [vmem:[#allocation391_spill] sm:$0xff] }
 0xa68   : > { %v4853_v37 = vpop.permute.xlu1 %4852  ;;  %v12049_v45 = vsel %vm3460_vm4, %v5037_v54, %v14243_v51  ;;  %14245 = vst [vmem:[#allocation387_spill] sm:$0xff] %v12055_v19  ;;  %v14247_v54 = vld [vmem:[#allocation153_spill] sm:$0xff]  ;;  %v14252_v51 = vld [vmem:[#allocation22_spill] sm:$0xff]  ;;  %v4235_v55 = vadd.f32 %v11549_v33, %v14255_v23 }
 0xa69   : > { %5235 = vmatpush.msrb.mxu3 %v12038_v5  ;;  %v5036_v46 = vsel %vm456_vm0, %v4157_v1, %v4853_v37  ;;  %v4907_v42 = vpop.permute.xlu2 %4906  ;;  %5170 = vmatpush.msrb.mxu0 %v12049_v45  ;;  %v4154_v6 = vadd.f32 %v11549_v33, %v14252_v51  ;;  %v4298_v51 = vadd.f32 %v11549_v33, %v11792_v18 }
 0xa6a   : > { %v5063_v11 = vsel %vm456_vm0, %v4238_v44, %v4907_v42  ;;  %v12065_v1 = vsel %vm3460_vm4, %v5036_v46, %v14246_v25  ;;  %v14250_v44 = vld [vmem:[#allocation283_spill] sm:$0xff]  ;;  %v12092_v42 = vsel %vm3460_vm4, %v5085_v60, %v14253_v22 }
 0xa6b   : > { %5236 = vmatpush.msrb.mxu3 %v12055_v19  ;;  %5171 = vmatpush.msrb.mxu0 %v12065_v1  ;;  %v12070_v34 = vsel %vm3460_vm4, %v5063_v11, %v14247_v54  ;;  %v12084_v20 = vsel %vm3460_vm4, %v5086_v36, %v14250_v44  ;;  %14254 = vst [vmem:[#allocation120_spill] sm:$0xff] %v12092_v42  ;;  %v14256_v36 = vld [vmem:[#allocation275_spill] sm:$0xff]  ;;  %v14259_v44 = vld [vmem:[#allocation148_spill] sm:$0xff] }
 0xa6c   : > { %5222 = vmatpush.msra.mxu2 %v12070_v34  ;;  %14251 = vst [vmem:[#allocation88_spill] sm:$0xff] %v12084_v20 }
 0xa6d   : > { %5237 = vmatpush.msrb.mxu3 %v12074_v2 }
 0xa6e   : > { %v4949_v37 = vpop.permute.xlu0 %4948 }
 0xa6f   : > { %5238 = vmatpush.msrb.mxu3 %v12084_v20  ;;  %v5084_v46 = vsel %vm456_vm0, %v4301_v16, %v4949_v37  ;;  %v14258_v16 = vld [vmem:[#allocation16_spill] sm:$0xff] }
 0xa70   : > { %v4851_v26 = vpop.permute.xlu1 %4850  ;;  %v12099_v11 = vsel %vm3460_vm4, %v5084_v46, %v14256_v36  ;;  %v14260_v46 = vld [vmem:[#allocation48_spill] sm:$0xff] }
 0xa71   : > { %5239 = vmatpush.msrb.mxu3 %v12092_v42  ;;  %14257 = vst [vmem:[#allocation324_spill] sm:$0xff] %v12099_v11  ;;  %v5035_v25 = vsel %vm456_vm0, %v4154_v6, %v4851_v26  ;;  %v4905_v54 = vpop.permute.xlu2 %4904  ;;  %v4151_v22 = vadd.f32 %v11549_v33, %v14260_v46 }
 0xa72   : > { %v5062_v57 = vsel %vm456_vm0, %v4235_v55, %v4905_v54  ;;  %v12106_v60 = vsel %vm3460_vm4, %v5035_v25, %v14258_v16  ;;  %v14261_v55 = vld [vmem:[#allocation266_spill] sm:$0xff]  ;;  %v14262_v25 = vld [vmem:[#allocation267_spill] sm:$0xff] }
 0xa73   : > { %5240 = vmatpush.msrb.mxu3 %v12099_v11  ;;  %5172 = vmatpush.msrb.mxu0 %v12106_v60  ;;  %v12111_v37 = vsel %vm3460_vm4, %v5062_v57, %v14259_v44  ;;  %v4232_v26 = vadd.f32 %v11549_v33, %v14261_v55  ;;  %v14264_v44 = vld [vmem:[#allocation14_spill] sm:$0xff] }
 0xa74   : > { %5223 = vmatpush.msra.mxu2 %v12111_v37  ;;  %v14266_v55 = vld [vmem:[#allocation314_spill] sm:$0xff] }
 0xa76   : > { %v4947_v6 = vpop.permute.xlu0 %4946 }
 0xa77   : > { %v5083_v23 = vsel %vm456_vm0, %v4298_v51, %v4947_v6  ;;  %v14265_v51 = vld [vmem:[#allocation140_spill] sm:$0xff] }
 0xa78   : > { %v4849_v36 = vpop.permute.xlu1 %4848  ;;  %v12123_v54 = vsel %vm3460_vm4, %v5083_v23, %v14262_v25  ;;  %v4295_v23 = vadd.f32 %v11549_v33, %v11759_v32  ;;  %v14267_v25 = vld [vmem:[#allocation325_spill] sm:$0xff]  ;;  %v5157_v32 = vld [vmem:[%s13022_s9 + $0x8] sm:$0xff] }
 0xa79   : > { %14263 = vst [vmem:[#allocation246_spill] sm:$0xff] %v12123_v54  ;;  %v4903_v57 = vpop.permute.xlu2 %4902  ;;  %v5034_v16 = vsel %vm456_vm0, %v4151_v22, %v4849_v36  ;;  %5241 = vmatpush.msrb.mxu3 %v12123_v54  ;;  %v4148_v36 = vadd.f32 %v11549_v33, %v14266_v55 }
 0xa7a   : > { %v5061_v18 = vsel %vm456_vm0, %v4232_v26, %v4903_v57  ;;  %v12130_v46 = vsel %vm3460_vm4, %v5034_v16, %v14264_v44  ;;  %v4229_v57 = vadd.f32 %v11549_v33, %v14267_v25  ;;  %v14268_v44 = vld [vmem:[#allocation259_spill] sm:$0xff]  ;;  %5203 = vmatmul.f32.vlgmr.msra.gmra.mxu3 %v5157_v32 }
 0xa7b   : > { %5173 = vmatpush.msrb.mxu0 %v12130_v46  ;;  %v12135_v6 = vsel %vm3460_vm4, %v5061_v18, %v14265_v51 }
 0xa7c   : > { %5224 = vmatpush.msra.mxu2 %v12135_v6 }
 0xa7e   : > { %v4945_v22 = vpop.permute.xlu0 %4944 }
 0xa7f   : > { %v5082_v26 = vsel %vm456_vm0, %v4295_v23, %v4945_v22  ;;  %v14270_v23 = vld [vmem:[#allocation12_spill] sm:$0xff] }
 0xa80   : > { %v4847_v16 = vpop.permute.xlu1 %4846  ;;  %v12147_v50 = vsel %vm3460_vm4, %v5082_v26, %v14268_v44  ;;  %v14271_v26 = vld [vmem:[#allocation136_spill] sm:$0xff]  ;;  %v14272_v44 = vld [vmem:[#allocation26_spill] sm:$0xff] }
 0xa81   : > { %14269 = vst [vmem:[#allocation395_spill] sm:$0xff] %v12147_v50  ;;  %v4901_v18 = vpop.permute.xlu2 %4900  ;;  %v5033_v51 = vsel %vm456_vm0, %v4148_v36, %v4847_v16  ;;  %5242 = vmatpush.msrb.mxu3 %v12147_v50  ;;  %v4292_v36 = vadd.f32 %v11549_v33, %v11720_v52  ;;  %v14275_v52 = vld [vmem:[#allocation10_spill] sm:$0xff] }
 0xa82   : > { %v5060_v55 = vsel %vm456_vm0, %v4229_v57, %v4901_v18  ;;  %v12157_v22 = vsel %vm3460_vm4, %v5033_v51, %v14270_v23  ;;  %v4145_v57 = vadd.f32 %v11549_v33, %v14272_v44  ;;  %v5161_v51 = vld [vmem:[%s13022_s9 + $0x28] sm:$0xff]  ;;  %v14273_v23 = vld [vmem:[#allocation258_spill] sm:$0xff] }
 0xa83   : > { %5174 = vmatpush.msrb.mxu0 %v12157_v22  ;;  %v12162_v25 = vsel %vm3460_vm4, %v5060_v55, %v14271_v26  ;;  %5206 = vmatmul.f32.gmra.mxu3 %v5161_v51  ;;  %v14276_v44 = vld [vmem:[#allocation47_spill] sm:$0xff] }
 0xa84   : > { %5225 = vmatpush.msra.mxu2 %v12162_v25  ;;  %v4142_v5 = vadd.f32 %v11549_v33, %v14276_v44 }
 0xa86   : > { %v4943_v16 = vpop.permute.xlu0 %4942 }
 0xa87   : > { %v5081_v18 = vsel %vm456_vm0, %v4292_v36, %v4943_v16  ;;  %v4289_v36 = vadd.f32 %v11549_v33, %v11680_v31  ;;  %v14278_v31 = vld [vmem:[#allocation8_spill] sm:$0xff] }
 0xa88   : > { %v4845_v32 = vpop.permute.xlu1 %4844  ;;  %v12175_v55 = vsel %vm3460_vm4, %v5081_v18, %v14273_v23  ;;  %v14277_v23 = vld [vmem:[#allocation253_spill] sm:$0xff] }
 0xa89   : > { %14274 = vst [vmem:[#allocation62_spill] sm:$0xff] %v12175_v55  ;;  %v5032_v26 = vsel %vm456_vm0, %v4145_v57, %v4845_v32  ;;  %5243 = vmatpush.msrb.mxu3 %v12175_v55  ;;  %v5158_v57 = vld [vmem:[%s13022_s9 + $0x10] sm:$0xff] }
 0xa8a   : > { %v12181_v58 = vsel %vm3460_vm4, %v5032_v26, %v14275_v52  ;;  %5226 = vmatmul.f32.vlgmr.msra.gmra.mxu2 %v5158_v57 }
 0xa8b   : > { %5175 = vmatpush.msrb.mxu0 %v12181_v58 }
 0xa8e   : > { %v4941_v16 = vpop.permute.xlu0 %4940 }
 0xa8f   : > { %v5080_v18 = vsel %vm456_vm0, %v4289_v36, %v4941_v16  ;;  %v4286_v36 = vadd.f32 %v11549_v33, %v11638_v38  ;;  %v5162_v16 = vld [vmem:[%s13022_s9 + $0x30] sm:$0xff]  ;;  %v14281_v38 = vld [vmem:[#allocation6_spill] sm:$0xff] }
 0xa90   : > { %v4843_v32 = vpop.permute.xlu1 %4842  ;;  %v12194_v26 = vsel %vm3460_vm4, %v5080_v18, %v14277_v23  ;;  %v14279_v18 = vld [vmem:[#allocation33_spill] sm:$0xff]  ;;  %v14280_v23 = vld [vmem:[#allocation244_spill] sm:$0xff] }
 0xa91   : > { %v5031_v51 = vsel %vm456_vm0, %v4142_v5, %v4843_v32  ;;  %5244 = vmatpush.msrb.mxu3 %v12194_v26  ;;  %v4139_v57 = vadd.f32 %v11549_v33, %v14279_v18  ;;  %v4283_v18 = vadd.f32 %v11549_v33, %v11594_v41  ;;  %v4933_v41 = vpop.permute.xlu2 %4932 }
 0xa92   : > { %v12200_v52 = vsel %vm3460_vm4, %v5031_v51, %v14278_v31  ;;  %5229 = vmatmul.f32.gmra.mxu2 %v5162_v16 }
 0xa93   : > { %5176 = vmatpush.msrb.mxu0 %v12200_v52 }
 0xa96   : > { %v4939_v44 = vpop.permute.xlu0 %4938 }
 0xa97   : > { %v5079_v5 = vsel %vm456_vm0, %v4286_v36, %v4939_v44  ;;  %v14282_v44 = vld [vmem:[#allocation55_spill] sm:$0xff] }
 0xa98   : > { %v4841_v32 = vpop.permute.xlu1 %4840  ;;  %v12213_v51 = vsel %vm3460_vm4, %v5079_v5, %v14280_v23  ;;  %v4136_v2 = vadd.f32 %v11549_v33, %v14282_v44  ;;  %v14283_v23 = vld [vmem:[#allocation243_spill] sm:$0xff]  ;;  %v4277_v44 = vadd.f32 %v11549_v33, %v11524_v24 }
 0xa99   : > { %v5030_v31 = vsel %vm456_vm0, %v4139_v57, %v4841_v32  ;;  %5245 = vmatpush.msrb.mxu3 %v12213_v51 }
 0xa9a   : > { %v12219_v19 = vsel %vm3460_vm4, %v5030_v31, %v14281_v38  ;;  %v14284_v31 = vld [vmem:[#allocation4_spill] sm:$0xff] }
 0xa9b   : > { %5177 = vmatpush.msrb.mxu0 %v12219_v19 }
 0xa9e   : > { %v4937_v36 = vpop.permute.xlu0 %4936 }
 0xa9f   : > { %v5078_v5 = vsel %vm456_vm0, %v4283_v18, %v4937_v36  ;;  %v4280_v18 = vadd.f32 %v11549_v33, %v11553_v62  ;;  %v14287_v62 = vld [vmem:[#allocation34_spill] sm:$0xff] }
 0xaa0   : > { %v4839_v16 = vpop.permute.xlu1 %4838  ;;  %v12229_v57 = vsel %vm3460_vm4, %v5078_v5, %v14283_v23  ;;  %v5076_v5 = vsel %vm456_vm0, %v4277_v44, %v4933_v41  ;;  %v4133_v41 = vadd.f32 %v11549_v33, %v14287_v62  ;;  %v5160_v33 = vld [vmem:[%s13022_s9 + $0x20] sm:$0xff] }
 0xaa1   : > { %v5029_v32 = vsel %vm456_vm0, %v4136_v2, %v4839_v16  ;;  %5246 = vmatpush.msrb.mxu3 %v12229_v57  ;;  %v14285_v16 = vld [vmem:[#allocation238_spill] sm:$0xff] }
 0xaa2   : > { %v12235_v38 = vsel %vm3460_vm4, %v5029_v32, %v14284_v31  ;;  %v5159_v32 = vld [vmem:[%s13022_s9 + $0x18] sm:$0xff]  ;;  %v14286_v31 = vld [vmem:[#allocation230_spill] sm:$0xff] }
 0xaa3   : > { %5178 = vmatpush.msrb.mxu0 %v12235_v38  ;;  %v12254_v24 = vsel %vm3460_vm4, %v5076_v5, %v14286_v31  ;;  %v5163_v5 = vld [vmem:[%s13022_s9 + $0x38] sm:$0xff] }
 0xaa6   : > { %v4935_v36 = vpop.permute.xlu0 %4934 }
 0xaa7   : > { %v5077_v2 = vsel %vm456_vm0, %v4280_v18, %v4935_v36  ;;  %v5156_v36 = vld [vmem:[%s13022_s9] sm:$0xff] }
 0xaa8   : > { %v12246_v23 = vsel %vm3460_vm4, %v5077_v2, %v14285_v16  ;;  %v14288_v2 = vld [vmem:[#allocation2_spill] sm:$0xff] }
 0xaa9   : > { %5247 = vmatpush.msrb.mxu3 %v12246_v23 }
 0xaab   : > { %5248 = vmatpush.msrb.mxu3 %v12254_v24 }
 0xaac   : > { %5249 = vmatmul.f32.vlgmr.msrb.gmra.mxu3 %v5159_v32 }
 0xaae   : > { %v4837_v44 = vpop.permute.xlu0 %4836 }
 0xaaf   : > { %v5028_v18 = vsel %vm456_vm0, %v4133_v41, %v4837_v44 }
 0xab0   : > { %v12265_v16 = vsel %vm3460_vm4, %v5028_v18, %v14288_v2 }
 0xab1   : > { %5179 = vmatpush.msrb.mxu0 %v12265_v16 }
 0xab2   : > { %5180 = vmatmul.f32.vlgmr.msrb.gmra.mxu0 %v5156_v36 }
 0xab4   : > { %5252 = vmatmul.f32.gmra.mxu3 %v5163_v5  ;;  %v5256_v5 = vld [vmem:[%s13023_s10] sm:$0xff] }
 0xaba   : > { %5183 = vmatmul.f32.gmra.mxu0 %v5160_v33  ;;  %v5257_v33 = vld [vmem:[%s13023_s10 + $0x8] sm:$0xff] }
 0xafd   : > { %v5204_v32 = vpop.f32.mrf.mxu3 }
 0xb06   : > { %v5207_v31 = vpop.f32.mrf.mxu3 }
 0xb0d   : > { %v5227_v62 = vpop.f32.mrf.mxu2 }
 0xb15   : > { %v5230_v20 = vpop.f32.mrf.mxu2 }
 0xb2f   : > { %v5181_v41 = vpop.f32.mrf.mxu0  ;;  %v5250_v44 = vpop.f32.mrf.mxu3 }
 0xb30   : > { %v5205_v18 = vadd.f32 %v5204_v32, %v5181_v41  ;;  %v5264_v32 = vld [vmem:[%s13023_s10 + $0x40] sm:$0xff]  ;;  %v5267_v41 = vld [vmem:[%s13023_s10 + $0x58] sm:$0xff] }
 0xb32   : > { %v5228_v54 = vadd.f32 %v5227_v62, %v5205_v18  ;;  %v5266_v62 = vld [vmem:[%s13023_s10 + $0x50] sm:$0xff]  ;;  %v5269_v18 = vld [vmem:[%s13023_s10 + $0x68] sm:$0xff] }
 0xb34   : > { %v5251_v36 = vadd.f32 %v5250_v44, %v5228_v54  ;;  %v5262_v54 = vld [vmem:[%s13023_s10 + $0x30] sm:$0xff]  ;;  %v5268_v44 = vld [vmem:[%s13023_s10 + $0x60] sm:$0xff] }
 0xb37   : > { %v5184_v2 = vpop.f32.mrf.mxu0  ;;  %v5253_v11 = vpop.f32.mrf.mxu3 }
 0xb38   : > { %v5208_v42 = vadd.f32 %v5207_v31, %v5184_v2  ;;  %v5265_v31 = vld [vmem:[%s13023_s10 + $0x48] sm:$0xff] }
 0xb39   : > { %v5982_v2 = vld [vmem:[%s13020_s7 + $0x8] sm:$0xf] }
 0xb3a   : > { %v5231_v50 = vadd.f32 %v5230_v20, %v5208_v42  ;;  %v5259_v20 = vld [vmem:[%s13023_s10 + $0x18] sm:$0xff]  ;;  %v5260_v42 = vld [vmem:[%s13023_s10 + $0x20] sm:$0xff]  ;;  %6783 = vmatpush.msk.msrb.mxu1 %vm6179_vm12, %v5982_v2  ;;  %6784 = vmatpush.msk.msra.mxu3 %vm6179_vm12, %v5982_v2 }
 0xb3c   : > { %v5254_v55 = vadd.f32 %v5253_v11, %v5231_v50  ;;  %v5258_v50 = vld [vmem:[%s13023_s10 + $0x10] sm:$0xff]  ;;  %v5261_v11 = vld [vmem:[%s13023_s10 + $0x28] sm:$0xff] }
 0xb3e   : > { %5526 = vmatpush.msra.mxu0 %v5254_v55  ;;  %6781 = vmatpush.msrb.mxu2 %v5254_v55  ;;  %v5263_v55 = vld [vmem:[%s13023_s10 + $0x38] sm:$0xff] }
 0xb40   : > { %5527 = vmatpush.msra.mxu0 %v5251_v36  ;;  %6782 = vmatpush.msrb.mxu2 %v5251_v36  ;;  %v5270_v36 = vld [vmem:[%s13023_s10 + $0x70] sm:$0xff] }
 0xb41   : > { %6648 = vmatmul.msk.f32.vlgmr.msra.gmra.mxu0 %vm3655_vm7, %v5256_v5  ;;  %6649 = vmatmul.msk.f32.vlgmr.msrb.gmra.mxu2 %vm3655_vm7, %v5257_v33  ;;  %v5981_v5 = vld [vmem:[%s13020_s7] sm:$0xff]  ;;  %v5271_v33 = vld [vmem:[%s13023_s10 + $0x78] sm:$0xff] }
 0xb42   : > { %6712 = vmatpush.msk.msrb.mxu0 %vm6179_vm12, %v5982_v2  ;;  %6785 = vmatpush.msrb.mxu1 %v5981_v5 }
 0xb43   : > { %6786 = vmatpush.msra.mxu3 %v5981_v5 }
 0xb44   : > { %6198 = vmatpush.msrb.mxu0 %v5981_v5 }
 0xb49   : > { %6650 = vmatmul.msk.f32.gmra.mxu2 %vm3655_vm7, %v5258_v50  ;;  %v5272_v50 = vld [vmem:[%s13023_s10 + $0x80] sm:$0xff] }
 0xb51   : > { %6651 = vmatmul.msk.f32.gmra.mxu2 %vm3655_vm7, %v5259_v20  ;;  %v12351_v20 = vld [vmem:[%s13019_s6] ss:$0 sm:$0xff] }
 0xb59   : > { %6652 = vmatmul.msk.f32.gmra.mxu2 %vm3655_vm7, %v5260_v42 }
 0xb61   : > { %6653 = vmatmul.msk.f32.gmra.mxu2 %vm3655_vm7, %v5261_v11  ;;  %v5273_v11 = vld [vmem:[%s13023_s10 + $0x88] sm:$0xff] }
 0xb69   : > { %6654 = vmatmul.msk.f32.gmra.mxu2 %vm3655_vm7, %v5262_v54 }
 0xb71   : > { %6655 = vmatmul.msk.f32.gmra.mxu2 %vm3655_vm7, %v5263_v55  ;;  %v12360_v55 = vld [vmem:[%s13019_s6 + $0x1] ss:$0 sm:$0xff] }
 0xb79   : > { %6656 = vmatmul.msk.f32.gmra.mxu2 %vm3655_vm7, %v5264_v32 }
 0xb81   : > { %6657 = vmatmul.msk.f32.gmra.mxu2 %vm3655_vm7, %v5265_v31 }
 0xb89   : > { %6658 = vmatmul.msk.f32.gmra.mxu2 %vm3655_vm7, %v5266_v62 }
 0xb91   : > { %6659 = vmatmul.msk.f32.gmra.mxu2 %vm3655_vm7, %v5267_v41 }
 0xb99   : > { %6660 = vmatmul.msk.f32.gmra.mxu2 %vm3655_vm7, %v5268_v44 }
 0xba1   : > { %6661 = vmatmul.msk.f32.gmra.mxu2 %vm3655_vm7, %v5269_v18  ;;  %v5274_v18 = vld [vmem:[%s13023_s10 + $0x90] sm:$0xff] }
 0xba9   : > { %6662 = vmatmul.msk.f32.gmra.mxu2 %vm3655_vm7, %v5270_v36 }
 0xbb1   : > { %6663 = vmatmul.msk.f32.gmra.mxu2 %vm3655_vm7, %v5271_v33 }
 0xbb9   : > { %6664 = vmatmul.msk.f32.gmra.mxu2 %vm3655_vm7, %v5272_v50 }
 0xbbe   : > { %v5529_v42 = vpop.f32.mrf.mxu0 }
 0xbbf   : > { %v5721_v54 = vadd.f32 %v5529_v42, %v12265_v16 }
 0xbc1   : > { %v5787_v32 = vmul.f32 %v12351_v20, %v5721_v54  ;;  %6665 = vmatmul.msk.f32.gmra.mxu2 %vm3655_vm7, %v5273_v11 }
 0xbc3   : > { %v5853_v31 = vadd.f32 %v12360_v55, %v5787_v32 }
 0xbc4   : > { %v5532_v62 = vpop.f32.mrf.mxu2 }
 0xbc5   : > { %v5917_v41 = vmax.f32 %v5853_v31, 0.0  ;;  %v5722_v44 = vadd.f32 %v5532_v62, %v12235_v38  ;;  %v5275_v38 = vld [vmem:[%s13023_s10 + $0x98] sm:$0xff] }
 0xbc7   : > { %v5788_v16 = vmul.f32 %v12351_v20, %v5722_v44  ;;  %6713 = vmatmul.msk.f32.vlgmr.msrb.gmra.mxu0 %vm3525_vm5, %v5917_v41 }
 0xbc9   : > { %v5854_v2 = vadd.f32 %v12360_v55, %v5788_v16  ;;  %6666 = vmatmul.msk.f32.gmra.mxu2 %vm3655_vm7, %v5274_v18 }
 0xbcb   : > { %v5918_v36 = vmax.f32 %v5854_v2, 0.0 }
 0xbcc   : > { %v5535_v5 = vpop.f32.mrf.mxu2 }
 0xbcd   : > { %v5723_v33 = vadd.f32 %v5535_v5, %v12219_v19  ;;  %6714 = vmatmul.msk.f32.vlgmr.msrb.gmra.mxu1 %vm3525_vm5, %v5918_v36  ;;  %v5276_v19 = vld [vmem:[%s13023_s10 + $0xa0] sm:$0xff] }
 0xbcf   : > { %v5789_v50 = vmul.f32 %v12351_v20, %v5723_v33 }
 0xbd1   : > { %v5855_v42 = vadd.f32 %v12360_v55, %v5789_v50  ;;  %6667 = vmatmul.msk.f32.gmra.mxu2 %vm3655_vm7, %v5275_v38 }
 0xbd3   : > { %v5919_v11 = vmax.f32 %v5855_v42, 0.0 }
 0xbd4   : > { %v5538_v54 = vpop.f32.mrf.mxu2 }
 0xbd5   : > { %v5724_v32 = vadd.f32 %v5538_v54, %v12200_v52  ;;  %6715 = vmatmul.msk.f32.gmra.mxu1 %vm3525_vm5, %v5919_v11  ;;  %v5277_v52 = vld [vmem:[%s13023_s10 + $0xa8] sm:$0xff] }
 0xbd7   : > { %v5790_v31 = vmul.f32 %v12351_v20, %v5724_v32 }
 0xbd9   : > { %v5856_v62 = vadd.f32 %v12360_v55, %v5790_v31  ;;  %6668 = vmatmul.msk.f32.gmra.mxu2 %vm3655_vm7, %v5276_v19 }
 0xbdb   : > { %v5920_v41 = vmax.f32 %v5856_v62, 0.0 }
 0xbdc   : > { %v5541_v44 = vpop.f32.mrf.mxu2 }
 0xbdd   : > { %v5725_v18 = vadd.f32 %v5541_v44, %v12181_v58  ;;  %6716 = vmatmul.msk.f32.gmra.mxu1 %vm3525_vm5, %v5920_v41  ;;  %v5278_v58 = vld [vmem:[%s13023_s10 + $0xb0] sm:$0xff] }
 0xbdf   : > { %v5791_v16 = vmul.f32 %v12351_v20, %v5725_v18 }
 0xbe1   : > { %v5857_v2 = vadd.f32 %v12360_v55, %v5791_v16  ;;  %6669 = vmatmul.msk.f32.gmra.mxu2 %vm3655_vm7, %v5277_v52 }
 0xbe3   : > { %v5921_v36 = vmax.f32 %v5857_v2, 0.0 }
 0xbe4   : > { %v5544_v5 = vpop.f32.mrf.mxu2 }
 0xbe5   : > { %v5726_v33 = vadd.f32 %v5544_v5, %v12157_v22  ;;  %6717 = vmatmul.msk.f32.gmra.mxu1 %vm3525_vm5, %v5921_v36  ;;  %v5279_v22 = vld [vmem:[%s13023_s10 + $0xb8] sm:$0xff] }
 0xbe7   : > { %v5792_v38 = vmul.f32 %v12351_v20, %v5726_v33 }
 0xbe9   : > { %v5858_v50 = vadd.f32 %v12360_v55, %v5792_v38  ;;  %6670 = vmatmul.msk.f32.gmra.mxu2 %vm3655_vm7, %v5278_v58 }
 0xbeb   : > { %v5922_v42 = vmax.f32 %v5858_v50, 0.0 }
 0xbec   : > { %v5547_v11 = vpop.f32.mrf.mxu2 }
 0xbed   : > { %v5727_v54 = vadd.f32 %v5547_v11, %v12130_v46  ;;  %6718 = vmatmul.msk.f32.vlgmr.msra.gmra.mxu3 %vm3525_vm5, %v5922_v42  ;;  %v5280_v46 = vld [vmem:[%s13023_s10 + $0xc0] sm:$0xff] }
 0xbef   : > { %v5793_v32 = vmul.f32 %v12351_v20, %v5727_v54 }
 0xbf1   : > { %6671 = vmatmul.msk.f32.gmra.mxu2 %vm3655_vm7, %v5279_v22  ;;  %v5859_v19 = vadd.f32 %v12360_v55, %v5793_v32 }
 0xbf3   : > { %v5923_v31 = vmax.f32 %v5859_v19, 0.0 }
 0xbf4   : > { %v5550_v62 = vpop.f32.mrf.mxu2 }
 0xbf5   : > { %v5728_v41 = vadd.f32 %v5550_v62, %v12106_v60  ;;  %6719 = vmatmul.msk.f32.gmra.mxu3 %vm3525_vm5, %v5923_v31  ;;  %v5281_v60 = vld [vmem:[%s13023_s10 + $0xc8] sm:$0xff] }
 0xbf7   : > { %v5794_v44 = vmul.f32 %v12351_v20, %v5728_v41 }
 0xbf9   : > { %6672 = vmatmul.msk.f32.gmra.mxu2 %vm3655_vm7, %v5280_v46  ;;  %v5860_v18 = vadd.f32 %v12360_v55, %v5794_v44 }
 0xbfb   : > { %v5924_v52 = vmax.f32 %v5860_v18, 0.0 }
 0xbfc   : > { %v5553_v16 = vpop.f32.mrf.mxu2 }
 0xbfd   : > { %v5729_v2 = vadd.f32 %v5553_v16, %v12065_v1  ;;  %6720 = vmatmul.msk.f32.gmra.mxu3 %vm3525_vm5, %v5924_v52  ;;  %v5282_v1 = vld [vmem:[%s13023_s10 + $0xd0] sm:$0xff] }
 0xbff   : > { %v5795_v36 = vmul.f32 %v12351_v20, %v5729_v2 }
 0xc01   : > { %6673 = vmatmul.msk.f32.gmra.mxu2 %vm3655_vm7, %v5281_v60  ;;  %v5861_v5 = vadd.f32 %v12360_v55, %v5795_v36 }
 0xc03   : > { %v5925_v33 = vmax.f32 %v5861_v5, 0.0 }
 0xc04   : > { %v5556_v58 = vpop.f32.mrf.mxu2 }
 0xc05   : > { %v5730_v38 = vadd.f32 %v5556_v58, %v12049_v45  ;;  %6721 = vmatmul.msk.f32.gmra.mxu3 %vm3525_vm5, %v5925_v33  ;;  %v5283_v45 = vld [vmem:[%s13023_s10 + $0xd8] sm:$0xff] }
 0xc07   : > { %v5796_v50 = vmul.f32 %v12351_v20, %v5730_v38 }
 0xc09   : > { %6674 = vmatmul.msk.f32.gmra.mxu2 %vm3655_vm7, %v5282_v1  ;;  %v5862_v42 = vadd.f32 %v12360_v55, %v5796_v50 }
 0xc0b   : > { %v5926_v11 = vmax.f32 %v5862_v42, 0.0 }
 0xc0c   : > { %v5559_v54 = vpop.f32.mrf.mxu2 }
 0xc0d   : > { %v5731_v22 = vadd.f32 %v5559_v54, %v11935_v12  ;;  %6722 = vmatmul.msk.f32.gmra.mxu3 %vm3525_vm5, %v5926_v11  ;;  %v5284_v12 = vld [vmem:[%s13023_s10 + $0xe0] sm:$0xff] }
 0xc0f   : > { %v5797_v32 = vmul.f32 %v12351_v20, %v5731_v22 }
 0xc11   : > { %6675 = vmatmul.msk.f32.gmra.mxu2 %vm3655_vm7, %v5283_v45  ;;  %v5863_v19 = vadd.f32 %v12360_v55, %v5797_v32 }
 0xc13   : > { %v5927_v31 = vmax.f32 %v5863_v19, 0.0 }
 0xc14   : > { %v5562_v62 = vpop.f32.mrf.mxu2 }
 0xc15   : > { %v5732_v41 = vadd.f32 %v5562_v62, %v11930_v63  ;;  %6723 = vmatmul.msk.f32.gmra.mxu3 %vm3525_vm5, %v5927_v31  ;;  %v5285_v63 = vld [vmem:[%s13023_s10 + $0xe8] sm:$0xff] }
 0xc17   : > { %v5798_v46 = vmul.f32 %v12351_v20, %v5732_v41 }
 0xc19   : > { %6676 = vmatmul.msk.f32.gmra.mxu2 %vm3655_vm7, %v5284_v12  ;;  %v5864_v44 = vadd.f32 %v12360_v55, %v5798_v46 }
 0xc1b   : > { %v5928_v18 = vmax.f32 %v5864_v44, 0.0  ;;  %v12495_v44 = vld [vmem:[%s13021_s8] ss:$0 sm:$0xff] }
 0xc1c   : > { %v5565_v52 = vpop.f32.mrf.mxu2 }
 0xc1d   : > { %v5733_v16 = vadd.f32 %v5565_v52, %v11924_v28  ;;  %6724 = vmatmul.msk.f32.gmra.mxu3 %vm3525_vm5, %v5928_v18  ;;  %v5286_v28 = vld [vmem:[%s13023_s10 + $0xf0] sm:$0xff] }
 0xc1f   : > { %v5799_v2 = vmul.f32 %v12351_v20, %v5733_v16 }
 0xc21   : > { %6677 = vmatmul.msk.f32.gmra.mxu2 %vm3655_vm7, %v5285_v63  ;;  %v5865_v60 = vadd.f32 %v12360_v55, %v5799_v2 }
 0xc23   : > { %v5929_v36 = vmax.f32 %v5865_v60, 0.0  ;;  %v5290_v60 = vld [vmem:[%s13023_s10 + $0x110] sm:$0xff] }
 0xc24   : > { %v5568_v5 = vpop.f32.mrf.mxu2 }
 0xc25   : > { %v5734_v33 = vadd.f32 %v5568_v5, %v11821_v61  ;;  %6725 = vmatmul.msk.f32.gmra.mxu3 %vm3525_vm5, %v5929_v36  ;;  %v5287_v61 = vld [vmem:[%s13023_s10 + $0xf8] sm:$0xff] }
 0xc27   : > { %v5800_v58 = vmul.f32 %v12351_v20, %v5734_v33 }
 0xc29   : > { %6678 = vmatmul.msk.f32.gmra.mxu2 %vm3655_vm7, %v5286_v28  ;;  %v5866_v38 = vadd.f32 %v12360_v55, %v5800_v58 }
 0xc2b   : > { %v5930_v1 = vmax.f32 %v5866_v38, 0.0 }
 0xc2c   : > { %v5571_v50 = vpop.f32.mrf.mxu2 }
 0xc2d   : > { %v5735_v42 = vadd.f32 %v5571_v50, %v11808_v40  ;;  %6726 = vmatmul.msk.f32.gmra.mxu3 %vm3525_vm5, %v5930_v1  ;;  %v5288_v40 = vld [vmem:[%s13023_s10 + $0x100] sm:$0xff]  ;;  %v5291_v1 = vld [vmem:[%s13023_s10 + $0x118] sm:$0xff] }
 0xc2f   : > { %v5801_v11 = vmul.f32 %v12351_v20, %v5735_v42 }
 0xc31   : > { %6679 = vmatmul.msk.f32.gmra.mxu2 %vm3655_vm7, %v5287_v61  ;;  %v5867_v54 = vadd.f32 %v12360_v55, %v5801_v11 }
 0xc33   : > { %v5931_v22 = vmax.f32 %v5867_v54, 0.0 }
 0xc34   : > { %v5574_v45 = vpop.f32.mrf.mxu2 }
 0xc35   : > { %v5736_v32 = vadd.f32 %v5574_v45, %v11747_v30  ;;  %6727 = vmatmul.msk.f32.gmra.mxu3 %vm3525_vm5, %v5931_v22  ;;  %v5289_v30 = vld [vmem:[%s13023_s10 + $0x108] sm:$0xff]  ;;  %v5292_v45 = vld [vmem:[%s13023_s10 + $0x120] sm:$0xff] }
 0xc37   : > { %v5802_v19 = vmul.f32 %v12351_v20, %v5736_v32 }
 0xc39   : > { %6680 = vmatmul.msk.f32.gmra.mxu2 %vm3655_vm7, %v5288_v40  ;;  %v5868_v31 = vadd.f32 %v12360_v55, %v5802_v19 }
 0xc3b   : > { %v5932_v62 = vmax.f32 %v5868_v31, 0.0 }
 0xc3c   : > { %v5577_v41 = vpop.f32.mrf.mxu2 }
 0xc3d   : > { %v5737_v12 = vadd.f32 %v5577_v41, %v12005_v10  ;;  %6728 = vmatmul.msk.f32.gmra.mxu3 %vm3525_vm5, %v5932_v62 }
 0xc3f   : > { %v5803_v46 = vmul.f32 %v12351_v20, %v5737_v12  ;;  %v5293_v12 = vld [vmem:[%s13023_s10 + $0x128] sm:$0xff] }
 0xc41   : > { %6681 = vmatmul.msk.f32.gmra.mxu2 %vm3655_vm7, %v5289_v30  ;;  %v5869_v18 = vadd.f32 %v12360_v55, %v5803_v46 }
 0xc43   : > { %v5933_v52 = vmax.f32 %v5869_v18, 0.0 }
 0xc44   : > { %v5580_v10 = vpop.f32.mrf.mxu2  ;;  %v6200_v16 = vpop.f32.mrf.mxu0 }
 0xc45   : > { %v5738_v63 = vadd.f32 %v5580_v10, %v11990_v35  ;;  %v6201_v2 = vadd.f32 %v12495_v44, %v6200_v16  ;;  %6729 = vmatmul.msk.f32.gmra.mxu3 %vm3525_vm5, %v5933_v52 }
 0xc47   : > { %v5804_v36 = vmul.f32 %v12351_v20, %v5738_v63  ;;  %6392 = vst.msk [vmem:[%s12503_s16] sm:$0xff] %vm3525_vm5, %v6201_v2  ;;  %v5294_v63 = vld [vmem:[%s13023_s10 + $0x130] sm:$0xff] }
 0xc49   : > { %6682 = vmatmul.msk.f32.gmra.mxu2 %vm3655_vm7, %v5290_v60  ;;  %v5870_v5 = vadd.f32 %v12360_v55, %v5804_v36 }
 0xc4a   : > { %v6203_v33 = vpop.f32.mrf.mxu1 }
 0xc4b   : > { %v6204_v35 = vadd.f32 %v12495_v44, %v6203_v33  ;;  %v5934_v28 = vmax.f32 %v5870_v5, 0.0 }
 0xc4c   : > { %v5583_v58 = vpop.f32.mrf.mxu2 }
 0xc4d   : > { %6393 = vst.msk [vmem:[%s12503_s16 + $0x8] sm:$0xff] %vm3525_vm5, %v6204_v35  ;;  %v5739_v38 = vadd.f32 %v5583_v58, %v11911_v53  ;;  %6730 = vmatmul.msk.f32.gmra.mxu3 %vm3525_vm5, %v5934_v28 }
 0xc4f   : > { %v5805_v50 = vmul.f32 %v12351_v20, %v5739_v38 }
 0xc51   : > { %6683 = vmatmul.msk.f32.gmra.mxu2 %vm3655_vm7, %v5291_v1  ;;  %v5871_v42 = vadd.f32 %v12360_v55, %v5805_v50 }
 0xc52   : > { %v6206_v61 = vpop.f32.mrf.mxu1 }
 0xc53   : > { %v6207_v11 = vadd.f32 %v12495_v44, %v6206_v61  ;;  %v5935_v54 = vmax.f32 %v5871_v42, 0.0  ;;  %v5296_v42 = vld [vmem:[%s13023_s10 + $0x140] sm:$0xff] }
 0xc54   : > { %v5586_v22 = vpop.f32.mrf.mxu2 }
 0xc55   : > { %6394 = vst.msk [vmem:[%s12503_s16 + $0x10] sm:$0xff] %vm3525_vm5, %v6207_v11  ;;  %v5740_v53 = vadd.f32 %v5586_v22, %v11904_v13  ;;  %6731 = vmatmul.msk.f32.gmra.mxu3 %vm3525_vm5, %v5935_v54 }
 0xc57   : > { %v5806_v32 = vmul.f32 %v12351_v20, %v5740_v53 }
 0xc59   : > { %6684 = vmatmul.msk.f32.gmra.mxu2 %vm3655_vm7, %v5292_v45  ;;  %v5872_v40 = vadd.f32 %v12360_v55, %v5806_v32  ;;  %v5297_v32 = vld [vmem:[%s13023_s10 + $0x148] sm:$0xff] }
 0xc5a   : > { %v6209_v19 = vpop.f32.mrf.mxu1 }
 0xc5b   : > { %v6210_v31 = vadd.f32 %v12495_v44, %v6209_v19  ;;  %v5936_v62 = vmax.f32 %v5872_v40, 0.0 }
 0xc5c   : > { %v5589_v41 = vpop.f32.mrf.mxu2 }
 0xc5d   : > { %6395 = vst.msk [vmem:[%s12503_s16 + $0x18] sm:$0xff] %vm3525_vm5, %v6210_v31  ;;  %v5741_v13 = vadd.f32 %v5589_v41, %v11896_v7  ;;  %6732 = vmatmul.msk.f32.gmra.mxu3 %vm3525_vm5, %v5936_v62 }
 0xc5f   : > { %v5807_v30 = vmul.f32 %v12351_v20, %v5741_v13 }
 0xc61   : > { %6685 = vmatmul.msk.f32.gmra.mxu2 %vm3655_vm7, %v5293_v12  ;;  %v5873_v46 = vadd.f32 %v12360_v55, %v5807_v30  ;;  %v5298_v12 = vld [vmem:[%s13023_s10 + $0x150] sm:$0xff] }
 0xc62   : > { %v6212_v18 = vpop.f32.mrf.mxu1 }
 0xc63   : > { %v6213_v52 = vadd.f32 %v12495_v44, %v6212_v18  ;;  %v5937_v10 = vmax.f32 %v5873_v46, 0.0 }
 0xc64   : > { %v5592_v16 = vpop.f32.mrf.mxu2 }
 0xc65   : > { %6396 = vst.msk [vmem:[%s12503_s16 + $0x20] sm:$0xff] %vm3525_vm5, %v6213_v52  ;;  %v5742_v7 = vadd.f32 %v5592_v16, %v11787_v21  ;;  %6733 = vmatmul.msk.f32.gmra.mxu3 %vm3525_vm5, %v5937_v10  ;;  %v5295_v21 = vld [vmem:[%s13023_s10 + $0x138] sm:$0xff] }
 0xc67   : > { %v5808_v2 = vmul.f32 %v12351_v20, %v5742_v7  ;;  %v5299_v7 = vld [vmem:[%s13023_s10 + $0x158] sm:$0xff] }
 0xc69   : > { %6686 = vmatmul.msk.f32.gmra.mxu2 %vm3655_vm7, %v5294_v63  ;;  %v5874_v60 = vadd.f32 %v12360_v55, %v5808_v2 }
 0xc6b   : > { %v5938_v36 = vmax.f32 %v5874_v60, 0.0 }
 0xc6c   : > { %v5595_v5 = vpop.f32.mrf.mxu2 }
 0xc6d   : > { %v5743_v33 = vadd.f32 %v5595_v5, %v11776_v15  ;;  %6734 = vmatmul.msk.f32.gmra.mxu3 %vm3525_vm5, %v5938_v36 }
 0xc6f   : > { %v5809_v35 = vmul.f32 %v12351_v20, %v5743_v33 }
 0xc70   : > { %v6215_v28 = vpop.f32.mrf.mxu3 }
 0xc71   : > { %v6216_v58 = vadd.f32 %v12495_v44, %v6215_v28  ;;  %6687 = vmatmul.msk.f32.gmra.mxu2 %vm3655_vm7, %v5295_v21  ;;  %v5875_v38 = vadd.f32 %v12360_v55, %v5809_v35  ;;  %v5300_v21 = vld [vmem:[%s13023_s10 + $0x160] sm:$0xff] }
 0xc73   : > { %6397 = vst.msk [vmem:[%s12503_s16 + $0x28] sm:$0xff] %vm3525_vm5, %v6216_v58  ;;  %v5939_v1 = vmax.f32 %v5875_v38, 0.0 }
 0xc74   : > { %v5598_v15 = vpop.f32.mrf.mxu2 }
 0xc75   : > { %v5744_v50 = vadd.f32 %v5598_v15, %v11716_v49  ;;  %6735 = vmatmul.msk.f32.gmra.mxu3 %vm3525_vm5, %v5939_v1 }
 0xc77   : > { %v5810_v61 = vmul.f32 %v12351_v20, %v5744_v50  ;;  %v5301_v50 = vld [vmem:[%s13023_s10 + $0x168] sm:$0xff] }
 0xc78   : > { %v6218_v11 = vpop.f32.mrf.mxu3 }
 0xc79   : > { %v6219_v54 = vadd.f32 %v12495_v44, %v6218_v11  ;;  %6688 = vmatmul.msk.f32.gmra.mxu2 %vm3655_vm7, %v5296_v42  ;;  %v5876_v22 = vadd.f32 %v12360_v55, %v5810_v61 }
 0xc7b   : > { %6398 = vst.msk [vmem:[%s12503_s16 + $0x30] sm:$0xff] %vm3525_vm5, %v6219_v54  ;;  %v5940_v53 = vmax.f32 %v5876_v22, 0.0 }
 0xc7c   : > { %v5601_v49 = vpop.f32.mrf.mxu2 }
 0xc7d   : > { %v5745_v45 = vadd.f32 %v5601_v49, %v11701_v59  ;;  %6736 = vmatmul.msk.f32.gmra.mxu3 %vm3525_vm5, %v5940_v53  ;;  %v5302_v49 = vld [vmem:[%s13023_s10 + $0x170] sm:$0xff] }
 0xc7f   : > { %v5811_v40 = vmul.f32 %v12351_v20, %v5745_v45 }
 0xc80   : > { %v6221_v19 = vpop.f32.mrf.mxu3 }
 0xc81   : > { %v6222_v31 = vadd.f32 %v12495_v44, %v6221_v19  ;;  %6689 = vmatmul.msk.f32.gmra.mxu2 %vm3655_vm7, %v5297_v32  ;;  %v5877_v62 = vadd.f32 %v12360_v55, %v5811_v40 }
 0xc83   : > { %6399 = vst.msk [vmem:[%s12503_s16 + $0x38] sm:$0xff] %vm3525_vm5, %v6222_v31  ;;  %v5941_v41 = vmax.f32 %v5877_v62, 0.0 }
 0xc84   : > { %v5604_v59 = vpop.f32.mrf.mxu2 }
 0xc85   : > { %v5746_v13 = vadd.f32 %v5604_v59, %v11684_v9  ;;  %6737 = vmatmul.msk.f32.gmra.mxu3 %vm3525_vm5, %v5941_v41  ;;  %v5303_v41 = vld [vmem:[%s13023_s10 + $0x178] sm:$0xff] }
 0xc87   : > { %v5812_v30 = vmul.f32 %v12351_v20, %v5746_v13 }
 0xc88   : > { %v6224_v46 = vpop.f32.mrf.mxu3 }
 0xc89   : > { %v5878_v18 = vadd.f32 %v12360_v55, %v5812_v30  ;;  %v6225_v52 = vadd.f32 %v12495_v44, %v6224_v46  ;;  %6690 = vmatmul.msk.f32.gmra.mxu2 %vm3655_vm7, %v5298_v12 }
 0xc8b   : > { %v5942_v10 = vmax.f32 %v5878_v18, 0.0  ;;  %6400 = vst.msk [vmem:[%s12503_s16 + $0x40] sm:$0xff] %vm3525_vm5, %v6225_v52  ;;  %v5304_v52 = vld [vmem:[%s13023_s10 + $0x180] sm:$0xff] }
 0xc8c   : > { %v5607_v9 = vpop.f32.mrf.mxu2 }
 0xc8d   : > { %v5747_v16 = vadd.f32 %v5607_v9, %v11675_v14  ;;  %6738 = vmatmul.msk.f32.gmra.mxu3 %vm3525_vm5, %v5942_v10 }
 0xc8f   : > { %v5813_v63 = vmul.f32 %v12351_v20, %v5747_v16 }
 0xc90   : > { %v6227_v2 = vpop.f32.mrf.mxu3 }
 0xc91   : > { %v5879_v60 = vadd.f32 %v12360_v55, %v5813_v63  ;;  %v6228_v36 = vadd.f32 %v12495_v44, %v6227_v2  ;;  %6691 = vmatmul.msk.f32.gmra.mxu2 %vm3655_vm7, %v5299_v7 }
 0xc93   : > { %v5943_v5 = vmax.f32 %v5879_v60, 0.0  ;;  %6401 = vst.msk [vmem:[%s12503_s16 + $0x48] sm:$0xff] %vm3525_vm5, %v6228_v36  ;;  %v5305_v60 = vld [vmem:[%s13023_s10 + $0x188] sm:$0xff] }
 0xc94   : > { %v5610_v14 = vpop.f32.mrf.mxu2 }
 0xc95   : > { %v5748_v33 = vadd.f32 %v5610_v14, %v11667_v39  ;;  %6739 = vmatmul.msk.f32.gmra.mxu3 %vm3525_vm5, %v5943_v5 }
 0xc97   : > { %v5814_v35 = vmul.f32 %v12351_v20, %v5748_v33 }
 0xc98   : > { %v6230_v28 = vpop.f32.mrf.mxu3 }
 0xc99   : > { %v5880_v58 = vadd.f32 %v12360_v55, %v5814_v35  ;;  %v6231_v38 = vadd.f32 %v12495_v44, %v6230_v28  ;;  %6692 = vmatmul.msk.f32.gmra.mxu2 %vm3655_vm7, %v5300_v21  ;;  %v5306_v28 = vld [vmem:[%s13023_s10 + $0x190] sm:$0xff] }
 0xc9b   : > { %v5944_v1 = vmax.f32 %v5880_v58, 0.0  ;;  %6402 = vst.msk [vmem:[%s12503_s16 + $0x50] sm:$0xff] %vm3525_vm5, %v6231_v38 }
 0xc9c   : > { %v5613_v39 = vpop.f32.mrf.mxu2 }
 0xc9d   : > { %v5749_v15 = vadd.f32 %v5613_v39, %v11642_v29  ;;  %6740 = vmatmul.msk.f32.gmra.mxu3 %vm3525_vm5, %v5944_v1 }
 0xc9f   : > { %v5815_v42 = vmul.f32 %v12351_v20, %v5749_v15 }
 0xca0   : > { %v6233_v61 = vpop.f32.mrf.mxu3 }
 0xca1   : > { %v5881_v11 = vadd.f32 %v12360_v55, %v5815_v42  ;;  %v6234_v54 = vadd.f32 %v12495_v44, %v6233_v61  ;;  %6693 = vmatmul.msk.f32.gmra.mxu2 %vm3655_vm7, %v5301_v50  ;;  %v5307_v42 = vld [vmem:[%s13023_s10 + $0x198] sm:$0xff] }
 0xca3   : > { %v5945_v22 = vmax.f32 %v5881_v11, 0.0  ;;  %6403 = vst.msk [vmem:[%s12503_s16 + $0x58] sm:$0xff] %vm3525_vm5, %v6234_v54 }
 0xca4   : > { %v5616_v29 = vpop.f32.mrf.mxu2 }
 0xca5   : > { %v5750_v53 = vadd.f32 %v5616_v29, %v11631_v3  ;;  %6741 = vmatmul.msk.f32.gmra.mxu3 %vm3525_vm5, %v5945_v22 }
 0xca7   : > { %v5816_v45 = vmul.f32 %v12351_v20, %v5750_v53 }
 0xca8   : > { %v6236_v32 = vpop.f32.mrf.mxu3 }
 0xca9   : > { %v5882_v40 = vadd.f32 %v12360_v55, %v5816_v45  ;;  %v6237_v19 = vadd.f32 %v12495_v44, %v6236_v32  ;;  %6694 = vmatmul.msk.f32.gmra.mxu2 %vm3655_vm7, %v5302_v49  ;;  %v5308_v49 = vld [vmem:[%s13023_s10 + $0x1a0] sm:$0xff] }
 0xcab   : > { %v5946_v31 = vmax.f32 %v5882_v40, 0.0  ;;  %6404 = vst.msk [vmem:[%s12503_s16 + $0x60] sm:$0xff] %vm3525_vm5, %v6237_v19 }
 0xcac   : > { %v5619_v3 = vpop.f32.mrf.mxu2 }
 0xcad   : > { %v5751_v62 = vadd.f32 %v5619_v3, %v11618_v8  ;;  %6742 = vmatmul.msk.f32.gmra.mxu3 %vm3525_vm5, %v5946_v31 }
 0xcaf   : > { %v5817_v59 = vmul.f32 %v12351_v20, %v5751_v62  ;;  %v5309_v62 = vld [vmem:[%s13023_s10 + $0x1a8] sm:$0xff] }
 0xcb0   : > { %v6239_v13 = vpop.f32.mrf.mxu3 }
 0xcb1   : > { %v5883_v12 = vadd.f32 %v12360_v55, %v5817_v59  ;;  %v6240_v30 = vadd.f32 %v12495_v44, %v6239_v13  ;;  %6695 = vmatmul.msk.f32.gmra.mxu2 %vm3655_vm7, %v5303_v41 }
 0xcb3   : > { %v5947_v46 = vmax.f32 %v5883_v12, 0.0  ;;  %6405 = vst.msk [vmem:[%s12503_s16 + $0x68] sm:$0xff] %vm3525_vm5, %v6240_v30 }
 0xcb4   : > { %v5622_v8 = vpop.f32.mrf.mxu2 }
 0xcb5   : > { %v5752_v18 = vadd.f32 %v5622_v8, %v11585_v0  ;;  %6743 = vmatmul.msk.f32.gmra.mxu3 %vm3525_vm5, %v5947_v46  ;;  %v5310_v8 = vld [vmem:[%s13023_s10 + $0x1b0] sm:$0xff] }
 0xcb7   : > { %v5818_v10 = vmul.f32 %v12351_v20, %v5752_v18 }
 0xcb8   : > { %v6242_v9 = vpop.f32.mrf.mxu3 }
 0xcb9   : > { %v5884_v16 = vadd.f32 %v12360_v55, %v5818_v10  ;;  %v6243_v7 = vadd.f32 %v12495_v44, %v6242_v9  ;;  %6696 = vmatmul.msk.f32.gmra.mxu2 %vm3655_vm7, %v5304_v52 }
 0xcbb   : > { %v5948_v63 = vmax.f32 %v5884_v16, 0.0  ;;  %6406 = vst.msk [vmem:[%s12503_s16 + $0x70] sm:$0xff] %vm3525_vm5, %v6243_v7 }
 0xcbc   : > { %v5625_v0 = vpop.f32.mrf.mxu2 }
 0xcbd   : > { %v5753_v2 = vadd.f32 %v5625_v0, %v12162_v25  ;;  %6744 = vmatmul.msk.f32.gmra.mxu3 %vm3525_vm5, %v5948_v63  ;;  %v5311_v63 = vld [vmem:[%s13023_s10 + $0x1b8] sm:$0xff] }
 0xcbf   : > { %v5819_v36 = vmul.f32 %v12351_v20, %v5753_v2 }
 0xcc0   : > { %v6245_v5 = vpop.f32.mrf.mxu3 }
 0xcc1   : > { %v5885_v14 = vadd.f32 %v12360_v55, %v5819_v36  ;;  %v6246_v33 = vadd.f32 %v12495_v44, %v6245_v5  ;;  %6697 = vmatmul.msk.f32.gmra.mxu2 %vm3655_vm7, %v5305_v60 }
 0xcc3   : > { %v5949_v21 = vmax.f32 %v5885_v14, 0.0  ;;  %6407 = vst.msk [vmem:[%s12503_s16 + $0x78] sm:$0xff] %vm3525_vm5, %v6246_v33  ;;  %v5312_v33 = vld [vmem:[%s13023_s10 + $0x1c0] sm:$0xff] }
 0xcc4   : > { %v5628_v25 = vpop.f32.mrf.mxu2 }
 0xcc5   : > { %v5754_v35 = vadd.f32 %v5628_v25, %v12135_v6  ;;  %6745 = vmatmul.msk.f32.gmra.mxu3 %vm3525_vm5, %v5949_v21 }
 0xcc7   : > { %v5820_v58 = vmul.f32 %v12351_v20, %v5754_v35 }
 0xcc8   : > { %v6248_v38 = vpop.f32.mrf.mxu3 }
 0xcc9   : > { %v5886_v1 = vadd.f32 %v12360_v55, %v5820_v58  ;;  %v6249_v39 = vadd.f32 %v12495_v44, %v6248_v38  ;;  %6698 = vmatmul.msk.f32.gmra.mxu2 %vm3655_vm7, %v5306_v28 }
 0xccb   : > { %v5950_v15 = vmax.f32 %v5886_v1, 0.0  ;;  %6408 = vst.msk [vmem:[%s12503_s16 + $0x80] sm:$0xff] %vm3525_vm5, %v6249_v39  ;;  %v5313_v1 = vld [vmem:[%s13023_s10 + $0x1c8] sm:$0xff] }
 0xccc   : > { %v5631_v6 = vpop.f32.mrf.mxu2 }
 0xccd   : > { %v5755_v50 = vadd.f32 %v5631_v6, %v12111_v37  ;;  %6746 = vmatmul.msk.f32.gmra.mxu3 %vm3525_vm5, %v5950_v15 }
 0xccf   : > { %v5821_v61 = vmul.f32 %v12351_v20, %v5755_v50 }
 0xcd0   : > { %v6251_v11 = vpop.f32.mrf.mxu3 }
 0xcd1   : > { %v5887_v54 = vadd.f32 %v12360_v55, %v5821_v61  ;;  %v6252_v22 = vadd.f32 %v12495_v44, %v6251_v11  ;;  %6699 = vmatmul.msk.f32.gmra.mxu2 %vm3655_vm7, %v5307_v42  ;;  %v5314_v11 = vld [vmem:[%s13023_s10 + $0x1d0] sm:$0xff] }
 0xcd3   : > { %v5951_v29 = vmax.f32 %v5887_v54, 0.0  ;;  %6409 = vst.msk [vmem:[%s12503_s16 + $0x88] sm:$0xff] %vm3525_vm5, %v6252_v22 }
 0xcd4   : > { %v5634_v37 = vpop.f32.mrf.mxu2 }
 0xcd5   : > { %v5756_v53 = vadd.f32 %v5634_v37, %v12070_v34  ;;  %6747 = vmatmul.msk.f32.gmra.mxu3 %vm3525_vm5, %v5951_v29 }
 0xcd7   : > { %v5822_v45 = vmul.f32 %v12351_v20, %v5756_v53 }
 0xcd8   : > { %v6254_v32 = vpop.f32.mrf.mxu3 }
 0xcd9   : > { %v5888_v40 = vadd.f32 %v12360_v55, %v5822_v45  ;;  %v6255_v19 = vadd.f32 %v12495_v44, %v6254_v32  ;;  %6700 = vmatmul.msk.f32.gmra.mxu2 %vm3655_vm7, %v5308_v49  ;;  %v5315_v45 = vld [vmem:[%s13023_s10 + $0x1d8] sm:$0xff] }
 0xcdb   : > { %v5952_v31 = vmax.f32 %v5888_v40, 0.0  ;;  %6410 = vst.msk [vmem:[%s12503_s16 + $0x90] sm:$0xff] %vm3525_vm5, %v6255_v19 }
 0xcdc   : > { %v5637_v34 = vpop.f32.mrf.mxu2 }
 0xcdd   : > { %v5757_v3 = vadd.f32 %v5637_v34, %v12010_v27  ;;  %6748 = vmatmul.msk.f32.gmra.mxu3 %vm3525_vm5, %v5952_v31 }
 0xcdf   : > { %v5823_v41 = vmul.f32 %v12351_v20, %v5757_v3  ;;  %v14289_v3 = vld [vmem:[#allocation114_spill] sm:$0xff] }
 0xce0   : > { %v6257_v59 = vpop.f32.mrf.mxu3 }
 0xce1   : > { %v5889_v13 = vadd.f32 %v12360_v55, %v5823_v41  ;;  %v6258_v12 = vadd.f32 %v12495_v44, %v6257_v59  ;;  %6701 = vmatmul.msk.f32.gmra.mxu2 %vm3655_vm7, %v5309_v62  ;;  %v5316_v41 = vld [vmem:[%s13023_s10 + $0x1e0] sm:$0xff] }
 0xce3   : > { %v5953_v30 = vmax.f32 %v5889_v13, 0.0  ;;  %6411 = vst.msk [vmem:[%s12503_s16 + $0x98] sm:$0xff] %vm3525_vm5, %v6258_v12 }
 0xce4   : > { %v5640_v27 = vpop.f32.mrf.mxu2 }
 0xce5   : > { %v5758_v46 = vadd.f32 %v5640_v27, %v11994_v56  ;;  %6749 = vmatmul.msk.f32.gmra.mxu3 %vm3525_vm5, %v5953_v30 }
 0xce7   : > { %v5824_v18 = vmul.f32 %v12351_v20, %v5758_v46 }
 0xce8   : > { %v6260_v52 = vpop.f32.mrf.mxu3 }
 0xce9   : > { %v5890_v10 = vadd.f32 %v12360_v55, %v5824_v18  ;;  %v6261_v9 = vadd.f32 %v12495_v44, %v6260_v52  ;;  %6702 = vmatmul.msk.f32.gmra.mxu2 %vm3655_vm7, %v5310_v8  ;;  %v14290_v8 = vld [vmem:[#allocation394_spill] sm:$0xff]  ;;  %v5317_v52 = vld [vmem:[%s13023_s10 + $0x1e8] sm:$0xff] }
 0xceb   : > { %v5954_v16 = vmax.f32 %v5890_v10, 0.0  ;;  %6412 = vst.msk [vmem:[%s12503_s16 + $0xa0] sm:$0xff] %vm3525_vm5, %v6261_v9 }
 0xcec   : > { %v5643_v56 = vpop.f32.mrf.mxu2 }
 0xced   : > { %v5759_v7 = vadd.f32 %v5643_v56, %v11977_v43  ;;  %6750 = vmatmul.msk.f32.gmra.mxu3 %vm3525_vm5, %v5954_v16 }
 0xcef   : > { %v5825_v0 = vmul.f32 %v12351_v20, %v5759_v7 }
 0xcf0   : > { %v6263_v2 = vpop.f32.mrf.mxu3 }
 0xcf1   : > { %v5891_v60 = vadd.f32 %v12360_v55, %v5825_v0  ;;  %v6264_v36 = vadd.f32 %v12495_v44, %v6263_v2  ;;  %6703 = vmatmul.msk.f32.gmra.mxu2 %vm3655_vm7, %v5311_v63  ;;  %v14291_v0 = vld [vmem:[#allocation347_spill] sm:$0xff] }
 0xcf3   : > { %v5955_v5 = vmax.f32 %v5891_v60, 0.0  ;;  %6413 = vst.msk [vmem:[%s12503_s16 + $0xa8] sm:$0xff] %vm3525_vm5, %v6264_v36  ;;  %v5318_v60 = vld [vmem:[%s13023_s10 + $0x1f0] sm:$0xff] }
 0xcf4   : > { %v5646_v43 = vpop.f32.mrf.mxu2 }
 0xcf5   : > { %v5760_v14 = vadd.f32 %v5646_v43, %v11968_v4  ;;  %6751 = vmatmul.msk.f32.gmra.mxu3 %vm3525_vm5, %v5955_v5 }
 0xcf7   : > { %v5826_v21 = vmul.f32 %v12351_v20, %v5760_v14 }
 0xcf8   : > { %v6266_v25 = vpop.f32.mrf.mxu3 }
 0xcf9   : > { %v5892_v35 = vadd.f32 %v12360_v55, %v5826_v21  ;;  %v6267_v28 = vadd.f32 %v12495_v44, %v6266_v25  ;;  %6704 = vmatmul.msk.f32.gmra.mxu2 %vm3655_vm7, %v5312_v33  ;;  %v14292_v25 = vld [vmem:[#allocation46_spill] sm:$0xff] }
 0xcfb   : > { %v5956_v58 = vmax.f32 %v5892_v35, 0.0  ;;  %6414 = vst.msk [vmem:[%s12503_s16 + $0xb0] sm:$0xff] %vm3525_vm5, %v6267_v28  ;;  %v5319_v28 = vld [vmem:[%s13023_s10 + $0x1f8] sm:$0xff] }
 0xcfc   : > { %v5649_v4 = vpop.f32.mrf.mxu2 }
 0xcfd   : > { %v5761_v38 = vadd.f32 %v5649_v4, %v11960_v17  ;;  %6752 = vmatmul.msk.f32.gmra.mxu3 %vm3525_vm5, %v5956_v58 }
 0xcff   : > { %v5827_v39 = vmul.f32 %v12351_v20, %v5761_v38 }
 0xd00   : > { %v6269_v15 = vpop.f32.mrf.mxu3 }
 0xd01   : > { %v5893_v6 = vadd.f32 %v12360_v55, %v5827_v39  ;;  %v6270_v50 = vadd.f32 %v12495_v44, %v6269_v15  ;;  %6705 = vmatmul.msk.f32.gmra.mxu2 %vm3655_vm7, %v5313_v1 }
 0xd03   : > { %v5957_v42 = vmax.f32 %v5893_v6, 0.0  ;;  %6415 = vst.msk [vmem:[%s12503_s16 + $0xb8] sm:$0xff] %vm3525_vm5, %v6270_v50  ;;  %v14293_v6 = vld [vmem:[#allocation328_spill] sm:$0xff] }
 0xd04   : > { %v5652_v17 = vpop.f32.mrf.mxu2 }
 0xd05   : > { %v5762_v61 = vadd.f32 %v5652_v17, %v11951_v47  ;;  %6753 = vmatmul.msk.f32.gmra.mxu3 %vm3525_vm5, %v5957_v42 }
 0xd07   : > { %v5828_v54 = vmul.f32 %v12351_v20, %v5762_v61 }
 0xd08   : > { %v6272_v22 = vpop.f32.mrf.mxu3 }
 0xd09   : > { %v5894_v29 = vadd.f32 %v12360_v55, %v5828_v54  ;;  %v6273_v37 = vadd.f32 %v12495_v44, %v6272_v22  ;;  %6706 = vmatmul.msk.f32.gmra.mxu2 %vm3655_vm7, %v5314_v11 }
 0xd0b   : > { %v5958_v53 = vmax.f32 %v5894_v29, 0.0  ;;  %6416 = vst.msk [vmem:[%s12503_s16 + $0xc0] sm:$0xff] %vm3525_vm5, %v6273_v37 }
 0xd0c   : > { %v5655_v47 = vpop.f32.mrf.mxu2 }
 0xd0d   : > { %v5763_v49 = vadd.f32 %v5655_v47, %v11883_v48  ;;  %6754 = vmatmul.msk.f32.gmra.mxu3 %vm3525_vm5, %v5958_v53 }
 0xd0f   : > { %v5829_v32 = vmul.f32 %v12351_v20, %v5763_v49 }
 0xd10   : > { %v6275_v40 = vpop.f32.mrf.mxu3 }
 0xd11   : > { %v5895_v19 = vadd.f32 %v12360_v55, %v5829_v32  ;;  %v6276_v31 = vadd.f32 %v12495_v44, %v6275_v40  ;;  %6707 = vmatmul.msk.f32.gmra.mxu2 %vm3655_vm7, %v5315_v45 }
 0xd13   : > { %v5959_v34 = vmax.f32 %v5895_v19, 0.0  ;;  %6417 = vst.msk [vmem:[%s12503_s16 + $0xc8] sm:$0xff] %vm3525_vm5, %v6276_v31 }
 0xd14   : > { %v5658_v48 = vpop.f32.mrf.mxu2 }
 0xd15   : > { %v5764_v62 = vadd.f32 %v5658_v48, %v14289_v3  ;;  %6755 = vmatmul.msk.f32.gmra.mxu3 %vm3525_vm5, %v5959_v34 }
 0xd17   : > { %v5830_v59 = vmul.f32 %v12351_v20, %v5764_v62 }
 0xd18   : > { %v6278_v13 = vpop.f32.mrf.mxu3 }
 0xd19   : > { %v5896_v12 = vadd.f32 %v12360_v55, %v5830_v59  ;;  %v6279_v30 = vadd.f32 %v12495_v44, %v6278_v13  ;;  %6708 = vmatmul.msk.f32.gmra.mxu2 %vm3655_vm7, %v5316_v41 }
 0xd1b   : > { %v5960_v27 = vmax.f32 %v5896_v12, 0.0  ;;  %6418 = vst.msk [vmem:[%s12503_s16 + $0xd0] sm:$0xff] %vm3525_vm5, %v6279_v30 }
 0xd1c   : > { %v5661_v46 = vpop.f32.mrf.mxu2 }
 0xd1d   : > { %v5765_v18 = vadd.f32 %v5661_v46, %v14290_v8  ;;  %6756 = vmatmul.msk.f32.gmra.mxu3 %vm3525_vm5, %v5960_v27 }
 0xd1f   : > { %v5831_v10 = vmul.f32 %v12351_v20, %v5765_v18 }
 0xd20   : > { %v6281_v9 = vpop.f32.mrf.mxu3 }
 0xd21   : > { %v5897_v16 = vadd.f32 %v12360_v55, %v5831_v10  ;;  %v6282_v56 = vadd.f32 %v12495_v44, %v6281_v9  ;;  %6709 = vmatmul.msk.f32.gmra.mxu2 %vm3655_vm7, %v5317_v52 }
 0xd23   : > { %v5961_v7 = vmax.f32 %v5897_v16, 0.0  ;;  %6419 = vst.msk [vmem:[%s12503_s16 + $0xd8] sm:$0xff] %vm3525_vm5, %v6282_v56 }
 0xd24   : > { %v5664_v63 = vpop.f32.mrf.mxu2 }
 0xd25   : > { %v5766_v2 = vadd.f32 %v5664_v63, %v14291_v0  ;;  %6757 = vmatmul.msk.f32.gmra.mxu3 %vm3525_vm5, %v5961_v7  ;;  %v14294_v0 = vld [vmem:[#allocation62_spill] sm:$0xff] }
 0xd27   : > { %v5832_v36 = vmul.f32 %v12351_v20, %v5766_v2 }
 0xd28   : > { %v6284_v5 = vpop.f32.mrf.mxu3 }
 0xd29   : > { %v5898_v43 = vadd.f32 %v12360_v55, %v5832_v36  ;;  %v6285_v14 = vadd.f32 %v12495_v44, %v6284_v5  ;;  %6710 = vmatmul.msk.f32.gmra.mxu2 %vm3655_vm7, %v5318_v60 }
 0xd2b   : > { %v5962_v33 = vmax.f32 %v5898_v43, 0.0  ;;  %6420 = vst.msk [vmem:[%s12503_s16 + $0xe0] sm:$0xff] %vm3525_vm5, %v6285_v14 }
 0xd2c   : > { %v5667_v21 = vpop.f32.mrf.mxu2 }
 0xd2d   : > { %v5767_v35 = vadd.f32 %v5667_v21, %v14292_v25  ;;  %6758 = vmatmul.msk.f32.gmra.mxu3 %vm3525_vm5, %v5962_v33  ;;  %v14295_v21 = vld [vmem:[#allocation395_spill] sm:$0xff] }
 0xd2f   : > { %v5833_v58 = vmul.f32 %v12351_v20, %v5767_v35 }
 0xd30   : > { %v6287_v4 = vpop.f32.mrf.mxu3 }
 0xd31   : > { %v5899_v38 = vadd.f32 %v12360_v55, %v5833_v58  ;;  %v6288_v1 = vadd.f32 %v12495_v44, %v6287_v4  ;;  %6711 = vmatmul.msk.f32.gmra.mxu2 %vm3655_vm7, %v5319_v28 }
 0xd33   : > { %v5963_v39 = vmax.f32 %v5899_v38, 0.0  ;;  %6421 = vst.msk [vmem:[%s12503_s16 + $0xe8] sm:$0xff] %vm3525_vm5, %v6288_v1 }
 0xd34   : > { %v5670_v15 = vpop.f32.mrf.mxu2 }
 0xd35   : > { %v5768_v50 = vadd.f32 %v5670_v15, %v14293_v6  ;;  %6759 = vmatmul.msk.f32.gmra.mxu3 %vm3525_vm5, %v5963_v39  ;;  %v14296_v39 = vld [vmem:[#allocation246_spill] sm:$0xff] }
 0xd37   : > { %v5834_v42 = vmul.f32 %v12351_v20, %v5768_v50 }
 0xd38   : > { %v6290_v17 = vpop.f32.mrf.mxu3 }
 0xd39   : > { %v5900_v61 = vadd.f32 %v12360_v55, %v5834_v42  ;;  %v6291_v11 = vadd.f32 %v12495_v44, %v6290_v17 }
 0xd3b   : > { %v5964_v54 = vmax.f32 %v5900_v61, 0.0  ;;  %6422 = vst.msk [vmem:[%s12503_s16 + $0xf0] sm:$0xff] %vm3525_vm5, %v6291_v11 }
 0xd3c   : > { %v5673_v22 = vpop.f32.mrf.mxu2 }
 0xd3d   : > { %v5769_v29 = vadd.f32 %v5673_v22, %v12254_v24  ;;  %6760 = vmatmul.msk.f32.gmra.mxu3 %vm3525_vm5, %v5964_v54  ;;  %v14297_v54 = vld [vmem:[#allocation324_spill] sm:$0xff] }
 0xd3f   : > { %v5835_v37 = vmul.f32 %v12351_v20, %v5769_v29 }
 0xd40   : > { %v6293_v53 = vpop.f32.mrf.mxu3 }
 0xd41   : > { %v5901_v47 = vadd.f32 %v12360_v55, %v5835_v37  ;;  %v6294_v49 = vadd.f32 %v12495_v44, %v6293_v53 }
 0xd43   : > { %v5965_v45 = vmax.f32 %v5901_v47, 0.0  ;;  %6423 = vst.msk [vmem:[%s12503_s16 + $0xf8] sm:$0xff] %vm3525_vm5, %v6294_v49 }
 0xd44   : > { %v5676_v32 = vpop.f32.mrf.mxu2 }
 0xd45   : > { %v5770_v40 = vadd.f32 %v5676_v32, %v12246_v23  ;;  %6761 = vmatmul.msk.f32.gmra.mxu3 %vm3525_vm5, %v5965_v45  ;;  %v14298_v32 = vld [vmem:[#allocation120_spill] sm:$0xff] }
 0xd47   : > { %v5836_v24 = vmul.f32 %v12351_v20, %v5770_v40 }
 0xd48   : > { %v6296_v19 = vpop.f32.mrf.mxu3 }
 0xd49   : > { %v5902_v31 = vadd.f32 %v12360_v55, %v5836_v24  ;;  %v6297_v34 = vadd.f32 %v12495_v44, %v6296_v19 }
 0xd4b   : > { %v5966_v48 = vmax.f32 %v5902_v31, 0.0  ;;  %6424 = vst.msk [vmem:[%s12503_s16 + $0x100] sm:$0xff] %vm3525_vm5, %v6297_v34 }
 0xd4c   : > { %v5679_v3 = vpop.f32.mrf.mxu2 }
 0xd4d   : > { %v5771_v62 = vadd.f32 %v5679_v3, %v12229_v57  ;;  %6762 = vmatmul.msk.f32.gmra.mxu3 %vm3525_vm5, %v5966_v48 }
 0xd4f   : > { %v5837_v23 = vmul.f32 %v12351_v20, %v5771_v62  ;;  %v14299_v62 = vld [vmem:[#allocation88_spill] sm:$0xff] }
 0xd50   : > { %v6299_v41 = vpop.f32.mrf.mxu3 }
 0xd51   : > { %v5903_v59 = vadd.f32 %v12360_v55, %v5837_v23  ;;  %v6300_v13 = vadd.f32 %v12495_v44, %v6299_v41 }
 0xd53   : > { %v5967_v12 = vmax.f32 %v5903_v59, 0.0  ;;  %6425 = vst.msk [vmem:[%s12503_s16 + $0x108] sm:$0xff] %vm3525_vm5, %v6300_v13 }
 0xd54   : > { %v5682_v30 = vpop.f32.mrf.mxu2 }
 0xd55   : > { %v5772_v27 = vadd.f32 %v5682_v30, %v12213_v51  ;;  %6763 = vmatmul.msk.f32.gmra.mxu3 %vm3525_vm5, %v5967_v12  ;;  %v12875_v51 = vld [vmem:[%s13019_s6] ss:$0 sm:$0xff] }
 0xd57   : > { %v5838_v57 = vmul.f32 %v12351_v20, %v5772_v27 }
 0xd58   : > { %v6302_v46 = vpop.f32.mrf.mxu3 }
 0xd59   : > { %v5904_v8 = vadd.f32 %v12360_v55, %v5838_v57  ;;  %v6303_v18 = vadd.f32 %v12495_v44, %v6302_v46  ;;  %v12881_v55 = vld [vmem:[%s13019_s6 + $0x1] ss:$0 sm:$0xff]  ;;  %v14300_v57 = vld [vmem:[#allocation39_spill] sm:$0xff] }
 0xd5b   : > { %v5968_v52 = vmax.f32 %v5904_v8, 0.0  ;;  %6426 = vst.msk [vmem:[%s12503_s16 + $0x110] sm:$0xff] %vm3525_vm5, %v6303_v18 }
 0xd5c   : > { %v5685_v10 = vpop.f32.mrf.mxu2 }
 0xd5d   : > { %v5773_v9 = vadd.f32 %v5685_v10, %v12194_v26  ;;  %6764 = vmatmul.msk.f32.gmra.mxu3 %vm3525_vm5, %v5968_v52 }
 0xd5f   : > { %v5839_v20 = vmul.f32 %v12875_v51, %v5773_v9 }
 0xd60   : > { %v6305_v16 = vpop.f32.mrf.mxu3 }
 0xd61   : > { %v5905_v56 = vadd.f32 %v12881_v55, %v5839_v20  ;;  %v6306_v26 = vadd.f32 %v12495_v44, %v6305_v16  ;;  %v14301_v16 = vld [vmem:[#allocation387_spill] sm:$0xff] }
 0xd63   : > { %v5969_v7 = vmax.f32 %v5905_v56, 0.0  ;;  %6427 = vst.msk [vmem:[%s12503_s16 + $0x118] sm:$0xff] %vm3525_vm5, %v6306_v26 }
 0xd64   : > { %v5688_v63 = vpop.f32.mrf.mxu2 }
 0xd65   : > { %v5774_v2 = vadd.f32 %v5688_v63, %v14294_v0  ;;  %6765 = vmatmul.msk.f32.gmra.mxu3 %vm3525_vm5, %v5969_v7 }
 0xd67   : > { %v5840_v60 = vmul.f32 %v12875_v51, %v5774_v2 }
 0xd68   : > { %v6308_v36 = vpop.f32.mrf.mxu3 }
 0xd69   : > { %v5906_v5 = vadd.f32 %v12881_v55, %v5840_v60  ;;  %v6309_v43 = vadd.f32 %v12495_v44, %v6308_v36  ;;  %v14302_v36 = vld [vmem:[#allocation349_spill] sm:$0xff] }
 0xd6b   : > { %v5970_v14 = vmax.f32 %v5906_v5, 0.0  ;;  %6428 = vst.msk [vmem:[%s12503_s16 + $0x120] sm:$0xff] %vm3525_vm5, %v6309_v43 }
 0xd6c   : > { %v5691_v33 = vpop.f32.mrf.mxu2 }
 0xd6d   : > { %v5775_v25 = vadd.f32 %v5691_v33, %v14295_v21  ;;  %6766 = vmatmul.msk.f32.gmra.mxu3 %vm3525_vm5, %v5970_v14 }
 0xd6f   : > { %v5841_v35 = vmul.f32 %v12875_v51, %v5775_v25 }
 0xd70   : > { %v6311_v28 = vpop.f32.mrf.mxu3 }
 0xd71   : > { %v5907_v58 = vadd.f32 %v12881_v55, %v5841_v35  ;;  %v6312_v4 = vadd.f32 %v12495_v44, %v6311_v28  ;;  %v14303_v28 = vld [vmem:[#allocation332_spill] sm:$0xff] }
 0xd73   : > { %v5971_v38 = vmax.f32 %v5907_v58, 0.0  ;;  %6429 = vst.msk [vmem:[%s12503_s16 + $0x128] sm:$0xff] %vm3525_vm5, %v6312_v4 }
 0xd74   : > { %v5694_v1 = vpop.f32.mrf.mxu2 }
 0xd75   : > { %v5776_v15 = vadd.f32 %v5694_v1, %v14296_v39  ;;  %6767 = vmatmul.msk.f32.gmra.mxu3 %vm3525_vm5, %v5971_v38 }
 0xd77   : > { %v5842_v6 = vmul.f32 %v12875_v51, %v5776_v15 }
 0xd78   : > { %v6314_v50 = vpop.f32.mrf.mxu3 }
 0xd79   : > { %v5908_v42 = vadd.f32 %v12881_v55, %v5842_v6  ;;  %v6315_v17 = vadd.f32 %v12495_v44, %v6314_v50  ;;  %v14304_v50 = vld [vmem:[#allocation69_spill] sm:$0xff] }
 0xd7b   : > { %v5972_v61 = vmax.f32 %v5908_v42, 0.0  ;;  %6430 = vst.msk [vmem:[%s12503_s16 + $0x130] sm:$0xff] %vm3525_vm5, %v6315_v17 }
 0xd7c   : > { %v5697_v11 = vpop.f32.mrf.mxu2 }
 0xd7d   : > { %v5777_v22 = vadd.f32 %v5697_v11, %v14297_v54  ;;  %6768 = vmatmul.msk.f32.gmra.mxu3 %vm3525_vm5, %v5972_v61 }
 0xd7f   : > { %v5843_v29 = vmul.f32 %v12875_v51, %v5777_v22 }
 0xd80   : > { %v6317_v37 = vpop.f32.mrf.mxu3 }
 0xd81   : > { %v5909_v53 = vadd.f32 %v12881_v55, %v5843_v29  ;;  %v6318_v47 = vadd.f32 %v12495_v44, %v6317_v37 }
 0xd83   : > { %v5973_v49 = vmax.f32 %v5909_v53, 0.0  ;;  %6431 = vst.msk [vmem:[%s12503_s16 + $0x138] sm:$0xff] %vm3525_vm5, %v6318_v47 }
 0xd84   : > { %v5700_v45 = vpop.f32.mrf.mxu2 }
 0xd85   : > { %v5778_v40 = vadd.f32 %v5700_v45, %v14298_v32  ;;  %6769 = vmatmul.msk.f32.gmra.mxu3 %vm3525_vm5, %v5973_v49 }
 0xd87   : > { %v5844_v24 = vmul.f32 %v12875_v51, %v5778_v40 }
 0xd88   : > { %v6320_v19 = vpop.f32.mrf.mxu3 }
 0xd89   : > { %v5910_v31 = vadd.f32 %v12881_v55, %v5844_v24  ;;  %v6321_v34 = vadd.f32 %v12495_v44, %v6320_v19 }
 0xd8b   : > { %v5974_v48 = vmax.f32 %v5910_v31, 0.0  ;;  %6432 = vst.msk [vmem:[%s12503_s16 + $0x140] sm:$0xff] %vm3525_vm5, %v6321_v34 }
 0xd8c   : > { %v5703_v3 = vpop.f32.mrf.mxu2 }
 0xd8d   : > { %v5779_v23 = vadd.f32 %v5703_v3, %v14299_v62  ;;  %6770 = vmatmul.msk.f32.gmra.mxu3 %vm3525_vm5, %v5974_v48 }
 0xd8f   : > { %v5845_v41 = vmul.f32 %v12875_v51, %v5779_v23  ;;  %v6820_v23 = vld [vmem:[%s13021_s8] ss:$0 sm:$0xff] }
 0xd90   : > { %v6323_v59 = vpop.f32.mrf.mxu3 }
 0xd91   : > { %v5911_v13 = vadd.f32 %v12881_v55, %v5845_v41  ;;  %v6324_v12 = vadd.f32 %v12495_v44, %v6323_v59 }
 0xd93   : > { %v5975_v30 = vmax.f32 %v5911_v13, 0.0  ;;  %6433 = vst.msk [vmem:[%s12503_s16 + $0x148] sm:$0xff] %vm3525_vm5, %v6324_v12 }
 0xd94   : > { %v5706_v27 = vpop.f32.mrf.mxu2 }
 0xd95   : > { %v5780_v46 = vadd.f32 %v5706_v27, %v14300_v57  ;;  %6771 = vmatmul.msk.f32.gmra.mxu3 %vm3525_vm5, %v5975_v30 }
 0xd97   : > { %v5846_v8 = vmul.f32 %v12875_v51, %v5780_v46 }
 0xd98   : > { %v6326_v18 = vpop.f32.mrf.mxu3 }
 0xd99   : > { %v5912_v52 = vadd.f32 %v12881_v55, %v5846_v8  ;;  %v6327_v10 = vadd.f32 %v12495_v44, %v6326_v18 }
 0xd9b   : > { %v5976_v9 = vmax.f32 %v5912_v52, 0.0  ;;  %6434 = vst.msk [vmem:[%s12503_s16 + $0x150] sm:$0xff] %vm3525_vm5, %v6327_v10 }
 0xd9c   : > { %v5709_v20 = vpop.f32.mrf.mxu2 }
 0xd9d   : > { %v5781_v56 = vadd.f32 %v5709_v20, %v14301_v16  ;;  %6772 = vmatmul.msk.f32.gmra.mxu3 %vm3525_vm5, %v5976_v9 }
 0xd9f   : > { %v5847_v26 = vmul.f32 %v12875_v51, %v5781_v56 }
 0xda0   : > { %v6329_v7 = vpop.f32.mrf.mxu3 }
 0xda1   : > { %v5913_v63 = vadd.f32 %v12881_v55, %v5847_v26  ;;  %v6330_v0 = vadd.f32 %v12495_v44, %v6329_v7 }
 0xda3   : > { %v5977_v2 = vmax.f32 %v5913_v63, 0.0  ;;  %6435 = vst.msk [vmem:[%s12503_s16 + $0x158] sm:$0xff] %vm3525_vm5, %v6330_v0 }
 0xda4   : > { %v5712_v60 = vpop.f32.mrf.mxu2 }
 0xda5   : > { %v5782_v5 = vadd.f32 %v5712_v60, %v14302_v36  ;;  %6773 = vmatmul.msk.f32.gmra.mxu3 %vm3525_vm5, %v5977_v2 }
 0xda7   : > { %v5848_v43 = vmul.f32 %v12875_v51, %v5782_v5 }
 0xda8   : > { %v6332_v14 = vpop.f32.mrf.mxu3 }
 0xda9   : > { %v5914_v33 = vadd.f32 %v12881_v55, %v5848_v43  ;;  %v6333_v21 = vadd.f32 %v12495_v44, %v6332_v14 }
 0xdab   : > { %v5978_v25 = vmax.f32 %v5914_v33, 0.0  ;;  %6436 = vst.msk [vmem:[%s12503_s16 + $0x160] sm:$0xff] %vm3525_vm5, %v6333_v21 }
 0xdac   : > { %v5715_v35 = vpop.f32.mrf.mxu2 }
 0xdad   : > { %v5783_v58 = vadd.f32 %v5715_v35, %v14303_v28  ;;  %6774 = vmatmul.msk.f32.gmra.mxu3 %vm3525_vm5, %v5978_v25 }
 0xdaf   : > { %v5849_v4 = vmul.f32 %v12875_v51, %v5783_v58 }
 0xdb0   : > { %v6335_v38 = vpop.f32.mrf.mxu3 }
 0xdb1   : > { %v5915_v1 = vadd.f32 %v12881_v55, %v5849_v4  ;;  %v6336_v39 = vadd.f32 %v12495_v44, %v6335_v38 }
 0xdb3   : > { %v5979_v15 = vmax.f32 %v5915_v1, 0.0  ;;  %6437 = vst.msk [vmem:[%s12503_s16 + $0x168] sm:$0xff] %vm3525_vm5, %v6336_v39 }
 0xdb4   : > { %v5718_v6 = vpop.f32.mrf.mxu2 }
 0xdb5   : > { %v5784_v42 = vadd.f32 %v5718_v6, %v14304_v50  ;;  %6775 = vmatmul.msk.f32.gmra.mxu3 %vm3525_vm5, %v5979_v15 }
 0xdb7   : > { %v5850_v17 = vmul.f32 %v12875_v51, %v5784_v42 }
 0xdb8   : > { %v6338_v61 = vpop.f32.mrf.mxu3 }
 0xdb9   : > { %v5916_v11 = vadd.f32 %v12881_v55, %v5850_v17  ;;  %v6339_v54 = vadd.f32 %v12495_v44, %v6338_v61 }
 0xdbb   : > { %v5980_v22 = vmax.f32 %v5916_v11, 0.0  ;;  %6438 = vst.msk [vmem:[%s12503_s16 + $0x170] sm:$0xff] %vm3525_vm5, %v6339_v54 }
 0xdbd   : > { %6776 = vmatmul.msk.f32.gmra.mxu3 %vm3525_vm5, %v5980_v22 }
 0xdc0   : > { %v6341_v29 = vpop.f32.mrf.mxu3 }
 0xdc1   : > { %v6342_v37 = vadd.f32 %v12495_v44, %v6341_v29 }
 0xdc3   : > { %6439 = vst.msk [vmem:[%s12503_s16 + $0x178] sm:$0xff] %vm3525_vm5, %v6342_v37 }
 0xdc8   : > { %v6344_v53 = vpop.f32.mrf.mxu3 }
 0xdc9   : > { %v6345_v51 = vadd.f32 %v12495_v44, %v6344_v53 }
 0xdcb   : > { %6440 = vst.msk [vmem:[%s12503_s16 + $0x180] sm:$0xff] %vm3525_vm5, %v6345_v51 }
 0xdd0   : > { %v6347_v55 = vpop.f32.mrf.mxu3 }
 0xdd1   : > { %v6348_v47 = vadd.f32 %v12495_v44, %v6347_v55 }
 0xdd3   : > { %6441 = vst.msk [vmem:[%s12503_s16 + $0x188] sm:$0xff] %vm3525_vm5, %v6348_v47 }
 0xdd8   : > { %v6350_v49 = vpop.f32.mrf.mxu3 }
 0xdd9   : > { %v6351_v45 = vadd.f32 %v12495_v44, %v6350_v49 }
 0xddb   : > { %6442 = vst.msk [vmem:[%s12503_s16 + $0x190] sm:$0xff] %vm3525_vm5, %v6351_v45 }
 0xde0   : > { %v6353_v32 = vpop.f32.mrf.mxu3 }
 0xde1   : > { %v6354_v40 = vadd.f32 %v12495_v44, %v6353_v32 }
 0xde3   : > { %6443 = vst.msk [vmem:[%s12503_s16 + $0x198] sm:$0xff] %vm3525_vm5, %v6354_v40 }
 0xde8   : > { %v6356_v24 = vpop.f32.mrf.mxu3 }
 0xde9   : > { %v6357_v19 = vadd.f32 %v12495_v44, %v6356_v24 }
 0xdeb   : > { %6444 = vst.msk [vmem:[%s12503_s16 + $0x1a0] sm:$0xff] %vm3525_vm5, %v6357_v19 }
 0xdf0   : > { %v6359_v31 = vpop.f32.mrf.mxu3 }
 0xdf1   : > { %v6360_v34 = vadd.f32 %v12495_v44, %v6359_v31 }
 0xdf3   : > { %6445 = vst.msk [vmem:[%s12503_s16 + $0x1a8] sm:$0xff] %vm3525_vm5, %v6360_v34 }
 0xdf8   : > { %v6362_v48 = vpop.f32.mrf.mxu3 }
 0xdf9   : > { %v6363_v3 = vadd.f32 %v12495_v44, %v6362_v48 }
 0xdfb   : > { %6446 = vst.msk [vmem:[%s12503_s16 + $0x1b0] sm:$0xff] %vm3525_vm5, %v6363_v3 }
 0xe00   : > { %v6365_v62 = vpop.f32.mrf.mxu3 }
 0xe01   : > { %v6366_v41 = vadd.f32 %v6820_v23, %v6365_v62 }
 0xe03   : > { %6447 = vst.msk [vmem:[%s12503_s16 + $0x1b8] sm:$0xff] %vm3525_vm5, %v6366_v41 }
 0xe08   : > { %v6368_v59 = vpop.f32.mrf.mxu3 }
 0xe09   : > { %v6369_v13 = vadd.f32 %v6820_v23, %v6368_v59 }
 0xe0b   : > { %6448 = vst.msk [vmem:[%s12503_s16 + $0x1c0] sm:$0xff] %vm3525_vm5, %v6369_v13 }
 0xe10   : > { %v6371_v12 = vpop.f32.mrf.mxu3 }
 0xe11   : > { %v6372_v30 = vadd.f32 %v6820_v23, %v6371_v12 }
 0xe13   : > { %6449 = vst.msk [vmem:[%s12503_s16 + $0x1c8] sm:$0xff] %vm3525_vm5, %v6372_v30 }
 0xe18   : > { %v6374_v44 = vpop.f32.mrf.mxu3 }
 0xe19   : > { %v6375_v27 = vadd.f32 %v6820_v23, %v6374_v44 }
 0xe1b   : > { %6450 = vst.msk [vmem:[%s12503_s16 + $0x1d0] sm:$0xff] %vm3525_vm5, %v6375_v27 }
 0xe20   : > { %v6377_v57 = vpop.f32.mrf.mxu3 }
 0xe21   : > { %v6378_v46 = vadd.f32 %v6820_v23, %v6377_v57 }
 0xe23   : > { %6451 = vst.msk [vmem:[%s12503_s16 + $0x1d8] sm:$0xff] %vm3525_vm5, %v6378_v46 }
 0xe28   : > { %v6380_v8 = vpop.f32.mrf.mxu3 }
 0xe29   : > { %v6381_v18 = vadd.f32 %v6820_v23, %v6380_v8 }
 0xe2b   : > { %6452 = vst.msk [vmem:[%s12503_s16 + $0x1e0] sm:$0xff] %vm3525_vm5, %v6381_v18 }
 0xe30   : > { %v6383_v52 = vpop.f32.mrf.mxu3 }
 0xe31   : > { %v6384_v10 = vadd.f32 %v6820_v23, %v6383_v52 }
 0xe33   : > { %6453 = vst.msk [vmem:[%s12503_s16 + $0x1e8] sm:$0xff] %vm3525_vm5, %v6384_v10 }
 0xe38   : > { %v6386_v9 = vpop.f32.mrf.mxu3 }
 0xe39   : > { %v6387_v20 = vadd.f32 %v6820_v23, %v6386_v9 }
 0xe3b   : > { %6454 = vst.msk [vmem:[%s12503_s16 + $0x1f0] sm:$0xff] %vm3525_vm5, %v6387_v20 }
 0xe40   : > { %v6389_v16 = vpop.f32.mrf.mxu3 }
 0xe41   : > { %v6390_v56 = vadd.f32 %v6820_v23, %v6389_v16 }
 0xe43   : > { %6455 = vst.msk [vmem:[%s12503_s16 + $0x1f8] sm:$0xff] %vm3525_vm5, %v6390_v56 }
 0xe44 PF: > { %s21_s17 = sadd.s32 1, %s6827_s17  }
 0xe45   : > { %p18_p4 = scmp.ge.s32.totalorder %s21_s17, 4  }
 0xe47   :  { %20 = sbr.rel (!%p18_p4) target bundleno = 1 (0x1), region = 94 }

</bundles_post_ra>
